<compile_context>
chip_gen: v5e
topology: v5e:2x2
jax: 0.10.0
libtpu: 0.0.40
codegen_flags: <defaults>
</compile_context>

<pallas_src>
import functools

import jax
import jax.numpy as jnp
from jax import lax
from jax.experimental import pallas as pl
from jax.experimental.pallas import tpu as pltpu

_EPS = 1e-5


def _stage_kernel(xp_ref,                       # (4, Ho+1, Wo+1, Cin) parity planes of padded input
                  sd_ref, bd_ref, wd_ref,       # DownSample: BN scale/shift (1,Cin), conv (9*Cin, Cout)
                  s1a_ref, b1a_ref, w1a_ref,    # ResBlock1 layer a
                  s1b_ref, b1b_ref, w1b_ref,    # ResBlock1 layer b
                  s2a_ref, b2a_ref, w2a_ref,    # ResBlock2 layer a
                  s2b_ref, b2b_ref, w2b_ref,    # ResBlock2 layer b
                  o_ref,                        # (1, Ho, Wo, Cout)
                  pad_ref,                      # scratch (Ho+2, Wo+2, Cout) bf16
                  *, H, W, Ho, Wo, Cin, Cout):
    f32 = jnp.float32

    # ---------------- DownSample: BN -> ReLU -> Conv3x3 stride 2 -------------
    sd = sd_ref[...].reshape(1, 1, Cin)
    bd = bd_ref[...].reshape(1, 1, Cin)
    planes = []
    for p in range(4):                      # parity plane (row%2, col%2) of padded input
        rp, cp = p // 2, p % 2
        xp = xp_ref[p].astype(f32)          # (Ho+1, Wo+1, Cin)
        a = jnp.maximum(xp * sd + bd, 0.0)
        # padding is applied AFTER BN+ReLU in torch: force the halo (and any
        # bottom/right alignment rows) back to exact zero.
        r = 2 * lax.broadcasted_iota(jnp.int32, a.shape, 0) + rp   # padded row index
        c = 2 * lax.broadcasted_iota(jnp.int32, a.shape, 1) + cp   # padded col index
        valid = (r >= 1) & (r <= H) & (c >= 1) & (c <= W)
        planes.append(jnp.where(valid, a, 0.0).astype(jnp.bfloat16))

    # output (i,j) <- padded (2i+kh, 2j+kw)  ==  plane[(kh%2,kw%2)][i+kh//2, j+kw//2]
    taps = []
    for t in range(9):                      # tap t = kh*3 + kw
        kh, kw = t // 3, t % 3
        src = planes[(kh % 2) * 2 + (kw % 2)]
        taps.append(src[kh // 2:kh // 2 + Ho, kw // 2:kw // 2 + Wo, :])
    lhs = jnp.concatenate(taps, axis=-1).reshape(Ho * Wo, 9 * Cin)
    y = jnp.dot(lhs, wd_ref[...], preferred_element_type=f32).reshape(Ho, Wo, Cout)

    # -------- shared padded scratch for the stride-1 ResBlock convs ----------
    # zero only the 4 halo strips; interiors are fully overwritten before use.
    pad_ref[0:1, :, :] = jnp.zeros((1, Wo + 2, Cout), jnp.bfloat16)
    pad_ref[Ho + 1:Ho + 2, :, :] = jnp.zeros((1, Wo + 2, Cout), jnp.bfloat16)
    pad_ref[:, 0:1, :] = jnp.zeros((Ho + 2, 1, Cout), jnp.bfloat16)
    pad_ref[:, Wo + 1:Wo + 2, :] = jnp.zeros((Ho + 2, 1, Cout), jnp.bfloat16)

    def bn_relu_conv(x, s_ref, b_ref, w_ref):
        """BN(eval) -> ReLU -> zero-pad(1) -> 3x3 conv (stride 1) as one im2col dot."""
        s = s_ref[...].reshape(1, 1, Cout)
        b = b_ref[...].reshape(1, 1, Cout)
        a = jnp.maximum(x * s + b, 0.0).astype(jnp.bfloat16)
        pad_ref[1:Ho + 1, 1:Wo + 1, :] = a
        tps = [pad_ref[kh:kh + Ho, kw:kw + Wo, :]
               for kh in range(3) for kw in range(3)]
        big = jnp.concatenate(tps, axis=-1).reshape(Ho * Wo, 9 * Cout)
        out = jnp.dot(big, w_ref[...], preferred_element_type=f32)
        return out.reshape(Ho, Wo, Cout)

    # ---------------- ResBlock 1 and ResBlock 2 (residual adds fused) --------
    h = bn_relu_conv(y, s1a_ref, b1a_ref, w1a_ref)
    y = bn_relu_conv(h, s1b_ref, b1b_ref, w1b_ref) + y
    h = bn_relu_conv(y, s2a_ref, b2a_ref, w2a_ref)
    y = bn_relu_conv(h, s2b_ref, b2b_ref, w2b_ref) + y

    o_ref[...] = y.reshape(1, Ho, Wo, Cout).astype(o_ref.dtype)


def _full_spec(shape):
    nd = len(shape)
    return pl.BlockSpec(shape, lambda n: (0,) * nd)


def encoder_stage(x, stage_params):
    """One encoder stage: DownSample -> ResBlock -> ResBlock.  NHWC f32 in/out."""
    N, H, W, Cin = x.shape
    sd, bd, wd = stage_params["down"]
    (s1a, b1a, w1a), (s1b, b1b, w1b) = stage_params["res1"]
    (s2a, b2a, w2a), (s2b, b2b, w2b) = stage_params["res2"]
    Cout = wd.shape[-1]
    Ho, Wo = (H + 1) // 2, (W + 1) // 2

    # Zero-pad (pad=1, plus bottom/right alignment so the parity split is exact)
    # and split into the 4 (row%2, col%2) parity planes in XLA.  This lets the
    # kernel compute the stride-2 conv with contiguous slices only.
    hp, wp = 2 * (Ho + 1), 2 * (Wo + 1)
    xpad = jnp.pad(x, ((0, 0), (1, hp - H - 1), (1, wp - W - 1), (0, 0)))
    planes = [xpad[:, rp::2, cp::2, :] for rp in (0, 1) for cp in (0, 1)]
    xps = jnp.stack(planes, axis=1).reshape(N * 4, Ho + 1, Wo + 1, Cin)

    kernel = functools.partial(_stage_kernel, H=H, W=W, Ho=Ho, Wo=Wo,
                               Cin=Cin, Cout=Cout)
    params = (sd, bd, wd, s1a, b1a, w1a, s1b, b1b, w1b,
              s2a, b2a, w2a, s2b, b2b, w2b)

    flops = 2 * N * Ho * Wo * 9 * (Cin * Cout + 4 * Cout * Cout)
    bytes_accessed = (int(xps.size) * 4 + N * Ho * Wo * Cout * 4 +
                      sum(int(p.size) * p.dtype.itemsize for p in params))

    return pl.pallas_call(
        kernel,
        out_shape=jax.ShapeDtypeStruct((N, Ho, Wo, Cout), jnp.float32),
        grid=(N,),
        in_specs=[pl.BlockSpec((4, Ho + 1, Wo + 1, Cin),
                               lambda n: (n, 0, 0, 0))]
                 + [_full_spec(p.shape) for p in params],
        out_specs=pl.BlockSpec((1, Ho, Wo, Cout), lambda n: (n, 0, 0, 0)),
        scratch_shapes=[pltpu.VMEM((Ho + 2, Wo + 2, Cout), jnp.bfloat16)],
        compiler_params=pltpu.CompilerParams(
            dimension_semantics=("parallel",),
            vmem_limit_bytes=32 * 1024 * 1024),
        cost_estimate=pl.CostEstimate(flops=flops, transcendentals=0,
                                      bytes_accessed=bytes_accessed),
    )(xps, *params)


def feature_encoder_forward(params, x):
    feats = []
    for stage in params:
        x = encoder_stage(x, stage)
        feats.append(x)
    return feats


# ----------------------- deterministic parameter init -----------------------

def _init_layer(key, cin, cout):
    """BN(eval) folded scale/shift (1,Cin) f32 + im2col conv weight (9*Cin,Cout) bf16."""
    kg, kb, km, kv, kw = jax.random.split(key, 5)
    gamma = jax.random.uniform(kg, (cin,), jnp.float32, 0.5, 1.5)
    beta = 0.1 * jax.random.normal(kb, (cin,), dtype=jnp.float32)
    mean = 0.1 * jax.random.normal(km, (cin,), dtype=jnp.float32)
    var = jax.random.uniform(kv, (cin,), jnp.float32, 0.5, 1.5)
    inv_std = 1.0 / jnp.sqrt(var + _EPS)
    scale = (gamma * inv_std).reshape(1, cin)
    shift = (beta - mean * gamma * inv_std).reshape(1, cin)
    fan_in = 9 * cin
    w = jax.random.normal(kw, (9, cin, cout), jnp.float32) * (2.0 / fan_in) ** 0.5
    # rows ordered tap-major / cin-minor, matching the tap-concat im2col LHS.
    w = w.reshape(9 * cin, cout).astype(jnp.bfloat16)
    return scale, shift, w


def init_feature_encoder(key, in_channels, chns):
    params = []
    prev = in_channels
    for i, c in enumerate(chns):
        ks = jax.random.split(jax.random.fold_in(key, i), 5)
        stage = {
            "down": _init_layer(ks[0], prev, c),
            "res1": (_init_layer(ks[1], c, c), _init_layer(ks[2], c, c)),
            "res2": (_init_layer(ks[3], c, c), _init_layer(ks[4], c, c)),
        }
        params.append(stage)
        prev = c
    return params


if __name__ == "__main__":
    key = jax.random.PRNGKey(0)
    kx, kp = jax.random.split(key)

    # small shapes: batch=2, in_channels=8, spatial=16, chns=[16,32,32,32,32]
    in_channels = 8
    chns = [16, 32, 32, 32, 32]

    x_nchw = jax.random.normal(kx, (2, in_channels, 16, 16), dtype=jnp.float32)
    x = jnp.transpose(x_nchw, (0, 2, 3, 1))  # NCHW -> NHWC kernel layout

    params = init_feature_encoder(kp, in_channels, chns)
    feats = feature_encoder_forward(params, x)
    feats = [jax.block_until_ready(f) for f in feats]

    expected_hw = [8, 4, 2, 1, 1]
    for f, c, hw in zip(feats, chns, expected_hw):
        assert f.shape == (2, hw, hw, c), f.shape
        assert bool(jnp.all(jnp.isfinite(f)))

    print("KERNEL_OK")
</pallas_src>

<mosaic_0001>
module attributes {stable_mosaic.version = 11 : i64} {
  func.func @_stage_kernel(%arg0: i32, %arg1: memref<4x9x9x8xf32, #tpu.memory_space<vmem>>, %arg2: memref<1x8xf32, #tpu.memory_space<vmem>>, %arg3: memref<1x8xf32, #tpu.memory_space<vmem>>, %arg4: memref<72x16xbf16, #tpu.memory_space<vmem>>, %arg5: memref<1x16xf32, #tpu.memory_space<vmem>>, %arg6: memref<1x16xf32, #tpu.memory_space<vmem>>, %arg7: memref<144x16xbf16, #tpu.memory_space<vmem>>, %arg8: memref<1x16xf32, #tpu.memory_space<vmem>>, %arg9: memref<1x16xf32, #tpu.memory_space<vmem>>, %arg10: memref<144x16xbf16, #tpu.memory_space<vmem>>, %arg11: memref<1x16xf32, #tpu.memory_space<vmem>>, %arg12: memref<1x16xf32, #tpu.memory_space<vmem>>, %arg13: memref<144x16xbf16, #tpu.memory_space<vmem>>, %arg14: memref<1x16xf32, #tpu.memory_space<vmem>>, %arg15: memref<1x16xf32, #tpu.memory_space<vmem>>, %arg16: memref<144x16xbf16, #tpu.memory_space<vmem>>, %arg17: memref<1x8x8x16xf32, #tpu.memory_space<vmem>>, %arg18: memref<10x10x16xbf16, #tpu.memory_space<vmem>>) attributes {dimension_semantics = [#tpu.dimension_semantics<parallel>], iteration_bounds = array<i64: 2>, scalar_prefetch = 0 : i64, scratch_operands = 1 : i64, tpu.core_type = #tpu.core_type<tc>, window_params = [{transform_indices = @transform_0, window_bounds = array<i64: 4, 9, 9, 8>}, {pipeline_mode = #tpu.pipeline_mode<synchronous>, transform_indices = @transform_1, window_bounds = array<i64: 1, 8>}, {pipeline_mode = #tpu.pipeline_mode<synchronous>, transform_indices = @transform_2, window_bounds = array<i64: 1, 8>}, {pipeline_mode = #tpu.pipeline_mode<synchronous>, transform_indices = @transform_3, window_bounds = array<i64: 72, 16>}, {pipeline_mode = #tpu.pipeline_mode<synchronous>, transform_indices = @transform_4, window_bounds = array<i64: 1, 16>}, {pipeline_mode = #tpu.pipeline_mode<synchronous>, transform_indices = @transform_5, window_bounds = array<i64: 1, 16>}, {pipeline_mode = #tpu.pipeline_mode<synchronous>, transform_indices = @transform_6, window_bounds = array<i64: 144, 16>}, {pipeline_mode = #tpu.pipeline_mode<synchronous>, transform_indices = @transform_7, window_bounds = array<i64: 1, 16>}, {pipeline_mode = #tpu.pipeline_mode<synchronous>, transform_indices = @transform_8, window_bounds = array<i64: 1, 16>}, {pipeline_mode = #tpu.pipeline_mode<synchronous>, transform_indices = @transform_9, window_bounds = array<i64: 144, 16>}, {pipeline_mode = #tpu.pipeline_mode<synchronous>, transform_indices = @transform_10, window_bounds = array<i64: 1, 16>}, {pipeline_mode = #tpu.pipeline_mode<synchronous>, transform_indices = @transform_11, window_bounds = array<i64: 1, 16>}, {pipeline_mode = #tpu.pipeline_mode<synchronous>, transform_indices = @transform_12, window_bounds = array<i64: 144, 16>}, {pipeline_mode = #tpu.pipeline_mode<synchronous>, transform_indices = @transform_13, window_bounds = array<i64: 1, 16>}, {pipeline_mode = #tpu.pipeline_mode<synchronous>, transform_indices = @transform_14, window_bounds = array<i64: 1, 16>}, {pipeline_mode = #tpu.pipeline_mode<synchronous>, transform_indices = @transform_15, window_bounds = array<i64: 144, 16>}, {transform_indices = @transform_16, window_bounds = array<i64: 1, 8, 8, 16>}]} {
    %c0 = arith.constant 0 : index
    %c0_0 = arith.constant 0 : index
    %0 = vector.load %arg2[%c0, %c0_0] : memref<1x8xf32, #tpu.memory_space<vmem>>, vector<1x8xf32>
    %1 = vector.shape_cast %0 : vector<1x8xf32> to vector<1x1x8xf32>
    %c0_1 = arith.constant 0 : index
    %c0_2 = arith.constant 0 : index
    %2 = vector.load %arg3[%c0_1, %c0_2] : memref<1x8xf32, #tpu.memory_space<vmem>>, vector<1x8xf32>
    %3 = vector.shape_cast %2 : vector<1x8xf32> to vector<1x1x8xf32>
    %c0_3 = arith.constant 0 : index
    %c0_4 = arith.constant 0 : index
    %c0_5 = arith.constant 0 : index
    %c0_6 = arith.constant 0 : index
    %4 = vector.load %arg1[%c0_3, %c0_4, %c0_5, %c0_6] : memref<4x9x9x8xf32, #tpu.memory_space<vmem>>, vector<1x9x9x8xf32>
    %5 = vector.shape_cast %4 : vector<1x9x9x8xf32> to vector<9x9x8xf32>
    %6 = vector.broadcast %1 : vector<1x1x8xf32> to vector<9x9x8xf32>
    %7 = arith.mulf %5, %6 : vector<9x9x8xf32>
    %8 = vector.broadcast %3 : vector<1x1x8xf32> to vector<9x9x8xf32>
    %9 = arith.addf %7, %8 : vector<9x9x8xf32>
    %cst = arith.constant 0.000000e+00 : f32
    %10 = vector.broadcast %cst : f32 to vector<9x9x8xf32>
    %11 = arith.maximumf %9, %10 : vector<9x9x8xf32>
    %12 = tpu.iota {dimensions = array<i32: 0>} : vector<9x9x8xi32>
    %c2_i32 = arith.constant 2 : i32
    %13 = vector.broadcast %c2_i32 : i32 to vector<9x9x8xi32>
    %14 = arith.muli %13, %12 : vector<9x9x8xi32>
    %c0_i32 = arith.constant 0 : i32
    %15 = vector.broadcast %c0_i32 : i32 to vector<9x9x8xi32>
    %16 = arith.addi %14, %15 : vector<9x9x8xi32>
    %17 = tpu.iota {dimensions = array<i32: 1>} : vector<9x9x8xi32>
    %c2_i32_7 = arith.constant 2 : i32
    %18 = vector.broadcast %c2_i32_7 : i32 to vector<9x9x8xi32>
    %19 = arith.muli %18, %17 : vector<9x9x8xi32>
    %c0_i32_8 = arith.constant 0 : i32
    %20 = vector.broadcast %c0_i32_8 : i32 to vector<9x9x8xi32>
    %21 = arith.addi %19, %20 : vector<9x9x8xi32>
    %c1_i32 = arith.constant 1 : i32
    %22 = vector.broadcast %c1_i32 : i32 to vector<9x9x8xi32>
    %23 = arith.cmpi sge, %16, %22 : vector<9x9x8xi32>
    %c16_i32 = arith.constant 16 : i32
    %24 = vector.broadcast %c16_i32 : i32 to vector<9x9x8xi32>
    %25 = arith.cmpi sle, %16, %24 : vector<9x9x8xi32>
    %26 = arith.andi %23, %25 : vector<9x9x8xi1>
    %c1_i32_9 = arith.constant 1 : i32
    %27 = vector.broadcast %c1_i32_9 : i32 to vector<9x9x8xi32>
    %28 = arith.cmpi sge, %21, %27 : vector<9x9x8xi32>
    %29 = arith.andi %26, %28 : vector<9x9x8xi1>
    %c16_i32_10 = arith.constant 16 : i32
    %30 = vector.broadcast %c16_i32_10 : i32 to vector<9x9x8xi32>
    %31 = arith.cmpi sle, %21, %30 : vector<9x9x8xi32>
    %32 = arith.andi %29, %31 : vector<9x9x8xi1>
    %cst_11 = arith.constant 0.000000e+00 : f32
    %33 = vector.broadcast %cst_11 : f32 to vector<9x9x8xf32>
    %34 = arith.select %32, %11, %33 : vector<9x9x8xi1>, vector<9x9x8xf32>
    %35 = arith.truncf %34 : vector<9x9x8xf32> to vector<9x9x8xbf16>
    %c1 = arith.constant 1 : index
    %c0_12 = arith.constant 0 : index
    %c0_13 = arith.constant 0 : index
    %c0_14 = arith.constant 0 : index
    %36 = vector.load %arg1[%c1, %c0_12, %c0_13, %c0_14] : memref<4x9x9x8xf32, #tpu.memory_space<vmem>>, vector<1x9x9x8xf32>
    %37 = vector.shape_cast %36 : vector<1x9x9x8xf32> to vector<9x9x8xf32>
    %38 = vector.broadcast %1 : vector<1x1x8xf32> to vector<9x9x8xf32>
    %39 = arith.mulf %37, %38 : vector<9x9x8xf32>
    %40 = vector.broadcast %3 : vector<1x1x8xf32> to vector<9x9x8xf32>
    %41 = arith.addf %39, %40 : vector<9x9x8xf32>
    %cst_15 = arith.constant 0.000000e+00 : f32
    %42 = vector.broadcast %cst_15 : f32 to vector<9x9x8xf32>
    %43 = arith.maximumf %41, %42 : vector<9x9x8xf32>
    %44 = tpu.iota {dimensions = array<i32: 0>} : vector<9x9x8xi32>
    %c2_i32_16 = arith.constant 2 : i32
    %45 = vector.broadcast %c2_i32_16 : i32 to vector<9x9x8xi32>
    %46 = arith.muli %45, %44 : vector<9x9x8xi32>
    %c0_i32_17 = arith.constant 0 : i32
    %47 = vector.broadcast %c0_i32_17 : i32 to vector<9x9x8xi32>
    %48 = arith.addi %46, %47 : vector<9x9x8xi32>
    %49 = tpu.iota {dimensions = array<i32: 1>} : vector<9x9x8xi32>
    %c2_i32_18 = arith.constant 2 : i32
    %50 = vector.broadcast %c2_i32_18 : i32 to vector<9x9x8xi32>
    %51 = arith.muli %50, %49 : vector<9x9x8xi32>
    %c1_i32_19 = arith.constant 1 : i32
    %52 = vector.broadcast %c1_i32_19 : i32 to vector<9x9x8xi32>
    %53 = arith.addi %51, %52 : vector<9x9x8xi32>
    %c1_i32_20 = arith.constant 1 : i32
    %54 = vector.broadcast %c1_i32_20 : i32 to vector<9x9x8xi32>
    %55 = arith.cmpi sge, %48, %54 : vector<9x9x8xi32>
    %c16_i32_21 = arith.constant 16 : i32
    %56 = vector.broadcast %c16_i32_21 : i32 to vector<9x9x8xi32>
    %57 = arith.cmpi sle, %48, %56 : vector<9x9x8xi32>
    %58 = arith.andi %55, %57 : vector<9x9x8xi1>
    %c1_i32_22 = arith.constant 1 : i32
    %59 = vector.broadcast %c1_i32_22 : i32 to vector<9x9x8xi32>
    %60 = arith.cmpi sge, %53, %59 : vector<9x9x8xi32>
    %61 = arith.andi %58, %60 : vector<9x9x8xi1>
    %c16_i32_23 = arith.constant 16 : i32
    %62 = vector.broadcast %c16_i32_23 : i32 to vector<9x9x8xi32>
    %63 = arith.cmpi sle, %53, %62 : vector<9x9x8xi32>
    %64 = arith.andi %61, %63 : vector<9x9x8xi1>
    %cst_24 = arith.constant 0.000000e+00 : f32
    %65 = vector.broadcast %cst_24 : f32 to vector<9x9x8xf32>
    %66 = arith.select %64, %43, %65 : vector<9x9x8xi1>, vector<9x9x8xf32>
    %67 = arith.truncf %66 : vector<9x9x8xf32> to vector<9x9x8xbf16>
    %c2 = arith.constant 2 : index
    %c0_25 = arith.constant 0 : index
    %c0_26 = arith.constant 0 : index
    %c0_27 = arith.constant 0 : index
    %68 = vector.load %arg1[%c2, %c0_25, %c0_26, %c0_27] : memref<4x9x9x8xf32, #tpu.memory_space<vmem>>, vector<1x9x9x8xf32>
    %69 = vector.shape_cast %68 : vector<1x9x9x8xf32> to vector<9x9x8xf32>
    %70 = vector.broadcast %1 : vector<1x1x8xf32> to vector<9x9x8xf32>
    %71 = arith.mulf %69, %70 : vector<9x9x8xf32>
    %72 = vector.broadcast %3 : vector<1x1x8xf32> to vector<9x9x8xf32>
    %73 = arith.addf %71, %72 : vector<9x9x8xf32>
    %cst_28 = arith.constant 0.000000e+00 : f32
    %74 = vector.broadcast %cst_28 : f32 to vector<9x9x8xf32>
    %75 = arith.maximumf %73, %74 : vector<9x9x8xf32>
    %76 = tpu.iota {dimensions = array<i32: 0>} : vector<9x9x8xi32>
    %c2_i32_29 = arith.constant 2 : i32
    %77 = vector.broadcast %c2_i32_29 : i32 to vector<9x9x8xi32>
    %78 = arith.muli %77, %76 : vector<9x9x8xi32>
    %c1_i32_30 = arith.constant 1 : i32
    %79 = vector.broadcast %c1_i32_30 : i32 to vector<9x9x8xi32>
    %80 = arith.addi %78, %79 : vector<9x9x8xi32>
    %81 = tpu.iota {dimensions = array<i32: 1>} : vector<9x9x8xi32>
    %c2_i32_31 = arith.constant 2 : i32
    %82 = vector.broadcast %c2_i32_31 : i32 to vector<9x9x8xi32>
    %83 = arith.muli %82, %81 : vector<9x9x8xi32>
    %c0_i32_32 = arith.constant 0 : i32
    %84 = vector.broadcast %c0_i32_32 : i32 to vector<9x9x8xi32>
    %85 = arith.addi %83, %84 : vector<9x9x8xi32>
    %c1_i32_33 = arith.constant 1 : i32
    %86 = vector.broadcast %c1_i32_33 : i32 to vector<9x9x8xi32>
    %87 = arith.cmpi sge, %80, %86 : vector<9x9x8xi32>
    %c16_i32_34 = arith.constant 16 : i32
    %88 = vector.broadcast %c16_i32_34 : i32 to vector<9x9x8xi32>
    %89 = arith.cmpi sle, %80, %88 : vector<9x9x8xi32>
    %90 = arith.andi %87, %89 : vector<9x9x8xi1>
    %c1_i32_35 = arith.constant 1 : i32
    %91 = vector.broadcast %c1_i32_35 : i32 to vector<9x9x8xi32>
    %92 = arith.cmpi sge, %85, %91 : vector<9x9x8xi32>
    %93 = arith.andi %90, %92 : vector<9x9x8xi1>
    %c16_i32_36 = arith.constant 16 : i32
    %94 = vector.broadcast %c16_i32_36 : i32 to vector<9x9x8xi32>
    %95 = arith.cmpi sle, %85, %94 : vector<9x9x8xi32>
    %96 = arith.andi %93, %95 : vector<9x9x8xi1>
    %cst_37 = arith.constant 0.000000e+00 : f32
    %97 = vector.broadcast %cst_37 : f32 to vector<9x9x8xf32>
    %98 = arith.select %96, %75, %97 : vector<9x9x8xi1>, vector<9x9x8xf32>
    %99 = arith.truncf %98 : vector<9x9x8xf32> to vector<9x9x8xbf16>
    %c3 = arith.constant 3 : index
    %c0_38 = arith.constant 0 : index
    %c0_39 = arith.constant 0 : index
    %c0_40 = arith.constant 0 : index
    %100 = vector.load %arg1[%c3, %c0_38, %c0_39, %c0_40] : memref<4x9x9x8xf32, #tpu.memory_space<vmem>>, vector<1x9x9x8xf32>
    %101 = vector.shape_cast %100 : vector<1x9x9x8xf32> to vector<9x9x8xf32>
    %102 = vector.broadcast %1 : vector<1x1x8xf32> to vector<9x9x8xf32>
    %103 = arith.mulf %101, %102 : vector<9x9x8xf32>
    %104 = vector.broadcast %3 : vector<1x1x8xf32> to vector<9x9x8xf32>
    %105 = arith.addf %103, %104 : vector<9x9x8xf32>
    %cst_41 = arith.constant 0.000000e+00 : f32
    %106 = vector.broadcast %cst_41 : f32 to vector<9x9x8xf32>
    %107 = arith.maximumf %105, %106 : vector<9x9x8xf32>
    %108 = tpu.iota {dimensions = array<i32: 0>} : vector<9x9x8xi32>
    %c2_i32_42 = arith.constant 2 : i32
    %109 = vector.broadcast %c2_i32_42 : i32 to vector<9x9x8xi32>
    %110 = arith.muli %109, %108 : vector<9x9x8xi32>
    %c1_i32_43 = arith.constant 1 : i32
    %111 = vector.broadcast %c1_i32_43 : i32 to vector<9x9x8xi32>
    %112 = arith.addi %110, %111 : vector<9x9x8xi32>
    %113 = tpu.iota {dimensions = array<i32: 1>} : vector<9x9x8xi32>
    %c2_i32_44 = arith.constant 2 : i32
    %114 = vector.broadcast %c2_i32_44 : i32 to vector<9x9x8xi32>
    %115 = arith.muli %114, %113 : vector<9x9x8xi32>
    %c1_i32_45 = arith.constant 1 : i32
    %116 = vector.broadcast %c1_i32_45 : i32 to vector<9x9x8xi32>
    %117 = arith.addi %115, %116 : vector<9x9x8xi32>
    %c1_i32_46 = arith.constant 1 : i32
    %118 = vector.broadcast %c1_i32_46 : i32 to vector<9x9x8xi32>
    %119 = arith.cmpi sge, %112, %118 : vector<9x9x8xi32>
    %c16_i32_47 = arith.constant 16 : i32
    %120 = vector.broadcast %c16_i32_47 : i32 to vector<9x9x8xi32>
    %121 = arith.cmpi sle, %112, %120 : vector<9x9x8xi32>
    %122 = arith.andi %119, %121 : vector<9x9x8xi1>
    %c1_i32_48 = arith.constant 1 : i32
    %123 = vector.broadcast %c1_i32_48 : i32 to vector<9x9x8xi32>
    %124 = arith.cmpi sge, %117, %123 : vector<9x9x8xi32>
    %125 = arith.andi %122, %124 : vector<9x9x8xi1>
    %c16_i32_49 = arith.constant 16 : i32
    %126 = vector.broadcast %c16_i32_49 : i32 to vector<9x9x8xi32>
    %127 = arith.cmpi sle, %117, %126 : vector<9x9x8xi32>
    %128 = arith.andi %125, %127 : vector<9x9x8xi1>
    %cst_50 = arith.constant 0.000000e+00 : f32
    %129 = vector.broadcast %cst_50 : f32 to vector<9x9x8xf32>
    %130 = arith.select %128, %107, %129 : vector<9x9x8xi1>, vector<9x9x8xf32>
    %131 = arith.truncf %130 : vector<9x9x8xf32> to vector<9x9x8xbf16>
    %132 = vector.extract_strided_slice %35 {offsets = [0, 0, 0], sizes = [8, 8, 8], strides = [1, 1, 1]} : vector<9x9x8xbf16> to vector<8x8x8xbf16>
    %133 = vector.extract_strided_slice %67 {offsets = [0, 0, 0], sizes = [8, 8, 8], strides = [1, 1, 1]} : vector<9x9x8xbf16> to vector<8x8x8xbf16>
    %134 = vector.extract_strided_slice %35 {offsets = [0, 1, 0], sizes = [8, 8, 8], strides = [1, 1, 1]} : vector<9x9x8xbf16> to vector<8x8x8xbf16>
    %135 = vector.extract_strided_slice %99 {offsets = [0, 0, 0], sizes = [8, 8, 8], strides = [1, 1, 1]} : vector<9x9x8xbf16> to vector<8x8x8xbf16>
    %136 = vector.extract_strided_slice %131 {offsets = [0, 0, 0], sizes = [8, 8, 8], strides = [1, 1, 1]} : vector<9x9x8xbf16> to vector<8x8x8xbf16>
    %137 = vector.extract_strided_slice %99 {offsets = [0, 1, 0], sizes = [8, 8, 8], strides = [1, 1, 1]} : vector<9x9x8xbf16> to vector<8x8x8xbf16>
    %138 = vector.extract_strided_slice %35 {offsets = [1, 0, 0], sizes = [8, 8, 8], strides = [1, 1, 1]} : vector<9x9x8xbf16> to vector<8x8x8xbf16>
    %139 = vector.extract_strided_slice %67 {offsets = [1, 0, 0], sizes = [8, 8, 8], strides = [1, 1, 1]} : vector<9x9x8xbf16> to vector<8x8x8xbf16>
    %140 = vector.extract_strided_slice %35 {offsets = [1, 1, 0], sizes = [8, 8, 8], strides = [1, 1, 1]} : vector<9x9x8xbf16> to vector<8x8x8xbf16>
    %141 = tpu.concatenate %132, %133, %134, %135, %136, %137, %138, %139, %140 in 2 : vector<8x8x8xbf16>, vector<8x8x8xbf16>, vector<8x8x8xbf16>, vector<8x8x8xbf16>, vector<8x8x8xbf16>, vector<8x8x8xbf16>, vector<8x8x8xbf16>, vector<8x8x8xbf16>, vector<8x8x8xbf16> -> vector<8x8x72xbf16>
    %142 = vector.shape_cast %141 : vector<8x8x72xbf16> to vector<64x72xbf16>
    %c0_51 = arith.constant 0 : index
    %c0_52 = arith.constant 0 : index
    %143 = vector.load %arg4[%c0_51, %c0_52] : memref<72x16xbf16, #tpu.memory_space<vmem>>, vector<72x16xbf16>
    %cst_53 = arith.constant dense<0.000000e+00> : vector<64x16xf32>
    %144 = tpu.matmul %142, %143, %cst_53 {dimension_numbers = #tpu.dot_dimension_numbers<[1], [0], [0], [1], [0, 0, 1, 1], [], []>} : vector<64x72xbf16>, vector<72x16xbf16>, vector<64x16xf32> -> vector<64x16xf32>
    %145 = vector.shape_cast %144 : vector<64x16xf32> to vector<8x8x16xf32>
    %cst_54 = arith.constant 0.000000e+00 : bf16
    %146 = vector.broadcast %cst_54 : bf16 to vector<1x10x16xbf16>
    %c0_55 = arith.constant 0 : index
    %c0_56 = arith.constant 0 : index
    %c0_57 = arith.constant 0 : index
    %147 = vector.load %arg18[%c0_55, %c0_56, %c0_57] : memref<10x10x16xbf16, #tpu.memory_space<vmem>>, vector<1x10x16xbf16>
    tpu.vector_store %arg18[%c0_55, %c0_56, %c0_57], %146 {strides = array<i32>} : memref<10x10x16xbf16, #tpu.memory_space<vmem>>, vector<1x10x16xbf16>,
    %cst_58 = arith.constant 0.000000e+00 : bf16
    %148 = vector.broadcast %cst_58 : bf16 to vector<1x10x16xbf16>
    %c9 = arith.constant 9 : index
    %c0_59 = arith.constant 0 : index
    %c0_60 = arith.constant 0 : index
    %149 = vector.load %arg18[%c9, %c0_59, %c0_60] : memref<10x10x16xbf16, #tpu.memory_space<vmem>>, vector<1x10x16xbf16>
    tpu.vector_store %arg18[%c9, %c0_59, %c0_60], %148 {strides = array<i32>} : memref<10x10x16xbf16, #tpu.memory_space<vmem>>, vector<1x10x16xbf16>,
    %cst_61 = arith.constant 0.000000e+00 : bf16
    %150 = vector.broadcast %cst_61 : bf16 to vector<10x1x16xbf16>
    %c0_62 = arith.constant 0 : index
    %c0_63 = arith.constant 0 : index
    %c0_64 = arith.constant 0 : index
    %151 = vector.load %arg18[%c0_62, %c0_63, %c0_64] : memref<10x10x16xbf16, #tpu.memory_space<vmem>>, vector<10x1x16xbf16>
    tpu.vector_store %arg18[%c0_62, %c0_63, %c0_64], %150 {strides = array<i32>} : memref<10x10x16xbf16, #tpu.memory_space<vmem>>, vector<10x1x16xbf16>,
    %cst_65 = arith.constant 0.000000e+00 : bf16
    %152 = vector.broadcast %cst_65 : bf16 to vector<10x1x16xbf16>
    %c0_66 = arith.constant 0 : index
    %c9_67 = arith.constant 9 : index
    %c0_68 = arith.constant 0 : index
    %153 = vector.load %arg18[%c0_66, %c9_67, %c0_68] : memref<10x10x16xbf16, #tpu.memory_space<vmem>>, vector<10x1x16xbf16>
    tpu.vector_store %arg18[%c0_66, %c9_67, %c0_68], %152 {strides = array<i32>} : memref<10x10x16xbf16, #tpu.memory_space<vmem>>, vector<10x1x16xbf16>,
    %c0_69 = arith.constant 0 : index
    %c0_70 = arith.constant 0 : index
    %154 = vector.load %arg5[%c0_69, %c0_70] : memref<1x16xf32, #tpu.memory_space<vmem>>, vector<1x16xf32>
    %155 = vector.shape_cast %154 : vector<1x16xf32> to vector<1x1x16xf32>
    %c0_71 = arith.constant 0 : index
    %c0_72 = arith.constant 0 : index
    %156 = vector.load %arg6[%c0_71, %c0_72] : memref<1x16xf32, #tpu.memory_space<vmem>>, vector<1x16xf32>
    %157 = vector.shape_cast %156 : vector<1x16xf32> to vector<1x1x16xf32>
    %158 = vector.broadcast %155 : vector<1x1x16xf32> to vector<8x8x16xf32>
    %159 = arith.mulf %145, %158 : vector<8x8x16xf32>
    %160 = vector.broadcast %157 : vector<1x1x16xf32> to vector<8x8x16xf32>
    %161 = arith.addf %159, %160 : vector<8x8x16xf32>
    %cst_73 = arith.constant 0.000000e+00 : f32
    %162 = vector.broadcast %cst_73 : f32 to vector<8x8x16xf32>
    %163 = arith.maximumf %161, %162 : vector<8x8x16xf32>
    %164 = arith.truncf %163 : vector<8x8x16xf32> to vector<8x8x16xbf16>
    %c1_74 = arith.constant 1 : index
    %c1_75 = arith.constant 1 : index
    %c0_76 = arith.constant 0 : index
    %165 = vector.load %arg18[%c1_74, %c1_75, %c0_76] : memref<10x10x16xbf16, #tpu.memory_space<vmem>>, vector<8x8x16xbf16>
    tpu.vector_store %arg18[%c1_74, %c1_75, %c0_76], %164 {strides = array<i32>} : memref<10x10x16xbf16, #tpu.memory_space<vmem>>, vector<8x8x16xbf16>,
    %c0_77 = arith.constant 0 : index
    %c0_78 = arith.constant 0 : index
    %c0_79 = arith.constant 0 : index
    %166 = vector.load %arg18[%c0_77, %c0_78, %c0_79] : memref<10x10x16xbf16, #tpu.memory_space<vmem>>, vector<8x8x16xbf16>
    %c0_80 = arith.constant 0 : index
    %c1_81 = arith.constant 1 : index
    %c0_82 = arith.constant 0 : index
    %167 = vector.load %arg18[%c0_80, %c1_81, %c0_82] : memref<10x10x16xbf16, #tpu.memory_space<vmem>>, vector<8x8x16xbf16>
    %c0_83 = arith.constant 0 : index
    %c2_84 = arith.constant 2 : index
    %c0_85 = arith.constant 0 : index
    %168 = vector.load %arg18[%c0_83, %c2_84, %c0_85] : memref<10x10x16xbf16, #tpu.memory_space<vmem>>, vector<8x8x16xbf16>
    %c1_86 = arith.constant 1 : index
    %c0_87 = arith.constant 0 : index
    %c0_88 = arith.constant 0 : index
    %169 = vector.load %arg18[%c1_86, %c0_87, %c0_88] : memref<10x10x16xbf16, #tpu.memory_space<vmem>>, vector<8x8x16xbf16>
    %c1_89 = arith.constant 1 : index
    %c1_90 = arith.constant 1 : index
    %c0_91 = arith.constant 0 : index
    %170 = vector.load %arg18[%c1_89, %c1_90, %c0_91] : memref<10x10x16xbf16, #tpu.memory_space<vmem>>, vector<8x8x16xbf16>
    %c1_92 = arith.constant 1 : index
    %c2_93 = arith.constant 2 : index
    %c0_94 = arith.constant 0 : index
    %171 = vector.load %arg18[%c1_92, %c2_93, %c0_94] : memref<10x10x16xbf16, #tpu.memory_space<vmem>>, vector<8x8x16xbf16>
    %c2_95 = arith.constant 2 : index
    %c0_96 = arith.constant 0 : index
    %c0_97 = arith.constant 0 : index
    %172 = vector.load %arg18[%c2_95, %c0_96, %c0_97] : memref<10x10x16xbf16, #tpu.memory_space<vmem>>, vector<8x8x16xbf16>
    %c2_98 = arith.constant 2 : index
    %c1_99 = arith.constant 1 : index
    %c0_100 = arith.constant 0 : index
    %173 = vector.load %arg18[%c2_98, %c1_99, %c0_100] : memref<10x10x16xbf16, #tpu.memory_space<vmem>>, vector<8x8x16xbf16>
    %c2_101 = arith.constant 2 : index
    %c2_102 = arith.constant 2 : index
    %c0_103 = arith.constant 0 : index
    %174 = vector.load %arg18[%c2_101, %c2_102, %c0_103] : memref<10x10x16xbf16, #tpu.memory_space<vmem>>, vector<8x8x16xbf16>
    %175 = tpu.concatenate %166, %167, %168, %169, %170, %171, %172, %173, %174 in 2 : vector<8x8x16xbf16>, vector<8x8x16xbf16>, vector<8x8x16xbf16>, vector<8x8x16xbf16>, vector<8x8x16xbf16>, vector<8x8x16xbf16>, vector<8x8x16xbf16>, vector<8x8x16xbf16>, vector<8x8x16xbf16> -> vector<8x8x144xbf16>
    %176 = vector.shape_cast %175 : vector<8x8x144xbf16> to vector<64x144xbf16>
    %c0_104 = arith.constant 0 : index
    %c0_105 = arith.constant 0 : index
    %177 = vector.load %arg7[%c0_104, %c0_105] : memref<144x16xbf16, #tpu.memory_space<vmem>>, vector<144x16xbf16>
    %cst_106 = arith.constant dense<0.000000e+00> : vector<64x16xf32>
    %178 = tpu.matmul %176, %177, %cst_106 {dimension_numbers = #tpu.dot_dimension_numbers<[1], [0], [0], [1], [0, 0, 1, 1], [], []>} : vector<64x144xbf16>, vector<144x16xbf16>, vector<64x16xf32> -> vector<64x16xf32>
    %179 = vector.shape_cast %178 : vector<64x16xf32> to vector<8x8x16xf32>
    %c0_107 = arith.constant 0 : index
    %c0_108 = arith.constant 0 : index
    %180 = vector.load %arg8[%c0_107, %c0_108] : memref<1x16xf32, #tpu.memory_space<vmem>>, vector<1x16xf32>
    %181 = vector.shape_cast %180 : vector<1x16xf32> to vector<1x1x16xf32>
    %c0_109 = arith.constant 0 : index
    %c0_110 = arith.constant 0 : index
    %182 = vector.load %arg9[%c0_109, %c0_110] : memref<1x16xf32, #tpu.memory_space<vmem>>, vector<1x16xf32>
    %183 = vector.shape_cast %182 : vector<1x16xf32> to vector<1x1x16xf32>
    %184 = vector.broadcast %181 : vector<1x1x16xf32> to vector<8x8x16xf32>
    %185 = arith.mulf %179, %184 : vector<8x8x16xf32>
    %186 = vector.broadcast %183 : vector<1x1x16xf32> to vector<8x8x16xf32>
    %187 = arith.addf %185, %186 : vector<8x8x16xf32>
    %cst_111 = arith.constant 0.000000e+00 : f32
    %188 = vector.broadcast %cst_111 : f32 to vector<8x8x16xf32>
    %189 = arith.maximumf %187, %188 : vector<8x8x16xf32>
    %190 = arith.truncf %189 : vector<8x8x16xf32> to vector<8x8x16xbf16>
    %c1_112 = arith.constant 1 : index
    %c1_113 = arith.constant 1 : index
    %c0_114 = arith.constant 0 : index
    %191 = vector.load %arg18[%c1_112, %c1_113, %c0_114] : memref<10x10x16xbf16, #tpu.memory_space<vmem>>, vector<8x8x16xbf16>
    tpu.vector_store %arg18[%c1_112, %c1_113, %c0_114], %190 {strides = array<i32>} : memref<10x10x16xbf16, #tpu.memory_space<vmem>>, vector<8x8x16xbf16>,
    %c0_115 = arith.constant 0 : index
    %c0_116 = arith.constant 0 : index
    %c0_117 = arith.constant 0 : index
    %192 = vector.load %arg18[%c0_115, %c0_116, %c0_117] : memref<10x10x16xbf16, #tpu.memory_space<vmem>>, vector<8x8x16xbf16>
    %c0_118 = arith.constant 0 : index
    %c1_119 = arith.constant 1 : index
    %c0_120 = arith.constant 0 : index
    %193 = vector.load %arg18[%c0_118, %c1_119, %c0_120] : memref<10x10x16xbf16, #tpu.memory_space<vmem>>, vector<8x8x16xbf16>
    %c0_121 = arith.constant 0 : index
    %c2_122 = arith.constant 2 : index
    %c0_123 = arith.constant 0 : index
    %194 = vector.load %arg18[%c0_121, %c2_122, %c0_123] : memref<10x10x16xbf16, #tpu.memory_space<vmem>>, vector<8x8x16xbf16>
    %c1_124 = arith.constant 1 : index
    %c0_125 = arith.constant 0 : index
    %c0_126 = arith.constant 0 : index
    %195 = vector.load %arg18[%c1_124, %c0_125, %c0_126] : memref<10x10x16xbf16, #tpu.memory_space<vmem>>, vector<8x8x16xbf16>
    %c1_127 = arith.constant 1 : index
    %c1_128 = arith.constant 1 : index
    %c0_129 = arith.constant 0 : index
    %196 = vector.load %arg18[%c1_127, %c1_128, %c0_129] : memref<10x10x16xbf16, #tpu.memory_space<vmem>>, vector<8x8x16xbf16>
    %c1_130 = arith.constant 1 : index
    %c2_131 = arith.constant 2 : index
    %c0_132 = arith.constant 0 : index
    %197 = vector.load %arg18[%c1_130, %c2_131, %c0_132] : memref<10x10x16xbf16, #tpu.memory_space<vmem>>, vector<8x8x16xbf16>
    %c2_133 = arith.constant 2 : index
    %c0_134 = arith.constant 0 : index
    %c0_135 = arith.constant 0 : index
    %198 = vector.load %arg18[%c2_133, %c0_134, %c0_135] : memref<10x10x16xbf16, #tpu.memory_space<vmem>>, vector<8x8x16xbf16>
    %c2_136 = arith.constant 2 : index
    %c1_137 = arith.constant 1 : index
    %c0_138 = arith.constant 0 : index
    %199 = vector.load %arg18[%c2_136, %c1_137, %c0_138] : memref<10x10x16xbf16, #tpu.memory_space<vmem>>, vector<8x8x16xbf16>
    %c2_139 = arith.constant 2 : index
    %c2_140 = arith.constant 2 : index
    %c0_141 = arith.constant 0 : index
    %200 = vector.load %arg18[%c2_139, %c2_140, %c0_141] : memref<10x10x16xbf16, #tpu.memory_space<vmem>>, vector<8x8x16xbf16>
    %201 = tpu.concatenate %192, %193, %194, %195, %196, %197, %198, %199, %200 in 2 : vector<8x8x16xbf16>, vector<8x8x16xbf16>, vector<8x8x16xbf16>, vector<8x8x16xbf16>, vector<8x8x16xbf16>, vector<8x8x16xbf16>, vector<8x8x16xbf16>, vector<8x8x16xbf16>, vector<8x8x16xbf16> -> vector<8x8x144xbf16>
    %202 = vector.shape_cast %201 : vector<8x8x144xbf16> to vector<64x144xbf16>
    %c0_142 = arith.constant 0 : index
    %c0_143 = arith.constant 0 : index
    %203 = vector.load %arg10[%c0_142, %c0_143] : memref<144x16xbf16, #tpu.memory_space<vmem>>, vector<144x16xbf16>
    %cst_144 = arith.constant dense<0.000000e+00> : vector<64x16xf32>
    %204 = tpu.matmul %202, %203, %cst_144 {dimension_numbers = #tpu.dot_dimension_numbers<[1], [0], [0], [1], [0, 0, 1, 1], [], []>} : vector<64x144xbf16>, vector<144x16xbf16>, vector<64x16xf32> -> vector<64x16xf32>
    %205 = vector.shape_cast %204 : vector<64x16xf32> to vector<8x8x16xf32>
    %206 = arith.addf %205, %145 : vector<8x8x16xf32>
    %c0_145 = arith.constant 0 : index
    %c0_146 = arith.constant 0 : index
    %207 = vector.load %arg11[%c0_145, %c0_146] : memref<1x16xf32, #tpu.memory_space<vmem>>, vector<1x16xf32>
    %208 = vector.shape_cast %207 : vector<1x16xf32> to vector<1x1x16xf32>
    %c0_147 = arith.constant 0 : index
    %c0_148 = arith.constant 0 : index
    %209 = vector.load %arg12[%c0_147, %c0_148] : memref<1x16xf32, #tpu.memory_space<vmem>>, vector<1x16xf32>
    %210 = vector.shape_cast %209 : vector<1x16xf32> to vector<1x1x16xf32>
    %211 = vector.broadcast %208 : vector<1x1x16xf32> to vector<8x8x16xf32>
    %212 = arith.mulf %206, %211 : vector<8x8x16xf32>
    %213 = vector.broadcast %210 : vector<1x1x16xf32> to vector<8x8x16xf32>
    %214 = arith.addf %212, %213 : vector<8x8x16xf32>
    %cst_149 = arith.constant 0.000000e+00 : f32
    %215 = vector.broadcast %cst_149 : f32 to vector<8x8x16xf32>
    %216 = arith.maximumf %214, %215 : vector<8x8x16xf32>
    %217 = arith.truncf %216 : vector<8x8x16xf32> to vector<8x8x16xbf16>
    %c1_150 = arith.constant 1 : index
    %c1_151 = arith.constant 1 : index
    %c0_152 = arith.constant 0 : index
    %218 = vector.load %arg18[%c1_150, %c1_151, %c0_152] : memref<10x10x16xbf16, #tpu.memory_space<vmem>>, vector<8x8x16xbf16>
    tpu.vector_store %arg18[%c1_150, %c1_151, %c0_152], %217 {strides = array<i32>} : memref<10x10x16xbf16, #tpu.memory_space<vmem>>, vector<8x8x16xbf16>,
    %c0_153 = arith.constant 0 : index
    %c0_154 = arith.constant 0 : index
    %c0_155 = arith.constant 0 : index
    %219 = vector.load %arg18[%c0_153, %c0_154, %c0_155] : memref<10x10x16xbf16, #tpu.memory_space<vmem>>, vector<8x8x16xbf16>
    %c0_156 = arith.constant 0 : index
    %c1_157 = arith.constant 1 : index
    %c0_158 = arith.constant 0 : index
    %220 = vector.load %arg18[%c0_156, %c1_157, %c0_158] : memref<10x10x16xbf16, #tpu.memory_space<vmem>>, vector<8x8x16xbf16>
    %c0_159 = arith.constant 0 : index
    %c2_160 = arith.constant 2 : index
    %c0_161 = arith.constant 0 : index
    %221 = vector.load %arg18[%c0_159, %c2_160, %c0_161] : memref<10x10x16xbf16, #tpu.memory_space<vmem>>, vector<8x8x16xbf16>
    %c1_162 = arith.constant 1 : index
    %c0_163 = arith.constant 0 : index
    %c0_164 = arith.constant 0 : index
    %222 = vector.load %arg18[%c1_162, %c0_163, %c0_164] : memref<10x10x16xbf16, #tpu.memory_space<vmem>>, vector<8x8x16xbf16>
    %c1_165 = arith.constant 1 : index
    %c1_166 = arith.constant 1 : index
    %c0_167 = arith.constant 0 : index
    %223 = vector.load %arg18[%c1_165, %c1_166, %c0_167] : memref<10x10x16xbf16, #tpu.memory_space<vmem>>, vector<8x8x16xbf16>
    %c1_168 = arith.constant 1 : index
    %c2_169 = arith.constant 2 : index
    %c0_170 = arith.constant 0 : index
    %224 = vector.load %arg18[%c1_168, %c2_169, %c0_170] : memref<10x10x16xbf16, #tpu.memory_space<vmem>>, vector<8x8x16xbf16>
    %c2_171 = arith.constant 2 : index
    %c0_172 = arith.constant 0 : index
    %c0_173 = arith.constant 0 : index
    %225 = vector.load %arg18[%c2_171, %c0_172, %c0_173] : memref<10x10x16xbf16, #tpu.memory_space<vmem>>, vector<8x8x16xbf16>
    %c2_174 = arith.constant 2 : index
    %c1_175 = arith.constant 1 : index
    %c0_176 = arith.constant 0 : index
    %226 = vector.load %arg18[%c2_174, %c1_175, %c0_176] : memref<10x10x16xbf16, #tpu.memory_space<vmem>>, vector<8x8x16xbf16>
    %c2_177 = arith.constant 2 : index
    %c2_178 = arith.constant 2 : index
    %c0_179 = arith.constant 0 : index
    %227 = vector.load %arg18[%c2_177, %c2_178, %c0_179] : memref<10x10x16xbf16, #tpu.memory_space<vmem>>, vector<8x8x16xbf16>
    %228 = tpu.concatenate %219, %220, %221, %222, %223, %224, %225, %226, %227 in 2 : vector<8x8x16xbf16>, vector<8x8x16xbf16>, vector<8x8x16xbf16>, vector<8x8x16xbf16>, vector<8x8x16xbf16>, vector<8x8x16xbf16>, vector<8x8x16xbf16>, vector<8x8x16xbf16>, vector<8x8x16xbf16> -> vector<8x8x144xbf16>
    %229 = vector.shape_cast %228 : vector<8x8x144xbf16> to vector<64x144xbf16>
    %c0_180 = arith.constant 0 : index
    %c0_181 = arith.constant 0 : index
    %230 = vector.load %arg13[%c0_180, %c0_181] : memref<144x16xbf16, #tpu.memory_space<vmem>>, vector<144x16xbf16>
    %cst_182 = arith.constant dense<0.000000e+00> : vector<64x16xf32>
    %231 = tpu.matmul %229, %230, %cst_182 {dimension_numbers = #tpu.dot_dimension_numbers<[1], [0], [0], [1], [0, 0, 1, 1], [], []>} : vector<64x144xbf16>, vector<144x16xbf16>, vector<64x16xf32> -> vector<64x16xf32>
    %232 = vector.shape_cast %231 : vector<64x16xf32> to vector<8x8x16xf32>
    %c0_183 = arith.constant 0 : index
    %c0_184 = arith.constant 0 : index
    %233 = vector.load %arg14[%c0_183, %c0_184] : memref<1x16xf32, #tpu.memory_space<vmem>>, vector<1x16xf32>
    %234 = vector.shape_cast %233 : vector<1x16xf32> to vector<1x1x16xf32>
    %c0_185 = arith.constant 0 : index
    %c0_186 = arith.constant 0 : index
    %235 = vector.load %arg15[%c0_185, %c0_186] : memref<1x16xf32, #tpu.memory_space<vmem>>, vector<1x16xf32>
    %236 = vector.shape_cast %235 : vector<1x16xf32> to vector<1x1x16xf32>
    %237 = vector.broadcast %234 : vector<1x1x16xf32> to vector<8x8x16xf32>
    %238 = arith.mulf %232, %237 : vector<8x8x16xf32>
    %239 = vector.broadcast %236 : vector<1x1x16xf32> to vector<8x8x16xf32>
    %240 = arith.addf %238, %239 : vector<8x8x16xf32>
    %cst_187 = arith.constant 0.000000e+00 : f32
    %241 = vector.broadcast %cst_187 : f32 to vector<8x8x16xf32>
    %242 = arith.maximumf %240, %241 : vector<8x8x16xf32>
    %243 = arith.truncf %242 : vector<8x8x16xf32> to vector<8x8x16xbf16>
    %c1_188 = arith.constant 1 : index
    %c1_189 = arith.constant 1 : index
    %c0_190 = arith.constant 0 : index
    %244 = vector.load %arg18[%c1_188, %c1_189, %c0_190] : memref<10x10x16xbf16, #tpu.memory_space<vmem>>, vector<8x8x16xbf16>
    tpu.vector_store %arg18[%c1_188, %c1_189, %c0_190], %243 {strides = array<i32>} : memref<10x10x16xbf16, #tpu.memory_space<vmem>>, vector<8x8x16xbf16>,
    %c0_191 = arith.constant 0 : index
    %c0_192 = arith.constant 0 : index
    %c0_193 = arith.constant 0 : index
    %245 = vector.load %arg18[%c0_191, %c0_192, %c0_193] : memref<10x10x16xbf16, #tpu.memory_space<vmem>>, vector<8x8x16xbf16>
    %c0_194 = arith.constant 0 : index
    %c1_195 = arith.constant 1 : index
    %c0_196 = arith.constant 0 : index
    %246 = vector.load %arg18[%c0_194, %c1_195, %c0_196] : memref<10x10x16xbf16, #tpu.memory_space<vmem>>, vector<8x8x16xbf16>
    %c0_197 = arith.constant 0 : index
    %c2_198 = arith.constant 2 : index
    %c0_199 = arith.constant 0 : index
    %247 = vector.load %arg18[%c0_197, %c2_198, %c0_199] : memref<10x10x16xbf16, #tpu.memory_space<vmem>>, vector<8x8x16xbf16>
    %c1_200 = arith.constant 1 : index
    %c0_201 = arith.constant 0 : index
    %c0_202 = arith.constant 0 : index
    %248 = vector.load %arg18[%c1_200, %c0_201, %c0_202] : memref<10x10x16xbf16, #tpu.memory_space<vmem>>, vector<8x8x16xbf16>
    %c1_203 = arith.constant 1 : index
    %c1_204 = arith.constant 1 : index
    %c0_205 = arith.constant 0 : index
    %249 = vector.load %arg18[%c1_203, %c1_204, %c0_205] : memref<10x10x16xbf16, #tpu.memory_space<vmem>>, vector<8x8x16xbf16>
    %c1_206 = arith.constant 1 : index
    %c2_207 = arith.constant 2 : index
    %c0_208 = arith.constant 0 : index
    %250 = vector.load %arg18[%c1_206, %c2_207, %c0_208] : memref<10x10x16xbf16, #tpu.memory_space<vmem>>, vector<8x8x16xbf16>
    %c2_209 = arith.constant 2 : index
    %c0_210 = arith.constant 0 : index
    %c0_211 = arith.constant 0 : index
    %251 = vector.load %arg18[%c2_209, %c0_210, %c0_211] : memref<10x10x16xbf16, #tpu.memory_space<vmem>>, vector<8x8x16xbf16>
    %c2_212 = arith.constant 2 : index
    %c1_213 = arith.constant 1 : index
    %c0_214 = arith.constant 0 : index
    %252 = vector.load %arg18[%c2_212, %c1_213, %c0_214] : memref<10x10x16xbf16, #tpu.memory_space<vmem>>, vector<8x8x16xbf16>
    %c2_215 = arith.constant 2 : index
    %c2_216 = arith.constant 2 : index
    %c0_217 = arith.constant 0 : index
    %253 = vector.load %arg18[%c2_215, %c2_216, %c0_217] : memref<10x10x16xbf16, #tpu.memory_space<vmem>>, vector<8x8x16xbf16>
    %254 = tpu.concatenate %245, %246, %247, %248, %249, %250, %251, %252, %253 in 2 : vector<8x8x16xbf16>, vector<8x8x16xbf16>, vector<8x8x16xbf16>, vector<8x8x16xbf16>, vector<8x8x16xbf16>, vector<8x8x16xbf16>, vector<8x8x16xbf16>, vector<8x8x16xbf16>, vector<8x8x16xbf16> -> vector<8x8x144xbf16>
    %255 = vector.shape_cast %254 : vector<8x8x144xbf16> to vector<64x144xbf16>
    %c0_218 = arith.constant 0 : index
    %c0_219 = arith.constant 0 : index
    %256 = vector.load %arg16[%c0_218, %c0_219] : memref<144x16xbf16, #tpu.memory_space<vmem>>, vector<144x16xbf16>
    %cst_220 = arith.constant dense<0.000000e+00> : vector<64x16xf32>
    %257 = tpu.matmul %255, %256, %cst_220 {dimension_numbers = #tpu.dot_dimension_numbers<[1], [0], [0], [1], [0, 0, 1, 1], [], []>} : vector<64x144xbf16>, vector<144x16xbf16>, vector<64x16xf32> -> vector<64x16xf32>
    %258 = vector.shape_cast %257 : vector<64x16xf32> to vector<8x8x16xf32>
    %259 = arith.addf %258, %206 : vector<8x8x16xf32>
    %260 = vector.shape_cast %259 : vector<8x8x16xf32> to vector<1x8x8x16xf32>
    %c0_221 = arith.constant 0 : index
    %c0_222 = arith.constant 0 : index
    %c0_223 = arith.constant 0 : index
    %c0_224 = arith.constant 0 : index
    %261 = vector.load %arg17[%c0_221, %c0_222, %c0_223, %c0_224] : memref<1x8x8x16xf32, #tpu.memory_space<vmem>>, vector<1x8x8x16xf32>
    tpu.vector_store %arg17[%c0_221, %c0_222, %c0_223, %c0_224], %260 {strides = array<i32>} : memref<1x8x8x16xf32, #tpu.memory_space<vmem>>, vector<1x8x8x16xf32>,
    return
  }
  func.func @transform_0(%arg0: i32) -> (i32, i32, i32, i32) {
    %c0_i32 = arith.constant 0 : i32
    %c0_i32_0 = arith.constant 0 : i32
    %c0_i32_1 = arith.constant 0 : i32
    %c0_i32_2 = arith.constant 0 : i32
    return %arg0, %c0_i32, %c0_i32_0, %c0_i32_1 : i32, i32, i32, i32
  }
  func.func @transform_1(%arg0: i32) -> (i32, i32) {
    %c0_i32 = arith.constant 0 : i32
    %c0_i32_0 = arith.constant 0 : i32
    %c0_i32_1 = arith.constant 0 : i32
    return %c0_i32, %c0_i32_0 : i32, i32
  }
  func.func @transform_2(%arg0: i32) -> (i32, i32) {
    %c0_i32 = arith.constant 0 : i32
    %c0_i32_0 = arith.constant 0 : i32
    %c0_i32_1 = arith.constant 0 : i32
    return %c0_i32, %c0_i32_0 : i32, i32
  }
  func.func @transform_3(%arg0: i32) -> (i32, i32) {
    %c0_i32 = arith.constant 0 : i32
    %c0_i32_0 = arith.constant 0 : i32
    %c0_i32_1 = arith.constant 0 : i32
    return %c0_i32, %c0_i32_0 : i32, i32
  }
  func.func @transform_4(%arg0: i32) -> (i32, i32) {
    %c0_i32 = arith.constant 0 : i32
    %c0_i32_0 = arith.constant 0 : i32
    %c0_i32_1 = arith.constant 0 : i32
    return %c0_i32, %c0_i32_0 : i32, i32
  }
  func.func @transform_5(%arg0: i32) -> (i32, i32) {
    %c0_i32 = arith.constant 0 : i32
    %c0_i32_0 = arith.constant 0 : i32
    %c0_i32_1 = arith.constant 0 : i32
    return %c0_i32, %c0_i32_0 : i32, i32
  }
  func.func @transform_6(%arg0: i32) -> (i32, i32) {
    %c0_i32 = arith.constant 0 : i32
    %c0_i32_0 = arith.constant 0 : i32
    %c0_i32_1 = arith.constant 0 : i32
    return %c0_i32, %c0_i32_0 : i32, i32
  }
  func.func @transform_7(%arg0: i32) -> (i32, i32) {
    %c0_i32 = arith.constant 0 : i32
    %c0_i32_0 = arith.constant 0 : i32
    %c0_i32_1 = arith.constant 0 : i32
    return %c0_i32, %c0_i32_0 : i32, i32
  }
  func.func @transform_8(%arg0: i32) -> (i32, i32) {
    %c0_i32 = arith.constant 0 : i32
    %c0_i32_0 = arith.constant 0 : i32
    %c0_i32_1 = arith.constant 0 : i32
    return %c0_i32, %c0_i32_0 : i32, i32
  }
  func.func @transform_9(%arg0: i32) -> (i32, i32) {
    %c0_i32 = arith.constant 0 : i32
    %c0_i32_0 = arith.constant 0 : i32
    %c0_i32_1 = arith.constant 0 : i32
    return %c0_i32, %c0_i32_0 : i32, i32
  }
  func.func @transform_10(%arg0: i32) -> (i32, i32) {
    %c0_i32 = arith.constant 0 : i32
    %c0_i32_0 = arith.constant 0 : i32
    %c0_i32_1 = arith.constant 0 : i32
    return %c0_i32, %c0_i32_0 : i32, i32
  }
  func.func @transform_11(%arg0: i32) -> (i32, i32) {
    %c0_i32 = arith.constant 0 : i32
    %c0_i32_0 = arith.constant 0 : i32
    %c0_i32_1 = arith.constant 0 : i32
    return %c0_i32, %c0_i32_0 : i32, i32
  }
  func.func @transform_12(%arg0: i32) -> (i32, i32) {
    %c0_i32 = arith.constant 0 : i32
    %c0_i32_0 = arith.constant 0 : i32
    %c0_i32_1 = arith.constant 0 : i32
    return %c0_i32, %c0_i32_0 : i32, i32
  }
  func.func @transform_13(%arg0: i32) -> (i32, i32) {
    %c0_i32 = arith.constant 0 : i32
    %c0_i32_0 = arith.constant 0 : i32
    %c0_i32_1 = arith.constant 0 : i32
    return %c0_i32, %c0_i32_0 : i32, i32
  }
  func.func @transform_14(%arg0: i32) -> (i32, i32) {
    %c0_i32 = arith.constant 0 : i32
    %c0_i32_0 = arith.constant 0 : i32
    %c0_i32_1 = arith.constant 0 : i32
    return %c0_i32, %c0_i32_0 : i32, i32
  }
  func.func @transform_15(%arg0: i32) -> (i32, i32) {
    %c0_i32 = arith.constant 0 : i32
    %c0_i32_0 = arith.constant 0 : i32
    %c0_i32_1 = arith.constant 0 : i32
    return %c0_i32, %c0_i32_0 : i32, i32
  }
  func.func @transform_16(%arg0: i32) -> (i32, i32, i32, i32) {
    %c0_i32 = arith.constant 0 : i32
    %c0_i32_0 = arith.constant 0 : i32
    %c0_i32_1 = arith.constant 0 : i32
    %c0_i32_2 = arith.constant 0 : i32
    return %arg0, %c0_i32, %c0_i32_0, %c0_i32_1 : i32, i32, i32, i32
  }
}

</mosaic_0001>

<bundles_post_ra>
// kernel: tpu_custom_call.1
= control target key start
LH: loop header
LB: loop body
LE: loop exit
PB: predicated region body
PF: predicated region fallthrough
CT: control target
= control target key end

     0   :  { %s8300_s0 = inlined_call_operand.vmem [shape: f32[8,9,9,8], index: 0, kind: input, shape index: {}]   ;;  %s8301_s1 = inlined_call_operand.vmem [shape: f32[1,8], index: 1, kind: input, shape index: {}]   ;;  %s8302_s2 = inlined_call_operand.vmem [shape: f32[1,8], index: 2, kind: input, shape index: {}]   ;;  %s8303_s3 = inlined_call_operand.vmem [shape: bf16[72,16], index: 3, kind: input, shape index: {}]   ;;  %s8304_s4 = inlined_call_operand.vmem [shape: f32[1,16], index: 4, kind: input, shape index: {}]   ;;  %s8305_s5 = inlined_call_operand.vmem [shape: f32[1,16], index: 5, kind: input, shape index: {}]   ;;  %s8306_s6 = inlined_call_operand.vmem [shape: bf16[144,16], index: 6, kind: input, shape index: {}]   ;;  %s8307_s7 = inlined_call_operand.vmem [shape: f32[1,16], index: 7, kind: input, shape index: {}]   ;;  %s8308_s8 = inlined_call_operand.vmem [shape: f32[1,16], index: 8, kind: input, shape index: {}]   ;;  %s8309_s9 = inlined_call_operand.vmem [shape: bf16[144,16], index: 9, kind: input, shape index: {}]   ;;  %s8310_s10 = inlined_call_operand.vmem [shape: f32[1,16], index: 10, kind: input, shape index: {}]   ;;  %s8311_s11 = inlined_call_operand.vmem [shape: f32[1,16], index: 11, kind: input, shape index: {}]   ;;  %s8312_s12 = inlined_call_operand.vmem [shape: bf16[144,16], index: 12, kind: input, shape index: {}]   ;;  %s8313_s13 = inlined_call_operand.vmem [shape: f32[1,16], index: 13, kind: input, shape index: {}]   ;;  %s8314_s14 = inlined_call_operand.vmem [shape: f32[1,16], index: 14, kind: input, shape index: {}]   ;;  %s8315_s15 = inlined_call_operand.vmem [shape: bf16[144,16], index: 15, kind: input, shape index: {}]   ;;  %s8316_s16 = inlined_call_operand.hbm [shape: f32[2,8,8,16], index: 16, kind: output, shape index: {}]  }
   0x1   :  { %8323 = sst [smem:[#allocation11_spill]] %s8300_s0 }
   0x2   :  { %8324 = sst [smem:[#allocation12_spill]] %s8301_s1 }
   0x3   :  { %8325 = sst [smem:[#allocation13_spill]] %s8302_s2 }
   0x4   :  { %21 = vsyncpa [#allocation4], 0 }
   0x5   :  { %23 = vsyncpa [#allocation4 + $0x1], 0  ;;  %s6399_s21 = smov 0   ;;  %s6401_s22 = smov 0  }
   0x6   :  { %s6403_s23 = smov 0   ;;  %s6405_s24 = smov 0  }
   0x7 LB: > { %8326 = sst [smem:[#allocation6_spill]] %s6286_s21  ;;  %s6420_s25 = sadd.s32 4294967295, %s6298_s24   ;;  %s6298_s24 = sphi %s6405_s24, %s8355_s24   ;;  %s6294_s23 = sphi %s6403_s23, %s8357_s23   ;;  %s6290_s22 = sphi %s6401_s22, %s8359_s22   ;;  %s6286_s21 = sphi %s6399_s21, %s8358_s21  }
   0x8   : > { %8327 = sst [smem:[#allocation7_spill]] %s6294_s23  ;;  %s5890_s26 = sadd.s32 4294967294, %s6298_s24  }
   0x9   : > { %s6424_s27 = sadd.s32 1, %s6298_s24   ;;  %s377_s28 = sadd.s32 1, %s6294_s23 }
   0xa   : > { %8328 = sst [smem:[#allocation8_spill]] %s6424_s27  ;;  %s374_s29 = ssub.s32 %s6298_s24, %s6424_s27 }
   0xb   : > { %p387_p0 = scmp.ne.s32.totalorder %s6294_s23, %s6290_s22  ;;  %p375_p1 = scmp.eq.s32.totalorder %s374_s29, 0 }
   0xc   : > { %p388_p2 = scmp.eq.s32.totalorder %s6420_s25, 1  ;;  %p393_p3 = scmp.ne.s32.totalorder %s6290_s22, %s6286_s21 }
   0xd   : > { %p394_p4 = scmp.eq.s32.totalorder %s5890_s26, 1  ;;  %p5893_p7 = scmp.ge.s32.totalorder %s6298_s24, 1 }
   0xe   : > { %s6435_s30 = scalar_select %p375_p1, %s6294_s23, %s377_s28  }
   0xf   : > { %p6437_p5 = por %p388_p2, %p387_p0  ;;  %p6441_p6 = por %p394_p4, %p393_p3 }
  0x10   : > { %8329 = sst [smem:[#allocation9_spill]] %s6435_s30  ;;  %p467_p8 = scmp.lt.s32.totalorder %s6298_s24, 3 }
  0x11   : > { %s8331_s17 = scalar_select %p6441_p6, 1, 0 }
  0x12   : > { %p468_p9 = pnand %p5893_p7, %p467_p8 }
  0x13   : > { %8332 = sst [smem:[#allocation10_spill]] %s8331_s17  ;;  %s5895_s18 = sshll.u32 (!%p468_p9), %s6420_s25, 2 }
  0x14   : > { %471 = sbr.rel (%p468_p9) target bundleno = 1760 (0x6e0), region = 84  ;;  %p519_p10 = scmp.lt.s32.totalorder (!%p468_p9), %s5895_s18, 7 }
  0x15   : > { %s8322_s19 = smov (!%p468_p9), 8   ;;  %s8333_s1 = sld [smem:[#allocation12_spill]] (!%p468_p9) }
  0x16   : > { %s8334_s23 = sld [smem:[#allocation11_spill]] (!%p468_p9)  ;;  %s6302_s21 = smov (!%p468_p9), 16  }
  0x17   : > { %s8335_s2 = sld [smem:[#allocation13_spill]] (!%p468_p9)  ;;  %s6304_s30 = smov (!%p468_p9), 24  }
  0x18   : > { %s6305_s17 = smov (!%p468_p9), 48   ;;  %s6308_s26 = smov (!%p468_p9), 64  }
  0x19   : > { %v606_v0 = vlaneseq  ;;  %v6300_v1 = vmov 0.0|0.0   ;;  %s8361_s18 = smov (!%p519_p10, %s5895_s18), 7  ;;  %vm1479_vm9 = vcmask 1043456   ;;  %vm1266_vm10 = vcmask 64512  }
  0x1a   : > { %v875_v2 = vunpack.c.l.b16 %v6300_v1  ;;  %s6157_s20 = smul.u32 144, %s8361_s18  ;;  %s6306_s18 = smov 40   ;;  %vm1291_vm11 = vcmask 130048   ;;  %vm1308_vm12 = vcmask 195584   ;;  %vm1325_vm13 = vcmask 261120  }
  0x1b   : > { %v607_v3 = vshrl.u32 %v606_v0, 7  ;;  %v6452_v9 = vld [vmem:[%s8333_s1] ss:$0 sm:$0xff]  ;;  %vm1342_vm14 = vcmask 326656   ;;  %vm1359_vm15 = vcmask 392192  }
  0x1c   : > { %v883_v4 = vpack.c.b16 %v875_v2, %v875_v2  ;;  %s6457_s27 = scalar_lea.vmem %s8334_s23, %s6157_s20  ;;  %s6303_s23 = smov 32  }
  0x1d   : > { %v609_v5 = vmul.u32 2, %v607_v3  ;;  %v608_v6 = vadd.s32 8, %v607_v3  ;;  %v6462_v13 = vld [vmem:[%s8335_s2] ss:$0 sm:$0xff]  ;;  %v5922_v19 = vld [vmem:[%s6457_s27 + $0x1b0] sm:$0xff]  ;;  %s6307_s20 = smov 56  }
  0x1e   : > { %891 = vrot.lane.b32.xlu0 %v883_v4, %s8322_s19  ;;  %v948_v7 = vshrl.u32 %v883_v4, 16  ;;  %v950_v8 = vshll.u32 %v883_v4, 16  ;;  %v5923_v15 = vld [vmem:[%s6457_s27 + $0x1c0] sm:$0xff]  ;;  %v530_v20 = vld [vmem:[%s6457_s27 + $0x10] sm:$0xff]  ;;  %v827_v21 = vmul.f32 %v6452_v9, %v5922_v19  ;;  %v5907_v25 = vld [vmem:[%s6457_s27 + $0x128] sm:$0x1] }
  0x1f   : > { %v696_v10 = vadd.s32 1, %v609_v5  ;;  %v610_v12 = vmul.u32 2, %v608_v6  ;;  %v5898_v16 = vld [vmem:[%s6457_s27 + $0xa0] sm:$0xff]  ;;  %vm611_vm0 = vcmp.ge.s32.totalorder %v609_v5, 1  ;;  %v828_v17 = vmul.f32 %v6452_v9, %v5923_v15  ;;  %v5908_v26 = vld [vmem:[%s6457_s27 + $0x130] sm:$0xff] }
  0x20   : > { %v952_v11 = vrot.slane %v950_v8, 1  ;;  %v670_v18 = vmul.f32 %v6452_v9, %v5898_v16  ;;  %v551_v22 = vmul.f32 %v6452_v9, %v530_v20  ;;  %vm617_vm3 = vcmp.le.s32.totalorder %v609_v5, 16  ;;  %v5906_v24 = vld [vmem:[%s6457_s27 + $0x120] sm:$0xff]  ;;  %v5909_v31 = vld [vmem:[%s6457_s27 + $0x138] sm:$0x1]  ;;  %v5899_v4 = vld [vmem:[%s6457_s27 + $0xb0] sm:$0xff] }
  0x21   : > { %vm697_vm1 = vcmp.ge.s32.totalorder %v696_v10, 1  ;;  %vm700_vm2 = vcmp.le.s32.totalorder %v696_v10, 16  ;;  %vm6473_vm4 = vcmp.ge.s32.totalorder %v610_v12, 1  ;;  %v836_v27 = vadd.f32 %v6462_v13, %v828_v17  ;;  %vm6497_vm6 = vmand %vm611_vm0, %vm617_vm3  ;;  %v531_v3 = vld [vmem:[%s6457_s27 + $0x18] sm:$0x1]  ;;  %v532_v5 = vld [vmem:[%s6457_s27 + $0x20] sm:$0xff] }
  0x22   : > { %v953_v14 = vor.u32 %v952_v11, %v948_v7  ;;  %v679_v28 = vadd.f32 %v6462_v13, %v670_v18  ;;  %v738_v29 = vmul.f32 %v6452_v9, %v5906_v24  ;;  %v739_v30 = vmul.f32 %v6452_v9, %v5907_v25  ;;  %vm6487_vm5 = vmand %vm697_vm1, %vm700_vm2  ;;  %v533_v10 = vld [vmem:[%s6457_s27 + $0x28] sm:$0x1]  ;;  %v534_v20 = vld [vmem:[%s6457_s27 + $0x30] sm:$0xff] }
  0x23   : > { %v835_v33 = vadd.f32 %v6462_v13, %v827_v21  ;;  %v572_v34 = vadd.f32 %v6462_v13, %v551_v22  ;;  %v740_v35 = vmul.f32 %v6452_v9, %v5908_v26  ;;  %v741_v36 = vmul.f32 %v6452_v9, %v5909_v31 }
  0x24   : > { %1003 = vrot.lane.b32.xlu1 %v953_v14, %s6302_s21  ;;  %v844_v37 = vmax.f32 %v836_v27, 0.0  ;;  %v688_v38 = vmax.f32 %v679_v28, 0.0  ;;  %v754_v40 = vadd.f32 %v6462_v13, %v738_v29  ;;  %v755_v41 = vadd.f32 %v6462_v13, %v739_v30  ;;  %v535_v28 = vld [vmem:[%s6457_s27 + $0x38] sm:$0x1] }
  0x25   : > { %v843_v42 = vmax.f32 %v835_v33, 0.0  ;;  %v590_v43 = vmax.f32 %v572_v34, 0.0  ;;  %vm6503_vm7 = vcmp.le.s32.totalorder %v610_v12, 16  ;;  %v756_v45 = vadd.f32 %v6462_v13, %v740_v35 }
  0x26   : > { %v852_v46 = vsel %vm6487_vm5, %v844_v37, 0.0  ;;  %v704_v47 = vsel %vm6487_vm5, %v688_v38, 0.0  ;;  %v770_v48 = vmax.f32 %v754_v40, 0.0  ;;  %v757_v49 = vadd.f32 %v6462_v13, %v741_v36  ;;  %vm6525_vm8 = vmand %vm6473_vm4, %vm6503_vm7 }
  0x27   : > { %v860_v50 = vpack.c.bf16 %v852_v46, %v852_v46  ;;  %v713_v51 = vpack.c.bf16 %v704_v47, %v704_v47  ;;  %v851_v52 = vsel %vm6487_vm5, %v843_v42, 0.0  ;;  %v625_v53 = vsel %vm6497_vm6, %v590_v43, 0.0 }
  0x28   : > { %v859_v54 = vpack.c.bf16 %v851_v52, %v851_v52  ;;  %v771_v55 = vmax.f32 %v755_v41, 0.0  ;;  %v786_v56 = vsel %vm6497_vm6, %v770_v48, 0.0  ;;  %v6519_v59 = vpack.c.bf16 %v625_v53, %v625_v53 }
  0x29   : > { %v1068_v57 = vunpack.c.l.b16 %v860_v50  ;;  %v876_v58 = vunpack.c.l.b16 %v713_v51  ;;  %v802_v61 = vpack.c.bf16 %v786_v56, %v786_v56  ;;  %v772_v62 = vmax.f32 %v756_v45, 0.0 }
  0x2a   : > { %v773_v63 = vmax.f32 %v757_v49, 0.0  ;;  %v787_v6 = vsel %vm6525_vm8, %v771_v55, 0.0  ;;  %v1067_v11 = vunpack.c.l.b16 %v859_v54  ;;  %v925_v12 = vunpack.c.l.b16 %v6519_v59 }
  0x2b   : > { %v1076_v0 = vpack.c.b16 %v1068_v57, %v1068_v57  ;;  %v6529_v1 = vpack.c.b16 %v876_v58, %v876_v58  ;;  %v1027_v2 = vunpack.c.l.b16 %v802_v61  ;;  %v788_v7 = vsel %vm6497_vm6, %v772_v62, 0.0 }
  0x2c   : > { %v789_v8 = vsel %vm6525_vm8, %v773_v63, 0.0  ;;  %v804_v15 = vpack.c.bf16 %v788_v7, %v788_v7  ;;  %v552_v17 = vmul.f32 %v6452_v9, %v531_v3  ;;  %v671_v18 = vmul.f32 %v6452_v9, %v5899_v4  ;;  %v5910_v7 = vld [vmem:[%s6457_s27 + $0x140] sm:$0xff] }
  0x2d   : > { %1085 = vrot.lane.b32.xlu1 %v1076_v0, %s6303_s23  ;;  %893 = vrot.lane.b32.xlu0 %v6529_v1, %s8322_s19  ;;  %v1035_v14 = vpack.c.b16 %v1027_v2, %v1027_v2  ;;  %v805_v16 = vpack.c.bf16 %v789_v8, %v789_v8  ;;  %v553_v19 = vmul.f32 %v6452_v9, %v532_v5  ;;  %vm1376_vm0 = vcmask 457728  }
  0x2e   : > { %v803_v21 = vpack.c.bf16 %v787_v6, %v787_v6  ;;  %v1028_v22 = vunpack.c.l.b16 %v804_v15  ;;  %v554_v23 = vmul.f32 %v6452_v9, %v533_v10  ;;  %v573_v25 = vadd.f32 %v6462_v13, %v552_v17  ;;  %v5912_v10 = vld [vmem:[%s6457_s27 + $0x150] sm:$0xff] }
  0x2f   : > { %1043 = vrot.lane.b32.xlu2 %v1035_v14, %s6304_s30  ;;  %v1108_v24 = vunpack.c.l.b16 %v805_v16  ;;  %v680_v26 = vadd.f32 %v6462_v13, %v671_v18  ;;  %v574_v27 = vadd.f32 %v6462_v13, %v553_v19  ;;  %v1075_v29 = vpack.c.b16 %v1067_v11, %v1067_v11 }
  0x30   : > { %v1197_v30 = vpack.c.b16 %v925_v12, %v925_v12  ;;  %v575_v31 = vadd.f32 %v6462_v13, %v554_v23  ;;  %v555_v33 = vmul.f32 %v6452_v9, %v534_v20  ;;  %v591_v35 = vmax.f32 %v573_v25, 0.0  ;;  %v5900_v23 = vld [vmem:[%s6457_s27 + $0xc0] sm:$0xff] }
  0x31   : > { %v1116_v34 = vpack.c.b16 %v1108_v24, %v1028_v22  ;;  %v592_v36 = vmax.f32 %v574_v27, 0.0  ;;  %v1107_v37 = vunpack.c.l.b16 %v803_v21  ;;  %v1036_v38 = vpack.c.b16 %v1028_v22, %v1028_v22  ;;  %v5913_v22 = vld [vmem:[%s6457_s27 + $0x158] sm:$0x1] }
  0x32   : > { %v593_v40 = vmax.f32 %v575_v31, 0.0  ;;  %v556_v41 = vmul.f32 %v6452_v9, %v535_v28  ;;  %v626_v43 = vsel %vm6525_vm8, %v591_v35, 0.0  ;;  %v689_v44 = vmax.f32 %v680_v26, 0.0  ;;  %v5924_v28 = vld [vmem:[%s6457_s27 + $0x1d0] sm:$0xff] }
  0x33   : > { %v1133_v42 = vshll.u32 %v1116_v34, 16  ;;  %v576_v45 = vadd.f32 %v6462_v13, %v555_v33  ;;  %v1131_v46 = vshrl.u32 %v1116_v34, 16  ;;  %v644_v47 = vpack.c.bf16 %v626_v43, %v626_v43 }
  0x34   : > { %v627_v48 = vsel %vm6497_vm6, %v592_v36, 0.0  ;;  %v628_v49 = vsel %vm6525_vm8, %v593_v40, 0.0  ;;  %v577_v53 = vadd.f32 %v6462_v13, %v556_v41  ;;  %v1115_v54 = vpack.c.b16 %v1107_v37, %v1027_v2  ;;  %v5911_v2 = vld [vmem:[%s6457_s27 + $0x148] sm:$0x1] }
  0x35   : > { %1083 = vrot.lane.b32.xlu0 %v1075_v29, %s6303_s23  ;;  %1205 = vrot.lane.b32.xlu1 %v1197_v30, %s6305_s17  ;;  %v1135_v50 = vrot.slane %v1133_v42, 1  ;;  %v6567_v51 = vpack.c.bf16 %v627_v48, %v627_v48  ;;  %v646_v52 = vpack.c.bf16 %v628_v49, %v628_v49  ;;  %v926_v55 = vunpack.c.l.b16 %v644_v47 }
  0x36   : > { %v705_v56 = vsel %vm6487_vm5, %v689_v44, 0.0  ;;  %v594_v58 = vmax.f32 %v576_v45, 0.0  ;;  %v595_v0 = vmax.f32 %v577_v53, 0.0  ;;  %v1126_v6 = vshll.u32 %v1115_v54, 16 }
  0x37   : > { %1045 = vrot.lane.b32.xlu2 %v1036_v38, %s6304_s30  ;;  %v927_v57 = vunpack.c.l.b16 %v6567_v51  ;;  %v1136_v61 = vor.u32 %v1135_v50, %v1131_v46  ;;  %v940_v62 = vpack.c.b16 %v926_v55, %v925_v12  ;;  %v928_v63 = vunpack.c.l.b16 %v646_v52 }
  0x38   : > { %v714_v8 = vpack.c.bf16 %v705_v56, %v705_v56  ;;  %v629_v12 = vsel %vm6497_vm6, %v594_v58, 0.0  ;;  %v630_v15 = vsel %vm6525_vm8, %v595_v0, 0.0  ;;  %v742_v16 = vmul.f32 %v6452_v9, %v5910_v7 }
  0x39   : > { %v955_v3 = vshrl.u32 %v940_v62, 16  ;;  %v957_v4 = vshll.u32 %v940_v62, 16  ;;  %v1198_v5 = vpack.c.b16 %v927_v57, %v927_v57  ;;  %v941_v14 = vpack.c.b16 %v928_v63, %v927_v57  ;;  %v5925_v62 = vld [vmem:[%s6457_s27 + $0x1e0] sm:$0xff] }
  0x3a   : > { %v743_v17 = vmul.f32 %v6452_v9, %v5911_v2  ;;  %v1124_v19 = vshrl.u32 %v1115_v54, 16  ;;  %v1128_v20 = vrot.slane %v1126_v6, 1  ;;  %v744_v21 = vmul.f32 %v6452_v9, %v5912_v10  ;;  %v536_v2 = vld [vmem:[%s6457_s27 + $0x40] sm:$0xff] }
  0x3b   : > { %v959_v11 = vrot.slane %v957_v4, 1  ;;  %v6588_v24 = vpack.c.bf16 %v629_v12, %v629_v12  ;;  %v648_v25 = vpack.c.bf16 %v630_v15, %v630_v15  ;;  %v877_v26 = vunpack.c.l.b16 %v714_v8 }
  0x3c   : > { %v964_v27 = vshll.u32 %v941_v14, 16  ;;  %v758_v29 = vadd.f32 %v6462_v13, %v742_v16  ;;  %v759_v30 = vadd.f32 %v6462_v13, %v743_v17  ;;  %v745_v31 = vmul.f32 %v6452_v9, %v5913_v22 }
  0x3d   : > { %1181 = vrot.lane.b32.xlu0 %v1136_v61, %s6306_s18  ;;  %v960_v18 = vor.u32 %v959_v11, %v955_v3  ;;  %v672_v33 = vmul.f32 %v6452_v9, %v5900_v23  ;;  %v1129_v34 = vor.u32 %v1128_v20, %v1124_v19  ;;  %v760_v35 = vadd.f32 %v6462_v13, %v744_v21 }
  0x3e   : > { %v6598_v36 = vunpack.c.l.b16 %v6588_v24  ;;  %v930_v37 = vunpack.c.l.b16 %v648_v25  ;;  %v829_v38 = vmul.f32 %v6452_v9, %v5924_v28  ;;  %v885_v41 = vpack.c.b16 %v877_v26, %v877_v26 }
  0x3f   : > { %1207 = vrot.lane.b32.xlu2 %v1198_v5, %s6305_s17  ;;  %1005 = vrot.lane.b32.xlu1 %v960_v18, %s6302_s21  ;;  %v681_v40 = vadd.f32 %v6462_v13, %v672_v33  ;;  %v962_v42 = vshrl.u32 %v941_v14, 16  ;;  %v966_v43 = vrot.slane %v964_v27, 1  ;;  %v774_v44 = vmax.f32 %v758_v29, 0.0  ;;  %v537_v5 = vld [vmem:[%s6457_s27 + $0x48] sm:$0x1] }
  0x40   : > { %v775_v45 = vmax.f32 %v759_v30, 0.0  ;;  %v761_v46 = vadd.f32 %v6462_v13, %v745_v31  ;;  %v942_v48 = vpack.c.b16 %v930_v37, %v6598_v36  ;;  %v776_v49 = vmax.f32 %v760_v35, 0.0 }
  0x41   : > { %v690_v47 = vmax.f32 %v681_v40, 0.0  ;;  %v837_v50 = vadd.f32 %v6462_v13, %v829_v38  ;;  %v790_v53 = vsel %vm6497_vm6, %v774_v44, 0.0  ;;  %v830_v3 = vmul.f32 %v6452_v9, %v5925_v62 }
  0x42   : > { %v791_v54 = vsel %vm6525_vm8, %v775_v45, 0.0  ;;  %v777_v55 = vmax.f32 %v761_v46, 0.0  ;;  %v971_v57 = vshll.u32 %v942_v48, 16  ;;  %v792_v58 = vsel %vm6497_vm6, %v776_v49, 0.0 }
  0x43   : > { %v706_v52 = vsel %vm6487_vm5, %v690_v47, 0.0  ;;  %v845_v61 = vmax.f32 %v837_v50, 0.0  ;;  %v806_v63 = vpack.c.bf16 %v790_v53, %v790_v53  ;;  %v807_v0 = vpack.c.bf16 %v791_v54, %v791_v54  ;;  %v5902_v50 = vld [vmem:[%s6457_s27 + $0xe0] sm:$0xff] }
  0x44   : > { %v715_v56 = vpack.c.bf16 %v706_v52, %v706_v52  ;;  %v793_v4 = vsel %vm6525_vm8, %v777_v55, 0.0  ;;  %v808_v6 = vpack.c.bf16 %v792_v58, %v792_v58  ;;  %v969_v8 = vshrl.u32 %v942_v48, 16 }
  0x45   : > { %1224 = vrot.lane.b32.xlu0 %v6529_v1, %s6307_s20  ;;  %v967_v1 = vor.u32 %v966_v43, %v962_v42  ;;  %v973_v10 = vrot.slane %v971_v57, 1  ;;  %v853_v11 = vsel %vm6487_vm5, %v845_v61, 0.0  ;;  %v838_v14 = vadd.f32 %v6462_v13, %v830_v3  ;;  %v5901_v43 = vld [vmem:[%s6457_s27 + $0xd0] sm:$0xff] }
  0x46   : > { %v878_v7 = vunpack.c.l.b16 %v715_v56  ;;  %v1029_v12 = vunpack.c.l.b16 %v806_v63  ;;  %v1109_v15 = vunpack.c.l.b16 %v807_v0  ;;  %v809_v16 = vpack.c.bf16 %v793_v4, %v793_v4  ;;  %v5915_v4 = vld [vmem:[%s6457_s27 + $0x168] sm:$0x1] }
  0x47   : > { %1179 = vrot.lane.b32.xlu2 %v1129_v34, %s6306_s18  ;;  %1226 = vrot.lane.b32.xlu1 %v885_v41, %s6307_s20  ;;  %v558_v17 = vmul.f32 %v6452_v9, %v537_v5  ;;  %v557_v19 = vmul.f32 %v6452_v9, %v536_v2  ;;  %v861_v21 = vpack.c.bf16 %v853_v11, %v853_v11  ;;  %v846_v22 = vmax.f32 %v838_v14, 0.0  ;;  %v538_v5 = vld [vmem:[%s6457_s27 + $0x50] sm:$0xff] }
  0x48   : > { %v6631_v20 = vpack.c.b16 %v878_v7, %v878_v7  ;;  %v6634_v23 = vor.u32 %v973_v10, %v969_v8  ;;  %v1117_v25 = vpack.c.b16 %v1109_v15, %v1029_v12  ;;  %v1110_v26 = vunpack.c.l.b16 %v809_v16  ;;  %v5914_v7 = vld [vmem:[%s6457_s27 + $0x160] sm:$0xff] }
  0x49   : > { %v579_v27 = vadd.f32 %v6462_v13, %v558_v17  ;;  %v578_v28 = vadd.f32 %v6462_v13, %v557_v19  ;;  %v1069_v29 = vunpack.c.l.b16 %v861_v21  ;;  %v854_v30 = vsel %vm6487_vm5, %v846_v22, 0.0  ;;  %v5916_v21 = vld [vmem:[%s6457_s27 + $0x170] sm:$0xff] }
  0x4a   : > { %v1140_v33 = vshll.u32 %v1117_v25, 16  ;;  %v1037_v38 = vpack.c.b16 %v1029_v12, %v1029_v12  ;;  %v862_v40 = vpack.c.bf16 %v854_v30, %v854_v30  ;;  %v1138_v42 = vshrl.u32 %v1117_v25, 16 }
  0x4b   : > { %v597_v35 = vmax.f32 %v579_v27, 0.0  ;;  %v596_v37 = vmax.f32 %v578_v28, 0.0  ;;  %v673_v47 = vmul.f32 %v6452_v9, %v5901_v43  ;;  %v674_v57 = vmul.f32 %v6452_v9, %v5902_v50 }
  0x4c   : > { %v1142_v44 = vrot.slane %v1140_v33, 1  ;;  %v1070_v49 = vunpack.c.l.b16 %v862_v40  ;;  %v559_v2 = vmul.f32 %v6452_v9, %v538_v5  ;;  %v747_v12 = vmul.f32 %v6452_v9, %v5915_v4 }
  0x4d   : > { %1252 = vrot.lane.b32.xlu0 %v967_v1, %s6308_s26  ;;  %v632_v46 = vsel %vm6525_vm8, %v597_v35, 0.0  ;;  %v631_v48 = vsel %vm6497_vm6, %v596_v37, 0.0  ;;  %v683_v3 = vadd.f32 %v6462_v13, %v674_v57  ;;  %v746_v17 = vmul.f32 %v6452_v9, %v5914_v7 }
  0x4e   : > { %v650_v52 = vpack.c.bf16 %v632_v46, %v632_v46  ;;  %v1143_v53 = vor.u32 %v1142_v44, %v1138_v42  ;;  %v6655_v56 = vpack.c.bf16 %v631_v48, %v631_v48  ;;  %v1078_v58 = vpack.c.b16 %v1070_v49, %v1070_v49 }
  0x4f   : > { %1250 = vrot.lane.b32.xlu2 %v960_v18, %s6308_s26  ;;  %895 = vrot.lane.b32.xlu1 %v885_v41, %s8322_s19  ;;  %v1030_v18 = vunpack.c.l.b16 %v808_v6  ;;  %v1077_v41 = vpack.c.b16 %v1069_v29, %v1069_v29  ;;  %v539_v6 = vld [vmem:[%s6457_s27 + $0x58] sm:$0x1]  ;;  %v580_v15 = vadd.f32 %v6462_v13, %v559_v2  ;;  %v692_v16 = vmax.f32 %v683_v3, 0.0 }
  0x50   : > { %v932_v61 = vunpack.c.l.b16 %v650_v52  ;;  %v931_v0 = vunpack.c.l.b16 %v6655_v56  ;;  %v560_v11 = vmul.f32 %v6452_v9, %v539_v6  ;;  %v763_v28 = vadd.f32 %v6462_v13, %v747_v12  ;;  %v5926_v52 = vld [vmem:[%s6457_s27 + $0x1f0] sm:$0xff]  ;;  %v540_v6 = vld [vmem:[%s6457_s27 + $0x60] sm:$0xff] }
  0x51   : > { %v1038_v31 = vpack.c.b16 %v1030_v18, %v1030_v18  ;;  %v1118_v34 = vpack.c.b16 %v1110_v26, %v1030_v18  ;;  %v1199_v18 = vpack.c.b16 %v6598_v36, %v6598_v36  ;;  %v598_v25 = vmax.f32 %v580_v15, 0.0  ;;  %v5927_v36 = vld [vmem:[%s6457_s27 + $0x200] sm:$0xff] }
  0x52   : > { %v943_v8 = vpack.c.b16 %v932_v61, %v931_v0  ;;  %v1200_v14 = vpack.c.b16 %v931_v0, %v931_v0  ;;  %v581_v19 = vadd.f32 %v6462_v13, %v560_v11  ;;  %v708_v30 = vsel %vm6487_vm5, %v692_v16, 0.0 }
  0x53   : > { %v1147_v45 = vshll.u32 %v1118_v34, 16  ;;  %v1145_v54 = vshrl.u32 %v1118_v34, 16  ;;  %v633_v29 = vsel %vm6497_vm6, %v598_v25, 0.0  ;;  %v748_v33 = vmul.f32 %v6452_v9, %v5916_v21 }
  0x54   : > { %v978_v26 = vshll.u32 %v943_v8, 16  ;;  %v599_v27 = vmax.f32 %v581_v19, 0.0  ;;  %v6690_v37 = vpack.c.bf16 %v633_v29, %v633_v29  ;;  %v976_v40 = vshrl.u32 %v943_v8, 16 }
  0x55   : > { %1007 = vrot.lane.b32.xlu0 %v967_v1, %s6302_s21  ;;  %v682_v1 = vadd.f32 %v6462_v13, %v673_v47  ;;  %v1149_v55 = vrot.slane %v1147_v45, 1  ;;  %v717_v42 = vpack.c.bf16 %v708_v30, %v708_v30  ;;  %v832_v43 = vmul.f32 %v6452_v9, %v5927_v36  ;;  %v543_v36 = vld [vmem:[%s6457_s27 + $0x78] sm:$0x1] }
  0x56   : > { %v634_v34 = vsel %vm6525_vm8, %v599_v27, 0.0  ;;  %v779_v44 = vmax.f32 %v763_v28, 0.0  ;;  %v764_v46 = vadd.f32 %v6462_v13, %v748_v33  ;;  %v6697_v48 = vunpack.c.l.b16 %v6690_v37  ;;  %v542_v33 = vld [vmem:[%s6457_s27 + $0x70] sm:$0xff] }
  0x57   : > { %897 = vrot.lane.b32.xlu2 %v6631_v20, %s8322_s19  ;;  %1009 = vrot.lane.b32.xlu1 %v6634_v23, %s6302_s21  ;;  %v691_v62 = vmax.f32 %v682_v1, 0.0  ;;  %v1150_v63 = vor.u32 %v1149_v55, %v1145_v54  ;;  %v880_v1 = vunpack.c.l.b16 %v717_v42  ;;  %v831_v54 = vmul.f32 %v6452_v9, %v5926_v52 }
  0x58   : > { %v780_v57 = vmax.f32 %v764_v46, 0.0  ;;  %v561_v16 = vmul.f32 %v6452_v9, %v540_v6  ;;  %v564_v46 = vmul.f32 %v6452_v9, %v543_v36  ;;  %vm1393_vm1 = vcmask 523264  }
  0x59   : > { %v707_v10 = vsel %vm6487_vm5, %v691_v62, 0.0  ;;  %v6714_v0 = vpack.c.b16 %v880_v1, %v880_v1  ;;  %vm1466_vm2 = vcmask 588800   ;;  %vm1512_vm3 = vcmask 125952  }
  0x5a   : > { %v716_v22 = vpack.c.bf16 %v707_v10, %v707_v10  ;;  %v796_v5 = vsel %vm6497_vm6, %v780_v57, 0.0  ;;  %vm1514_vm4 = vcmask 122880  }
  0x5b   : > { %v812_v12 = vpack.c.bf16 %v796_v5, %v796_v5 }
  0x5c   : > { %v879_v35 = vunpack.c.l.b16 %v716_v22 }
  0x5d   : > { %1049 = vrot.lane.b32.xlu0 %v1038_v31, %s6304_s30  ;;  %v762_v31 = vadd.f32 %v6462_v13, %v746_v17  ;;  %v5903_v17 = vld [vmem:[%s6457_s27 + $0xf0] sm:$0xff]  ;;  %v1032_v30 = vunpack.c.l.b16 %v812_v12 }
  0x5e   : > { %v887_v47 = vpack.c.b16 %v879_v35, %v879_v35  ;;  %v675_v27 = vmul.f32 %v6452_v9, %v5903_v17 }
  0x5f   : > { %1047 = vrot.lane.b32.xlu2 %v1037_v38, %s6304_s30  ;;  %1087 = vrot.lane.b32.xlu1 %v1077_v41, %s6303_s23  ;;  %v652_v38 = vpack.c.bf16 %v634_v34, %v634_v34  ;;  %v980_v41 = vrot.slane %v978_v26, 1  ;;  %v778_v45 = vmax.f32 %v762_v31, 0.0  ;;  %v582_v31 = vadd.f32 %v6462_v13, %v561_v16 }
  0x60   : > { %v684_v42 = vadd.f32 %v6462_v13, %v675_v27  ;;  %v1201_v16 = vpack.c.b16 %v6697_v48, %v6697_v48  ;;  %v5918_v27 = vld [vmem:[%s6457_s27 + $0x180] sm:$0xff] }
  0x61   : > { %v934_v49 = vunpack.c.l.b16 %v652_v38  ;;  %v981_v50 = vor.u32 %v980_v41, %v976_v40  ;;  %v794_v55 = vsel %vm6497_vm6, %v778_v45, 0.0  ;;  %v563_v45 = vmul.f32 %v6452_v9, %v542_v33  ;;  %v5921_v33 = vld [vmem:[%s6457_s27 + $0x198] sm:$0x1] }
  0x62   : > { %v810_v3 = vpack.c.bf16 %v794_v55, %v794_v55 }
  0x63   : > { %v944_v61 = vpack.c.b16 %v934_v49, %v6697_v48 }
  0x65   : > { %1183 = vrot.lane.b32.xlu0 %v1143_v53, %s6306_s18  ;;  %v795_v53 = vsel %vm6525_vm8, %v779_v44, 0.0  ;;  %v985_v2 = vshll.u32 %v944_v61, 16  ;;  %v600_v44 = vmax.f32 %v582_v31, 0.0  ;;  %v5920_v31 = vld [vmem:[%s6457_s27 + $0x190] sm:$0xff] }
  0x66   : > { %v811_v62 = vpack.c.bf16 %v795_v53, %v795_v53 }
  0x67   : > { %1089 = vrot.lane.b32.xlu2 %v1078_v58, %s6303_s23  ;;  %1185 = vrot.lane.b32.xlu1 %v1150_v63, %s6306_s18  ;;  %v5917_v58 = vld [vmem:[%s6457_s27 + $0x178] sm:$0x1]  ;;  %v839_v63 = vadd.f32 %v6462_v13, %v831_v54  ;;  %v987_v21 = vrot.slane %v985_v2, 1  ;;  %v693_v54 = vmax.f32 %v684_v42, 0.0  ;;  %v635_v57 = vsel %vm6497_vm6, %v600_v44, 0.0 }
  0x68   : > { %v1111_v8 = vunpack.c.l.b16 %v811_v62  ;;  %v5904_v62 = vld [vmem:[%s6457_s27 + $0x100] sm:$0xff]  ;;  %v6755_v6 = vpack.c.bf16 %v635_v57, %v635_v57  ;;  %v750_v44 = vmul.f32 %v6452_v9, %v5918_v27 }
  0x69   : > { %v847_v10 = vmax.f32 %v839_v63, 0.0  ;;  %v676_v2 = vmul.f32 %v6452_v9, %v5904_v62 }
  0x6a   : > { %v935_v17 = vunpack.c.l.b16 %v6755_v6 }
  0x6b   : > { %v855_v28 = vsel %vm6487_vm5, %v847_v10, 0.0 }
  0x6c   : > { %v863_v35 = vpack.c.bf16 %v855_v28, %v855_v28  ;;  %v1202_v36 = vpack.c.b16 %v935_v17, %v935_v17 }
  0x6d   : > { %1211 = vrot.lane.b32.xlu0 %v1200_v14, %s6305_s17  ;;  %v1031_v14 = vunpack.c.l.b16 %v810_v3 }
  0x6e   : > { %v1071_v49 = vunpack.c.l.b16 %v863_v35 }
  0x6f   : > { %1209 = vrot.lane.b32.xlu2 %v1199_v18, %s6305_s17  ;;  %1228 = vrot.lane.b32.xlu1 %v6631_v20, %s6307_s20  ;;  %v840_v20 = vadd.f32 %v6462_v13, %v832_v43  ;;  %v983_v18 = vshrl.u32 %v944_v61, 16  ;;  %v1119_v26 = vpack.c.b16 %v1111_v8, %v1031_v14  ;;  %v1039_v29 = vpack.c.b16 %v1031_v14, %v1031_v14 }
  0x70   : > { %v1040_v43 = vpack.c.b16 %v1032_v30, %v1032_v30  ;;  %v585_v61 = vadd.f32 %v6462_v13, %v564_v46  ;;  %v1079_v63 = vpack.c.b16 %v1071_v49, %v1071_v49  ;;  %v752_v46 = vmul.f32 %v6452_v9, %v5920_v31  ;;  %v5928_v49 = vld [vmem:[%s6457_s27 + $0x210] sm:$0xff] }
  0x71   : > { %v848_v4 = vmax.f32 %v840_v20, 0.0  ;;  %v6736_v34 = vor.u32 %v987_v21, %v983_v18  ;;  %v1154_v41 = vshll.u32 %v1119_v26, 16  ;;  %v1152_v20 = vshrl.u32 %v1119_v26, 16  ;;  %v1418_v18 = vld [vmem:[%s8303_s3 + $0x20] sm:$0xf] }
  0x72   : > { %v603_v10 = vmax.f32 %v585_v61, 0.0  ;;  %v1456_v48 = vunpack.c.l.b16 %v1418_v18  ;;  %v833_v61 = vmul.f32 %v6452_v9, %v5928_v49  ;;  %v768_v62 = vadd.f32 %v6462_v13, %v752_v46  ;;  %v6115_v46 = vld [vmem:[%s8303_s3] sm:$0xff] }
  0x73   : > { %v856_v15 = vsel %vm6487_vm5, %v848_v4, 0.0  ;;  %v1156_v53 = vrot.slane %v1154_v41, 1 }
  0x74   : > { %v864_v25 = vpack.c.bf16 %v856_v15, %v856_v15  ;;  %v638_v26 = vsel %vm6525_vm8, %v603_v10, 0.0  ;;  %v841_v10 = vadd.f32 %v6462_v13, %v833_v61 }
  0x75   : > { %1254 = vrot.lane.b32.xlu0 %v6634_v23, %s6308_s26  ;;  %v749_v23 = vmul.f32 %v6452_v9, %v5917_v58  ;;  %v584_v58 = vadd.f32 %v6462_v13, %v563_v45  ;;  %v1157_v5 = vor.u32 %v1156_v53, %v1152_v20  ;;  %v6118_v20 = vld [vmem:[%s8303_s3 + $0x18] sm:$0xff] }
  0x76   : > { %v1072_v40 = vunpack.c.l.b16 %v864_v25 }
  0x77   : > { %1230 = vrot.lane.b32.xlu2 %v887_v47, %s6307_s20  ;;  %1256 = vrot.lane.b32.xlu1 %v981_v50, %s6308_s26  ;;  %v765_v7 = vadd.f32 %v6462_v13, %v749_v23  ;;  %v602_v8 = vmax.f32 %v584_v58, 0.0  ;;  %v766_v58 = vadd.f32 %v6462_v13, %v750_v44 }
  0x78   : > { %v1080_v1 = vpack.c.b16 %v1072_v40, %v1072_v40 }
  0x79   : > { %v781_v11 = vmax.f32 %v765_v7, 0.0  ;;  %v709_v7 = vsel %vm6487_vm5, %v693_v54, 0.0  ;;  %v637_v25 = vsel %vm6497_vm6, %v602_v8, 0.0 }
  0x7a   : > { %v6781_v35 = vpack.c.bf16 %v637_v25, %v637_v25 }
  0x7b   : > { %v797_v19 = vsel %vm6525_vm8, %v781_v11, 0.0 }
  0x7c   : > { %v813_v22 = vpack.c.bf16 %v797_v19, %v797_v19  ;;  %v718_v19 = vpack.c.bf16 %v709_v7, %v709_v7  ;;  %v6117_v7 = vld [vmem:[%s8303_s3 + $0x10] sm:$0xff] }
  0x7d   : > { %901 = vrot.lane.b32.xlu0 %v6714_v0, %s8322_s19 }
  0x7e   : > { %v1112_v38 = vunpack.c.l.b16 %v813_v22  ;;  %v685_v22 = vadd.f32 %v6462_v13, %v676_v2  ;;  %v881_v42 = vunpack.c.l.b16 %v718_v19  ;;  %v782_v2 = vmax.f32 %v766_v58, 0.0 }
  0x7f   : > { %899 = vrot.lane.b32.xlu2 %v887_v47, %s8322_s19  ;;  %1011 = vrot.lane.b32.xlu1 %v981_v50, %s6302_s21  ;;  %v541_v47 = vld [vmem:[%s6457_s27 + $0x68] sm:$0x1] }
  0x80   : > { %v1120_v50 = vpack.c.b16 %v1112_v38, %v1032_v30  ;;  %v562_v52 = vmul.f32 %v6452_v9, %v541_v47  ;;  %v656_v38 = vpack.c.bf16 %v638_v26, %v638_v26  ;;  %v753_v47 = vmul.f32 %v6452_v9, %v5921_v33  ;;  %v6116_v26 = vld [vmem:[%s8303_s3 + $0x8] sm:$0xff] }
  0x81   : > { %v889_v53 = vpack.c.b16 %v881_v42, %v881_v42 }
  0x82   : > { %v583_v23 = vadd.f32 %v6462_v13, %v562_v52  ;;  %v1161_v3 = vshll.u32 %v1120_v50, 16  ;;  %v1159_v14 = vshrl.u32 %v1120_v50, 16  ;;  %v6794_v52 = vunpack.c.l.b16 %v6781_v35 }
  0x84   : > { %v601_v4 = vmax.f32 %v583_v23, 0.0  ;;  %v1163_v12 = vrot.slane %v1161_v3, 1  ;;  %v5929_v23 = vld [vmem:[%s6457_s27 + $0x220] sm:$0xff] }
  0x85   : > { %1051 = vrot.lane.b32.xlu0 %v1039_v29, %s6304_s30  ;;  %v1461_v29 = vpack.c.b16 %v1456_v48, %v1456_v48  ;;  %v834_v8 = vmul.f32 %v6452_v9, %v5929_v23 }
  0x86   : > { %v636_v11 = vsel %vm6525_vm8, %v601_v4, 0.0  ;;  %v1164_v28 = vor.u32 %v1163_v12, %v1159_v14  ;;  %v5919_v12 = vld [vmem:[%s6457_s27 + $0x188] sm:$0x1] }
  0x87   : > { %1013 = vrot.lane.b32.xlu2 %v6736_v34, %s6302_s21  ;;  %1053 = vrot.lane.b32.xlu1 %v1040_v43, %s6304_s30  ;;  %v654_v15 = vpack.c.bf16 %v636_v11, %v636_v11  ;;  %v694_v43 = vmax.f32 %v685_v22, 0.0  ;;  %v1481_v45 = vsel %vm1479_vm9, %v1461_v29, 0  ;;  %v784_v11 = vmax.f32 %v768_v62, 0.0 }
  0x88   : > { %1486 = vmatpush.bf16.msra.mxu0 %v1481_v45  ;;  %v751_v18 = vmul.f32 %v6452_v9, %v5919_v12  ;;  %v842_v27 = vadd.f32 %v6462_v13, %v834_v8  ;;  %v849_v29 = vmax.f32 %v841_v10, 0.0  ;;  %v5905_v10 = vld [vmem:[%s6457_s27 + $0x110] sm:$0xff] }
  0x89   : > { %v6747_v55 = vpop.permute.xlu2 %1043  ;;  %v936_v30 = vunpack.c.l.b16 %v654_v15  ;;  %v710_v57 = vsel %vm6487_vm5, %v694_v43, 0.0 }
  0x8a   : > { %v719_v4 = vpack.c.bf16 %v710_v57, %v710_v57 }
  0x8b   : > { %v945_v50 = vpack.c.b16 %v936_v30, %v935_v17  ;;  %v800_v30 = vsel %vm6497_vm6, %v784_v11, 0.0 }
  0x8c   : > { %1487 = vmatpush.bf16.msra.mxu0 %v6118_v20  ;;  %v882_v22 = vunpack.c.l.b16 %v719_v4  ;;  %v816_v49 = vpack.c.bf16 %v800_v30, %v800_v30  ;;  %v857_v20 = vsel %vm6487_vm5, %v849_v29, 0.0 }
  0x8d   : > { %1093 = vrot.lane.b32.xlu0 %v1080_v1, %s6303_s23  ;;  %v938_v1 = vunpack.c.l.b16 %v656_v38  ;;  %v992_v3 = vshll.u32 %v945_v50, 16  ;;  %v990_v17 = vshrl.u32 %v945_v50, 16 }
  0x8e   : > { %v6841_v42 = vpack.c.b16 %v882_v22, %v882_v22  ;;  %v6221_v22 = vld [vmem:[%s8333_s1] ss:$0 sm:$0xff] }
  0x8f   : > { %1091 = vrot.lane.b32.xlu2 %v1079_v63, %s6303_s23  ;;  %1187 = vrot.lane.b32.xlu1 %v1157_v5, %s6306_s18  ;;  %v769_v63 = vadd.f32 %v6462_v13, %v753_v47  ;;  %v946_v5 = vpack.c.b16 %v938_v1, %v6794_v52  ;;  %v994_v19 = vrot.slane %v992_v3, 1  ;;  %v850_v47 = vmax.f32 %v842_v27, 0.0 }
  0x90   : > { %v6784_v40 = vpop.permute.xlu0 %891  ;;  %1488 = vmatpush.bf16.msra.mxu0 %v6117_v7  ;;  %v865_v3 = vpack.c.bf16 %v857_v20, %v857_v20 }
  0x91   : > { %v6771_v21 = vpop.permute.xlu2 %1045  ;;  %v785_v14 = vmax.f32 %v769_v63, 0.0  ;;  %v999_v25 = vshll.u32 %v946_v5, 16  ;;  %v995_v33 = vor.u32 %v994_v19, %v990_v17  ;;  %v997_v43 = vshrl.u32 %v946_v5, 16 }
  0x92   : > { %v858_v4 = vsel %vm6487_vm5, %v850_v47, 0.0  ;;  %v1269_v12 = vsel %vm1266_vm10, 0.0|0.0, %v6784_v40  ;;  %v1073_v19 = vunpack.c.l.b16 %v865_v3 }
  0x93   : > { %v801_v31 = vsel %vm6525_vm8, %v785_v14, 0.0  ;;  %v1001_v44 = vrot.slane %v999_v25, 1  ;;  %v866_v14 = vpack.c.bf16 %v858_v4, %v858_v4  ;;  %v677_v25 = vmul.f32 %v6221_v22, %v5905_v10 }
  0x94   : > { %1489 = vmatpush.bf16.msra.mxu0 %v6116_v26  ;;  %v817_v50 = vpack.c.bf16 %v801_v31, %v801_v31  ;;  %v1081_v29 = vpack.c.b16 %v1073_v19, %v1073_v19  ;;  %v1203_v10 = vpack.c.b16 %v6794_v52, %v6794_v52 }
  0x95   : > { %1213 = vrot.lane.b32.xlu0 %v1201_v16, %s6305_s17 }
  0x96   : > { %v6786_v41 = vpop.permute.xlu1 %1003  ;;  %v1114_v7 = vunpack.c.l.b16 %v817_v50 }
  0x97   : > { %1189 = vrot.lane.b32.xlu2 %v1164_v28, %s6306_s18  ;;  %1215 = vrot.lane.b32.xlu1 %v1202_v36, %s6305_s17  ;;  %v767_v28 = vadd.f32 %v6462_v13, %v751_v18  ;;  %v544_v36 = vld [vmem:[%s6457_s27 + $0x80] sm:$0xff]  ;;  %v1293_v40 = vsel %vm1291_vm11, %v1269_v12, %v6786_v41 }
  0x98   : > { %1490 = vmatpush.bf16.msra.mxu0 %v6115_v46  ;;  %v565_v57 = vmul.f32 %v6452_v9, %v544_v36  ;;  %v6222_v36 = vld [vmem:[%s8335_s2] ss:$0 sm:$0xff] }
  0x99   : > { %v6800_v54 = vpop.permute.xlu2 %1207  ;;  %v783_v38 = vmax.f32 %v767_v28, 0.0  ;;  %v1074_v28 = vunpack.c.l.b16 %v866_v14 }
  0x9b   : > { %v799_v1 = vsel %vm6525_vm8, %v783_v38, 0.0  ;;  %v1082_v50 = vpack.c.b16 %v1074_v28, %v1074_v28 }
  0x9c   : > { %v815_v23 = vpack.c.bf16 %v799_v1, %v799_v1 }
  0x9d   : > { %1234 = vrot.lane.b32.xlu0 %v889_v53, %s6307_s20 }
  0x9e   : > { %v1113_v11 = vunpack.c.l.b16 %v815_v23 }
  0x9f   : > { %v6817_v15 = vpop.permute.xlu1 %1085  ;;  %v6819_v16 = vpop.permute.xlu0 %893  ;;  %1232 = vrot.lane.b32.xlu2 %v6714_v0, %s6307_s20  ;;  %1258 = vrot.lane.b32.xlu1 %v6736_v34, %s6308_s26  ;;  %v798_v0 = vsel %vm6497_vm6, %v782_v2, 0.0  ;;  %v545_v34 = vld [vmem:[%s6457_s27 + $0x88] sm:$0x1]  ;;  %v586_v2 = vadd.f32 %v6462_v13, %v565_v57  ;;  %s6310_s27 = smov 80  }
  0xa0   : > { %v814_v45 = vpack.c.bf16 %v798_v0, %v798_v0  ;;  %v566_v58 = vmul.f32 %v6452_v9, %v545_v34  ;;  %v1034_v9 = vunpack.c.l.b16 %v816_v49  ;;  %v686_v34 = vadd.f32 %v6222_v36, %v677_v25 }
  0xa1   : > { %v6829_v48 = vpop.permute.xlu2 %1179  ;;  %v604_v26 = vmax.f32 %v586_v2, 0.0  ;;  %v1272_v38 = vsel %vm1266_vm10, %v6519_v59, %v6819_v16 }
  0xa2   : > { %v1033_v62 = vunpack.c.l.b16 %v814_v45  ;;  %v587_v8 = vadd.f32 %v6462_v13, %v566_v58  ;;  %v1122_v18 = vpack.c.b16 %v1114_v7, %v1034_v9  ;;  %v1042_v45 = vpack.c.b16 %v1034_v9, %v1034_v9 }
  0xa3   : > { %v695_v16 = vmax.f32 %v686_v34, 0.0 }
  0xa4   : > { %v1041_v17 = vpack.c.b16 %v1033_v62, %v1033_v62  ;;  %v605_v13 = vmax.f32 %v587_v8, 0.0  ;;  %v1121_v27 = vpack.c.b16 %v1113_v11, %v1033_v62  ;;  %v1175_v30 = vshll.u32 %v1122_v18, 16 }
  0xa5   : > { %903 = vrot.lane.b32.xlu0 %v889_v53, %s8322_s19  ;;  %v6854_v53 = vor.u32 %v1001_v44, %v997_v43  ;;  %v1310_v43 = vsel %vm1308_vm12, %v1293_v40, %v6747_v55  ;;  %v1173_v39 = vshrl.u32 %v1122_v18, 16 }
  0xa6   : > { %v640_v41 = vsel %vm6525_vm8, %v605_v13, 0.0  ;;  %v1168_v46 = vshll.u32 %v1121_v27, 16  ;;  %v1177_v1 = vrot.slane %v1175_v30, 1  ;;  %v1166_v58 = vshrl.u32 %v1121_v27, 16 }
  0xa7   : > { %v1084_v61 = vpop.permute.xlu0 %1083  ;;  %1260 = vrot.lane.b32.xlu2 %v995_v33, %s6308_s26  ;;  %905 = vrot.lane.b32.xlu1 %v6841_v42, %s8322_s19  ;;  %v6858_v63 = vpop.permute.xlu1 %1205  ;;  %v658_v59 = vpack.c.bf16 %v640_v41, %v640_v41 }
  0xa8   : > { %v1327_v47 = vsel %vm1325_vm13, %v1310_v43, %v1084_v61  ;;  %v1170_v61 = vrot.slane %v1168_v46, 1 }
  0xa9   : > { %v6862_v5 = vpop.permute.xlu2 %1250  ;;  %v1344_v55 = vsel %vm1342_vm14, %v1327_v47, %v6829_v48  ;;  %v1241_v4 = vunpack.c.l.b16 %v658_v59  ;;  %v711_v48 = vsel %vm6487_vm5, %v695_v16, 0.0  ;;  %vm1520_vm5 = vsmask.f32 256 }
  0xaa   : > { %v1361_v9 = vsel %vm1359_vm15, %v1344_v55, %v6858_v63  ;;  %v720_v11 = vpack.c.bf16 %v711_v48, %v711_v48  ;;  %vm6971_vm7 = vmand %vm1514_vm4, %vm1520_vm5 }
  0xac   : > { %v1222_v52 = vunpack.c.l.b16 %v720_v11 }
  0xad   : > { %1017 = vrot.lane.b32.xlu0 %v6854_v53, %s6302_s21 }
  0xaf   : > { %v1182_v0 = vpop.permute.xlu0 %1181  ;;  %1015 = vrot.lane.b32.xlu2 %v995_v33, %s6302_s21  ;;  %1055 = vrot.lane.b32.xlu1 %v1041_v17, %s6304_s30  ;;  %v639_v33 = vsel %vm6497_vm6, %v604_v26, 0.0  ;;  %vm1552_vm6 = vsmask.f32 7938 }
  0xb0   : > { %v657_v20 = vpack.c.bf16 %v639_v33, %v639_v33  ;;  %vm6977_vm8 = vmand %vm1514_vm4, %vm1552_vm6 }
  0xb1   : > { %v6878_v31 = vpop.permute.xlu2 %897  ;;  %v1006_v44 = vpop.permute.xlu1 %1005  ;;  %vm7036_vm9 = vmand %vm1512_vm3, %vm1552_vm6 }
  0xb2   : > { %v1295_v49 = vsel %vm1291_vm11, %v1272_v38, %v1006_v44  ;;  %v1196_v3 = vunpack.c.l.b16 %v657_v20  ;;  %v1278_v46 = vsel %vm1266_vm10, %v6588_v24, %v6878_v31 }
  0xb3   : > { %v1312_v60 = vsel %vm1308_vm12, %v1295_v49, %v6771_v21  ;;  %v1178_v21 = vor.u32 %v1177_v1, %v1173_v39 }
  0xb4   : > { %v1329_v23 = vsel %vm1325_vm13, %v1312_v60, %v6817_v15  ;;  %v1171_v15 = vor.u32 %v1170_v61, %v1166_v58  ;;  %v1242_v14 = vpack.c.b16 %v1241_v4, %v1196_v3 }
  0xb5   : > { %1095 = vrot.lane.b32.xlu0 %v1081_v29, %s6303_s23  ;;  %v1346_v2 = vsel %vm1342_vm14, %v1329_v23, %v1182_v0  ;;  %v1204_v0 = vpack.c.b16 %v1196_v3, %v1196_v3 }
  0xb6   : > { %v1363_v63 = vsel %vm1359_vm15, %v1346_v2, %v6800_v54  ;;  %v1246_v25 = vshll.u32 %v1242_v14, 16  ;;  %v1244_v27 = vshrl.u32 %v1242_v14, 16 }
  0xb7   : > { %v1225_v57 = vpop.permute.xlu0 %1224  ;;  %1057 = vrot.lane.b32.xlu2 %v1042_v45, %s6304_s30  ;;  %1097 = vrot.lane.b32.xlu1 %v1082_v50, %s6303_s23 }
  0xb8   : > { %v1378_v7 = vsel %vm1376_vm0, %v1361_v9, %v1225_v57  ;;  %v1248_v40 = vrot.slane %v1246_v25, 1 }
  0xb9   : > { %v1048_v62 = vpop.permute.xlu2 %1047  ;;  %v1227_v8 = vpop.permute.xlu1 %1226  ;;  %v1395_v32 = vsel %vm1393_vm1, %v1378_v7, %v6862_v5  ;;  %v1223_v5 = vpack.c.b16 %v1222_v52, %v1222_v52 }
  0xba   : > { %v1380_v12 = vsel %vm1376_vm0, %v1363_v63, %v1227_v8  ;;  %v1427_v18 = vunpack.c.l.b16 %v1395_v32  ;;  %v1249_v29 = vor.u32 %v1248_v40, %v1244_v27 }
  0xbd   : > { %1193 = vrot.lane.b32.xlu0 %v1178_v21, %s6306_s18 }
  0xbf   : > { %v1253_v17 = vpop.permute.xlu0 %1252  ;;  %1191 = vrot.lane.b32.xlu2 %v1171_v15, %s6306_s18  ;;  %1217 = vrot.lane.b32.xlu1 %v1203_v10, %s6305_s17  ;;  %s6311_s18 = smov 96  }
  0xc0   : > { %v1397_v19 = vsel %vm1393_vm1, %v1380_v12, %v1253_v17 }
  0xc1   : > { %v1428_v22 = vunpack.c.l.b16 %v1397_v19  ;;  %v1090_v26 = vpop.permute.xlu2 %1089  ;;  %v896_v13 = vpop.permute.xlu1 %895 }
  0xc2   : > { %v1275_v43 = vsel %vm1266_vm10, %v6567_v51, %v896_v13 }
  0xc3   : > { %v1435_v54 = vpack.c.b16 %v1428_v22, %v1427_v18 }
  0xc5   : > { %1236 = vrot.lane.b32.xlu0 %v6841_v42, %s6307_s20  ;;  %5946 = vmatmul.msk.bf16.vlgmr.msra.gmra.mxu0 %vm1466_vm2, %v1435_v54 }
  0xc7   : > { %v1008_v28 = vpop.permute.xlu0 %1007  ;;  %1219 = vrot.lane.b32.xlu2 %v1204_v0, %s6305_s17  ;;  %1238 = vrot.lane.b32.xlu1 %v1223_v5, %s6307_s20  ;;  %s6312_s20 = smov 112  }
  0xc8   : > { %v1297_v45 = vsel %vm1291_vm11, %v1275_v43, %v1008_v28 }
  0xc9   : > { %v1210_v30 = vpop.permute.xlu2 %1209  ;;  %v1010_v36 = vpop.permute.xlu1 %1009  ;;  %v1314_v49 = vsel %vm1308_vm12, %v1297_v45, %v1048_v62 }
  0xcd   : > { %1264 = vrot.lane.b32.xlu0 %v1249_v29, %s6308_s26 }
  0xcf   : > { %v1050_v34 = vpop.permute.xlu0 %1049  ;;  %1262 = vrot.lane.b32.xlu2 %v6854_v53, %s6308_s26  ;;  %v1299_v53 = vsel %vm1291_vm11, %v1278_v46, %v1010_v36 }
  0xd0   : > { %v1316_v60 = vsel %vm1308_vm12, %v1299_v53, %v1050_v34 }
  0xd1   : > { %v1231_v42 = vpop.permute.xlu2 %1230  ;;  %v1088_v33 = vpop.permute.xlu1 %1087  ;;  %v1333_v20 = vsel %vm1325_vm13, %v1316_v60, %v1090_v26  ;;  %v6309_v26 = vmov 0  }
  0xd2   : > { %v1331_v39 = vsel %vm1325_vm13, %v1314_v49, %v1088_v33  ;;  %1513 = vst.msk [vmem:[#allocation2] sm:$0xf] %vm1512_vm3, %v6309_v26 }
  0xd3   : > { %1515 = vst.msk [vmem:[#allocation2 + $0x4] sm:$0x1] %vm1514_vm4, %v6309_v26 }
  0xd4   : > { %1517 = vst.msk [vmem:[#allocation2 + $0x48] sm:$0xf] %vm1512_vm3, %v6309_v26 }
  0xd5   : > { %1518 = vst.msk [vmem:[#allocation2 + $0x4c] sm:$0x1] %vm1514_vm4, %v6309_v26 }
  0xd7   : > { %v1184_v41 = vpop.permute.xlu0 %1183 }
  0xd8   : > { %v1348_v1 = vsel %vm1342_vm14, %v1331_v39, %v1184_v41 }
  0xd9   : > { %v900_v38 = vpop.permute.xlu2 %899  ;;  %v1186_v44 = vpop.permute.xlu1 %1185  ;;  %v1365_v59 = vsel %vm1359_vm15, %v1348_v1, %v1210_v30  ;;  %v1522_v33 = vld [vmem:[#allocation2] sm:$0x1] }
  0xda   : > { %v1350_v16 = vsel %vm1342_vm14, %v1333_v20, %v1186_v44  ;;  %v1281_v63 = vsel %vm1266_vm10, %v6655_v56, %v900_v38  ;;  %v1523_v43 = vsel %vm6971_vm7, 0, %v1522_v33  ;;  %v1554_v44 = vld [vmem:[#allocation2 + $0x4] sm:$0x1] }
  0xdb   : > { %1524 = vst [vmem:[#allocation2] sm:$0x1] %v1523_v43  ;;  %v1555_v45 = vsel %vm6977_vm8, 0, %v1554_v44 }
  0xdc   : > { %1556 = vst [vmem:[#allocation2 + $0x4] sm:$0x1] %v1555_v45 }
  0xdf   : > { %v1212_v47 = vpop.permute.xlu0 %1211 }
  0xe0   : > { %v1367_v55 = vsel %vm1359_vm15, %v1350_v16, %v1212_v47  ;;  %v1557_v16 = vld [vmem:[#allocation2 + $0xc] sm:$0x1] }
  0xe1   : > { %v1014_v50 = vpop.permute.xlu2 %1013  ;;  %v1229_v51 = vpop.permute.xlu1 %1228  ;;  %v1384_v58 = vsel %vm1376_vm0, %v1367_v55, %v1231_v42  ;;  %v1558_v55 = vsel %vm6977_vm8, 0, %v1557_v16  ;;  %v1563_v16 = vld [vmem:[#allocation2 + $0x1c] sm:$0x1] }
  0xe2   : > { %v1382_v24 = vsel %vm1376_vm0, %v1365_v59, %v1229_v51  ;;  %v1755_v53 = vld [vmem:[#allocation2] sm:$0xf]  ;;  %v1525_v59 = vld [vmem:[#allocation2 + $0x8] sm:$0x1]  ;;  %1559 = vst [vmem:[#allocation2 + $0xc] sm:$0x1] %v1558_v55 }
  0xe3   : > { %v1763_v39 = vld [vmem:[#allocation2 + $0x4] sm:$0x1]  ;;  %v1844_v60 = vunpack.c.l.b16 %v1755_v53 }
  0xe4   : > { %v1845_v51 = vunpack.c.l.b16 %v1763_v39 }
  0xe6   : > { %v1860_v20 = vpack.c.b16 %v1845_v51, %v1844_v60 }
  0xe7   : > { %v1255_v31 = vpop.permute.xlu0 %1254 }
  0xe8   : > { %v1399_v57 = vsel %vm1393_vm1, %v1382_v24, %v1255_v31  ;;  %v1526_v31 = vsel %vm6971_vm7, 0, %v1525_v59  ;;  %v1531_v59 = vld [vmem:[#allocation2 + $0x18] sm:$0x1] }
  0xe9   : > { %v1429_v61 = vunpack.c.l.b16 %v1399_v57  ;;  %v1257_v23 = vpop.permute.xlu1 %1256  ;;  %v1092_v21 = vpop.permute.xlu2 %1091  ;;  %v1871_v57 = vshll.u32 %v1860_v20, 16  ;;  %1527 = vst [vmem:[#allocation2 + $0x8] sm:$0x1] %v1526_v31 }
  0xea   : > { %v1401_v62 = vsel %vm1393_vm1, %v1384_v58, %v1257_v23  ;;  %v1869_v58 = vshrl.u32 %v1860_v20, 16  ;;  %v1710_v20 = vld [vmem:[#allocation2 + $0xc] sm:$0x1] }
  0xeb   : > { %v1430_v3 = vunpack.c.l.b16 %v1401_v62  ;;  %v1873_v23 = vrot.slane %v1871_v57, 1  ;;  %v1532_v57 = vsel %vm6971_vm7, 0, %v1531_v59 }
  0xec   : > { %1533 = vst [vmem:[#allocation2 + $0x18] sm:$0x1] %v1532_v57 }
  0xed   : > { %v1436_v4 = vpack.c.b16 %v1430_v3, %v1429_v61  ;;  %v1771_v61 = vld [vmem:[#allocation2] sm:$0xe] }
  0xef   : > { %v902_v9 = vpop.permute.xlu0 %901  ;;  %5947 = vmatmul.msk.bf16.gmra.mxu0 %vm1466_vm2, %v1436_v4  ;;  %v1874_v4 = vor.u32 %v1873_v23, %v1869_v58  ;;  %v1564_v58 = vsel %vm6977_vm8, 0, %v1563_v16 }
  0xf0   : > { %v1284_v14 = vsel %vm1266_vm10, %v6690_v37, %v902_v9  ;;  %1565 = vst [vmem:[#allocation2 + $0x1c] sm:$0x1] %v1564_v58 }
  0xf1   : > { %v1012_v48 = vpop.permute.xlu1 %1011  ;;  %v1190_v7 = vpop.permute.xlu2 %1189  ;;  %v1303_v12 = vsel %vm1291_vm11, %v1284_v14, %v1014_v50  ;;  %1924 = vrot.lane.b32.xlu1 %v1874_v4, %s6302_s21  ;;  %v1528_v14 = vld [vmem:[#allocation2 + $0x10] sm:$0x1] }
  0xf2   : > { %v1301_v19 = vsel %vm1291_vm11, %v1281_v63, %v1012_v48  ;;  %v1560_v63 = vld [vmem:[#allocation2 + $0x14] sm:$0x1] }
  0xf7   : > { %v1052_v2 = vpop.permute.xlu0 %1051 }
  0xf8   : > { %v1318_v22 = vsel %vm1308_vm12, %v1301_v19, %v1052_v2 }
  0xf9   : > { %v1054_v8 = vpop.permute.xlu1 %1053  ;;  %v1233_v10 = vpop.permute.xlu2 %1232  ;;  %v1335_v56 = vsel %vm1325_vm13, %v1318_v22, %v1092_v21  ;;  %v1948_v21 = vunpack.c.l.b16 %v1771_v61 }
  0xfa   : > { %v1320_v18 = vsel %vm1308_vm12, %v1303_v12, %v1054_v8  ;;  %v1529_v12 = vsel %vm6971_vm7, 0, %v1528_v14 }
  0xfb   : > { %v1956_v9 = vpack.c.b16 %v1845_v51, %v1948_v21  ;;  %1530 = vst [vmem:[#allocation2 + $0x10] sm:$0x1] %v1529_v12 }
  0xfd   : > { %v1964_v48 = vrot.slane %v1956_v9, 1 }
  0xff   : > { %v1094_v15 = vpop.permute.xlu0 %1093  ;;  %1972 = vrot.lane.b32.xlu0 %v1964_v48, %s6303_s23 }
 0x100   : > { %v1337_v52 = vsel %vm1325_vm13, %v1320_v18, %v1094_v15 }
 0x101   : > { %v1188_v11 = vpop.permute.xlu1 %1187  ;;  %v1261_v17 = vpop.permute.xlu2 %1260  ;;  %v1354_v37 = vsel %vm1342_vm14, %v1337_v52, %v1190_v7 }
 0x102   : > { %v1352_v13 = vsel %vm1342_vm14, %v1335_v56, %v1188_v11  ;;  %v1713_v9 = vld [vmem:[#allocation2 + $0x10] sm:$0xf] }
 0x107   : > { %v1214_v32 = vpop.permute.xlu0 %1213 }
 0x108   : > { %v1369_v5 = vsel %vm1359_vm15, %v1352_v13, %v1214_v32 }
 0x109   : > { %v1216_v25 = vpop.permute.xlu1 %1215  ;;  %v1386_v28 = vsel %vm1376_vm0, %v1369_v5, %v1233_v10  ;;  %v1016_v36 = vpop.permute.xlu2 %1015 }
 0x10a   : > { %v1371_v54 = vsel %vm1359_vm15, %v1354_v37, %v1216_v25 }
 0x10f   : > { %v1235_v0 = vpop.permute.xlu0 %1234 }
 0x110   : > { %v1388_v27 = vsel %vm1376_vm0, %v1371_v54, %v1235_v0 }
 0x111   : > { %v1405_v40 = vsel %vm1393_vm1, %v1388_v27, %v1261_v17  ;;  %v1259_v29 = vpop.permute.xlu1 %1258  ;;  %v1058_v50 = vpop.permute.xlu2 %1057  ;;  %v1561_v17 = vsel %vm6977_vm8, 0, %v1560_v63 }
 0x112   : > { %v1432_v30 = vunpack.c.l.b16 %v1405_v40  ;;  %v1403_v34 = vsel %vm1393_vm1, %v1386_v28, %v1259_v29  ;;  %1562 = vst [vmem:[#allocation2 + $0x14] sm:$0x1] %v1561_v17  ;;  %v7016_v28 = vld [vmem:[%s8304_s4] ss:$0 sm:$0xff] }
 0x113   : > { %v1431_v41 = vunpack.c.l.b16 %v1403_v34  ;;  %v7022_v34 = vld [vmem:[%s8305_s5] ss:$0 sm:$0xff] }
 0x115   : > { %v1437_v46 = vpack.c.b16 %v1432_v30, %v1431_v41 }
 0x117   : > { %v904_v47 = vpop.permute.xlu0 %903  ;;  %5948 = vmatmul.msk.bf16.gmra.mxu0 %vm1466_vm2, %v1437_v46 }
 0x118   : > { %v1287_v8 = vsel %vm1266_vm10, %v6755_v6, %v904_v47 }
 0x119   : > { %v906_v49 = vpop.permute.xlu1 %905  ;;  %v1192_v3 = vpop.permute.xlu2 %1191  ;;  %v1305_v32 = vsel %vm1291_vm11, %v1287_v8, %v1016_v36  ;;  %v1716_v48 = vld [vmem:[#allocation2 + $0x14] sm:$0x1] }
 0x11a   : > { %v1290_v10 = vsel %vm1266_vm10, %v6781_v35, %v906_v49  ;;  %vm2412_vm10 = vcmask 654336  }
 0x11f   : > { %v1018_v1 = vpop.permute.xlu0 %1017 }
 0x120   : > { %v1307_v6 = vsel %vm1291_vm11, %v1290_v10, %v1018_v1  ;;  %v1707_v1 = vld [vmem:[#allocation2 + $0x8] sm:$0xf] }
 0x121   : > { %v1056_v24 = vpop.permute.xlu1 %1055  ;;  %v1220_v15 = vpop.permute.xlu2 %1219  ;;  %v1324_v22 = vsel %vm1308_vm12, %v1307_v6, %v1058_v50 }
 0x122   : > { %v1322_v19 = vsel %vm1308_vm12, %v1305_v32, %v1056_v24  ;;  %vm2429_vm12 = vcmask 785408  }
 0x127   : > { %v1096_v62 = vpop.permute.xlu0 %1095 }
 0x128   : > { %v1339_v18 = vsel %vm1325_vm13, %v1322_v19, %v1096_v62 }
 0x129   : > { %v1098_v7 = vpop.permute.xlu1 %1097  ;;  %v1356_v52 = vsel %vm1342_vm14, %v1339_v18, %v1192_v3  ;;  %v1263_v13 = vpop.permute.xlu2 %1262 }
 0x12a   : > { %v1341_v25 = vsel %vm1325_vm13, %v1324_v22, %v1098_v7 }
 0x12f   : > { %v1194_v2 = vpop.permute.xlu0 %1193 }
 0x130   : > { %v1358_v56 = vsel %vm1342_vm14, %v1341_v25, %v1194_v2  ;;  %v1534_v25 = vld [vmem:[#allocation2 + $0x20] sm:$0x1]  ;;  %vm2446_vm14 = vcmask 916480  }
 0x131   : > { %v1218_v11 = vpop.permute.xlu1 %1217  ;;  %v1375_v0 = vsel %vm1359_vm15, %v1358_v56, %v1220_v15 }
 0x132   : > { %v1373_v26 = vsel %vm1359_vm15, %v1356_v52, %v1218_v11 }
 0x137   : > { %v1237_v35 = vpop.permute.xlu0 %1236 }
 0x138   : > { %v1390_v37 = vsel %vm1376_vm0, %v1373_v26, %v1237_v35  ;;  %v1566_v26 = vld [vmem:[#allocation2 + $0x24] sm:$0x1] }
 0x139   : > { %v1239_v54 = vpop.permute.xlu1 %1238  ;;  %v1407_v5 = vsel %vm1393_vm1, %v1390_v37, %v1263_v13 }
 0x13a   : > { %v1392_v27 = vsel %vm1376_vm0, %v1375_v0, %v1239_v54  ;;  %v1433_v30 = vunpack.c.l.b16 %v1407_v5  ;;  %v1535_v54 = vsel %vm6971_vm7, 0, %v1534_v25  ;;  %v1567_v5 = vsel %vm6977_vm8, 0, %v1566_v26  ;;  %v1537_v26 = vld [vmem:[#allocation2 + $0x28] sm:$0x1] }
 0x13b   : > { %1536 = vst [vmem:[#allocation2 + $0x20] sm:$0x1] %v1535_v54 }
 0x13c   : > { %1568 = vst [vmem:[#allocation2 + $0x24] sm:$0x1] %v1567_v5 }
 0x13f   : > { %v1265_v40 = vpop.permute.xlu0 %1264 }
 0x140   : > { %v1409_v29 = vsel %vm1393_vm1, %v1392_v27, %v1265_v40 }
 0x141   : > { %v1434_v36 = vunpack.c.l.b16 %v1409_v29 }
 0x142   : > { %v7024_v33 = vpop.f32.mrf.mxu0 }
 0x143   : > { %v1589_v41 = vmul.f32 %v7016_v28, %v7024_v33  ;;  %v1438_v43 = vpack.c.b16 %v1434_v36, %v1433_v30 }
 0x145   : > { %v1600_v44 = vadd.f32 %v7022_v34, %v1589_v41  ;;  %5949 = vmatmul.msk.bf16.gmra.mxu0 %vm1466_vm2, %v1438_v43 }
 0x147   : > { %v1608_v45 = vmax.f32 %v1600_v44, 0.0 }
 0x149   : > { %v1616_v46 = vpack.c.bf16 %v1608_v45, %v1608_v45 }
 0x14a   : > { %v7030_v47 = vpop.f32.mrf.mxu0 }
 0x14b   : > { %v1625_v49 = vshrl.u32 %v1616_v46, 16  ;;  %v1590_v50 = vmul.f32 %v7016_v28, %v7030_v47  ;;  %v1628_v39 = vshll.u32 %v1616_v46, 16 }
 0x14d   : > { %v1627_v53 = vrot.slane %v1625_v49, 7  ;;  %v1601_v51 = vadd.f32 %v7022_v34, %v1590_v50 }
 0x14f   : > { %v1630_v24 = vor.u32 %v1628_v39, %v1627_v53  ;;  %v1631_v31 = vrot.slane %v1627_v53, 4  ;;  %v1609_v55 = vmax.f32 %v1601_v51, 0.0 }
 0x151   : > { %v1708_v61 = vsel %vm7036_vm9, %v1630_v24, %v1707_v1  ;;  %v1711_v23 = vsel %vm6971_vm7, %v1631_v31, %v1710_v20  ;;  %v1617_v21 = vpack.c.bf16 %v1609_v55, %v1609_v55 }
 0x152   : > { %1709 = vst [vmem:[#allocation2 + $0x8] sm:$0xf] %v1708_v61 }
 0x153   : > { %1712 = vst [vmem:[#allocation2 + $0xc] sm:$0x1] %v1711_v23  ;;  %v1633_v62 = vshrl.u32 %v1617_v21, 16  ;;  %v1636_v4 = vshll.u32 %v1617_v21, 16 }
 0x155   : > { %v1635_v3 = vrot.slane %v1633_v62, 7 }
 0x157   : > { %v1638_v7 = vor.u32 %v1636_v4, %v1635_v3  ;;  %v1639_v2 = vrot.slane %v1635_v3, 4 }
 0x159   : > { %v1714_v8 = vsel %vm7036_vm9, %v1638_v7, %v1713_v9  ;;  %v1717_v15 = vsel %vm6971_vm7, %v1639_v2, %v1716_v48  ;;  %v1779_v10 = vld [vmem:[#allocation2 + $0x8] sm:$0xf]  ;;  %v6127_v2 = vld [vmem:[%s8306_s6 + $0x40] sm:$0xff] }
 0x15a   : > { %v1795_v11 = vld [vmem:[#allocation2 + $0x8] sm:$0xe]  ;;  %1715 = vst [vmem:[#allocation2 + $0x10] sm:$0xf] %v1714_v8  ;;  %v1996_v63 = vunpack.c.l.b16 %v1779_v10  ;;  %v1787_v32 = vld [vmem:[#allocation2 + $0xc] sm:$0x1]  ;;  %2619 = vmatpush.bf16.msra.mxu2 %v6127_v2 }
 0x15b   : > { %v1772_v14 = vld [vmem:[#allocation2 + $0x8] sm:$0xe]  ;;  %v2132_v12 = vunpack.c.l.b16 %v1795_v11  ;;  %v1764_v17 = vld [vmem:[#allocation2 + $0xc] sm:$0x1]  ;;  %1718 = vst [vmem:[#allocation2 + $0x14] sm:$0x1] %v1717_v15  ;;  %v2036_v6 = vunpack.c.l.b16 %v1787_v32 }
 0x15c   : > { %v1949_v19 = vunpack.c.l.b16 %v1772_v14  ;;  %v1847_v18 = vunpack.c.l.b16 %v1764_v17  ;;  %v1756_v35 = vld [vmem:[#allocation2 + $0x8] sm:$0xf]  ;;  %v2004_v22 = vpack.c.b16 %v1996_v63, %v1996_v63 }
 0x15d   : > { %v1846_v52 = vunpack.c.l.b16 %v1756_v35  ;;  %v2140_v56 = vpack.c.b16 %v2036_v6, %v2132_v12  ;;  %v2044_v13 = vpack.c.b16 %v2036_v6, %v1996_v63 }
 0x15e   : > { %v1957_v37 = vpack.c.b16 %v1847_v18, %v1949_v19  ;;  %2012 = vrot.lane.b32.xlu2 %v2004_v22, %s6305_s17 }
 0x15f   : > { %v1861_v0 = vpack.c.b16 %v1847_v18, %v1846_v52  ;;  %v2148_v27 = vrot.slane %v2140_v56, 1  ;;  %v2055_v29 = vshll.u32 %v2044_v13, 16  ;;  %v2053_v1 = vshrl.u32 %v2044_v13, 16  ;;  %v1569_v56 = vld [vmem:[#allocation2 + $0x2c] sm:$0x1] }
 0x160   : > { %v1965_v40 = vrot.slane %v1957_v37, 1 }
 0x161   : > { %v1878_v30 = vshll.u32 %v1861_v0, 16  ;;  %2156 = vrot.lane.b32.xlu0 %v2148_v27, %s6310_s27  ;;  %v1780_v36 = vld [vmem:[#allocation2 + $0x10] sm:$0xf]  ;;  %v1876_v41 = vshrl.u32 %v1861_v0, 16  ;;  %v2057_v44 = vrot.slane %v2055_v29, 1  ;;  %v1538_v0 = vsel %vm6971_vm7, 0, %v1537_v26 }
 0x162   : > { %1974 = vrot.lane.b32.xlu1 %v1965_v40, %s6303_s23  ;;  %v1804_v45 = vld [vmem:[#allocation2 + $0x10] sm:$0xf]  ;;  %v1997_v46 = vunpack.c.l.b16 %v1780_v36  ;;  %v1788_v49 = vld [vmem:[#allocation2 + $0x14] sm:$0x1]  ;;  %1539 = vst [vmem:[#allocation2 + $0x28] sm:$0x1] %v1538_v0 }
 0x163   : > { %v1880_v43 = vrot.slane %v1878_v30, 1  ;;  %v1757_v50 = vld [vmem:[#allocation2 + $0x10] sm:$0xf]  ;;  %v1765_v53 = vld [vmem:[#allocation2 + $0x14] sm:$0x1]  ;;  %v2058_v24 = vor.u32 %v2057_v44, %v2053_v1  ;;  %v2180_v31 = vunpack.c.l.b16 %v1804_v45  ;;  %v2037_v55 = vunpack.c.l.b16 %v1788_v49 }
 0x164   : > { %v1796_v51 = vld [vmem:[#allocation2 + $0x10] sm:$0xe]  ;;  %v1848_v20 = vunpack.c.l.b16 %v1757_v50  ;;  %v7060_v59 = vld [vmem:[#allocation2 + $0x14] sm:$0x1]  ;;  %v1849_v16 = vunpack.c.l.b16 %v1765_v53  ;;  %v2005_v57 = vpack.c.b16 %v1997_v46, %v1997_v46  ;;  %v1570_v27 = vsel %vm6977_vm8, 0, %v1569_v56 }
 0x165   : > { %v1881_v39 = vor.u32 %v1880_v43, %v1876_v41  ;;  %v2133_v58 = vunpack.c.l.b16 %v1796_v51  ;;  %v2220_v23 = vunpack.c.l.b16 %v7060_v59  ;;  %v1773_v62 = vld [vmem:[#allocation2 + $0x10] sm:$0xe]  ;;  %v2188_v48 = vpack.c.b16 %v2180_v31, %v2180_v31  ;;  %1571 = vst [vmem:[#allocation2 + $0x2c] sm:$0x1] %v1570_v27  ;;  %v1719_v36 = vld [vmem:[#allocation2 + $0x18] sm:$0xf] }
 0x166   : > { %v1862_v61 = vpack.c.b16 %v1849_v16, %v1848_v20  ;;  %v1950_v7 = vunpack.c.l.b16 %v1773_v62  ;;  %v2045_v12 = vpack.c.b16 %v2037_v55, %v1997_v46  ;;  %v1722_v41 = vld [vmem:[#allocation2 + $0x1c] sm:$0x1]  ;;  %v1820_v51 = vld [vmem:[#allocation2 + $0x10] sm:$0xe]  ;;  %v1572_v59 = vld [vmem:[#allocation2 + $0x34] sm:$0x1] }
 0x167   : > { %1926 = vrot.lane.b32.xlu2 %v1881_v39, %s6302_s21  ;;  %v2141_v3 = vpack.c.b16 %v2037_v55, %v2133_v58  ;;  %v2228_v9 = vpack.c.b16 %v2220_v23, %v2180_v31  ;;  %v1728_v31 = vld [vmem:[#allocation2 + $0x24] sm:$0x1]  ;;  %v2316_v55 = vunpack.c.l.b16 %v1820_v51  ;;  %v1573_v0 = vsel %vm6977_vm8, 0, %v1572_v59 }
 0x168   : > { %v1885_v21 = vshll.u32 %v1862_v61, 16  ;;  %v1883_v8 = vshrl.u32 %v1862_v61, 16  ;;  %v1958_v32 = vpack.c.b16 %v1849_v16, %v1950_v7  ;;  %v2062_v35 = vshll.u32 %v2045_v12, 16  ;;  %1574 = vst [vmem:[#allocation2 + $0x34] sm:$0x1] %v1573_v0 }
 0x169   : > { %2014 = vrot.lane.b32.xlu0 %v2005_v57, %s6305_s17  ;;  %v2149_v11 = vrot.slane %v2141_v3, 1  ;;  %v2239_v63 = vshll.u32 %v2228_v9, 16  ;;  %v2237_v52 = vshrl.u32 %v2228_v9, 16  ;;  %v2060_v43 = vshrl.u32 %v2045_v12, 16 }
 0x16a   : > { %2108 = vrot.lane.b32.xlu1 %v2058_v24, %s6308_s26  ;;  %v1887_v4 = vrot.slane %v1885_v21, 1  ;;  %v1966_v18 = vrot.slane %v1958_v32, 1  ;;  %v2064_v5 = vrot.slane %v2062_v35, 1  ;;  %v1725_v24 = vld [vmem:[#allocation2 + $0x20] sm:$0xf] }
 0x16b   : > { %v2241_v6 = vrot.slane %v2239_v63, 1 }
 0x16c   : > { %v7071_v15 = vpop.f32.mrf.mxu0  ;;  %v1888_v14 = vor.u32 %v1887_v4, %v1883_v8  ;;  %v2065_v49 = vor.u32 %v2064_v5, %v2060_v43 }
 0x16d   : > { %v1591_v10 = vmul.f32 %v7016_v28, %v7071_v15  ;;  %v2242_v54 = vor.u32 %v2241_v6, %v2237_v52 }
 0x16f   : > { %2196 = vrot.lane.b32.xlu2 %v2188_v48, %s6311_s18  ;;  %v1602_v17 = vadd.f32 %v7022_v34, %v1591_v10  ;;  %v2324_v10 = vpack.c.b16 %v2220_v23, %v2316_v55 }
 0x171   : > { %1928 = vrot.lane.b32.xlu0 %v1888_v14, %s6302_s21  ;;  %v1610_v19 = vmax.f32 %v1602_v17, 0.0 }
 0x172   : > { %2158 = vrot.lane.b32.xlu1 %v2149_v11, %s6310_s27 }
 0x173   : > { %v1618_v22 = vpack.c.bf16 %v1610_v19, %v1610_v19 }
 0x174   : > { %v7079_v25 = vpop.f32.mrf.mxu0 }
 0x175   : > { %v1641_v37 = vshrl.u32 %v1618_v22, 16  ;;  %v1592_v13 = vmul.f32 %v7016_v28, %v7079_v25  ;;  %v1644_v29 = vshll.u32 %v1618_v22, 16 }
 0x177   : > { %1976 = vrot.lane.b32.xlu2 %v1966_v18, %s6303_s23  ;;  %v1643_v40 = vrot.slane %v1641_v37, 7  ;;  %v1603_v30 = vadd.f32 %v7022_v34, %v1592_v13  ;;  %v1540_v37 = vld [vmem:[#allocation2 + $0x30] sm:$0x1]  ;;  %v2332_v13 = vrot.slane %v2324_v10, 1 }
 0x179   : > { %v1646_v44 = vor.u32 %v1644_v29, %v1643_v40  ;;  %v1647_v45 = vrot.slane %v1643_v40, 4  ;;  %v1611_v46 = vmax.f32 %v1603_v30, 0.0  ;;  %v2472_v43 = vunpack.c.l.b16 %v2332_v13 }
 0x17a   : > { %2292 = vrot.lane.b32.xlu1 %v2242_v54, %s6312_s20  ;;  %v1541_v54 = vsel %vm6971_vm7, 0, %v1540_v37 }
 0x17b   : > { %v1720_v50 = vsel %vm7036_vm9, %v1646_v44, %v1719_v36  ;;  %v1723_v53 = vsel %vm6971_vm7, %v1647_v45, %v1722_v41  ;;  %v1619_v39 = vpack.c.bf16 %v1611_v46, %v1611_v46  ;;  %1542 = vst [vmem:[#allocation2 + $0x30] sm:$0x1] %v1541_v54 }
 0x17c   : > { %1721 = vst [vmem:[#allocation2 + $0x18] sm:$0xf] %v1720_v50 }
 0x17d   : > { %1724 = vst [vmem:[#allocation2 + $0x1c] sm:$0x1] %v1723_v53  ;;  %v1649_v1 = vshrl.u32 %v1619_v39, 16  ;;  %v1652_v16 = vshll.u32 %v1619_v39, 16 }
 0x17f   : > { %2110 = vrot.lane.b32.xlu2 %v2065_v49, %s6308_s26  ;;  %v1651_v20 = vrot.slane %v1649_v1, 7 }
 0x181   : > { %v1654_v57 = vor.u32 %v1652_v16, %v1651_v20  ;;  %v1655_v58 = vrot.slane %v1651_v20, 4 }
 0x183   : > { %v1726_v61 = vsel %vm7036_vm9, %v1654_v57, %v1725_v24  ;;  %v1729_v21 = vsel %vm6971_vm7, %v1655_v58, %v1728_v31  ;;  %v1805_v62 = vld [vmem:[#allocation2 + $0x18] sm:$0xf] }
 0x184   : > { %v1781_v3 = vld [vmem:[#allocation2 + $0x18] sm:$0xf]  ;;  %1727 = vst [vmem:[#allocation2 + $0x20] sm:$0xf] %v1726_v61  ;;  %v2181_v9 = vunpack.c.l.b16 %v1805_v62  ;;  %v1789_v7 = vld [vmem:[#allocation2 + $0x1c] sm:$0x1] }
 0x185   : > { %v1797_v4 = vld [vmem:[#allocation2 + $0x18] sm:$0xe]  ;;  %v1998_v48 = vunpack.c.l.b16 %v1781_v3  ;;  %v1813_v8 = vld [vmem:[#allocation2 + $0x1c] sm:$0x1]  ;;  %1730 = vst [vmem:[#allocation2 + $0x24] sm:$0x1] %v1729_v21  ;;  %v2038_v11 = vunpack.c.l.b16 %v1789_v7 }
 0x186   : > { %v2134_v2 = vunpack.c.l.b16 %v1797_v4  ;;  %v1821_v14 = vld [vmem:[#allocation2 + $0x18] sm:$0xe]  ;;  %v2221_v63 = vunpack.c.l.b16 %v1813_v8  ;;  %v1766_v32 = vld [vmem:[#allocation2 + $0x1c] sm:$0x1]  ;;  %v2189_v12 = vpack.c.b16 %v2181_v9, %v2181_v9 }
 0x187   : > { %v2006_v17 = vpack.c.b16 %v1998_v48, %v1998_v48  ;;  %v2317_v19 = vunpack.c.l.b16 %v1821_v14  ;;  %v1774_v6 = vld [vmem:[#allocation2 + $0x18] sm:$0xe]  ;;  %v1851_v18 = vunpack.c.l.b16 %v1766_v32  ;;  %v2046_v36 = vpack.c.b16 %v2038_v11, %v1998_v48 }
 0x188   : > { %v7101_v35 = vld [vmem:[#allocation2 + $0x18] sm:$0xf]  ;;  %v2142_v22 = vpack.c.b16 %v2038_v11, %v2134_v2  ;;  %v1951_v52 = vunpack.c.l.b16 %v1774_v6  ;;  %v2229_v56 = vpack.c.b16 %v2221_v63, %v2181_v9  ;;  %2198 = vrot.lane.b32.xlu0 %v2189_v12, %s6311_s18 }
 0x189   : > { %v1850_v26 = vunpack.c.l.b16 %v7101_v35  ;;  %2016 = vrot.lane.b32.xlu1 %v2006_v17, %s6305_s17  ;;  %v2325_v23 = vpack.c.b16 %v2221_v63, %v2317_v19  ;;  %v2069_v39 = vshll.u32 %v2046_v36, 16  ;;  %v2067_v7 = vshrl.u32 %v2046_v36, 16 }
 0x18a   : > { %v2150_v5 = vrot.slane %v2142_v22, 1  ;;  %v1959_v29 = vpack.c.b16 %v1851_v18, %v1951_v52  ;;  %v2246_v30 = vshll.u32 %v2229_v56, 16  ;;  %v2244_v16 = vshrl.u32 %v2229_v56, 16 }
 0x18b   : > { %v1863_v27 = vpack.c.b16 %v1851_v18, %v1850_v26  ;;  %v2333_v40 = vrot.slane %v2325_v23, 1  ;;  %v7111_v51 = vld [vmem:[#allocation2 + $0x20] sm:$0xf]  ;;  %v2071_v58 = vrot.slane %v2069_v39, 1 }
 0x18c   : > { %2160 = vrot.lane.b32.xlu2 %v2150_v5, %s6310_s27  ;;  %v2248_v49 = vrot.slane %v2246_v30, 1  ;;  %v1967_v53 = vrot.slane %v1959_v29, 1  ;;  %v1767_v1 = vld [vmem:[#allocation2 + $0x24] sm:$0x1]  ;;  %v1806_v24 = vld [vmem:[#allocation2 + $0x20] sm:$0xf]  ;;  %v1852_v57 = vunpack.c.l.b16 %v7111_v51 }
 0x18d   : > { %v1892_v41 = vshll.u32 %v1863_v27, 16  ;;  %v2474_v44 = vunpack.c.l.b16 %v2333_v40  ;;  %v1890_v45 = vshrl.u32 %v1863_v27, 16  ;;  %v1853_v55 = vunpack.c.l.b16 %v1767_v1  ;;  %v1782_v61 = vld [vmem:[#allocation2 + $0x20] sm:$0xf]  ;;  %v1790_v21 = vld [vmem:[#allocation2 + $0x24] sm:$0x1] }
 0x18e   : > { %v2249_v31 = vor.u32 %v2248_v49, %v2244_v16  ;;  %v2182_v62 = vunpack.c.l.b16 %v1806_v24  ;;  %v1798_v3 = vld [vmem:[#allocation2 + $0x20] sm:$0xe]  ;;  %v7118_v9 = vld [vmem:[#allocation2 + $0x24] sm:$0x1]  ;;  %v1999_v8 = vunpack.c.l.b16 %v1782_v61  ;;  %v2039_v10 = vunpack.c.l.b16 %v1790_v21 }
 0x18f   : > { %v1894_v46 = vrot.slane %v1892_v41, 1  ;;  %v2506_v50 = vpack.c.b16 %v2474_v44, %v2472_v43  ;;  %v1775_v4 = vld [vmem:[#allocation2 + $0x20] sm:$0xe]  ;;  %v1864_v11 = vpack.c.b16 %v1853_v55, %v1852_v57  ;;  %v2072_v14 = vor.u32 %v2071_v58, %v2067_v7  ;;  %v1731_v44 = vld [vmem:[#allocation2 + $0x28] sm:$0xf] }
 0x190   : > { %1978 = vrot.lane.b32.xlu0 %v1967_v53, %s6303_s23  ;;  %v2135_v63 = vunpack.c.l.b16 %v1798_v3  ;;  %v1952_v32 = vunpack.c.l.b16 %v1775_v4  ;;  %v2222_v12 = vunpack.c.l.b16 %v7118_v9  ;;  %v2190_v19 = vpack.c.b16 %v2182_v62, %v2182_v62  ;;  %v1822_v3 = vld [vmem:[#allocation2 + $0x20] sm:$0xe] }
 0x191   : > { %v1895_v20 = vor.u32 %v1894_v46, %v1890_v45  ;;  %5986 = vmatmul.msk.bf16.vlgmr.msra.gmra.mxu2 %vm1291_vm11, %v2506_v50  ;;  %v2007_v18 = vpack.c.b16 %v1999_v8, %v1999_v8  ;;  %v1899_v22 = vshll.u32 %v1864_v11, 16  ;;  %v2047_v37 = vpack.c.b16 %v2039_v10, %v1999_v8  ;;  %v1734_v45 = vld [vmem:[#allocation2 + $0x2c] sm:$0x1] }
 0x192   : > { %v2143_v52 = vpack.c.b16 %v2039_v10, %v2135_v63  ;;  %v1960_v26 = vpack.c.b16 %v1853_v55, %v1952_v32  ;;  %v2230_v56 = vpack.c.b16 %v2222_v12, %v2182_v62  ;;  %v1897_v43 = vshrl.u32 %v1864_v11, 16  ;;  %v1575_v55 = vld [vmem:[#allocation2 + $0x3c] sm:$0x1]  ;;  %v1737_v10 = vld [vmem:[#allocation2 + $0x30] sm:$0xf] }
 0x193   : > { %1930 = vrot.lane.b32.xlu1 %v1895_v20, %s6302_s21  ;;  %v1901_v0 = vrot.slane %v1899_v22, 1  ;;  %v2076_v29 = vshll.u32 %v2047_v37, 16  ;;  %v1576_v61 = vsel %vm6977_vm8, 0, %v1575_v55  ;;  %v2074_v62 = vshrl.u32 %v2047_v37, 16  ;;  %v1740_v11 = vld [vmem:[#allocation2 + $0x34] sm:$0x1] }
 0x194   : > { %2294 = vrot.lane.b32.xlu2 %v2249_v31, %s6312_s20  ;;  %v7120_v48 = vpop.f32.mrf.mxu0  ;;  %v2151_v5 = vrot.slane %v2143_v52, 1  ;;  %v1968_v27 = vrot.slane %v1960_v26, 1  ;;  %v2253_v40 = vshll.u32 %v2230_v56, 16  ;;  %v1543_v31 = vld [vmem:[#allocation2 + $0x38] sm:$0x1]  ;;  %v2251_v57 = vshrl.u32 %v2230_v56, 16 }
 0x195   : > { %v1593_v2 = vmul.f32 %v7016_v28, %v7120_v48  ;;  %v1902_v53 = vor.u32 %v1901_v0, %v1897_v43  ;;  %v2078_v24 = vrot.slane %v2076_v29, 1  ;;  %v1544_v58 = vsel %vm6971_vm7, 0, %v1543_v31  ;;  %1577 = vst [vmem:[#allocation2 + $0x3c] sm:$0x1] %v1576_v61  ;;  %v1578_v31 = vld [vmem:[#allocation2 + $0x44] sm:$0x1] }
 0x196   : > { %v2255_v39 = vrot.slane %v2253_v40, 1  ;;  %1545 = vst [vmem:[#allocation2 + $0x38] sm:$0x1] %v1544_v58 }
 0x197   : > { %v1604_v17 = vadd.f32 %v7022_v34, %v1593_v2  ;;  %v2079_v8 = vor.u32 %v2078_v24, %v2074_v62 }
 0x198   : > { %2112 = vrot.lane.b32.xlu0 %v2072_v14, %s6308_s26  ;;  %v2256_v4 = vor.u32 %v2255_v39, %v2251_v57  ;;  %v2318_v14 = vunpack.c.l.b16 %v1822_v3 }
 0x199   : > { %v1612_v6 = vmax.f32 %v1604_v17, 0.0 }
 0x19b   : > { %2200 = vrot.lane.b32.xlu1 %v2190_v19, %s6311_s18  ;;  %v1620_v59 = vpack.c.bf16 %v1612_v6, %v1612_v6 }
 0x19c   : > { %2018 = vrot.lane.b32.xlu2 %v2007_v18, %s6305_s17  ;;  %v7131_v23 = vpop.f32.mrf.mxu0 }
 0x19d   : > { %v1657_v13 = vshrl.u32 %v1620_v59, 16  ;;  %v1594_v54 = vmul.f32 %v7016_v28, %v7131_v23  ;;  %v1660_v36 = vshll.u32 %v1620_v59, 16 }
 0x19f   : > { %v1659_v30 = vrot.slane %v1657_v13, 7  ;;  %v1605_v41 = vadd.f32 %v7022_v34, %v1594_v54  ;;  %v2326_v13 = vpack.c.b16 %v2222_v12, %v2318_v14 }
 0x1a0   : > { %2162 = vrot.lane.b32.xlu0 %v2151_v5, %s6310_s27 }
 0x1a1   : > { %v1662_v46 = vor.u32 %v1660_v36, %v1659_v30  ;;  %v1663_v49 = vrot.slane %v1659_v30, 4  ;;  %v1613_v50 = vmax.f32 %v1605_v41, 0.0  ;;  %v2334_v12 = vrot.slane %v2326_v13, 1 }
 0x1a3   : > { %1980 = vrot.lane.b32.xlu1 %v1968_v27, %s6303_s23  ;;  %v1732_v1 = vsel %vm7036_vm9, %v1662_v46, %v1731_v44  ;;  %v1735_v20 = vsel %vm6971_vm7, %v1663_v49, %v1734_v45  ;;  %v1621_v16 = vpack.c.bf16 %v1613_v50, %v1613_v50  ;;  %v2476_v58 = vunpack.c.l.b16 %v2334_v12 }
 0x1a4   : > { %1932 = vrot.lane.b32.xlu2 %v1902_v53, %s6302_s21  ;;  %1733 = vst [vmem:[#allocation2 + $0x28] sm:$0xf] %v1732_v1 }
 0x1a5   : > { %1736 = vst [vmem:[#allocation2 + $0x2c] sm:$0x1] %v1735_v20  ;;  %v1665_v21 = vshrl.u32 %v1621_v16, 16  ;;  %v1668_v2 = vshll.u32 %v1621_v16, 16  ;;  %v1546_v20 = vld [vmem:[#allocation2 + $0x40] sm:$0x1] }
 0x1a6   : > { %v1547_v57 = vsel %vm6971_vm7, 0, %v1546_v20 }
 0x1a7   : > { %v1667_v7 = vrot.slane %v1665_v21, 7  ;;  %1548 = vst [vmem:[#allocation2 + $0x40] sm:$0x1] %v1547_v57 }
 0x1a8   : > { %2296 = vrot.lane.b32.xlu0 %v2256_v4, %s6312_s20 }
 0x1a9   : > { %v1670_v63 = vor.u32 %v1668_v2, %v1667_v7  ;;  %v1671_v32 = vrot.slane %v1667_v7, 4  ;;  %v1579_v2 = vsel %vm6977_vm8, 0, %v1578_v31  ;;  %v6125_v31 = vld [vmem:[%s8306_s6 + $0x30] sm:$0xff] }
 0x1aa   : > { %1580 = vst [vmem:[#allocation2 + $0x44] sm:$0x1] %v1579_v2 }
 0x1ab   : > { %2114 = vrot.lane.b32.xlu1 %v2079_v8, %s6308_s26  ;;  %v1738_v17 = vsel %vm7036_vm9, %v1670_v63, %v1737_v10  ;;  %v1741_v19 = vsel %vm6971_vm7, %v1671_v32, %v1740_v11  ;;  %v1807_v6 = vld [vmem:[#allocation2 + $0x28] sm:$0xf] }
 0x1ac   : > { %v1783_v18 = vld [vmem:[#allocation2 + $0x28] sm:$0xf]  ;;  %1739 = vst [vmem:[#allocation2 + $0x30] sm:$0xf] %v1738_v17  ;;  %v2183_v52 = vunpack.c.l.b16 %v1807_v6  ;;  %v1791_v56 = vld [vmem:[#allocation2 + $0x2c] sm:$0x1] }
 0x1ad   : > { %v1799_v22 = vld [vmem:[#allocation2 + $0x28] sm:$0xe]  ;;  %v2000_v26 = vunpack.c.l.b16 %v1783_v18  ;;  %v1815_v59 = vld [vmem:[#allocation2 + $0x2c] sm:$0x1]  ;;  %1742 = vst [vmem:[#allocation2 + $0x34] sm:$0x1] %v1741_v19  ;;  %v2040_v54 = vunpack.c.l.b16 %v1791_v56 }
 0x1ae   : > { %v2136_v37 = vunpack.c.l.b16 %v1799_v22  ;;  %v1823_v0 = vld [vmem:[#allocation2 + $0x28] sm:$0xe]  ;;  %v2223_v5 = vunpack.c.l.b16 %v1815_v59  ;;  %v1768_v27 = vld [vmem:[#allocation2 + $0x2c] sm:$0x1]  ;;  %v2191_v40 = vpack.c.b16 %v2183_v52, %v2183_v52 }
 0x1af   : > { %v2008_v29 = vpack.c.b16 %v2000_v26, %v2000_v26  ;;  %v2319_v30 = vunpack.c.l.b16 %v1823_v0  ;;  %v1776_v36 = vld [vmem:[#allocation2 + $0x28] sm:$0xe]  ;;  %v1855_v41 = vunpack.c.l.b16 %v1768_v27  ;;  %v2048_v50 = vpack.c.b16 %v2040_v54, %v2000_v26 }
 0x1b0   : > { %v7155_v43 = vld [vmem:[#allocation2 + $0x28] sm:$0xf]  ;;  %v2144_v44 = vpack.c.b16 %v2040_v54, %v2136_v37  ;;  %v1953_v45 = vunpack.c.l.b16 %v1776_v36  ;;  %v2231_v49 = vpack.c.b16 %v2223_v5, %v2183_v52  ;;  %2202 = vrot.lane.b32.xlu2 %v2191_v40, %s6311_s18  ;;  %v6126_v54 = vld [vmem:[%s8306_s6 + $0x38] sm:$0xff] }
 0x1b1   : > { %v1854_v46 = vunpack.c.l.b16 %v7155_v43  ;;  %2020 = vrot.lane.b32.xlu0 %v2008_v29, %s6305_s17  ;;  %v2327_v9 = vpack.c.b16 %v2223_v5, %v2319_v30  ;;  %v2083_v62 = vshll.u32 %v2048_v50, 16  ;;  %v2081_v59 = vshrl.u32 %v2048_v50, 16  ;;  %2583 = vmatpush.bf16.msra.mxu1 %v6126_v54 }
 0x1b2   : > { %v2152_v53 = vrot.slane %v2144_v44, 1  ;;  %v1961_v39 = vpack.c.b16 %v1855_v41, %v1953_v45  ;;  %v2260_v24 = vshll.u32 %v2231_v49, 16  ;;  %v2258_v63 = vshrl.u32 %v2231_v49, 16  ;;  %v1581_v45 = vld [vmem:[#allocation2 + $0x4c] sm:$0x1] }
 0x1b3   : > { %v1865_v1 = vpack.c.b16 %v1855_v41, %v1854_v46  ;;  %v2335_v16 = vrot.slane %v2327_v9, 1  ;;  %v7165_v11 = vld [vmem:[#allocation2 + $0x30] sm:$0xf]  ;;  %v2085_v18 = vrot.slane %v2083_v62, 1  ;;  %v1582_v49 = vsel %vm6977_vm8, 0, %v1581_v45 }
 0x1b4   : > { %2164 = vrot.lane.b32.xlu1 %v2152_v53, %s6310_s27  ;;  %v1969_v21 = vrot.slane %v1961_v39, 1  ;;  %v2262_v7 = vrot.slane %v2260_v24, 1  ;;  %v1769_v10 = vld [vmem:[#allocation2 + $0x34] sm:$0x1]  ;;  %v1808_v32 = vld [vmem:[#allocation2 + $0x30] sm:$0xf]  ;;  %v1856_v6 = vunpack.c.l.b16 %v7165_v11 }
 0x1b5   : > { %v1906_v55 = vshll.u32 %v1865_v1, 16  ;;  %v2478_v61 = vunpack.c.l.b16 %v2335_v16  ;;  %v1904_v3 = vshrl.u32 %v1865_v1, 16  ;;  %v1857_v19 = vunpack.c.l.b16 %v1769_v10  ;;  %v1784_v22 = vld [vmem:[#allocation2 + $0x30] sm:$0xf]  ;;  %v1792_v26 = vld [vmem:[#allocation2 + $0x34] sm:$0x1]  ;;  %2584 = vmatpush.bf16.msra.mxu1 %v6125_v31 }
 0x1b6   : > { %v2263_v17 = vor.u32 %v2262_v7, %v2258_v63  ;;  %v2184_v52 = vunpack.c.l.b16 %v1808_v32  ;;  %v1800_v56 = vld [vmem:[#allocation2 + $0x30] sm:$0xe]  ;;  %v7172_v37 = vld [vmem:[#allocation2 + $0x34] sm:$0x1]  ;;  %v2001_v0 = vunpack.c.l.b16 %v1784_v22  ;;  %v2086_v40 = vor.u32 %v2085_v18, %v2081_v59  ;;  %1583 = vst [vmem:[#allocation2 + $0x4c] sm:$0x1] %v1582_v49 }
 0x1b7   : > { %v1908_v4 = vrot.slane %v1906_v55, 1  ;;  %v2508_v8 = vpack.c.b16 %v2478_v61, %v2476_v58  ;;  %v1777_v13 = vld [vmem:[#allocation2 + $0x30] sm:$0xe]  ;;  %v1866_v5 = vpack.c.b16 %v1857_v19, %v1856_v6  ;;  %v2041_v29 = vunpack.c.l.b16 %v1792_v26  ;;  %v7208_v6 = vpop.permute.xlu1 %1924  ;;  %v1743_v18 = vld [vmem:[#allocation2 + $0x38] sm:$0xf]  ;;  %v6120_v31 = vld [vmem:[%s8306_s6 + $0x8] sm:$0xff] }
 0x1b8   : > { %1982 = vrot.lane.b32.xlu2 %v1969_v21, %s6303_s23  ;;  %v7177_v27 = vpop.permute.xlu2 %2012  ;;  %v2137_v30 = vunpack.c.l.b16 %v1800_v56  ;;  %v2224_v36 = vunpack.c.l.b16 %v7172_v37  ;;  %v2192_v41 = vpack.c.b16 %v2184_v52, %v2184_v52  ;;  %v1954_v44 = vunpack.c.l.b16 %v1777_v13  ;;  %v1746_v22 = vld [vmem:[#allocation2 + $0x3c] sm:$0x1]  ;;  %v1824_v45 = vld [vmem:[#allocation2 + $0x30] sm:$0xe] }
 0x1b9   : > { %v1909_v14 = vor.u32 %v1908_v4, %v1904_v3  ;;  %5987 = vmatmul.msk.bf16.gmra.mxu2 %vm1291_vm11, %v2508_v8  ;;  %v2009_v9 = vpack.c.b16 %v2001_v0, %v2001_v0  ;;  %v1913_v50 = vshll.u32 %v1866_v5, 16  ;;  %v2049_v16 = vpack.c.b16 %v2041_v29, %v2001_v0  ;;  %v6124_v3 = vld [vmem:[%s8306_s6 + $0x28] sm:$0xff] }
 0x1ba   : > { %v2145_v53 = vpack.c.b16 %v2041_v29, %v2137_v30  ;;  %v2232_v39 = vpack.c.b16 %v2224_v36, %v2184_v52  ;;  %v1962_v20 = vpack.c.b16 %v1857_v19, %v1954_v44  ;;  %v1911_v21 = vshrl.u32 %v1866_v5, 16  ;;  %2585 = vmatpush.bf16.msra.mxu1 %v6124_v3  ;;  %v6122_v29 = vld [vmem:[%s8306_s6 + $0x18] sm:$0xff] }
 0x1bb   : > { %1934 = vrot.lane.b32.xlu0 %v1909_v14, %s6302_s21  ;;  %v1915_v24 = vrot.slane %v1913_v50, 1  ;;  %v2090_v62 = vshll.u32 %v2049_v16, 16  ;;  %v2088_v13 = vshrl.u32 %v2049_v16, 16  ;;  %v1749_v50 = vld [vmem:[#allocation2 + $0x40] sm:$0xf]  ;;  %v2320_v16 = vunpack.c.l.b16 %v1824_v45 }
 0x1bc   : > { %2298 = vrot.lane.b32.xlu1 %v2263_v17, %s6312_s20  ;;  %v2153_v55 = vrot.slane %v2145_v53, 1  ;;  %v2267_v57 = vshll.u32 %v2232_v39, 16  ;;  %v1970_v61 = vrot.slane %v1962_v20, 1  ;;  %v2265_v52 = vshrl.u32 %v2232_v39, 16  ;;  %v1752_v53 = vld [vmem:[#allocation2 + $0x44] sm:$0x1] }
 0x1bd   : > { %v1916_v8 = vor.u32 %v1915_v24, %v1911_v21  ;;  %v2092_v19 = vrot.slane %v2090_v62, 1  ;;  %v7231_v24 = vpop.permute.xlu0 %1972 }
 0x1be   : > { %v2269_v14 = vrot.slane %v2267_v57, 1 }
 0x1c0   : > { %2116 = vrot.lane.b32.xlu2 %v2086_v40, %s6308_s26  ;;  %v2270_v54 = vor.u32 %v2269_v14, %v2265_v52  ;;  %v2093_v40 = vor.u32 %v2092_v19, %v2088_v13 }
 0x1c1   : > { %v7198_v4 = vpop.permute.xlu2 %1926 }
 0x1c2   : > { %v7181_v46 = vpop.f32.mrf.mxu0 }
 0x1c3   : > { %2204 = vrot.lane.b32.xlu0 %v2192_v41, %s6311_s18  ;;  %v1595_v12 = vmul.f32 %v7016_v28, %v7181_v46  ;;  %v1549_v41 = vld [vmem:[#allocation2 + $0x48] sm:$0x1] }
 0x1c4   : > { %2022 = vrot.lane.b32.xlu1 %v2009_v9, %s6305_s17  ;;  %v1550_v49 = vsel %vm6971_vm7, 0, %v1549_v41 }
 0x1c5   : > { %v1606_v1 = vadd.f32 %v7022_v34, %v1595_v12  ;;  %1551 = vst [vmem:[#allocation2 + $0x48] sm:$0x1] %v1550_v49 }
 0x1c7   : > { %v1614_v38 = vmax.f32 %v1606_v1, 0.0 }
 0x1c8   : > { %2166 = vrot.lane.b32.xlu2 %v2153_v55, %s6310_s27 }
 0x1c9   : > { %v1622_v58 = vpack.c.bf16 %v1614_v38, %v1614_v38  ;;  %v7222_v44 = vpop.permute.xlu2 %2196  ;;  %v6121_v38 = vld [vmem:[%s8306_s6 + $0x10] sm:$0xff] }
 0x1ca   : > { %v7201_v7 = vpop.f32.mrf.mxu0 }
 0x1cb   : > { %v1673_v2 = vshrl.u32 %v1622_v58, 16  ;;  %1984 = vrot.lane.b32.xlu0 %v1970_v61, %s6303_s23  ;;  %v1596_v10 = vmul.f32 %v7016_v28, %v7201_v7  ;;  %v1676_v32 = vshll.u32 %v1622_v58, 16  ;;  %v6123_v28 = vld [vmem:[%s8306_s6 + $0x20] sm:$0xff] }
 0x1cc   : > { %1936 = vrot.lane.b32.xlu1 %v1916_v8, %s6302_s21  ;;  %2586 = vmatpush.bf16.msra.mxu1 %v6123_v28 }
 0x1cd   : > { %v1675_v63 = vrot.slane %v1673_v2, 7  ;;  %v1607_v17 = vadd.f32 %v7022_v34, %v1596_v10 }
 0x1cf   : > { %v1678_v26 = vor.u32 %v1676_v32, %v1675_v63  ;;  %v1679_v56 = vrot.slane %v1675_v63, 4  ;;  %v1615_v59 = vmax.f32 %v1607_v17, 0.0  ;;  %v2328_v17 = vpack.c.b16 %v2224_v36, %v2320_v16 }
 0x1d0   : > { %2300 = vrot.lane.b32.xlu2 %v2270_v54, %s6312_s20  ;;  %2587 = vmatpush.bf16.msra.mxu1 %v6122_v29 }
 0x1d1   : > { %v1744_v0 = vsel %vm7036_vm9, %v1678_v26, %v1743_v18  ;;  %v1747_v34 = vsel %vm6971_vm7, %v1679_v56, %v1746_v22  ;;  %v1623_v5 = vpack.c.bf16 %v1615_v59, %v1615_v59  ;;  %v7244_v13 = vpop.permute.xlu2 %1976 }
 0x1d2   : > { %1745 = vst [vmem:[#allocation2 + $0x38] sm:$0xf] %v1744_v0 }
 0x1d3   : > { %1748 = vst [vmem:[#allocation2 + $0x3c] sm:$0x1] %v1747_v34  ;;  %v1681_v30 = vshrl.u32 %v1623_v5, 16  ;;  %2118 = vrot.lane.b32.xlu0 %v2093_v40, %s6308_s26  ;;  %v1684_v12 = vshll.u32 %v1623_v5, 16  ;;  %v2336_v5 = vrot.slane %v2328_v17, 1  ;;  %v7249_v40 = vpop.permute.xlu0 %2156 }
 0x1d4   : > { %v7226_v39 = vpop.permute.xlu1 %1974  ;;  %2588 = vmatpush.bf16.msra.mxu1 %v6121_v38 }
 0x1d5   : > { %v1683_v9 = vrot.slane %v1681_v30, 7  ;;  %v2480_v16 = vunpack.c.l.b16 %v2336_v5 }
 0x1d7   : > { %v1686_v1 = vor.u32 %v1684_v12, %v1683_v9  ;;  %v1687_v20 = vrot.slane %v1683_v9, 4  ;;  %v7253_v9 = vld [vmem:[#allocation2 + $0x4c] sm:$0x1]  ;;  %v6119_v12 = vld [vmem:[%s8306_s6] sm:$0xff] }
 0x1d8   : > { %2589 = vmatpush.bf16.msra.mxu1 %v6120_v31 }
 0x1d9   : > { %v1750_v55 = vsel %vm7036_vm9, %v1686_v1, %v1749_v50  ;;  %v1753_v57 = vsel %vm6971_vm7, %v1687_v20, %v1752_v53  ;;  %v1809_v58 = vld [vmem:[#allocation2 + $0x38] sm:$0xf]  ;;  %v1827_v20 = vld [vmem:[#allocation2 + $0x48] sm:$0xe] }
 0x1da   : > { %v1785_v61 = vld [vmem:[#allocation2 + $0x38] sm:$0xf]  ;;  %1751 = vst [vmem:[#allocation2 + $0x40] sm:$0xf] %v1750_v55  ;;  %v2185_v62 = vunpack.c.l.b16 %v1809_v58  ;;  %v1793_v2 = vld [vmem:[#allocation2 + $0x3c] sm:$0x1]  ;;  %v2227_v58 = vunpack.c.l.b16 %v7253_v9 }
 0x1db   : > { %v1801_v21 = vld [vmem:[#allocation2 + $0x38] sm:$0xe]  ;;  %v2002_v3 = vunpack.c.l.b16 %v1785_v61  ;;  %v1817_v10 = vld [vmem:[#allocation2 + $0x3c] sm:$0x1]  ;;  %1754 = vst [vmem:[#allocation2 + $0x44] sm:$0x1] %v1753_v57  ;;  %v2042_v14 = vunpack.c.l.b16 %v1793_v2 }
 0x1dc   : > { %v2138_v8 = vunpack.c.l.b16 %v1801_v21  ;;  %v1825_v63 = vld [vmem:[#allocation2 + $0x38] sm:$0xe]  ;;  %v2225_v32 = vunpack.c.l.b16 %v1817_v10  ;;  %v1770_v19 = vld [vmem:[#allocation2 + $0x3c] sm:$0x1]  ;;  %v2193_v18 = vpack.c.b16 %v2185_v62, %v2185_v62  ;;  %v7251_v29 = vpop.permute.xlu1 %2108  ;;  %2590 = vmatpush.bf16.msra.mxu1 %v6119_v12  ;;  %v6223_v9 = vld [vmem:[#allocation2] sm:$0xf] }
 0x1dd   : > { %v2010_v22 = vpack.c.b16 %v2002_v3, %v2002_v3  ;;  %v1778_v52 = vld [vmem:[#allocation2 + $0x38] sm:$0xe]  ;;  %v2321_v59 = vunpack.c.l.b16 %v1825_v63  ;;  %v1859_v28 = vunpack.c.l.b16 %v1770_v19  ;;  %v2050_v49 = vpack.c.b16 %v2042_v14, %v2002_v3 }
 0x1de   : > { %v7242_v26 = vld [vmem:[#allocation2 + $0x38] sm:$0xf]  ;;  %v2146_v56 = vpack.c.b16 %v2042_v14, %v2138_v8  ;;  %2206 = vrot.lane.b32.xlu1 %v2193_v18, %s6311_s18  ;;  %v1955_v54 = vunpack.c.l.b16 %v1778_v52  ;;  %v2233_v36 = vpack.c.b16 %v2225_v32, %v2185_v62  ;;  %v2323_v63 = vunpack.c.l.b16 %v1827_v20 }
 0x1df   : > { %2024 = vrot.lane.b32.xlu2 %v2010_v22, %s6305_s17  ;;  %v1858_v37 = vunpack.c.l.b16 %v7242_v26  ;;  %v2329_v34 = vpack.c.b16 %v2225_v32, %v2321_v59  ;;  %v2097_v3 = vshll.u32 %v2050_v49, 16  ;;  %v2342_v12 = vsel %vm1291_vm11, %v6223_v9, %v7208_v6 }
 0x1e0   : > { %v2154_v0 = vrot.slane %v2146_v56, 1  ;;  %v1963_v30 = vpack.c.b16 %v1859_v28, %v1955_v54  ;;  %v2274_v45 = vshll.u32 %v2233_v36, 16  ;;  %v2272_v10 = vshrl.u32 %v2233_v36, 16  ;;  %v7262_v56 = vpop.permute.xlu2 %2110  ;;  %v2015_v36 = vpop.permute.xlu0 %2014 }
 0x1e1   : > { %v1867_v41 = vpack.c.b16 %v1859_v28, %v1858_v37  ;;  %v2337_v50 = vrot.slane %v2329_v34, 1  ;;  %v1786_v1 = vld [vmem:[#allocation2 + $0x40] sm:$0xf]  ;;  %v2099_v59 = vrot.slane %v2097_v3, 1  ;;  %v2331_v54 = vpack.c.b16 %v2227_v58, %v2323_v63 }
 0x1e2   : > { %2168 = vrot.lane.b32.xlu0 %v2154_v0, %s6310_s27  ;;  %v2276_v31 = vrot.slane %v2274_v45, 1  ;;  %v1818_v55 = vld [vmem:[#allocation2 + $0x44] sm:$0x1]  ;;  %v1826_v57 = vld [vmem:[#allocation2 + $0x40] sm:$0xe]  ;;  %v1971_v61 = vrot.slane %v1963_v30, 1  ;;  %v2003_v14 = vunpack.c.l.b16 %v1786_v1 }
 0x1e3   : > { %v1920_v53 = vshll.u32 %v1867_v41, 16  ;;  %v2482_v38 = vunpack.c.l.b16 %v2337_v50  ;;  %v1918_v21 = vshrl.u32 %v1867_v41, 16  ;;  %v1794_v2 = vld [vmem:[#allocation2 + $0x44] sm:$0x1]  ;;  %v2226_v17 = vunpack.c.l.b16 %v1818_v55  ;;  %v1810_v52 = vld [vmem:[#allocation2 + $0x40] sm:$0xf] }
 0x1e4   : > { %v2322_v19 = vunpack.c.l.b16 %v1826_v57  ;;  %v2043_v18 = vunpack.c.l.b16 %v1794_v2  ;;  %v2277_v22 = vor.u32 %v2276_v31, %v2272_v10  ;;  %v1802_v37 = vld [vmem:[#allocation2 + $0x40] sm:$0xe]  ;;  %v2159_v0 = vpop.permute.xlu1 %2158  ;;  %v2095_v34 = vshrl.u32 %v2050_v49, 16  ;;  %v1811_v1 = vld [vmem:[#allocation2 + $0x48] sm:$0xf] }
 0x1e5   : > { %v1922_v62 = vrot.slane %v1920_v53, 1  ;;  %v2510_v8 = vpack.c.b16 %v2482_v38, %v2480_v16  ;;  %v2186_v5 = vunpack.c.l.b16 %v1810_v52  ;;  %v2139_v45 = vunpack.c.l.b16 %v1802_v37 }
 0x1e6   : > { %1986 = vrot.lane.b32.xlu1 %v1971_v61, %s6303_s23  ;;  %v2330_v28 = vpack.c.b16 %v2226_v17, %v2322_v19  ;;  %v2051_v30 = vpack.c.b16 %v2043_v18, %v2003_v14  ;;  %v2100_v41 = vor.u32 %v2099_v59, %v2095_v34  ;;  %v2339_v53 = vrot.slane %v2331_v54, 1  ;;  %v6224_v19 = vld [vmem:[#allocation2 + $0x8] sm:$0xf] }
 0x1e7   : > { %v1923_v32 = vor.u32 %v1922_v62, %v1918_v21  ;;  %5988 = vmatmul.msk.bf16.gmra.mxu2 %vm1291_vm11, %v2510_v8  ;;  %v2194_v20 = vpack.c.b16 %v2186_v5, %v2186_v5  ;;  %v2011_v38 = vpack.c.b16 %v2003_v14, %v2003_v14  ;;  %v2365_v31 = vsel %vm1325_vm13, %v2342_v12, %v7231_v24 }
 0x1e8   : > { %v2338_v50 = vrot.slane %v2330_v28, 1  ;;  %v2104_v16 = vshll.u32 %v2051_v30, 16  ;;  %v7271_v49 = vpop.permute.xlu2 %2160  ;;  %v2147_v55 = vpack.c.b16 %v2043_v18, %v2139_v45  ;;  %v2187_v57 = vunpack.c.l.b16 %v1811_v1  ;;  %v1929_v8 = vpop.permute.xlu0 %1928 }
 0x1e9   : > { %1938 = vrot.lane.b32.xlu2 %v1923_v32, %s6302_s21  ;;  %v2234_v61 = vpack.c.b16 %v2226_v17, %v2186_v5  ;;  %v2486_v21 = vunpack.c.l.b16 %v2339_v53  ;;  %v2381_v2 = vsel %vm1359_vm15, %v2365_v31, %v7177_v27  ;;  %v2102_v14 = vshrl.u32 %v2051_v30, 16 }
 0x1ea   : > { %2302 = vrot.lane.b32.xlu0 %v2277_v22, %s6312_s20  ;;  %v2484_v6 = vunpack.c.l.b16 %v2338_v50  ;;  %v2106_v62 = vrot.slane %v2104_v16, 1  ;;  %v2235_v3 = vpack.c.b16 %v2227_v58, %v2187_v57  ;;  %v2155_v24 = vrot.slane %v2147_v55, 1 }
 0x1eb   : > { %v2281_v63 = vshll.u32 %v2234_v61, 16  ;;  %v2345_v17 = vsel %vm1291_vm11, %v6224_v19, %v7198_v4  ;;  %v2397_v18 = vsel %vm1393_vm1, %v2381_v2, %v7251_v29  ;;  %v2195_v52 = vpack.c.b16 %v2187_v57, %v2187_v57 }
 0x1ec   : > { %v2293_v10 = vpop.permute.xlu1 %2292  ;;  %v2288_v32 = vshll.u32 %v2235_v3, 16  ;;  %v2512_v22 = vpack.c.b16 %v2486_v21, %v2484_v6  ;;  %v2367_v58 = vsel %vm1325_vm13, %v2345_v17, %v7226_v39  ;;  %v2107_v27 = vor.u32 %v2106_v62, %v2102_v14 }
 0x1ed   : > { %v2383_v59 = vsel %vm1359_vm15, %v2367_v58, %v2015_v36  ;;  %v2414_v28 = vsel %vm2412_vm10, %v2397_v18, %v7249_v40  ;;  %v2283_v4 = vrot.slane %v2281_v63, 1  ;;  %v2286_v29 = vshrl.u32 %v2235_v3, 16  ;;  %v6225_v3 = vld [vmem:[#allocation2 + $0x10] sm:$0xf] }
 0x1ee   : > { %2120 = vrot.lane.b32.xlu1 %v2100_v41, %s6308_s26  ;;  %v2290_v54 = vrot.slane %v2288_v32, 1  ;;  %v2279_v37 = vshrl.u32 %v2234_v61, 16  ;;  %v2399_v34 = vsel %vm1393_vm1, %v2383_v59, %v7262_v56  ;;  %v2431_v36 = vsel %vm2429_vm12, %v2414_v28, %v7222_v44 }
 0x1ef   : > { %v2416_v5 = vsel %vm2412_vm10, %v2399_v34, %v2159_v0  ;;  %v2448_v40 = vsel %vm2446_vm14, %v2431_v36, %v2293_v10  ;;  %v2348_v2 = vsel %vm1291_vm11, %v6225_v3, %v1929_v8 }
 0x1f0   : > { %v2295_v39 = vpop.permute.xlu2 %2294  ;;  %v2284_v45 = vor.u32 %v2283_v4, %v2279_v37  ;;  %v2291_v9 = vor.u32 %v2290_v54, %v2286_v29  ;;  %v2471_v53 = vunpack.c.l.b16 %v2448_v40  ;;  %v2369_v14 = vsel %vm1325_vm13, %v2348_v2, %v7244_v13 }
 0x1f1   : > { %2208 = vrot.lane.b32.xlu2 %v2194_v20, %s6311_s18 }
 0x1f2   : > { %2026 = vrot.lane.b32.xlu0 %v2011_v38, %s6305_s17 }
 0x1f6   : > { %2170 = vrot.lane.b32.xlu1 %v2155_v24, %s6310_s27 }
 0x1f7   : > { %5989 = vmatmul.msk.bf16.gmra.mxu2 %vm1291_vm11, %v2512_v22 }
 0x1f8   : > { %v2019_v44 = vpop.permute.xlu2 %2018 }
 0x1f9   : > { %2122 = vrot.lane.b32.xlu2 %v2107_v27, %s6308_s26 }
 0x1fa   : > { %2210 = vrot.lane.b32.xlu0 %v2195_v52, %s6311_s18  ;;  %v2199_v30 = vpop.permute.xlu0 %2198 }
 0x1fb   : > { %v2017_v41 = vpop.permute.xlu1 %2016  ;;  %v2433_v12 = vsel %vm2429_vm12, %v2416_v5, %v2199_v30 }
 0x1fc   : > { %v2450_v50 = vsel %vm2446_vm14, %v2433_v12, %v2295_v39  ;;  %v2385_v32 = vsel %vm1359_vm15, %v2369_v14, %v2017_v41 }
 0x1fd   : > { %v2473_v1 = vunpack.c.l.b16 %v2450_v50 }
 0x1fe   : > { %2304 = vrot.lane.b32.xlu1 %v2284_v45, %s6312_s20 }
 0x1ff   : > { %v2505_v56 = vpack.c.b16 %v2473_v1, %v2471_v53 }
 0x200   : > { %v1933_v31 = vpop.permute.xlu2 %1932 }
 0x201   : > { %2306 = vrot.lane.b32.xlu2 %v2291_v9, %s6312_s20  ;;  %2591 = vmatmul.bf16.vlgmr.msra.gmra.mxu1 %v2505_v56  ;;  %v2354_v45 = vsel %vm1291_vm11, %v7111_v51, %v1933_v31 }
 0x202   : > { %v1979_v0 = vpop.permute.xlu0 %1978 }
 0x205   : > { %v1931_v20 = vpop.permute.xlu1 %1930 }
 0x206   : > { %v2351_v10 = vsel %vm1291_vm11, %v7101_v35, %v1931_v20 }
 0x207   : > { %v2371_v63 = vsel %vm1325_vm13, %v2351_v10, %v1979_v0 }
 0x208   : > { %v2387_v18 = vsel %vm1359_vm15, %v2371_v63, %v2019_v44 }
 0x20a   : > { %v2113_v16 = vpop.permute.xlu0 %2112  ;;  %v2203_v61 = vpop.permute.xlu2 %2202 }
 0x20b   : > { %v2401_v19 = vsel %vm1393_vm1, %v2385_v32, %v2113_v16 }
 0x20c   : > { %v2418_v8 = vsel %vm2412_vm10, %v2401_v19, %v7271_v49 }
 0x20d   : > { %v2201_v38 = vpop.permute.xlu1 %2200 }
 0x20e   : > { %v2435_v58 = vsel %vm2429_vm12, %v2418_v8, %v2201_v38 }
 0x212   : > { %v2163_v55 = vpop.permute.xlu0 %2162  ;;  %v1983_v62 = vpop.permute.xlu2 %1982 }
 0x215   : > { %v1981_v57 = vpop.permute.xlu1 %1980 }
 0x216   : > { %v2373_v9 = vsel %vm1325_vm13, %v2354_v45, %v1981_v57 }
 0x21a   : > { %v2297_v6 = vpop.permute.xlu0 %2296  ;;  %v2117_v52 = vpop.permute.xlu2 %2116 }
 0x21b   : > { %v2452_v27 = vsel %vm2446_vm14, %v2435_v58, %v2297_v6 }
 0x21c   : > { %v2475_v29 = vunpack.c.l.b16 %v2452_v27 }
 0x21d   : > { %v2115_v21 = vpop.permute.xlu1 %2114 }
 0x21e   : > { %v2403_v22 = vsel %vm1393_vm1, %v2387_v18, %v2115_v21 }
 0x21f   : > { %v2420_v35 = vsel %vm2412_vm10, %v2403_v22, %v2163_v55 }
 0x220   : > { %v2437_v59 = vsel %vm2429_vm12, %v2420_v35, %v2203_v61 }
 0x222   : > { %v2167_v37 = vpop.permute.xlu2 %2166 }
 0x223   : > { %v2021_v24 = vpop.permute.xlu0 %2020 }
 0x224   : > { %v2389_v12 = vsel %vm1359_vm15, %v2373_v9, %v2021_v24 }
 0x225   : > { %v2405_v56 = vsel %vm1393_vm1, %v2389_v12, %v2117_v52 }
 0x226   : > { %v2165_v17 = vpop.permute.xlu1 %2164 }
 0x227   : > { %v2422_v20 = vsel %vm2412_vm10, %v2405_v56, %v2165_v17  ;;  %v2621_v56 = vpop.f32.mrf.mxu2 }
 0x22a   : > { %v2301_v49 = vpop.permute.xlu2 %2300 }
 0x22d   : > { %v1935_v13 = vpop.permute.xlu0 %1934 }
 0x22e   : > { %v2299_v28 = vpop.permute.xlu1 %2298  ;;  %v2357_v1 = vsel %vm1291_vm11, %v7155_v43, %v1935_v13 }
 0x22f   : > { %v2454_v4 = vsel %vm2446_vm14, %v2437_v59, %v2299_v28  ;;  %v2375_v0 = vsel %vm1325_vm13, %v2357_v1, %v1983_v62 }
 0x230   : > { %v2477_v54 = vunpack.c.l.b16 %v2454_v4 }
 0x232   : > { %v2507_v39 = vpack.c.b16 %v2477_v54, %v2475_v29 }
 0x234   : > { %2596 = vmatmul.bf16.gmra.mxu1 %v2507_v39 }
 0x235   : > { %v2205_v34 = vpop.permute.xlu0 %2204 }
 0x236   : > { %v2023_v36 = vpop.permute.xlu1 %2022  ;;  %v2439_v51 = vsel %vm2429_vm12, %v2422_v20, %v2205_v34  ;;  %v2808_v34 = vld [vmem:[#allocation2] sm:$0xf] }
 0x237   : > { %v2391_v16 = vsel %vm1359_vm15, %v2375_v0, %v2023_v36  ;;  %v2456_v61 = vsel %vm2446_vm14, %v2439_v51, %v2301_v49  ;;  %v2896_v36 = vunpack.c.l.b16 %v2808_v34 }
 0x238   : > { %v2479_v3 = vunpack.c.l.b16 %v2456_v61 }
 0x239   : > { %v2025_v40 = vpop.permute.xlu2 %2024 }
 0x23d   : > { %v1985_v5 = vpop.permute.xlu0 %1984 }
 0x23e   : > { %v1937_v30 = vpop.permute.xlu1 %1936 }
 0x23f   : > { %v2360_v24 = vsel %vm1291_vm11, %v7165_v11, %v1937_v30  ;;  %v2824_v30 = vld [vmem:[#allocation2] sm:$0xe] }
 0x240   : > { %v2377_v18 = vsel %vm1325_vm13, %v2360_v24, %v1985_v5 }
 0x241   : > { %v2393_v52 = vsel %vm1359_vm15, %v2377_v18, %v2025_v40 }
 0x243   : > { %v1939_v50 = vpop.permute.xlu2 %1938 }
 0x244   : > { %v2363_v14 = vsel %vm1291_vm11, %v7242_v26, %v1939_v50 }
 0x245   : > { %v2119_v41 = vpop.permute.xlu0 %2118 }
 0x246   : > { %v2407_v38 = vsel %vm1393_vm1, %v2391_v16, %v2119_v41  ;;  %v3000_v41 = vunpack.c.l.b16 %v2824_v30  ;;  %v7359_v16 = vld [vmem:[%s8308_s8] ss:$0 sm:$0xff] }
 0x247   : > { %v2424_v57 = vsel %vm2412_vm10, %v2407_v38, %v2167_v37  ;;  %v2816_v37 = vld [vmem:[#allocation2 + $0x4] sm:$0x1] }
 0x248   : > { %v2897_v49 = vunpack.c.l.b16 %v2816_v37 }
 0x24a   : > { %v2912_v40 = vpack.c.b16 %v2897_v49, %v2896_v36  ;;  %v3008_v9 = vpack.c.b16 %v2897_v49, %v3000_v41 }
 0x24b   : > { %v2209_v55 = vpop.permute.xlu2 %2208 }
 0x24c   : > { %v2923_v45 = vshll.u32 %v2912_v40, 16  ;;  %v2921_v12 = vshrl.u32 %v2912_v40, 16 }
 0x24e   : > { %v2925_v50 = vrot.slane %v2923_v45, 1 }
 0x250   : > { %v2207_v53 = vpop.permute.xlu1 %2206  ;;  %v2926_v1 = vor.u32 %v2925_v50, %v2921_v12 }
 0x251   : > { %v2441_v43 = vsel %vm2429_vm12, %v2424_v57, %v2207_v53  ;;  %v3016_v53 = vrot.slane %v3008_v9, 1 }
 0x252   : > { %2976 = vrot.lane.b32.xlu0 %v2926_v1, %s6302_s21 }
 0x253   : > { %v2123_v32 = vpop.permute.xlu2 %2122  ;;  %3024 = vrot.lane.b32.xlu2 %v3016_v53, %s6303_s23 }
 0x254   : > { %v2169_v44 = vpop.permute.xlu0 %2168 }
 0x258   : > { %v1987_v31 = vpop.permute.xlu1 %1986 }
 0x259   : > { %v2379_v19 = vsel %vm1325_vm13, %v2363_v14, %v1987_v31 }
 0x25b   : > { %v2307_v13 = vpop.permute.xlu2 %2306 }
 0x25c   : > { %v2303_v6 = vpop.permute.xlu0 %2302 }
 0x25d   : > { %v2458_v21 = vsel %vm2446_vm14, %v2441_v43, %v2303_v6 }
 0x25e   : > { %v2481_v62 = vunpack.c.l.b16 %v2458_v21 }
 0x260   : > { %v2509_v2 = vpack.c.b16 %v2481_v62, %v2479_v3  ;;  %v2121_v10 = vpop.permute.xlu1 %2120 }
 0x261   : > { %v2409_v11 = vsel %vm1393_vm1, %v2393_v52, %v2121_v10 }
 0x262   : > { %2601 = vmatmul.bf16.gmra.mxu1 %v2509_v2  ;;  %v2426_v27 = vsel %vm2412_vm10, %v2409_v11, %v2169_v44  ;;  %v7354_v44 = vld [vmem:[%s8307_s7] ss:$0 sm:$0xff] }
 0x263   : > { %v2443_v28 = vsel %vm2429_vm12, %v2426_v27, %v2209_v55  ;;  %v2623_v55 = vpop.f32.mrf.mxu2 }
 0x264   : > { %v2027_v63 = vpop.permute.xlu0 %2026 }
 0x265   : > { %v2395_v17 = vsel %vm1359_vm15, %v2379_v19, %v2027_v63  ;;  %v2763_v63 = vld [vmem:[#allocation2 + $0xc] sm:$0x1] }
 0x266   : > { %v2411_v22 = vsel %vm1393_vm1, %v2395_v17, %v2123_v32  ;;  %v6226_v32 = vld [vmem:[#allocation2 + $0x8] sm:$0xf] }
 0x268   : > { %v2171_v8 = vpop.permute.xlu1 %2170 }
 0x269   : > { %v2428_v35 = vsel %vm2412_vm10, %v2411_v22, %v2171_v8 }
 0x26c   : > { %v2211_v58 = vpop.permute.xlu0 %2210 }
 0x26d   : > { %v2445_v26 = vsel %vm2429_vm12, %v2428_v35, %v2211_v58  ;;  %v2766_v58 = vld [vmem:[#allocation2 + $0x10] sm:$0xf] }
 0x26e   : > { %v2462_v59 = vsel %vm2446_vm14, %v2445_v26, %v2307_v13  ;;  %v2769_v26 = vld [vmem:[#allocation2 + $0x14] sm:$0x1] }
 0x26f   : > { %v2485_v54 = vunpack.c.l.b16 %v2462_v59 }
 0x270   : > { %v2305_v4 = vpop.permute.xlu1 %2304 }
 0x271   : > { %v2460_v29 = vsel %vm2446_vm14, %v2443_v28, %v2305_v4 }
 0x272   : > { %v2483_v39 = vunpack.c.l.b16 %v2460_v29 }
 0x274   : > { %v2511_v5 = vpack.c.b16 %v2485_v54, %v2483_v39 }
 0x276   : > { %2606 = vmatmul.bf16.gmra.mxu1 %v2511_v5 }
 0x27e   : > { %v2592_v0 = vpop.f32.mrf.mxu1 }
 0x27f   : > { %v2622_v20 = vadd.f32 %v2621_v56, %v2592_v0 }
 0x281   : > { %v2646_v51 = vmul.f32 %v7354_v44, %v2622_v20 }
 0x283   : > { %v2657_v38 = vadd.f32 %v7359_v16, %v2646_v51 }
 0x285   : > { %v2665_v31 = vmax.f32 %v2657_v38, 0.0 }
 0x286   : > { %v2594_v57 = vpop.f32.mrf.mxu1 }
 0x287   : > { %v2673_v61 = vpack.c.bf16 %v2665_v31, %v2665_v31  ;;  %v2624_v43 = vadd.f32 %v2623_v55, %v2594_v57 }
 0x289   : > { %v2682_v6 = vshrl.u32 %v2673_v61, 16  ;;  %v2647_v21 = vmul.f32 %v7354_v44, %v2624_v43  ;;  %v2685_v3 = vshll.u32 %v2673_v61, 16 }
 0x28b   : > { %v2684_v62 = vrot.slane %v2682_v6, 7  ;;  %v2658_v2 = vadd.f32 %v7359_v16, %v2647_v21 }
 0x28d   : > { %v2687_v10 = vor.u32 %v2685_v3, %v2684_v62  ;;  %v2688_v24 = vrot.slane %v2684_v62, 4  ;;  %v2666_v14 = vmax.f32 %v2658_v2, 0.0 }
 0x28f   : > { %v2761_v19 = vsel %vm7036_vm9, %v2687_v10, %v6226_v32  ;;  %v2764_v17 = vsel %vm6971_vm7, %v2688_v24, %v2763_v63  ;;  %v2674_v18 = vpack.c.bf16 %v2666_v14, %v2666_v14 }
 0x290   : > { %2762 = vst [vmem:[#allocation2 + $0x8] sm:$0xf] %v2761_v19 }
 0x291   : > { %2765 = vst [vmem:[#allocation2 + $0xc] sm:$0x1] %v2764_v17  ;;  %v2690_v22 = vshrl.u32 %v2674_v18, 16  ;;  %v2693_v52 = vshll.u32 %v2674_v18, 16 }
 0x293   : > { %v2692_v8 = vrot.slane %v2690_v22, 7 }
 0x295   : > { %v2695_v35 = vor.u32 %v2693_v52, %v2692_v8  ;;  %v2696_v11 = vrot.slane %v2692_v8, 4 }
 0x297   : > { %v2767_v13 = vsel %vm7036_vm9, %v2695_v35, %v2766_v58  ;;  %v2770_v27 = vsel %vm6971_vm7, %v2696_v11, %v2769_v26  ;;  %v2832_v59 = vld [vmem:[#allocation2 + $0x8] sm:$0xf] }
 0x298   : > { %v2848_v28 = vld [vmem:[#allocation2 + $0x8] sm:$0xe]  ;;  %2771 = vst [vmem:[#allocation2 + $0x14] sm:$0x1] %v2770_v27  ;;  %v3048_v29 = vunpack.c.l.b16 %v2832_v59  ;;  %v2840_v54 = vld [vmem:[#allocation2 + $0xc] sm:$0x1] }
 0x299   : > { %v2825_v4 = vld [vmem:[#allocation2 + $0x8] sm:$0xe]  ;;  %v3184_v39 = vunpack.c.l.b16 %v2848_v28  ;;  %v2817_v37 = vld [vmem:[#allocation2 + $0xc] sm:$0x1]  ;;  %2768 = vst [vmem:[#allocation2 + $0x10] sm:$0xf] %v2767_v13  ;;  %v3088_v49 = vunpack.c.l.b16 %v2840_v54 }
 0x29a   : > { %v3001_v34 = vunpack.c.l.b16 %v2825_v4  ;;  %v2899_v36 = vunpack.c.l.b16 %v2817_v37  ;;  %v2809_v5 = vld [vmem:[#allocation2 + $0x8] sm:$0xf]  ;;  %v3056_v40 = vpack.c.b16 %v3048_v29, %v3048_v29  ;;  %v2626_v4 = vpop.f32.mrf.mxu2 }
 0x29b   : > { %v2898_v30 = vunpack.c.l.b16 %v2809_v5  ;;  %v3192_v41 = vpack.c.b16 %v3088_v49, %v3184_v39  ;;  %v3096_v9 = vpack.c.b16 %v3088_v49, %v3048_v29  ;;  %v6136_v5 = vld [vmem:[%s8309_s9 + $0x40] sm:$0xff] }
 0x29c   : > { %v3009_v45 = vpack.c.b16 %v2899_v36, %v3001_v34  ;;  %3064 = vrot.lane.b32.xlu1 %v3056_v40, %s6305_s17  ;;  %3668 = vmatpush.bf16.msrb.mxu2 %v6136_v5 }
 0x29d   : > { %v2913_v12 = vpack.c.b16 %v2899_v36, %v2898_v30  ;;  %v3200_v50 = vrot.slane %v3192_v41, 1  ;;  %v3107_v1 = vshll.u32 %v3096_v9, 16  ;;  %v3105_v57 = vshrl.u32 %v3096_v9, 16 }
 0x29e   : > { %v3017_v53 = vrot.slane %v3009_v45, 1 }
 0x29f   : > { %v2930_v56 = vshll.u32 %v2913_v12, 16  ;;  %3208 = vrot.lane.b32.xlu2 %v3200_v50, %s6310_s27  ;;  %v2818_v0 = vld [vmem:[#allocation2 + $0x14] sm:$0x1]  ;;  %v2928_v20 = vshrl.u32 %v2913_v12, 16  ;;  %v3109_v38 = vrot.slane %v3107_v1, 1 }
 0x2a0   : > { %3026 = vrot.lane.b32.xlu0 %v3017_v53, %s6303_s23  ;;  %v2833_v31 = vld [vmem:[#allocation2 + $0x10] sm:$0xf]  ;;  %v2901_v55 = vunpack.c.l.b16 %v2818_v0  ;;  %v2841_v43 = vld [vmem:[#allocation2 + $0x14] sm:$0x1] }
 0x2a1   : > { %v2932_v51 = vrot.slane %v2930_v56, 1  ;;  %v3049_v61 = vunpack.c.l.b16 %v2833_v31  ;;  %v2810_v6 = vld [vmem:[#allocation2 + $0x10] sm:$0xf]  ;;  %v7376_v10 = vld [vmem:[#allocation2 + $0x14] sm:$0x1]  ;;  %v3110_v24 = vor.u32 %v3109_v38, %v3105_v57  ;;  %v3089_v14 = vunpack.c.l.b16 %v2841_v43 }
 0x2a2   : > { %v2856_v62 = vld [vmem:[#allocation2 + $0x10] sm:$0xf]  ;;  %v2900_v2 = vunpack.c.l.b16 %v2810_v6  ;;  %v3272_v18 = vunpack.c.l.b16 %v7376_v10  ;;  %v2628_v50 = vpop.f32.mrf.mxu2 }
 0x2a3   : > { %v2933_v21 = vor.u32 %v2932_v51, %v2928_v20  ;;  %v2849_v3 = vld [vmem:[#allocation2 + $0x10] sm:$0xe]  ;;  %v3057_v32 = vpack.c.b16 %v3049_v61, %v3049_v61  ;;  %v3232_v19 = vunpack.c.l.b16 %v2856_v62  ;;  %v3097_v54 = vpack.c.b16 %v3089_v14, %v3049_v61  ;;  %v2775_v62 = vld [vmem:[#allocation2 + $0x1c] sm:$0x1] }
 0x2a4   : > { %v2914_v63 = vpack.c.b16 %v2901_v55, %v2900_v2  ;;  %v3185_v17 = vunpack.c.l.b16 %v2849_v3  ;;  %v2826_v8 = vld [vmem:[#allocation2 + $0x10] sm:$0xe] }
 0x2a5   : > { %2978 = vrot.lane.b32.xlu1 %v2933_v21, %s6302_s21  ;;  %v3280_v11 = vpack.c.b16 %v3272_v18, %v3232_v19  ;;  %v3240_v58 = vpack.c.b16 %v3232_v19, %v3232_v19  ;;  %v3002_v26 = vunpack.c.l.b16 %v2826_v8  ;;  %v3114_v36 = vshll.u32 %v3097_v54, 16  ;;  %v2772_v21 = vld [vmem:[#allocation2 + $0x18] sm:$0xf] }
 0x2a6   : > { %v2937_v22 = vshll.u32 %v2914_v63, 16  ;;  %v3193_v52 = vpack.c.b16 %v3089_v14, %v3185_v17  ;;  %v2935_v13 = vshrl.u32 %v2914_v63, 16  ;;  %v3112_v1 = vshrl.u32 %v3097_v54, 16  ;;  %v2872_v63 = vld [vmem:[#allocation2 + $0x10] sm:$0xe] }
 0x2a7   : > { %3066 = vrot.lane.b32.xlu2 %v3057_v32, %s6305_s17  ;;  %v3291_v28 = vshll.u32 %v3280_v11, 16  ;;  %v3010_v29 = vpack.c.b16 %v2901_v55, %v3002_v26  ;;  %v3289_v30 = vshrl.u32 %v3280_v11, 16  ;;  %v3116_v9 = vrot.slane %v3114_v36, 1 }
 0x2a8   : > { %3160 = vrot.lane.b32.xlu0 %v3110_v24, %s6308_s26  ;;  %v2939_v35 = vrot.slane %v2937_v22, 1  ;;  %v3201_v27 = vrot.slane %v3193_v52, 1  ;;  %v3368_v17 = vunpack.c.l.b16 %v2872_v63  ;;  %v2778_v52 = vld [vmem:[#allocation2 + $0x20] sm:$0xf] }
 0x2a9   : > { %v3293_v34 = vrot.slane %v3291_v28, 1  ;;  %v3018_v49 = vrot.slane %v3010_v29, 1  ;;  %v3117_v20 = vor.u32 %v3116_v9, %v3112_v1 }
 0x2aa   : > { %v2940_v59 = vor.u32 %v2939_v35, %v2935_v13  ;;  %v2781_v35 = vld [vmem:[#allocation2 + $0x24] sm:$0x1]  ;;  %v3376_v54 = vpack.c.b16 %v3272_v18, %v3368_v17 }
 0x2ab   : > { %v3294_v45 = vor.u32 %v3293_v34, %v3289_v30 }
 0x2ac   : > { %v3384_v10 = vrot.slane %v3376_v54, 1 }
 0x2ad   : > { %3248 = vrot.lane.b32.xlu1 %v3240_v58, %s6311_s18 }
 0x2af   : > { %2980 = vrot.lane.b32.xlu2 %v2940_v59, %s6302_s21 }
 0x2b0   : > { %3210 = vrot.lane.b32.xlu0 %v3201_v27, %s6310_s27 }
 0x2b1   : > { %v2597_v39 = vpop.f32.mrf.mxu1 }
 0x2b2   : > { %v2627_v37 = vadd.f32 %v2626_v4, %v2597_v39 }
 0x2b4   : > { %v2648_v40 = vmul.f32 %v7354_v44, %v2627_v37 }
 0x2b5   : > { %3028 = vrot.lane.b32.xlu1 %v3018_v49, %s6303_s23 }
 0x2b6   : > { %v2659_v41 = vadd.f32 %v7359_v16, %v2648_v40 }
 0x2b8   : > { %v2667_v12 = vmax.f32 %v2659_v41, 0.0  ;;  %3344 = vrot.lane.b32.xlu0 %v3294_v45, %s6312_s20 }
 0x2b9   : > { %v2599_v53 = vpop.f32.mrf.mxu1 }
 0x2ba   : > { %v2675_v56 = vpack.c.bf16 %v2667_v12, %v2667_v12  ;;  %v2629_v0 = vadd.f32 %v2628_v50, %v2599_v53 }
 0x2bc   : > { %v2698_v51 = vshrl.u32 %v2675_v56, 16  ;;  %v2649_v38 = vmul.f32 %v7354_v44, %v2629_v0  ;;  %v2701_v55 = vshll.u32 %v2675_v56, 16 }
 0x2bd   : > { %3162 = vrot.lane.b32.xlu1 %v3117_v20, %s6308_s26 }
 0x2be   : > { %v2700_v31 = vrot.slane %v2698_v51, 7  ;;  %v2660_v57 = vadd.f32 %v7359_v16, %v2649_v38 }
 0x2c0   : > { %v2703_v61 = vor.u32 %v2701_v55, %v2700_v31  ;;  %v2704_v43 = vrot.slane %v2700_v31, 4  ;;  %v2668_v6 = vmax.f32 %v2660_v57, 0.0  ;;  %v3521_v57 = vunpack.c.l.b16 %v3384_v10 }
 0x2c2   : > { %v2773_v3 = vsel %vm7036_vm9, %v2703_v61, %v2772_v21  ;;  %v2776_v2 = vsel %vm6971_vm7, %v2704_v43, %v2775_v62  ;;  %v2676_v24 = vpack.c.bf16 %v2668_v6, %v2668_v6 }
 0x2c3   : > { %2777 = vst [vmem:[#allocation2 + $0x1c] sm:$0x1] %v2776_v2 }
 0x2c4   : > { %2774 = vst [vmem:[#allocation2 + $0x18] sm:$0xf] %v2773_v3  ;;  %v2706_v14 = vshrl.u32 %v2676_v24, 16  ;;  %v2709_v19 = vshll.u32 %v2676_v24, 16 }
 0x2c6   : > { %v2708_v32 = vrot.slane %v2706_v14, 7 }
 0x2c8   : > { %v2711_v22 = vor.u32 %v2709_v19, %v2708_v32  ;;  %v2712_v8 = vrot.slane %v2708_v32, 4 }
 0x2ca   : > { %v2779_v11 = vsel %vm7036_vm9, %v2711_v22, %v2778_v52  ;;  %v2782_v58 = vsel %vm6971_vm7, %v2712_v8, %v2781_v35  ;;  %v2842_v26 = vld [vmem:[#allocation2 + $0x1c] sm:$0x1] }
 0x2cb   : > { %v2865_v13 = vld [vmem:[#allocation2 + $0x1c] sm:$0x1]  ;;  %2783 = vst [vmem:[#allocation2 + $0x24] sm:$0x1] %v2782_v58  ;;  %v2857_v59 = vld [vmem:[#allocation2 + $0x18] sm:$0xf]  ;;  %v3090_v4 = vunpack.c.l.b16 %v2842_v26 }
 0x2cc   : > { %v2819_v27 = vld [vmem:[#allocation2 + $0x1c] sm:$0x1]  ;;  %v2834_v28 = vld [vmem:[#allocation2 + $0x18] sm:$0xf]  ;;  %v3273_v29 = vunpack.c.l.b16 %v2865_v13  ;;  %2780 = vst [vmem:[#allocation2 + $0x20] sm:$0xf] %v2779_v11  ;;  %v3233_v39 = vunpack.c.l.b16 %v2857_v59  ;;  %v2631_v13 = vpop.f32.mrf.mxu2 }
 0x2cd   : > { %v3050_v37 = vunpack.c.l.b16 %v2834_v28  ;;  %v2850_v34 = vld [vmem:[#allocation2 + $0x18] sm:$0xe]  ;;  %v2903_v36 = vunpack.c.l.b16 %v2819_v27 }
 0x2ce   : > { %v2873_v49 = vld [vmem:[#allocation2 + $0x18] sm:$0xe]  ;;  %v3186_v5 = vunpack.c.l.b16 %v2850_v34  ;;  %v3241_v45 = vpack.c.b16 %v3233_v39, %v3233_v39  ;;  %v3281_v18 = vpack.c.b16 %v3273_v29, %v3233_v39 }
 0x2cf   : > { %v3369_v40 = vunpack.c.l.b16 %v2873_v49  ;;  %v2827_v30 = vld [vmem:[#allocation2 + $0x18] sm:$0xe]  ;;  %v3058_v9 = vpack.c.b16 %v3050_v37, %v3050_v37  ;;  %v3098_v0 = vpack.c.b16 %v3090_v4, %v3050_v37 }
 0x2d0   : > { %v7407_v41 = vld [vmem:[#allocation2 + $0x18] sm:$0xf]  ;;  %v3003_v12 = vunpack.c.l.b16 %v2827_v30  ;;  %v3194_v53 = vpack.c.b16 %v3090_v4, %v3186_v5  ;;  %3250 = vrot.lane.b32.xlu2 %v3241_v45, %s6311_s18  ;;  %v3298_v31 = vshll.u32 %v3281_v18, 16  ;;  %v3296_v19 = vshrl.u32 %v3281_v18, 16 }
 0x2d1   : > { %v2902_v50 = vunpack.c.l.b16 %v7407_v41  ;;  %v3377_v1 = vpack.c.b16 %v3273_v29, %v3369_v40  ;;  %3068 = vrot.lane.b32.xlu0 %v3058_v9, %s6305_s17  ;;  %v3121_v2 = vshll.u32 %v3098_v0, 16  ;;  %v3119_v28 = vshrl.u32 %v3098_v0, 16 }
 0x2d2   : > { %v3202_v20 = vrot.slane %v3194_v53, 1  ;;  %v3011_v38 = vpack.c.b16 %v2903_v36, %v3003_v12  ;;  %v3300_v3 = vrot.slane %v3298_v31, 1  ;;  %v2820_v63 = vld [vmem:[#allocation2 + $0x24] sm:$0x1] }
 0x2d3   : > { %v2915_v56 = vpack.c.b16 %v2903_v36, %v2902_v50  ;;  %v3385_v51 = vrot.slane %v3377_v1, 1  ;;  %v2858_v14 = vld [vmem:[#allocation2 + $0x20] sm:$0xf]  ;;  %v2843_v8 = vld [vmem:[#allocation2 + $0x24] sm:$0x1]  ;;  %v2905_v52 = vunpack.c.l.b16 %v2820_v63  ;;  %v3123_v11 = vrot.slane %v3121_v2, 1 }
 0x2d4   : > { %3212 = vrot.lane.b32.xlu1 %v3202_v20, %s6310_s27  ;;  %v3019_v62 = vrot.slane %v3011_v38, 1  ;;  %v7413_v32 = vld [vmem:[#allocation2 + $0x20] sm:$0xf]  ;;  %v3301_v17 = vor.u32 %v3300_v3, %v3296_v19  ;;  %v3234_v22 = vunpack.c.l.b16 %v2858_v14  ;;  %v7420_v59 = vld [vmem:[#allocation2 + $0x24] sm:$0x1]  ;;  %v3091_v4 = vunpack.c.l.b16 %v2843_v8 }
 0x2d5   : > { %v2944_v55 = vshll.u32 %v2915_v56, 16  ;;  %v3523_v61 = vunpack.c.l.b16 %v3385_v51  ;;  %v2942_v43 = vshrl.u32 %v2915_v56, 16  ;;  %v2904_v35 = vunpack.c.l.b16 %v7413_v32  ;;  %v2835_v58 = vld [vmem:[#allocation2 + $0x20] sm:$0xf]  ;;  %v2633_v56 = vpop.f32.mrf.mxu2 }
 0x2d6   : > { %v2851_v26 = vld [vmem:[#allocation2 + $0x20] sm:$0xe]  ;;  %v3242_v29 = vpack.c.b16 %v3234_v22, %v3234_v22  ;;  %v3051_v39 = vunpack.c.l.b16 %v2835_v58  ;;  %v3124_v49 = vor.u32 %v3123_v11, %v3119_v28  ;;  %v3274_v40 = vunpack.c.l.b16 %v7420_v59  ;;  %v2787_v11 = vld [vmem:[#allocation2 + $0x2c] sm:$0x1] }
 0x2d7   : > { %v2946_v6 = vrot.slane %v2944_v55, 1  ;;  %v3555_v21 = vpack.c.b16 %v3523_v61, %v3521_v57  ;;  %v2828_v27 = vld [vmem:[#allocation2 + $0x20] sm:$0xe]  ;;  %v3187_v37 = vunpack.c.l.b16 %v2851_v26  ;;  %v2916_v34 = vpack.c.b16 %v2905_v52, %v2904_v35  ;;  %v2784_v35 = vld [vmem:[#allocation2 + $0x28] sm:$0xf] }
 0x2d8   : > { %3030 = vrot.lane.b32.xlu2 %v3019_v62, %s6303_s23  ;;  %v3004_v5 = vunpack.c.l.b16 %v2828_v27  ;;  %v3059_v45 = vpack.c.b16 %v3051_v39, %v3051_v39  ;;  %v3099_v12 = vpack.c.b16 %v3091_v4, %v3051_v39  ;;  %v3282_v10 = vpack.c.b16 %v3274_v40, %v3234_v22 }
 0x2d9   : > { %v2947_v24 = vor.u32 %v2946_v6, %v2942_v43  ;;  %6026 = vmatmul.msk.bf16.vlgmr.msrb.gmra.mxu2 %vm1291_vm11, %v3555_v21  ;;  %v3195_v9 = vpack.c.b16 %v3091_v4, %v3187_v37  ;;  %v2951_v50 = vshll.u32 %v2916_v34, 16  ;;  %v2949_v43 = vshrl.u32 %v2916_v34, 16 }
 0x2da   : > { %v3012_v1 = vpack.c.b16 %v2905_v52, %v3004_v5  ;;  %v3128_v38 = vshll.u32 %v3099_v12, 16  ;;  %v3305_v61 = vshll.u32 %v3282_v10, 16  ;;  %v3126_v19 = vshrl.u32 %v3099_v12, 16 }
 0x2db   : > { %2982 = vrot.lane.b32.xlu0 %v2947_v24, %s6302_s21  ;;  %v3203_v0 = vrot.slane %v3195_v9, 1  ;;  %v2953_v51 = vrot.slane %v2951_v50, 1  ;;  %v3303_v52 = vshrl.u32 %v3282_v10, 16  ;;  %v2793_v9 = vld [vmem:[#allocation2 + $0x34] sm:$0x1] }
 0x2dc   : > { %3346 = vrot.lane.b32.xlu1 %v3301_v17, %s6312_s20  ;;  %v3020_v55 = vrot.slane %v3012_v1, 1  ;;  %v3130_v3 = vrot.slane %v3128_v38, 1  ;;  %v3307_v63 = vrot.slane %v3305_v61, 1 }
 0x2dd   : > { %v2954_v62 = vor.u32 %v2953_v51, %v2949_v43  ;;  %v2636_v4 = vpop.f32.mrf.mxu2 }
 0x2de   : > { %v3131_v58 = vor.u32 %v3130_v3, %v3126_v19  ;;  %v3308_v28 = vor.u32 %v3307_v63, %v3303_v52 }
 0x2df   : > { %v2602_v54 = vpop.f32.mrf.mxu1 }
 0x2e0   : > { %v2632_v36 = vadd.f32 %v2631_v13, %v2602_v54  ;;  %3164 = vrot.lane.b32.xlu2 %v3124_v49, %s6308_s26  ;;  %v2874_v54 = vld [vmem:[#allocation2 + $0x20] sm:$0xe] }
 0x2e2   : > { %v2650_v30 = vmul.f32 %v7354_v44, %v2632_v36 }
 0x2e3   : > { %3252 = vrot.lane.b32.xlu0 %v3242_v29, %s6311_s18 }
 0x2e4   : > { %v2661_v53 = vadd.f32 %v7359_v16, %v2650_v30  ;;  %3070 = vrot.lane.b32.xlu1 %v3059_v45, %s6305_s17  ;;  %v3370_v30 = vunpack.c.l.b16 %v2874_v54  ;;  %v2790_v45 = vld [vmem:[#allocation2 + $0x30] sm:$0xf] }
 0x2e6   : > { %v2669_v18 = vmax.f32 %v2661_v53, 0.0  ;;  %v3378_v43 = vpack.c.b16 %v3274_v40, %v3370_v30 }
 0x2e7   : > { %v2604_v20 = vpop.f32.mrf.mxu1 }
 0x2e8   : > { %v2677_v31 = vpack.c.bf16 %v2669_v18, %v2669_v18  ;;  %v2634_v57 = vadd.f32 %v2633_v56, %v2604_v20  ;;  %3214 = vrot.lane.b32.xlu2 %v3203_v0, %s6310_s27  ;;  %v3386_v59 = vrot.slane %v3378_v43, 1 }
 0x2ea   : > { %v2714_v6 = vshrl.u32 %v2677_v31, 16  ;;  %v2651_v21 = vmul.f32 %v7354_v44, %v2634_v57  ;;  %v2717_v24 = vshll.u32 %v2677_v31, 16 }
 0x2eb   : > { %3032 = vrot.lane.b32.xlu0 %v3020_v55, %s6303_s23 }
 0x2ec   : > { %v2716_v2 = vrot.slane %v2714_v6, 7  ;;  %v2662_v14 = vadd.f32 %v7359_v16, %v2651_v21  ;;  %2984 = vrot.lane.b32.xlu1 %v2954_v62, %s6302_s21 }
 0x2ee   : > { %v2719_v17 = vor.u32 %v2717_v24, %v2716_v2  ;;  %v2720_v22 = vrot.slane %v2716_v2, 4  ;;  %v2670_v8 = vmax.f32 %v2662_v14, 0.0  ;;  %v2638_v14 = vpop.f32.mrf.mxu2 }
 0x2f0   : > { %v2785_v26 = vsel %vm7036_vm9, %v2719_v17, %v2784_v35  ;;  %v2788_v13 = vsel %vm6971_vm7, %v2720_v22, %v2787_v11  ;;  %v2678_v27 = vpack.c.bf16 %v2670_v8, %v2670_v8  ;;  %3348 = vrot.lane.b32.xlu2 %v3308_v28, %s6312_s20 }
 0x2f1   : > { %2789 = vst [vmem:[#allocation2 + $0x2c] sm:$0x1] %v2788_v13 }
 0x2f2   : > { %2786 = vst [vmem:[#allocation2 + $0x28] sm:$0xf] %v2785_v26  ;;  %v2722_v29 = vshrl.u32 %v2678_v27, 16  ;;  %v2725_v37 = vshll.u32 %v2678_v27, 16 }
 0x2f3   : > { %3166 = vrot.lane.b32.xlu0 %v3131_v58, %s6308_s26  ;;  %v2607_v34 = vpop.f32.mrf.mxu1 }
 0x2f4   : > { %v2724_v39 = vrot.slane %v2722_v29, 7  ;;  %v2637_v49 = vadd.f32 %v2636_v4, %v2607_v34 }
 0x2f6   : > { %v2727_v36 = vor.u32 %v2725_v37, %v2724_v39  ;;  %v2728_v5 = vrot.slane %v2724_v39, 4  ;;  %v2652_v12 = vmul.f32 %v7354_v44, %v2637_v49 }
 0x2f8   : > { %v2791_v50 = vsel %vm7036_vm9, %v2727_v36, %v2790_v45  ;;  %v2794_v53 = vsel %vm6971_vm7, %v2728_v5, %v2793_v9  ;;  %v2844_v1 = vld [vmem:[#allocation2 + $0x2c] sm:$0x1]  ;;  %v2663_v56 = vadd.f32 %v7359_v16, %v2652_v12  ;;  %v2796_v36 = vld [vmem:[#allocation2 + $0x38] sm:$0xf]  ;;  %v3525_v5 = vunpack.c.l.b16 %v3386_v59 }
 0x2f9   : > { %v2867_v10 = vld [vmem:[#allocation2 + $0x2c] sm:$0x1]  ;;  %2795 = vst [vmem:[#allocation2 + $0x34] sm:$0x1] %v2794_v53  ;;  %v2859_v0 = vld [vmem:[#allocation2 + $0x28] sm:$0xf]  ;;  %v3092_v51 = vunpack.c.l.b16 %v2844_v1 }
 0x2fa   : > { %v2821_v18 = vld [vmem:[#allocation2 + $0x2c] sm:$0x1]  ;;  %v2836_v20 = vld [vmem:[#allocation2 + $0x28] sm:$0xf]  ;;  %v3275_v38 = vunpack.c.l.b16 %v2867_v10  ;;  %2792 = vst [vmem:[#allocation2 + $0x30] sm:$0xf] %v2791_v50  ;;  %v3235_v31 = vunpack.c.l.b16 %v2859_v0 }
 0x2fb   : > { %v3052_v55 = vunpack.c.l.b16 %v2836_v20  ;;  %v2852_v57 = vld [vmem:[#allocation2 + $0x28] sm:$0xe]  ;;  %v2907_v6 = vunpack.c.l.b16 %v2821_v18  ;;  %v2671_v21 = vmax.f32 %v2663_v56, 0.0  ;;  %v2609_v17 = vpop.f32.mrf.mxu1  ;;  %v2799_v53 = vld [vmem:[#allocation2 + $0x3c] sm:$0x1] }
 0x2fc   : > { %v2875_v61 = vld [vmem:[#allocation2 + $0x28] sm:$0xe]  ;;  %v3188_v62 = vunpack.c.l.b16 %v2852_v57  ;;  %v3243_v63 = vpack.c.b16 %v3235_v31, %v3235_v31  ;;  %v3283_v22 = vpack.c.b16 %v3275_v38, %v3235_v31  ;;  %v2639_v35 = vadd.f32 %v2638_v14, %v2609_v17  ;;  %v7465_v57 = vpop.permute.xlu2 %3024 }
 0x2fd   : > { %v3371_v3 = vunpack.c.l.b16 %v2875_v61  ;;  %v2829_v2 = vld [vmem:[#allocation2 + $0x28] sm:$0xe]  ;;  %v3060_v19 = vpack.c.b16 %v3052_v55, %v3052_v55  ;;  %v2679_v52 = vpack.c.bf16 %v2671_v21, %v2671_v21  ;;  %v3100_v49 = vpack.c.b16 %v3092_v51, %v3052_v55 }
 0x2fe   : > { %v7449_v24 = vld [vmem:[#allocation2 + $0x28] sm:$0xf]  ;;  %v3005_v8 = vunpack.c.l.b16 %v2829_v2  ;;  %v3196_v11 = vpack.c.b16 %v3092_v51, %v3188_v62  ;;  %3254 = vrot.lane.b32.xlu1 %v3243_v63, %s6311_s18  ;;  %v2653_v27 = vmul.f32 %v7354_v44, %v2639_v35  ;;  %v3312_v4 = vshll.u32 %v3283_v22, 16 }
 0x2ff   : > { %v3379_v58 = vpack.c.b16 %v3275_v38, %v3371_v3  ;;  %3072 = vrot.lane.b32.xlu2 %v3060_v19, %s6305_s17  ;;  %v2906_v26 = vunpack.c.l.b16 %v7449_v24  ;;  %v2730_v13 = vshrl.u32 %v2679_v52, 16  ;;  %v2733_v37 = vshll.u32 %v2679_v52, 16 }
 0x300   : > { %v3013_v40 = vpack.c.b16 %v2907_v6, %v3005_v8  ;;  %v3204_v28 = vrot.slane %v3196_v11, 1  ;;  %v2664_v34 = vadd.f32 %v7359_v16, %v2653_v27  ;;  %v3314_v1 = vrot.slane %v3312_v4, 1  ;;  %v7457_v20 = vld [vmem:[#allocation2 + $0x34] sm:$0x1]  ;;  %v2802_v4 = vld [vmem:[#allocation2 + $0x40] sm:$0xf] }
 0x301   : > { %v3387_v29 = vrot.slane %v3379_v58, 1  ;;  %v2917_v54 = vpack.c.b16 %v2907_v6, %v2906_v26  ;;  %v2732_v39 = vrot.slane %v2730_v13, 7  ;;  %v3135_v0 = vshll.u32 %v3100_v49, 16  ;;  %v7463_v55 = vld [vmem:[#allocation2 + $0x30] sm:$0xf] }
 0x302   : > { %3216 = vrot.lane.b32.xlu0 %v3204_v28, %s6310_s27  ;;  %v3021_v45 = vrot.slane %v3013_v40, 1  ;;  %v2672_v44 = vmax.f32 %v2664_v34, 0.0  ;;  %v3310_v31 = vshrl.u32 %v3283_v22, 16  ;;  %v2868_v43 = vld [vmem:[#allocation2 + $0x34] sm:$0x1]  ;;  %v2909_v2 = vunpack.c.l.b16 %v7457_v20 }
 0x303   : > { %v3527_v30 = vunpack.c.l.b16 %v3387_v29  ;;  %v2958_v9 = vshll.u32 %v2917_v54, 16  ;;  %v2735_v12 = vor.u32 %v2733_v37, %v2732_v39  ;;  %v2736_v50 = vrot.slane %v2732_v39, 4  ;;  %v2876_v6 = vld [vmem:[#allocation2 + $0x30] sm:$0xe]  ;;  %v2845_v8 = vld [vmem:[#allocation2 + $0x34] sm:$0x1] }
 0x304   : > { %v2956_v18 = vshrl.u32 %v2917_v54, 16  ;;  %v2680_v38 = vpack.c.bf16 %v2672_v44, %v2672_v44  ;;  %v3315_v62 = vor.u32 %v3314_v1, %v3310_v31  ;;  %v2860_v3 = vld [vmem:[#allocation2 + $0x30] sm:$0xf]  ;;  %v3137_v14 = vrot.slane %v3135_v0, 1  ;;  %v2805_v29 = vld [vmem:[#allocation2 + $0x44] sm:$0x1]  ;;  %v7481_v1 = vpop.permute.xlu2 %3208 }
 0x305   : > { %v3557_v10 = vpack.c.b16 %v3527_v30, %v3525_v5  ;;  %v2960_v56 = vrot.slane %v2958_v9, 1  ;;  %v2797_v16 = vsel %vm7036_vm9, %v2735_v12, %v2796_v36  ;;  %v2800_v51 = vsel %vm6971_vm7, %v2736_v50, %v2799_v53  ;;  %v2837_v63 = vld [vmem:[#allocation2 + $0x30] sm:$0xf]  ;;  %v7487_v31 = vld [vmem:[#allocation2 + $0x4c] sm:$0x1] }
 0x306   : > { %2801 = vst [vmem:[#allocation2 + $0x3c] sm:$0x1] %v2800_v51  ;;  %3034 = vrot.lane.b32.xlu1 %v3021_v45, %s6303_s23  ;;  %v2738_v21 = vshrl.u32 %v2680_v38, 16  ;;  %v2908_v19 = vunpack.c.l.b16 %v7463_v55  ;;  %v2741_v22 = vshll.u32 %v2680_v38, 16  ;;  %v2853_v52 = vld [vmem:[#allocation2 + $0x30] sm:$0xe]  ;;  %v3276_v35 = vunpack.c.l.b16 %v2868_v43 }
 0x307   : > { %6027 = vmatmul.msk.bf16.gmra.mxu2 %vm1291_vm11, %v3557_v10  ;;  %v2961_v61 = vor.u32 %v2960_v56, %v2956_v18  ;;  %2798 = vst [vmem:[#allocation2 + $0x38] sm:$0xf] %v2797_v16  ;;  %v3372_v11 = vunpack.c.l.b16 %v2876_v6  ;;  %v3133_v58 = vshrl.u32 %v3100_v49, 16  ;;  %v3236_v59 = vunpack.c.l.b16 %v2860_v3  ;;  %v2830_v28 = vld [vmem:[#allocation2 + $0x30] sm:$0xe]  ;;  %v6135_v3 = vld [vmem:[%s8309_s9 + $0x38] sm:$0xff] }
 0x308   : > { %v2740_v17 = vrot.slane %v2738_v21, 7  ;;  %v2918_v40 = vpack.c.b16 %v2909_v2, %v2908_v19  ;;  %v3053_v27 = vunpack.c.l.b16 %v2837_v63  ;;  %v3093_v39 = vunpack.c.l.b16 %v2845_v8  ;;  %3632 = vmatpush.bf16.msra.mxu3 %v6135_v3 }
 0x309   : > { %2986 = vrot.lane.b32.xlu2 %v2961_v61, %s6302_s21  ;;  %v3138_v54 = vor.u32 %v3137_v14, %v3133_v58  ;;  %v3189_v37 = vunpack.c.l.b16 %v2853_v52  ;;  %v3380_v49 = vpack.c.b16 %v3276_v35, %v3372_v11  ;;  %v3244_v30 = vpack.c.b16 %v3236_v59, %v3236_v59  ;;  %v7489_v61 = vpop.permute.xlu0 %2976 }
 0x30a   : > { %3350 = vrot.lane.b32.xlu0 %v3315_v62, %s6312_s20  ;;  %v2743_v26 = vor.u32 %v2741_v22, %v2740_v17  ;;  %v2744_v13 = vrot.slane %v2740_v17, 4  ;;  %v3006_v45 = vunpack.c.l.b16 %v2830_v28  ;;  %v2965_v9 = vshll.u32 %v2918_v40, 16  ;;  %v2879_v62 = vld [vmem:[#allocation2 + $0x48] sm:$0xe] }
 0x30b   : > { %v3061_v53 = vpack.c.b16 %v3053_v27, %v3053_v27  ;;  %v3197_v10 = vpack.c.b16 %v3093_v39, %v3189_v37  ;;  %v3284_v18 = vpack.c.b16 %v3276_v35, %v3236_v59  ;;  %v3388_v0 = vrot.slane %v3380_v49, 1  ;;  %v6134_v35 = vld [vmem:[%s8309_s9 + $0x30] sm:$0xff] }
 0x30c   : > { %v2803_v34 = vsel %vm7036_vm9, %v2743_v26, %v2802_v4  ;;  %v2806_v36 = vsel %vm6971_vm7, %v2744_v13, %v2805_v29  ;;  %v3014_v20 = vpack.c.b16 %v2909_v2, %v3006_v45  ;;  %v2967_v16 = vrot.slane %v2965_v9, 1  ;;  %v7509_v29 = vpop.permute.xlu2 %3066  ;;  %3633 = vmatpush.bf16.msra.mxu3 %v6134_v35 }
 0x30d   : > { %v7477_v5 = vld [vmem:[#allocation2 + $0x3c] sm:$0x1]  ;;  %2804 = vst [vmem:[#allocation2 + $0x40] sm:$0xf] %v2803_v34  ;;  %v3101_v51 = vpack.c.b16 %v3093_v39, %v3053_v27  ;;  %v3205_v43 = vrot.slane %v3197_v10, 1  ;;  %v2963_v6 = vshrl.u32 %v2918_v40, 16  ;;  %v3529_v14 = vunpack.c.l.b16 %v3388_v0 }
 0x30e   : > { %3168 = vrot.lane.b32.xlu1 %v3138_v54, %s6308_s26  ;;  %v2877_v12 = vld [vmem:[#allocation2 + $0x38] sm:$0xe]  ;;  %v3277_v50 = vunpack.c.l.b16 %v7477_v5  ;;  %2807 = vst [vmem:[#allocation2 + $0x44] sm:$0x1] %v2806_v36  ;;  %v3319_v21 = vshll.u32 %v3284_v18, 16  ;;  %v3022_v2 = vrot.slane %v3014_v20, 1  ;;  %v3279_v52 = vunpack.c.l.b16 %v7487_v31  ;;  %v7501_v11 = vpop.permute.xlu1 %3064 }
 0x30f   : > { %v3373_v44 = vunpack.c.l.b16 %v2877_v12  ;;  %v2968_v17 = vor.u32 %v2967_v16, %v2963_v6  ;;  %v3142_v22 = vshll.u32 %v3101_v51, 16  ;;  %v2861_v59 = vld [vmem:[#allocation2 + $0x38] sm:$0xf]  ;;  %v3375_v13 = vunpack.c.l.b16 %v2879_v62  ;;  %v2823_v28 = vld [vmem:[#allocation2 + $0x3c] sm:$0x1] }
 0x310   : > { %v3321_v27 = vrot.slane %v3319_v21, 1  ;;  %v7507_v4 = vld [vmem:[#allocation2 + $0x38] sm:$0xf]  ;;  %v3317_v54 = vshrl.u32 %v3284_v18, 16  ;;  %v3237_v37 = vunpack.c.l.b16 %v2861_v59  ;;  %v2846_v34 = vld [vmem:[#allocation2 + $0x3c] sm:$0x1] }
 0x311   : > { %3256 = vrot.lane.b32.xlu2 %v3244_v30, %s6311_s18  ;;  %v3381_v56 = vpack.c.b16 %v3277_v50, %v3373_v44  ;;  %v3144_v39 = vrot.slane %v3142_v22, 1  ;;  %v2854_v36 = vld [vmem:[#allocation2 + $0x38] sm:$0xe]  ;;  %v3383_v30 = vpack.c.b16 %v3279_v52, %v3375_v13  ;;  %v3140_v9 = vshrl.u32 %v3101_v51, 16  ;;  %v6133_v18 = vld [vmem:[%s8309_s9 + $0x28] sm:$0xff]  ;;  %v6132_v51 = vld [vmem:[%s8309_s9 + $0x20] sm:$0xff] }
 0x312   : > { %3074 = vrot.lane.b32.xlu0 %v3061_v53, %s6305_s17  ;;  %v3322_v45 = vor.u32 %v3321_v27, %v3317_v54  ;;  %v2838_v12 = vld [vmem:[#allocation2 + $0x38] sm:$0xf]  ;;  %v2911_v44 = vunpack.c.l.b16 %v2823_v28  ;;  %v2910_v10 = vunpack.c.l.b16 %v7507_v4  ;;  %v3245_v20 = vpack.c.b16 %v3237_v37, %v3237_v37  ;;  %3634 = vmatpush.bf16.msra.mxu3 %v6133_v18 }
 0x313   : > { %v3389_v38 = vrot.slane %v3381_v56, 1  ;;  %v2831_v53 = vld [vmem:[#allocation2 + $0x38] sm:$0xe]  ;;  %v7519_v56 = vpop.permute.xlu0 %3026  ;;  %v3145_v0 = vor.u32 %v3144_v39, %v3140_v9  ;;  %v3094_v16 = vunpack.c.l.b16 %v2846_v34  ;;  %v3391_v62 = vrot.slane %v3383_v30, 1  ;;  %v6130_v34 = vld [vmem:[%s8309_s9 + $0x10] sm:$0xff] }
 0x314   : > { %v2878_v19 = vld [vmem:[#allocation2 + $0x40] sm:$0xe]  ;;  %v3007_v6 = vunpack.c.l.b16 %v2831_v53  ;;  %v2919_v3 = vpack.c.b16 %v2911_v44, %v2910_v10  ;;  %v6131_v13 = vld [vmem:[%s8309_s9 + $0x18] sm:$0xff] }
 0x315   : > { %v3531_v63 = vunpack.c.l.b16 %v3389_v38  ;;  %v7495_v8 = vld [vmem:[#allocation2 + $0x44] sm:$0x1]  ;;  %v3374_v26 = vunpack.c.l.b16 %v2878_v19  ;;  %v3190_v38 = vunpack.c.l.b16 %v2854_v36  ;;  %v3285_v19 = vpack.c.b16 %v3277_v50, %v3237_v37  ;;  %v2839_v36 = vld [vmem:[#allocation2 + $0x40] sm:$0xf] }
 0x316   : > { %3218 = vrot.lane.b32.xlu1 %v3205_v43, %s6310_s27  ;;  %v3278_v40 = vunpack.c.l.b16 %v7495_v8  ;;  %v3054_v43 = vunpack.c.l.b16 %v2838_v12  ;;  %3635 = vmatpush.bf16.msra.mxu3 %v6132_v51  ;;  %v3535_v22 = vunpack.c.l.b16 %v3391_v62  ;;  %v2862_v18 = vld [vmem:[#allocation2 + $0x40] sm:$0xf]  ;;  %v6129_v51 = vld [vmem:[%s8309_s9 + $0x8] sm:$0xff] }
 0x317   : > { %v3559_v58 = vpack.c.b16 %v3531_v63, %v3529_v14  ;;  %v7526_v14 = vpop.permute.xlu1 %2978  ;;  %v3198_v63 = vpack.c.b16 %v3094_v16, %v3190_v38  ;;  %v3326_v28 = vshll.u32 %v3285_v19, 16  ;;  %v3238_v62 = vunpack.c.l.b16 %v2862_v18  ;;  %v6227_v18 = vld [vmem:[#allocation2] sm:$0xf] }
 0x318   : > { %v3382_v49 = vpack.c.b16 %v3278_v40, %v3374_v26  ;;  %v3102_v35 = vpack.c.b16 %v3094_v16, %v3054_v43  ;;  %v3062_v59 = vpack.c.b16 %v3054_v43, %v3054_v43  ;;  %v2972_v26 = vshll.u32 %v2919_v3, 16 }
 0x319   : > { %3036 = vrot.lane.b32.xlu2 %v3022_v2, %s6303_s23  ;;  %6028 = vmatmul.msk.bf16.gmra.mxu2 %vm1291_vm11, %v3559_v58  ;;  %v3015_v2 = vpack.c.b16 %v2911_v44, %v3007_v6  ;;  %v7531_v58 = vpop.permute.xlu2 %2980  ;;  %v3206_v27 = vrot.slane %v3198_v63, 1  ;;  %v3328_v30 = vrot.slane %v3326_v28, 1  ;;  %v3324_v44 = vshrl.u32 %v3285_v19, 16  ;;  %v2863_v6 = vld [vmem:[#allocation2 + $0x48] sm:$0xf]  ;;  %v6128_v19 = vld [vmem:[%s8309_s9] sm:$0xff] }
 0x31a   : > { %2988 = vrot.lane.b32.xlu0 %v2968_v17, %s6302_s21  ;;  %v3390_v21 = vrot.slane %v3382_v49, 1  ;;  %v3149_v50 = vshll.u32 %v3102_v35, 16  ;;  %3636 = vmatpush.bf16.msra.mxu3 %v6131_v13  ;;  %v2974_v37 = vrot.slane %v2972_v26, 1  ;;  %v2847_v49 = vld [vmem:[#allocation2 + $0x44] sm:$0x1]  ;;  %v3147_v38 = vshrl.u32 %v3102_v35, 16 }
 0x31b   : > { %v3023_v54 = vrot.slane %v3015_v2, 1  ;;  %v7537_v39 = vpop.permute.xlu0 %3160  ;;  %v3095_v16 = vunpack.c.l.b16 %v2847_v49  ;;  %v3329_v43 = vor.u32 %v3328_v30, %v3324_v44  ;;  %v3286_v35 = vpack.c.b16 %v3278_v40, %v3238_v62 }
 0x31c   : > { %v3533_v17 = vunpack.c.l.b16 %v3390_v21  ;;  %v3151_v12 = vrot.slane %v3149_v50, 1  ;;  %v3246_v26 = vpack.c.b16 %v3238_v62, %v3238_v62 }
 0x31d   : > { %v3333_v50 = vshll.u32 %v3286_v35, 16 }
 0x31e   : > { %3352 = vrot.lane.b32.xlu1 %v3322_v45, %s6312_s20  ;;  %v3561_v5 = vpack.c.b16 %v3535_v22, %v3533_v17  ;;  %v2970_v45 = vshrl.u32 %v2919_v3, 16  ;;  %3637 = vmatpush.bf16.msra.mxu3 %v6130_v34  ;;  %v3152_v21 = vor.u32 %v3151_v12, %v3147_v38  ;;  %v3239_v17 = vunpack.c.l.b16 %v2863_v6 }
 0x31f   : > { %v7545_v9 = vpop.permute.xlu1 %3248  ;;  %v3335_v34 = vrot.slane %v3333_v50, 1  ;;  %v3331_v12 = vshrl.u32 %v3286_v35, 16 }
 0x320   : > { %v2975_v10 = vor.u32 %v2974_v37, %v2970_v45  ;;  %v3287_v28 = vpack.c.b16 %v3279_v52, %v3239_v17  ;;  %v3247_v45 = vpack.c.b16 %v3239_v17, %v3239_v17 }
 0x321   : > { %3170 = vrot.lane.b32.xlu2 %v3145_v0, %s6308_s26  ;;  %v3055_v0 = vunpack.c.l.b16 %v2839_v36 }
 0x322   : > { %3258 = vrot.lane.b32.xlu0 %v3245_v20, %s6311_s18  ;;  %v2855_v20 = vld [vmem:[#allocation2 + $0x40] sm:$0xe]  ;;  %3638 = vmatpush.bf16.msra.mxu3 %v6129_v51  ;;  %v3340_v40 = vshll.u32 %v3287_v28, 16  ;;  %v3338_v31 = vshrl.u32 %v3287_v28, 16 }
 0x323   : > { %v3191_v3 = vunpack.c.l.b16 %v2855_v20  ;;  %v3103_v63 = vpack.c.b16 %v3095_v16, %v3055_v0  ;;  %v3211_v2 = vpop.permute.xlu0 %3210  ;;  %v6228_v20 = vld [vmem:[#allocation2 + $0x8] sm:$0xf] }
 0x324   : > { %v3342_v52 = vrot.slane %v3340_v40, 1  ;;  %v6229_v40 = vld [vmem:[#allocation2 + $0x10] sm:$0xf] }
 0x325   : > { %v3199_v22 = vpack.c.b16 %v3095_v16, %v3191_v3  ;;  %v3156_v13 = vshll.u32 %v3103_v63, 16  ;;  %v3154_v8 = vshrl.u32 %v3103_v63, 16  ;;  %v3397_v16 = vsel %vm1291_vm11, %v6228_v20, %v7526_v14 }
 0x326   : > { %3076 = vrot.lane.b32.xlu1 %v3062_v59, %s6305_s17  ;;  %3639 = vmatpush.bf16.msra.mxu3 %v6128_v19  ;;  %v3343_v38 = vor.u32 %v3342_v52, %v3338_v31  ;;  %v3419_v6 = vsel %vm1325_vm13, %v3397_v16, %v7519_v56 }
 0x327   : > { %v3158_v37 = vrot.slane %v3156_v13, 1 }
 0x329   : > { %3220 = vrot.lane.b32.xlu2 %v3206_v27, %s6310_s27  ;;  %6029 = vmatmul.msk.bf16.gmra.mxu2 %vm1291_vm11, %v3561_v5  ;;  %v7562_v27 = vpop.permute.xlu1 %3028  ;;  %v3207_v5 = vrot.slane %v3199_v22, 1  ;;  %v3159_v30 = vor.u32 %v3158_v37, %v3154_v8 }
 0x32a   : > { %3038 = vrot.lane.b32.xlu0 %v3023_v54, %s6303_s23  ;;  %v7547_v53 = vpop.permute.xlu2 %3250  ;;  %v3063_v54 = vpack.c.b16 %v3055_v0, %v3055_v0  ;;  %v3394_v0 = vsel %vm1291_vm11, %v6227_v18, %v7489_v61  ;;  %v3435_v61 = vsel %vm1359_vm15, %v3419_v6, %v7509_v29 }
 0x32b   : > { %v3345_v36 = vpop.permute.xlu0 %3344 }
 0x32e   : > { %2990 = vrot.lane.b32.xlu1 %v2975_v10, %s6302_s21  ;;  %v3336_v10 = vor.u32 %v3335_v34, %v3331_v12 }
 0x331   : > { %3354 = vrot.lane.b32.xlu2 %v3329_v43, %s6312_s20  ;;  %v3163_v44 = vpop.permute.xlu1 %3162  ;;  %v3417_v43 = vsel %vm1325_vm13, %v3394_v0, %v7465_v57 }
 0x332   : > { %3172 = vrot.lane.b32.xlu0 %v3152_v21, %s6308_s26  ;;  %v7560_v59 = vpop.permute.xlu2 %3030  ;;  %v3433_v3 = vsel %vm1359_vm15, %v3417_v43, %v7501_v11  ;;  %v3451_v63 = vsel %vm1393_vm1, %v3435_v61, %v3163_v44 }
 0x333   : > { %v3449_v14 = vsel %vm1393_vm1, %v3433_v3, %v7537_v39  ;;  %v3467_v56 = vsel %vm2412_vm10, %v3451_v63, %v3211_v2 }
 0x334   : > { %v3465_v57 = vsel %vm2412_vm10, %v3449_v14, %v7481_v1  ;;  %v3483_v11 = vsel %vm2429_vm12, %v3467_v56, %v7547_v53  ;;  %v3400_v53 = vsel %vm1291_vm11, %v6229_v40, %v7531_v58 }
 0x335   : > { %v3481_v19 = vsel %vm2429_vm12, %v3465_v57, %v7545_v9  ;;  %v3421_v34 = vsel %vm1325_vm13, %v3400_v53, %v7562_v27 }
 0x336   : > { %3260 = vrot.lane.b32.xlu1 %v3246_v26, %s6311_s18  ;;  %v3497_v22 = vsel %vm2446_vm14, %v3481_v19, %v3345_v36 }
 0x337   : > { %v3520_v26 = vunpack.c.l.b16 %v3497_v22 }
 0x339   : > { %3078 = vrot.lane.b32.xlu2 %v3063_v54, %s6305_s17 }
 0x33a   : > { %3222 = vrot.lane.b32.xlu0 %v3207_v5, %s6310_s27  ;;  %v3165_v49 = vpop.permute.xlu2 %3164 }
 0x33e   : > { %3174 = vrot.lane.b32.xlu1 %v3159_v30, %s6308_s26 }
 0x341   : > { %3262 = vrot.lane.b32.xlu2 %v3247_v45, %s6311_s18 }
 0x342   : > { %3356 = vrot.lane.b32.xlu0 %v3336_v10, %s6312_s20  ;;  %v3215_v21 = vpop.permute.xlu2 %3214 }
 0x343   : > { %v3069_v51 = vpop.permute.xlu0 %3068 }
 0x344   : > { %v3437_v36 = vsel %vm1359_vm15, %v3421_v34, %v3069_v51 }
 0x345   : > { %v3453_v12 = vsel %vm1393_vm1, %v3437_v36, %v3165_v49 }
 0x346   : > { %3358 = vrot.lane.b32.xlu1 %v3343_v38, %s6312_s20  ;;  %v3213_v62 = vpop.permute.xlu1 %3212 }
 0x347   : > { %v3469_v44 = vsel %vm2412_vm10, %v3453_v12, %v3213_v62 }
 0x34a   : > { %v3349_v35 = vpop.permute.xlu2 %3348 }
 0x34d   : > { %v2983_v17 = vpop.permute.xlu0 %2982 }
 0x34e   : > { %v3347_v29 = vpop.permute.xlu1 %3346  ;;  %v3403_v45 = vsel %vm1291_vm11, %v7407_v41, %v2983_v17 }
 0x34f   : > { %v3499_v39 = vsel %vm2446_vm14, %v3483_v11, %v3347_v29  ;;  %v3423_v52 = vsel %vm1325_vm13, %v3403_v45, %v7560_v59 }
 0x350   : > { %v3522_v13 = vunpack.c.l.b16 %v3499_v39 }
 0x352   : > { %v3554_v28 = vpack.c.b16 %v3522_v13, %v3520_v26 }
 0x354   : > { %3640 = vmatmul.bf16.vlgmr.msra.gmra.mxu3 %v3554_v28 }
 0x355   : > { %v3253_v1 = vpop.permute.xlu0 %3252 }
 0x356   : > { %v3071_v2 = vpop.permute.xlu1 %3070  ;;  %v3485_v18 = vsel %vm2429_vm12, %v3469_v44, %v3253_v1 }
 0x357   : > { %v3439_v10 = vsel %vm1359_vm15, %v3423_v52, %v3071_v2  ;;  %v3501_v41 = vsel %vm2446_vm14, %v3485_v18, %v3349_v35 }
 0x358   : > { %v3524_v51 = vunpack.c.l.b16 %v3501_v41 }
 0x359   : > { %v3073_v54 = vpop.permute.xlu2 %3072 }
 0x35d   : > { %v3033_v5 = vpop.permute.xlu0 %3032 }
 0x35e   : > { %v2985_v9 = vpop.permute.xlu1 %2984 }
 0x35f   : > { %v3406_v61 = vsel %vm1291_vm11, %v7413_v32, %v2985_v9 }
 0x360   : > { %v3425_v14 = vsel %vm1325_vm13, %v3406_v61, %v3033_v5 }
 0x361   : > { %v3441_v57 = vsel %vm1359_vm15, %v3425_v14, %v3073_v54 }
 0x363   : > { %v2987_v50 = vpop.permute.xlu2 %2986 }
 0x364   : > { %v3409_v17 = vsel %vm1291_vm11, %v7449_v24, %v2987_v50 }
 0x365   : > { %v3167_v37 = vpop.permute.xlu0 %3166 }
 0x366   : > { %v3455_v27 = vsel %vm1393_vm1, %v3439_v10, %v3167_v37 }
 0x367   : > { %v3471_v20 = vsel %vm2412_vm10, %v3455_v27, %v3215_v21 }
 0x36b   : > { %v3257_v8 = vpop.permute.xlu2 %3256 }
 0x370   : > { %v3255_v30 = vpop.permute.xlu1 %3254 }
 0x371   : > { %v3487_v49 = vsel %vm2429_vm12, %v3471_v20, %v3255_v30 }
 0x373   : > { %v3037_v58 = vpop.permute.xlu2 %3036 }
 0x374   : > { %v3217_v31 = vpop.permute.xlu0 %3216 }
 0x378   : > { %v3035_v0 = vpop.permute.xlu1 %3034 }
 0x379   : > { %v3427_v22 = vsel %vm1325_vm13, %v3409_v17, %v3035_v0 }
 0x37b   : > { %v3171_v6 = vpop.permute.xlu2 %3170 }
 0x37c   : > { %v3351_v16 = vpop.permute.xlu0 %3350 }
 0x37d   : > { %v3503_v38 = vsel %vm2446_vm14, %v3487_v49, %v3351_v16 }
 0x37e   : > { %v3526_v59 = vunpack.c.l.b16 %v3503_v38 }
 0x380   : > { %v3556_v43 = vpack.c.b16 %v3526_v59, %v3524_v51  ;;  %v3169_v62 = vpop.permute.xlu1 %3168 }
 0x381   : > { %v3457_v19 = vsel %vm1393_vm1, %v3441_v57, %v3169_v62  ;;  %v3865_v62 = vld [vmem:[#allocation2] sm:$0xf] }
 0x382   : > { %3645 = vmatmul.bf16.gmra.mxu3 %v3556_v43  ;;  %v3473_v11 = vsel %vm2412_vm10, %v3457_v19, %v3217_v31  ;;  %v3953_v61 = vunpack.c.l.b16 %v3865_v62 }
 0x383   : > { %v3221_v63 = vpop.permute.xlu2 %3220  ;;  %v3489_v39 = vsel %vm2429_vm12, %v3473_v11, %v3257_v8 }
 0x384   : > { %v3075_v3 = vpop.permute.xlu0 %3074 }
 0x385   : > { %v3443_v29 = vsel %vm1359_vm15, %v3427_v22, %v3075_v3 }
 0x386   : > { %v3459_v32 = vsel %vm1393_vm1, %v3443_v29, %v3171_v6  ;;  %v3873_v6 = vld [vmem:[#allocation2 + $0x4] sm:$0x1]  ;;  %v3670_v29 = vpop.f32.mrf.mxu2 }
 0x387   : > { %v3954_v3 = vunpack.c.l.b16 %v3873_v6 }
 0x388   : > { %v3219_v21 = vpop.permute.xlu1 %3218 }
 0x389   : > { %v3475_v26 = vsel %vm2412_vm10, %v3459_v32, %v3219_v21  ;;  %v3969_v14 = vpack.c.b16 %v3954_v3, %v3953_v61  ;;  %v3881_v21 = vld [vmem:[#allocation2] sm:$0xe] }
 0x38b   : > { %v3355_v1 = vpop.permute.xlu2 %3354  ;;  %v3980_v57 = vshll.u32 %v3969_v14, 16  ;;  %v3978_v19 = vshrl.u32 %v3969_v14, 16 }
 0x38c   : > { %v2989_v56 = vpop.permute.xlu0 %2988 }
 0x38d   : > { %v3412_v30 = vsel %vm1291_vm11, %v7463_v55, %v2989_v56  ;;  %v3982_v17 = vrot.slane %v3980_v57, 1 }
 0x38e   : > { %v3429_v31 = vsel %vm1325_vm13, %v3412_v30, %v3037_v58 }
 0x38f   : > { %v3983_v11 = vor.u32 %v3982_v17, %v3978_v19 }
 0x390   : > { %v3353_v35 = vpop.permute.xlu1 %3352 }
 0x391   : > { %v3505_v13 = vsel %vm2446_vm14, %v3489_v39, %v3353_v35  ;;  %4033 = vrot.lane.b32.xlu2 %v3983_v11, %s6302_s21  ;;  %v7652_v39 = vld [vmem:[%s8310_s10] ss:$0 sm:$0xff] }
 0x392   : > { %v3528_v2 = vunpack.c.l.b16 %v3505_v13  ;;  %v7660_v13 = vld [vmem:[%s8311_s11] ss:$0 sm:$0xff] }
 0x393   : > { %v3079_v45 = vpop.permute.xlu2 %3078 }
 0x394   : > { %v3259_v28 = vpop.permute.xlu0 %3258 }
 0x395   : > { %v3491_v54 = vsel %vm2429_vm12, %v3475_v26, %v3259_v28 }
 0x396   : > { %v3507_v24 = vsel %vm2446_vm14, %v3491_v54, %v3355_v1  ;;  %v3672_v54 = vpop.f32.mrf.mxu2 }
 0x397   : > { %v3530_v5 = vunpack.c.l.b16 %v3507_v24 }
 0x398   : > { %v3077_v50 = vpop.permute.xlu1 %3076 }
 0x399   : > { %v3558_v9 = vpack.c.b16 %v3530_v5, %v3528_v2  ;;  %v3445_v44 = vsel %vm1359_vm15, %v3429_v31, %v3077_v50 }
 0x39b   : > { %3650 = vmatmul.bf16.gmra.mxu3 %v3558_v9  ;;  %v3263_v20 = vpop.permute.xlu2 %3262 }
 0x39c   : > { %v3039_v37 = vpop.permute.xlu0 %3038 }
 0x3a0   : > { %v2991_v40 = vpop.permute.xlu1 %2990 }
 0x3a1   : > { %v3415_v8 = vsel %vm1291_vm11, %v7507_v4, %v2991_v40 }
 0x3a2   : > { %v3431_v12 = vsel %vm1325_vm13, %v3415_v8, %v3039_v37 }
 0x3a3   : > { %v3447_v10 = vsel %vm1359_vm15, %v3431_v12, %v3079_v45  ;;  %v3820_v45 = vld [vmem:[#allocation2 + $0xc] sm:$0x1]  ;;  %v6230_v12 = vld [vmem:[#allocation2 + $0x8] sm:$0xf] }
 0x3a4   : > { %v3173_v53 = vpop.permute.xlu0 %3172 }
 0x3a5   : > { %v3461_v18 = vsel %vm1393_vm1, %v3445_v44, %v3173_v53 }
 0x3a6   : > { %v3477_v4 = vsel %vm2412_vm10, %v3461_v18, %v3221_v63  ;;  %v4057_v63 = vunpack.c.l.b16 %v3881_v21 }
 0x3a8   : > { %v3261_v34 = vpop.permute.xlu1 %3260  ;;  %v4065_v56 = vpack.c.b16 %v3954_v3, %v4057_v63 }
 0x3a9   : > { %v3493_v41 = vsel %vm2429_vm12, %v3477_v4, %v3261_v34  ;;  %v3823_v4 = vld [vmem:[#allocation2 + $0x10] sm:$0xf] }
 0x3aa   : > { %v4073_v22 = vrot.slane %v4065_v56, 1 }
 0x3ac   : > { %v3223_v36 = vpop.permute.xlu0 %3222  ;;  %4081 = vrot.lane.b32.xlu1 %v4073_v22, %s6303_s23 }
 0x3b0   : > { %v3175_v52 = vpop.permute.xlu1 %3174 }
 0x3b1   : > { %v3463_v27 = vsel %vm1393_vm1, %v3447_v10, %v3175_v52 }
 0x3b2   : > { %v3479_v55 = vsel %vm2412_vm10, %v3463_v27, %v3223_v36 }
 0x3b3   : > { %v3495_v58 = vsel %vm2429_vm12, %v3479_v55, %v3263_v20  ;;  %v3826_v20 = vld [vmem:[#allocation2 + $0x14] sm:$0x1] }
 0x3b4   : > { %v3357_v0 = vpop.permute.xlu0 %3356 }
 0x3b5   : > { %v3509_v49 = vsel %vm2446_vm14, %v3493_v41, %v3357_v0 }
 0x3b6   : > { %v3532_v59 = vunpack.c.l.b16 %v3509_v49 }
 0x3b8   : > { %v3359_v16 = vpop.permute.xlu1 %3358 }
 0x3b9   : > { %v3511_v38 = vsel %vm2446_vm14, %v3495_v58, %v3359_v16 }
 0x3ba   : > { %v3534_v51 = vunpack.c.l.b16 %v3511_v38 }
 0x3bc   : > { %v3560_v43 = vpack.c.b16 %v3534_v51, %v3532_v59 }
 0x3be   : > { %3655 = vmatmul.bf16.gmra.mxu3 %v3560_v43 }
 0x3d7   : > { %v3641_v35 = vpop.f32.mrf.mxu3 }
 0x3d8   : > { %v3671_v32 = vadd.f32 %v3670_v29, %v3641_v35 }
 0x3da   : > { %v7655_v26 = vadd.f32 %v3671_v32, %v7024_v33 }
 0x3dc   : > { %v3703_v28 = vmul.f32 %v7652_v39, %v7655_v26 }
 0x3de   : > { %v3714_v1 = vadd.f32 %v7660_v13, %v3703_v28 }
 0x3df   : > { %v3643_v24 = vpop.f32.mrf.mxu3 }
 0x3e0   : > { %v3722_v2 = vmax.f32 %v3714_v1, 0.0  ;;  %v3673_v5 = vadd.f32 %v3672_v54, %v3643_v24 }
 0x3e2   : > { %v3730_v50 = vpack.c.bf16 %v3722_v2, %v3722_v2  ;;  %v7666_v9 = vadd.f32 %v3673_v5, %v7030_v47 }
 0x3e4   : > { %v3739_v33 = vshrl.u32 %v3730_v50, 16  ;;  %v3704_v37 = vmul.f32 %v7652_v39, %v7666_v9  ;;  %v3742_v53 = vshll.u32 %v3730_v50, 16 }
 0x3e6   : > { %v3741_v40 = vrot.slane %v3739_v33, 7  ;;  %v3715_v34 = vadd.f32 %v7660_v13, %v3704_v37 }
 0x3e8   : > { %v3744_v8 = vor.u32 %v3742_v53, %v3741_v40  ;;  %v3745_v36 = vrot.slane %v3741_v40, 4  ;;  %v3723_v30 = vmax.f32 %v3715_v34, 0.0 }
 0x3ea   : > { %v3818_v31 = vsel %vm7036_vm9, %v3744_v8, %v6230_v12  ;;  %v3821_v47 = vsel %vm6971_vm7, %v3745_v36, %v3820_v45  ;;  %v3731_v52 = vpack.c.bf16 %v3723_v30, %v3723_v30  ;;  %v3675_v12 = vpop.f32.mrf.mxu2 }
 0x3eb   : > { %3822 = vst [vmem:[#allocation2 + $0xc] sm:$0x1] %v3821_v47 }
 0x3ec   : > { %3819 = vst [vmem:[#allocation2 + $0x8] sm:$0xf] %v3818_v31  ;;  %v3747_v44 = vshrl.u32 %v3731_v52, 16  ;;  %v3750_v18 = vshll.u32 %v3731_v52, 16 }
 0x3ee   : > { %v3749_v10 = vrot.slane %v3747_v44, 7 }
 0x3f0   : > { %v3752_v27 = vor.u32 %v3750_v18, %v3749_v10  ;;  %v3753_v0 = vrot.slane %v3749_v10, 4 }
 0x3f2   : > { %v3824_v55 = vsel %vm7036_vm9, %v3752_v27, %v3823_v4  ;;  %v3827_v41 = vsel %vm6971_vm7, %v3753_v0, %v3826_v20  ;;  %v3897_v49 = vld [vmem:[#allocation2 + $0xc] sm:$0x1] }
 0x3f3   : > { %v3874_v58 = vld [vmem:[#allocation2 + $0xc] sm:$0x1]  ;;  %3825 = vst [vmem:[#allocation2 + $0x10] sm:$0xf] %v3824_v55  ;;  %v3889_v16 = vld [vmem:[#allocation2 + $0x8] sm:$0xf]  ;;  %v4145_v59 = vunpack.c.l.b16 %v3897_v49 }
 0x3f4   : > { %v3905_v38 = vld [vmem:[#allocation2 + $0x8] sm:$0xe]  ;;  %v3956_v51 = vunpack.c.l.b16 %v3874_v58  ;;  %3828 = vst [vmem:[#allocation2 + $0x14] sm:$0x1] %v3827_v41  ;;  %v4105_v43 = vunpack.c.l.b16 %v3889_v16 }
 0x3f5   : > { %v4241_v6 = vunpack.c.l.b16 %v3905_v38  ;;  %v3882_v62 = vld [vmem:[#allocation2 + $0x8] sm:$0xe] }
 0x3f6   : > { %v3866_v3 = vld [vmem:[#allocation2 + $0x8] sm:$0xf]  ;;  %v4058_v61 = vunpack.c.l.b16 %v3882_v62  ;;  %v4113_v21 = vpack.c.b16 %v4105_v43, %v4105_v43  ;;  %v4153_v57 = vpack.c.b16 %v4145_v59, %v4105_v43 }
 0x3f7   : > { %v3955_v14 = vunpack.c.l.b16 %v3866_v3  ;;  %v4249_v63 = vpack.c.b16 %v4145_v59, %v4241_v6 }
 0x3f8   : > { %v4066_v56 = vpack.c.b16 %v3956_v51, %v4058_v61  ;;  %4121 = vrot.lane.b32.xlu0 %v4113_v21, %s6305_s17  ;;  %v4164_v29 = vshll.u32 %v4153_v57, 16  ;;  %v4162_v8 = vshrl.u32 %v4153_v57, 16  ;;  %v3677_v61 = vpop.f32.mrf.mxu2 }
 0x3f9   : > { %v3970_v19 = vpack.c.b16 %v3956_v51, %v3955_v14  ;;  %v4257_v17 = vrot.slane %v4249_v63, 1  ;;  %v6145_v63 = vld [vmem:[%s8312_s12 + $0x40] sm:$0xff] }
 0x3fa   : > { %v4074_v22 = vrot.slane %v4066_v56, 1  ;;  %v3890_v35 = vld [vmem:[#allocation2 + $0x10] sm:$0xf]  ;;  %v4166_v2 = vrot.slane %v4164_v29, 1  ;;  %4725 = vmatpush.bf16.msrb.mxu1 %v6145_v63 }
 0x3fb   : > { %v3987_v11 = vshll.u32 %v3970_v19, 16  ;;  %4265 = vrot.lane.b32.xlu1 %v4257_v17, %s6310_s27  ;;  %v3985_v28 = vshrl.u32 %v3970_v19, 16  ;;  %v4106_v1 = vunpack.c.l.b16 %v3890_v35  ;;  %v3867_v54 = vld [vmem:[#allocation2 + $0x10] sm:$0xf]  ;;  %v3875_v24 = vld [vmem:[#allocation2 + $0x14] sm:$0x1] }
 0x3fc   : > { %4083 = vrot.lane.b32.xlu2 %v4074_v22, %s6303_s23  ;;  %v3913_v5 = vld [vmem:[#allocation2 + $0x10] sm:$0xf]  ;;  %v3957_v50 = vunpack.c.l.b16 %v3867_v54  ;;  %v3898_v37 = vld [vmem:[#allocation2 + $0x14] sm:$0x1]  ;;  %v3958_v53 = vunpack.c.l.b16 %v3875_v24  ;;  %v4167_v31 = vor.u32 %v4166_v2, %v4162_v8 }
 0x3fd   : > { %v3989_v32 = vrot.slane %v3987_v11, 1  ;;  %v3906_v40 = vld [vmem:[#allocation2 + $0x10] sm:$0xe]  ;;  %v7682_v34 = vld [vmem:[#allocation2 + $0x14] sm:$0x1]  ;;  %v4114_v36 = vpack.c.b16 %v4106_v1, %v4106_v1  ;;  %v4289_v30 = vunpack.c.l.b16 %v3913_v5  ;;  %v4146_v47 = vunpack.c.l.b16 %v3898_v37 }
 0x3fe   : > { %v3971_v45 = vpack.c.b16 %v3958_v53, %v3957_v50  ;;  %v4242_v52 = vunpack.c.l.b16 %v3906_v40  ;;  %v4329_v44 = vunpack.c.l.b16 %v7682_v34  ;;  %v3883_v27 = vld [vmem:[#allocation2 + $0x10] sm:$0xe]  ;;  %v3832_v37 = vld [vmem:[#allocation2 + $0x1c] sm:$0x1] }
 0x3ff   : > { %v3990_v33 = vor.u32 %v3989_v32, %v3985_v28  ;;  %v4297_v49 = vpack.c.b16 %v4289_v30, %v4289_v30  ;;  %v4059_v16 = vunpack.c.l.b16 %v3883_v27  ;;  %v4154_v3 = vpack.c.b16 %v4146_v47, %v4106_v1 }
 0x400   : > { %v3994_v10 = vshll.u32 %v3971_v45, 16  ;;  %v4250_v20 = vpack.c.b16 %v4146_v47, %v4242_v52  ;;  %v4337_v55 = vpack.c.b16 %v4329_v44, %v4289_v30  ;;  %v3992_v58 = vshrl.u32 %v3971_v45, 16  ;;  %v3929_v30 = vld [vmem:[#allocation2 + $0x10] sm:$0xe] }
 0x401   : > { %4035 = vrot.lane.b32.xlu0 %v3990_v33, %s6302_s21  ;;  %v4067_v62 = vpack.c.b16 %v3958_v53, %v4059_v16  ;;  %v4171_v22 = vshll.u32 %v4154_v3, 16  ;;  %v4169_v50 = vshrl.u32 %v4154_v3, 16  ;;  %v3829_v33 = vld [vmem:[#allocation2 + $0x18] sm:$0xf]  ;;  %v4425_v52 = vunpack.c.l.b16 %v3929_v30 }
 0x402   : > { %v3996_v4 = vrot.slane %v3994_v10, 1  ;;  %v4258_v51 = vrot.slane %v4250_v20, 1  ;;  %v4348_v43 = vshll.u32 %v4337_v55, 16  ;;  %v4346_v11 = vshrl.u32 %v4337_v55, 16 }
 0x403   : > { %4123 = vrot.lane.b32.xlu1 %v4114_v36, %s6305_s17  ;;  %v4075_v17 = vrot.slane %v4067_v62, 1  ;;  %v4173_v24 = vrot.slane %v4171_v22, 1 }
 0x404   : > { %4217 = vrot.lane.b32.xlu2 %v4167_v31, %s6308_s26  ;;  %v3997_v59 = vor.u32 %v3996_v4, %v3992_v58  ;;  %v4350_v57 = vrot.slane %v4348_v43, 1  ;;  %v3838_v4 = vld [vmem:[#allocation2 + $0x24] sm:$0x1] }
 0x405   : > { %v3646_v18 = vpop.f32.mrf.mxu3  ;;  %v4174_v36 = vor.u32 %v4173_v24, %v4169_v50 }
 0x406   : > { %v3676_v0 = vadd.f32 %v3675_v12, %v3646_v18  ;;  %v4351_v32 = vor.u32 %v4350_v57, %v4346_v11  ;;  %v3680_v12 = vpop.f32.mrf.mxu2 }
 0x408   : > { %v7691_v41 = vadd.f32 %v3676_v0, %v7071_v15  ;;  %v3835_v0 = vld [vmem:[#allocation2 + $0x20] sm:$0xf] }
 0x409   : > { %4305 = vrot.lane.b32.xlu0 %v4297_v49, %s6311_s18 }
 0x40a   : > { %v3705_v38 = vmul.f32 %v7652_v39, %v7691_v41 }
 0x40b   : > { %4037 = vrot.lane.b32.xlu1 %v3997_v59, %s6302_s21  ;;  %v4433_v59 = vpack.c.b16 %v4329_v44, %v4425_v52 }
 0x40c   : > { %v3716_v6 = vadd.f32 %v7660_v13, %v3705_v38  ;;  %4267 = vrot.lane.b32.xlu2 %v4258_v51, %s6310_s27 }
 0x40d   : > { %v3648_v15 = vpop.f32.mrf.mxu3 }
 0x40e   : > { %v3724_v14 = vmax.f32 %v3716_v6, 0.0  ;;  %v3678_v21 = vadd.f32 %v3677_v61, %v3648_v15  ;;  %v3682_v24 = vpop.f32.mrf.mxu2 }
 0x410   : > { %v3732_v56 = vpack.c.bf16 %v3724_v14, %v3724_v14  ;;  %v7703_v19 = vadd.f32 %v3678_v21, %v7079_v25 }
 0x411   : > { %4085 = vrot.lane.b32.xlu0 %v4075_v17, %s6303_s23 }
 0x412   : > { %v3755_v29 = vshrl.u32 %v3732_v56, 16  ;;  %v3706_v35 = vmul.f32 %v7652_v39, %v7703_v19  ;;  %v3758_v1 = vshll.u32 %v3732_v56, 16 }
 0x414   : > { %v3757_v28 = vrot.slane %v3755_v29, 7  ;;  %v3717_v54 = vadd.f32 %v7660_v13, %v3706_v35  ;;  %4401 = vrot.lane.b32.xlu2 %v4351_v32, %s6312_s20 }
 0x416   : > { %v3760_v25 = vor.u32 %v3758_v1, %v3757_v28  ;;  %v3761_v2 = vrot.slane %v3757_v28, 4  ;;  %v3725_v5 = vmax.f32 %v3717_v54, 0.0  ;;  %v4441_v1 = vrot.slane %v4433_v59, 1 }
 0x418   : > { %v3830_v40 = vsel %vm7036_vm9, %v3760_v25, %v3829_v33  ;;  %v3833_v53 = vsel %vm6971_vm7, %v3761_v2, %v3832_v37  ;;  %v3733_v8 = vpack.c.bf16 %v3725_v5, %v3725_v5 }
 0x419   : > { %3831 = vst [vmem:[#allocation2 + $0x18] sm:$0xf] %v3830_v40  ;;  %4219 = vrot.lane.b32.xlu0 %v4174_v36, %s6308_s26 }
 0x41a   : > { %3834 = vst [vmem:[#allocation2 + $0x1c] sm:$0x1] %v3833_v53  ;;  %v3763_v45 = vshrl.u32 %v3733_v8, 16  ;;  %v3766_v47 = vshll.u32 %v3733_v8, 16 }
 0x41c   : > { %v3765_v31 = vrot.slane %v3763_v45, 7 }
 0x41e   : > { %v3768_v10 = vor.u32 %v3766_v47, %v3765_v31  ;;  %v3769_v18 = vrot.slane %v3765_v31, 4  ;;  %v3651_v27 = vpop.f32.mrf.mxu3 }
 0x41f   : > { %v3681_v20 = vadd.f32 %v3680_v12, %v3651_v27  ;;  %v4578_v12 = vunpack.c.l.b16 %v4441_v1 }
 0x420   : > { %v3836_v55 = vsel %vm7036_vm9, %v3768_v10, %v3835_v0  ;;  %v3839_v49 = vsel %vm6971_vm7, %v3769_v18, %v3838_v4  ;;  %v3914_v58 = vld [vmem:[#allocation2 + $0x18] sm:$0xf] }
 0x421   : > { %v3891_v16 = vld [vmem:[#allocation2 + $0x18] sm:$0xf]  ;;  %3837 = vst [vmem:[#allocation2 + $0x20] sm:$0xf] %v3836_v55  ;;  %v7722_v51 = vadd.f32 %v3681_v20, %v7120_v48  ;;  %v4290_v43 = vunpack.c.l.b16 %v3914_v58  ;;  %v3899_v62 = vld [vmem:[#allocation2 + $0x1c] sm:$0x1] }
 0x422   : > { %v3907_v38 = vld [vmem:[#allocation2 + $0x18] sm:$0xe]  ;;  %v4107_v6 = vunpack.c.l.b16 %v3891_v16  ;;  %v3922_v61 = vld [vmem:[#allocation2 + $0x1c] sm:$0x1]  ;;  %3840 = vst [vmem:[#allocation2 + $0x24] sm:$0x1] %v3839_v49  ;;  %v4147_v15 = vunpack.c.l.b16 %v3899_v62 }
 0x423   : > { %v4243_v3 = vunpack.c.l.b16 %v3907_v38  ;;  %v3930_v14 = vld [vmem:[#allocation2 + $0x18] sm:$0xe]  ;;  %v4330_v21 = vunpack.c.l.b16 %v3922_v61  ;;  %v3876_v63 = vld [vmem:[#allocation2 + $0x1c] sm:$0x1]  ;;  %v3707_v57 = vmul.f32 %v7652_v39, %v7722_v51  ;;  %v4298_v56 = vpack.c.b16 %v4290_v43, %v4290_v43 }
 0x424   : > { %v4115_v34 = vpack.c.b16 %v4107_v6, %v4107_v6  ;;  %v4426_v44 = vunpack.c.l.b16 %v3930_v14  ;;  %v3884_v17 = vld [vmem:[#allocation2 + $0x18] sm:$0xe]  ;;  %v3960_v11 = vunpack.c.l.b16 %v3876_v63  ;;  %v4155_v53 = vpack.c.b16 %v4147_v15, %v4107_v6  ;;  %v3841_v6 = vld [vmem:[#allocation2 + $0x28] sm:$0xf] }
 0x425   : > { %v7726_v22 = vld [vmem:[#allocation2 + $0x18] sm:$0xf]  ;;  %v4251_v48 = vpack.c.b16 %v4147_v15, %v4243_v3  ;;  %v4060_v29 = vunpack.c.l.b16 %v3884_v17  ;;  %v3718_v32 = vadd.f32 %v7660_v13, %v3707_v57  ;;  %4307 = vrot.lane.b32.xlu1 %v4298_v56, %s6311_s18  ;;  %v4338_v54 = vpack.c.b16 %v4330_v21, %v4290_v43  ;;  %v3844_v56 = vld [vmem:[#allocation2 + $0x2c] sm:$0x1] }
 0x426   : > { %v3959_v35 = vunpack.c.l.b16 %v7726_v22  ;;  %4125 = vrot.lane.b32.xlu2 %v4115_v34, %s6305_s17  ;;  %v4434_v28 = vpack.c.b16 %v4330_v21, %v4426_v44  ;;  %v3653_v25 = vpop.f32.mrf.mxu3  ;;  %v4178_v20 = vshll.u32 %v4155_v53, 16 }
 0x427   : > { %v4259_v2 = vrot.slane %v4251_v48, 1  ;;  %v4068_v5 = vpack.c.b16 %v3960_v11, %v4060_v29  ;;  %v3726_v33 = vmax.f32 %v3718_v32, 0.0  ;;  %v3683_v37 = vadd.f32 %v3682_v24, %v3653_v25 }
 0x428   : > { %v3972_v50 = vpack.c.b16 %v3960_v11, %v3959_v35  ;;  %v4442_v40 = vrot.slane %v4434_v28, 1  ;;  %v4355_v36 = vshll.u32 %v4338_v54, 16  ;;  %v4353_v58 = vshrl.u32 %v4338_v54, 16  ;;  %v3915_v59 = vld [vmem:[#allocation2 + $0x20] sm:$0xf] }
 0x429   : > { %4269 = vrot.lane.b32.xlu0 %v4259_v2, %s6310_s27  ;;  %v3734_v30 = vpack.c.bf16 %v3726_v33, %v3726_v33  ;;  %v7734_v45 = vadd.f32 %v3683_v37, %v7131_v23  ;;  %v4076_v47 = vrot.slane %v4068_v5, 1  ;;  %v3877_v55 = vld [vmem:[#allocation2 + $0x24] sm:$0x1]  ;;  %v7741_v43 = vld [vmem:[#allocation2 + $0x20] sm:$0xf]  ;;  %v4180_v63 = vrot.slane %v4178_v20, 1 }
 0x42a   : > { %v4001_v8 = vshll.u32 %v3972_v50, 16  ;;  %v4580_v31 = vunpack.c.l.b16 %v4442_v40  ;;  %v3999_v52 = vshrl.u32 %v3972_v50, 16  ;;  %v4357_v18 = vrot.slane %v4355_v36, 1  ;;  %v3892_v3 = vld [vmem:[#allocation2 + $0x20] sm:$0xf] }
 0x42b   : > { %v3771_v27 = vshrl.u32 %v3734_v30, 16  ;;  %v3708_v0 = vmul.f32 %v7652_v39, %v7734_v45  ;;  %v3774_v38 = vshll.u32 %v3734_v30, 16  ;;  %v3962_v61 = vunpack.c.l.b16 %v3877_v55  ;;  %v3923_v57 = vld [vmem:[#allocation2 + $0x24] sm:$0x1]  ;;  %v3908_v17 = vld [vmem:[#allocation2 + $0x20] sm:$0xe] }
 0x42c   : > { %v4003_v10 = vrot.slane %v4001_v8, 1  ;;  %v4612_v4 = vpack.c.b16 %v4580_v31, %v4578_v12  ;;  %v4358_v62 = vor.u32 %v4357_v18, %v4353_v58  ;;  %v4291_v34 = vunpack.c.l.b16 %v3915_v59  ;;  %v3900_v44 = vld [vmem:[#allocation2 + $0x24] sm:$0x1]  ;;  %v3885_v28 = vld [vmem:[#allocation2 + $0x20] sm:$0xe] }
 0x42d   : > { %v3773_v16 = vrot.slane %v3771_v27, 7  ;;  %v3719_v23 = vadd.f32 %v7660_v13, %v3708_v0  ;;  %4087 = vrot.lane.b32.xlu1 %v4076_v47, %s6303_s23  ;;  %v3961_v48 = vunpack.c.l.b16 %v7741_v43  ;;  %v4176_v32 = vshrl.u32 %v4155_v53, 16  ;;  %v3931_v24 = vld [vmem:[#allocation2 + $0x20] sm:$0xe]  ;;  %v3847_v18 = vld [vmem:[#allocation2 + $0x30] sm:$0xf] }
 0x42e   : > { %v4004_v49 = vor.u32 %v4003_v10, %v3999_v52  ;;  %6066 = vmatmul.msk.bf16.vlgmr.msrb.gmra.mxu1 %vm1291_vm11, %v4612_v4  ;;  %v4108_v1 = vunpack.c.l.b16 %v3892_v3  ;;  %v4331_v25 = vunpack.c.l.b16 %v3923_v57  ;;  %v4148_v50 = vunpack.c.l.b16 %v3900_v44  ;;  %v3850_v27 = vld [vmem:[#allocation2 + $0x34] sm:$0x1]  ;;  %v3685_v44 = vpop.f32.mrf.mxu2 }
 0x42f   : > { %v3776_v15 = vor.u32 %v3774_v38, %v3773_v16  ;;  %v3777_v14 = vrot.slane %v3773_v16, 4  ;;  %v3727_v21 = vmax.f32 %v3719_v23, 0.0  ;;  %v3973_v54 = vpack.c.b16 %v3962_v61, %v3961_v48 }
 0x430   : > { %4039 = vrot.lane.b32.xlu2 %v4004_v49, %s6302_s21  ;;  %v4181_v5 = vor.u32 %v4180_v63, %v4176_v32  ;;  %v4244_v33 = vunpack.c.l.b16 %v3908_v17  ;;  %v4299_v37 = vpack.c.b16 %v4291_v34, %v4291_v34  ;;  %v4061_v40 = vunpack.c.l.b16 %v3885_v28 }
 0x431   : > { %4403 = vrot.lane.b32.xlu0 %v4358_v62, %s6312_s20  ;;  %v3842_v11 = vsel %vm7036_vm9, %v3776_v15, %v3841_v6  ;;  %v3845_v29 = vsel %vm6971_vm7, %v3777_v14, %v3844_v56  ;;  %v3735_v35 = vpack.c.bf16 %v3727_v21, %v3727_v21  ;;  %v4427_v30 = vunpack.c.l.b16 %v3931_v24 }
 0x432   : > { %3843 = vst [vmem:[#allocation2 + $0x28] sm:$0xf] %v3842_v11  ;;  %v4116_v53 = vpack.c.b16 %v4108_v1, %v4108_v1  ;;  %v4008_v12 = vshll.u32 %v3973_v54, 16  ;;  %v4339_v31 = vpack.c.b16 %v4331_v25, %v4291_v34  ;;  %v4252_v10 = vpack.c.b16 %v4148_v50, %v4244_v33 }
 0x433   : > { %3846 = vst [vmem:[#allocation2 + $0x2c] sm:$0x1] %v3845_v29  ;;  %v3779_v2 = vshrl.u32 %v3735_v35, 16  ;;  %v3782_v36 = vshll.u32 %v3735_v35, 16  ;;  %v4069_v0 = vpack.c.b16 %v3962_v61, %v4061_v40  ;;  %v4156_v4 = vpack.c.b16 %v4148_v50, %v4108_v1 }
 0x434   : > { %v4435_v58 = vpack.c.b16 %v4331_v25, %v4427_v30  ;;  %v4010_v16 = vrot.slane %v4008_v12, 1  ;;  %v4362_v59 = vshll.u32 %v4339_v31, 16  ;;  %v4260_v6 = vrot.slane %v4252_v10, 1 }
 0x435   : > { %v3781_v8 = vrot.slane %v3779_v2, 7  ;;  %4221 = vrot.lane.b32.xlu1 %v4181_v5, %s6308_s26  ;;  %v4077_v3 = vrot.slane %v4069_v0, 1  ;;  %v4006_v15 = vshrl.u32 %v3973_v54, 16  ;;  %v4185_v61 = vshll.u32 %v4156_v4, 16 }
 0x436   : > { %v4443_v21 = vrot.slane %v4435_v58, 1  ;;  %v4364_v57 = vrot.slane %v4362_v59, 1  ;;  %v4360_v17 = vshrl.u32 %v4339_v31, 16  ;;  %v4183_v25 = vshrl.u32 %v4156_v4, 16  ;;  %v3687_v4 = vpop.f32.mrf.mxu2 }
 0x437   : > { %v3784_v47 = vor.u32 %v3782_v36, %v3781_v8  ;;  %v3785_v52 = vrot.slane %v3781_v8, 4  ;;  %v4011_v63 = vor.u32 %v4010_v16, %v4006_v15  ;;  %v4187_v48 = vrot.slane %v4185_v61, 1 }
 0x438   : > { %4309 = vrot.lane.b32.xlu2 %v4299_v37, %s6311_s18  ;;  %v4582_v35 = vunpack.c.l.b16 %v4443_v21  ;;  %v4365_v24 = vor.u32 %v4364_v57, %v4360_v17  ;;  %v7778_v21 = vpop.permute.xlu2 %4033 }
 0x439   : > { %4127 = vrot.lane.b32.xlu0 %v4116_v53, %s6305_s17  ;;  %v3848_v20 = vsel %vm7036_vm9, %v3784_v47, %v3847_v18  ;;  %v3851_v55 = vsel %vm6971_vm7, %v3785_v52, %v3850_v27  ;;  %v3932_v49 = vld [vmem:[#allocation2 + $0x28] sm:$0xe]  ;;  %v4188_v36 = vor.u32 %v4187_v48, %v4183_v25 }
 0x43a   : > { %3849 = vst [vmem:[#allocation2 + $0x30] sm:$0xf] %v3848_v20  ;;  %v3924_v38 = vld [vmem:[#allocation2 + $0x2c] sm:$0x1]  ;;  %v4428_v23 = vunpack.c.l.b16 %v3932_v49  ;;  %v3916_v34 = vld [vmem:[#allocation2 + $0x28] sm:$0xf] }
 0x43b   : > { %3852 = vst [vmem:[#allocation2 + $0x34] sm:$0x1] %v3851_v55  ;;  %v4332_v62 = vunpack.c.l.b16 %v3924_v38  ;;  %v3878_v11 = vld [vmem:[#allocation2 + $0x2c] sm:$0x1]  ;;  %v7760_v29 = vld [vmem:[#allocation2 + $0x28] sm:$0xf]  ;;  %v4292_v2 = vunpack.c.l.b16 %v3916_v34 }
 0x43c   : > { %v3901_v28 = vld [vmem:[#allocation2 + $0x2c] sm:$0x1]  ;;  %v3909_v1 = vld [vmem:[#allocation2 + $0x28] sm:$0xe]  ;;  %v3964_v40 = vunpack.c.l.b16 %v3878_v11  ;;  %v3963_v8 = vunpack.c.l.b16 %v7760_v29 }
 0x43d   : > { %4271 = vrot.lane.b32.xlu1 %v4260_v6, %s6310_s27  ;;  %v4436_v14 = vpack.c.b16 %v4332_v62, %v4428_v23  ;;  %v3893_v33 = vld [vmem:[#allocation2 + $0x28] sm:$0xf]  ;;  %v4149_v30 = vunpack.c.l.b16 %v3901_v28  ;;  %v4245_v53 = vunpack.c.l.b16 %v3909_v1  ;;  %v4300_v31 = vpack.c.b16 %v4292_v2, %v4292_v2 }
 0x43e   : > { %v3886_v37 = vld [vmem:[#allocation2 + $0x28] sm:$0xe]  ;;  %v4109_v47 = vunpack.c.l.b16 %v3893_v33  ;;  %v3974_v18 = vpack.c.b16 %v3964_v40, %v3963_v8  ;;  %v4340_v0 = vpack.c.b16 %v4332_v62, %v4292_v2  ;;  %v3853_v33 = vld [vmem:[#allocation2 + $0x38] sm:$0xf] }
 0x43f   : > { %v4444_v56 = vrot.slane %v4436_v14, 1  ;;  %v4062_v52 = vunpack.c.l.b16 %v3886_v37  ;;  %v4253_v27 = vpack.c.b16 %v4149_v30, %v4245_v53  ;;  %v3856_v37 = vld [vmem:[#allocation2 + $0x3c] sm:$0x1] }
 0x440   : > { %4089 = vrot.lane.b32.xlu2 %v4077_v3, %s6303_s23  ;;  %v4157_v49 = vpack.c.b16 %v4149_v30, %v4109_v47  ;;  %v4117_v38 = vpack.c.b16 %v4109_v47, %v4109_v47  ;;  %v4015_v23 = vshll.u32 %v3974_v18, 16  ;;  %v4369_v6 = vshll.u32 %v4340_v0, 16 }
 0x441   : > { %4041 = vrot.lane.b32.xlu0 %v4011_v63, %s6302_s21  ;;  %v4584_v32 = vunpack.c.l.b16 %v4444_v56  ;;  %v3656_v54 = vpop.f32.mrf.mxu3  ;;  %v4070_v55 = vpack.c.b16 %v3964_v40, %v4062_v52  ;;  %v4261_v59 = vrot.slane %v4253_v27, 1  ;;  %v6144_v56 = vld [vmem:[%s8312_s12 + $0x38] sm:$0xff]  ;;  %v4013_v34 = vshrl.u32 %v3974_v18, 16  ;;  %v3917_v28 = vld [vmem:[#allocation2 + $0x30] sm:$0xf] }
 0x442   : > { %v3686_v5 = vadd.f32 %v3685_v44, %v3656_v54  ;;  %v4192_v61 = vshll.u32 %v4157_v49, 16  ;;  %v4017_v57 = vrot.slane %v4015_v23, 1  ;;  %v7787_v11 = vld [vmem:[#allocation2 + $0x34] sm:$0x1]  ;;  %4689 = vmatpush.bf16.msrb.mxu0 %v6144_v56  ;;  %v4190_v8 = vshrl.u32 %v4157_v49, 16 }
 0x443   : > { %v4614_v50 = vpack.c.b16 %v4584_v32, %v4582_v35  ;;  %v4078_v62 = vrot.slane %v4070_v55, 1  ;;  %v7789_v35 = vld [vmem:[#allocation2 + $0x30] sm:$0xf]  ;;  %v4367_v32 = vshrl.u32 %v4340_v0, 16  ;;  %v3902_v1 = vld [vmem:[#allocation2 + $0x34] sm:$0x1]  ;;  %v4293_v47 = vunpack.c.l.b16 %v3917_v28 }
 0x444   : > { %v7764_v12 = vadd.f32 %v3686_v5, %v7181_v46  ;;  %v4018_v2 = vor.u32 %v4017_v57, %v4013_v34  ;;  %v3910_v5 = vld [vmem:[#allocation2 + $0x30] sm:$0xe]  ;;  %v4150_v18 = vunpack.c.l.b16 %v3902_v1  ;;  %v3859_v57 = vld [vmem:[#allocation2 + $0x40] sm:$0xf]  ;;  %v3862_v56 = vld [vmem:[#allocation2 + $0x44] sm:$0x1] }
 0x445   : > { %6067 = vmatmul.msk.bf16.gmra.mxu1 %vm1291_vm11, %v4614_v50  ;;  %4405 = vrot.lane.b32.xlu1 %v4365_v24, %s6312_s20  ;;  %v3925_v50 = vld [vmem:[#allocation2 + $0x34] sm:$0x1]  ;;  %v3894_v52 = vld [vmem:[#allocation2 + $0x30] sm:$0xf]  ;;  %v4246_v27 = vunpack.c.l.b16 %v3910_v5  ;;  %v6142_v5 = vld [vmem:[%s8312_s12 + $0x28] sm:$0xff] }
 0x446   : > { %v3709_v10 = vmul.f32 %v7652_v39, %v7764_v12  ;;  %v4333_v0 = vunpack.c.l.b16 %v3925_v50  ;;  %v4110_v55 = vunpack.c.l.b16 %v3894_v52  ;;  %v3887_v49 = vld [vmem:[#allocation2 + $0x30] sm:$0xe] }
 0x448   : > { %4223 = vrot.lane.b32.xlu2 %v4188_v36, %s6308_s26  ;;  %v3720_v46 = vadd.f32 %v7660_v13, %v3709_v10  ;;  %v3965_v36 = vunpack.c.l.b16 %v7789_v35 }
 0x449   : > { %4311 = vrot.lane.b32.xlu0 %v4300_v31, %s6311_s18  ;;  %v3658_v20 = vpop.f32.mrf.mxu3 }
 0x44a   : > { %v3728_v58 = vmax.f32 %v3720_v46, 0.0  ;;  %v3688_v16 = vadd.f32 %v3687_v4, %v3658_v20  ;;  %v3933_v46 = vld [vmem:[#allocation2 + $0x30] sm:$0xe] }
 0x44b   : > { %v6143_v20 = vld [vmem:[%s8312_s12 + $0x30] sm:$0xff] }
 0x44c   : > { %v3736_v3 = vpack.c.bf16 %v3728_v58, %v3728_v58  ;;  %v7774_v15 = vadd.f32 %v3688_v16, %v7201_v7  ;;  %v4371_v7 = vrot.slane %v4369_v6, 1  ;;  %4690 = vmatpush.bf16.msrb.mxu0 %v6143_v20  ;;  %v4254_v6 = vpack.c.b16 %v4150_v18, %v4246_v27 }
 0x44d   : > { %4129 = vrot.lane.b32.xlu1 %v4117_v38, %s6305_s17 }
 0x44e   : > { %v3787_v14 = vshrl.u32 %v3736_v3, 16  ;;  %v3710_v63 = vmul.f32 %v7652_v39, %v7774_v15  ;;  %v3790_v17 = vshll.u32 %v3736_v3, 16  ;;  %v4194_v39 = vrot.slane %v4192_v61, 1 }
 0x44f   : > { %v4372_v40 = vor.u32 %v4371_v7, %v4367_v32  ;;  %v4341_v3 = vpack.c.b16 %v4333_v0, %v4293_v47  ;;  %v4118_v7 = vpack.c.b16 %v4110_v55, %v4110_v55  ;;  %v4158_v32 = vpack.c.b16 %v4150_v18, %v4110_v55  ;;  %v3936_v18 = vld [vmem:[#allocation2 + $0x48] sm:$0xe]  ;;  %v6141_v55 = vld [vmem:[%s8312_s12 + $0x20] sm:$0xff] }
 0x450   : > { %4273 = vrot.lane.b32.xlu2 %v4261_v59, %s6310_s27  ;;  %v3789_v44 = vrot.slane %v3787_v14, 7  ;;  %v3721_v48 = vadd.f32 %v7660_v13, %v3710_v63  ;;  %v3966_v13 = vunpack.c.l.b16 %v7787_v11  ;;  %v4195_v10 = vor.u32 %v4194_v39, %v4190_v8  ;;  %4691 = vmatpush.bf16.msrb.mxu0 %v6142_v5 }
 0x451   : > { %4091 = vrot.lane.b32.xlu0 %v4078_v62, %s6303_s23  ;;  %v4429_v59 = vunpack.c.l.b16 %v3933_v46  ;;  %v4301_v14 = vpack.c.b16 %v4293_v47, %v4293_v47  ;;  %v4063_v63 = vunpack.c.l.b16 %v3887_v49  ;;  %v4262_v39 = vrot.slane %v4254_v6, 1 }
 0x452   : > { %v3792_v54 = vor.u32 %v3790_v17, %v3789_v44  ;;  %v3793_v24 = vrot.slane %v3789_v44, 4  ;;  %v3729_v25 = vmax.f32 %v3721_v48, 0.0  ;;  %v3975_v58 = vpack.c.b16 %v3966_v13, %v3965_v36  ;;  %v7820_v36 = vld [vmem:[#allocation2 + $0x4c] sm:$0x1] }
 0x453   : > { %v4437_v11 = vpack.c.b16 %v4333_v0, %v4429_v59  ;;  %v4376_v28 = vshll.u32 %v4341_v3, 16  ;;  %v4336_v59 = vunpack.c.l.b16 %v7820_v36 }
 0x454   : > { %v3854_v30 = vsel %vm7036_vm9, %v3792_v54, %v3853_v33  ;;  %v3857_v53 = vsel %vm6971_vm7, %v3793_v24, %v3856_v37  ;;  %v3737_v31 = vpack.c.bf16 %v3729_v25, %v3729_v25  ;;  %v4022_v34 = vshll.u32 %v3975_v58, 16  ;;  %4692 = vmatpush.bf16.msrb.mxu0 %v6141_v55 }
 0x455   : > { %4043 = vrot.lane.b32.xlu1 %v4018_v2, %s6302_s21  ;;  %3855 = vst [vmem:[#allocation2 + $0x38] sm:$0xf] %v3854_v30  ;;  %v4071_v24 = vpack.c.b16 %v3966_v13, %v4063_v63  ;;  %v4445_v33 = vrot.slane %v4437_v11, 1  ;;  %v4199_v37 = vshll.u32 %v4158_v32, 16  ;;  %v4378_v8 = vrot.slane %v4376_v28, 1 }
 0x456   : > { %3858 = vst [vmem:[#allocation2 + $0x3c] sm:$0x1] %v3857_v53  ;;  %v3795_v4 = vshrl.u32 %v3737_v31, 16  ;;  %v3798_v38 = vshll.u32 %v3737_v31, 16  ;;  %v7803_v23 = vpop.permute.xlu2 %4083  ;;  %v4024_v2 = vrot.slane %v4022_v34, 1  ;;  %v4197_v63 = vshrl.u32 %v4158_v32, 16 }
 0x457   : > { %v4079_v30 = vrot.slane %v4071_v24, 1  ;;  %v4586_v27 = vunpack.c.l.b16 %v4445_v33  ;;  %v4201_v46 = vrot.slane %v4199_v37, 1 }
 0x458   : > { %4407 = vrot.lane.b32.xlu2 %v4372_v40, %s6312_s20  ;;  %v3797_v16 = vrot.slane %v3795_v4, 7  ;;  %v4020_v40 = vshrl.u32 %v3975_v58, 16 }
 0x459   : > { %4225 = vrot.lane.b32.xlu0 %v4195_v10, %s6308_s26  ;;  %v4374_v10 = vshrl.u32 %v4341_v3, 16 }
 0x45a   : > { %v3800_v62 = vor.u32 %v3798_v38, %v3797_v16  ;;  %v3801_v61 = vrot.slane %v3797_v16, 4  ;;  %v4025_v52 = vor.u32 %v4024_v2, %v4020_v40 }
 0x45b   : > { %v4379_v49 = vor.u32 %v4378_v8, %v4374_v10  ;;  %v6139_v10 = vld [vmem:[%s8312_s12 + $0x10] sm:$0xff] }
 0x45c   : > { %v3860_v44 = vsel %vm7036_vm9, %v3800_v62, %v3859_v57  ;;  %v3863_v17 = vsel %vm6971_vm7, %v3801_v61, %v3862_v56  ;;  %v3934_v48 = vld [vmem:[#allocation2 + $0x38] sm:$0xe] }
 0x45d   : > { %4313 = vrot.lane.b32.xlu1 %v4301_v14, %s6311_s18  ;;  %3864 = vst [vmem:[#allocation2 + $0x44] sm:$0x1] %v3863_v17  ;;  %v7811_v1 = vld [vmem:[#allocation2 + $0x3c] sm:$0x1]  ;;  %v4430_v54 = vunpack.c.l.b16 %v3934_v48  ;;  %v7824_v47 = vld [vmem:[#allocation2 + $0x38] sm:$0xf]  ;;  %v4432_v14 = vunpack.c.l.b16 %v3936_v18  ;;  %v7857_v18 = vpop.permute.xlu1 %4081 }
 0x45e   : > { %3861 = vst [vmem:[#allocation2 + $0x40] sm:$0xf] %v3860_v44  ;;  %v4334_v25 = vunpack.c.l.b16 %v7811_v1  ;;  %v7822_v13 = vpop.permute.xlu2 %4217  ;;  %v3880_v31 = vld [vmem:[#allocation2 + $0x3c] sm:$0x1]  ;;  %v3918_v4 = vld [vmem:[#allocation2 + $0x38] sm:$0xf]  ;;  %v3967_v16 = vunpack.c.l.b16 %v7824_v47  ;;  %v4202_v44 = vor.u32 %v4201_v46, %v4197_v63 }
 0x45f   : > { %v3968_v58 = vunpack.c.l.b16 %v3880_v31  ;;  %v3895_v3 = vld [vmem:[#allocation2 + $0x38] sm:$0xf]  ;;  %v4294_v57 = vunpack.c.l.b16 %v3918_v4  ;;  %v3903_v56 = vld [vmem:[#allocation2 + $0x3c] sm:$0x1] }
 0x460   : > { %4131 = vrot.lane.b32.xlu2 %v4118_v7, %s6305_s17  ;;  %v4438_v50 = vpack.c.b16 %v4334_v25, %v4430_v54  ;;  %v3911_v7 = vld [vmem:[#allocation2 + $0x38] sm:$0xe]  ;;  %v4111_v17 = vunpack.c.l.b16 %v3895_v3  ;;  %v4151_v11 = vunpack.c.l.b16 %v3903_v56  ;;  %v4440_v54 = vpack.c.b16 %v4336_v59, %v4432_v14 }
 0x461   : > { %4275 = vrot.lane.b32.xlu0 %v4262_v39, %s6310_s27  ;;  %v3888_v34 = vld [vmem:[#allocation2 + $0x38] sm:$0xe]  ;;  %v3976_v48 = vpack.c.b16 %v3968_v58, %v3967_v16  ;;  %v4247_v39 = vunpack.c.l.b16 %v3911_v7  ;;  %v4302_v32 = vpack.c.b16 %v4294_v57, %v4294_v57 }
 0x462   : > { %v4446_v53 = vrot.slane %v4438_v50, 1  ;;  %v4064_v2 = vunpack.c.l.b16 %v3888_v34  ;;  %v6140_v50 = vld [vmem:[%s8312_s12 + $0x18] sm:$0xff]  ;;  %v4119_v33 = vpack.c.b16 %v4111_v17, %v4111_v17 }
 0x463   : > { %v4029_v37 = vshll.u32 %v3976_v48, 16  ;;  %v4255_v40 = vpack.c.b16 %v4151_v11, %v4247_v39  ;;  %4693 = vmatpush.bf16.msrb.mxu0 %v6140_v50 }
 0x464   : > { %v4588_v0 = vunpack.c.l.b16 %v4446_v53  ;;  %v7827_v20 = vld [vmem:[#allocation2 + $0x44] sm:$0x1]  ;;  %v4342_v53 = vpack.c.b16 %v4334_v25, %v4294_v57  ;;  %v4072_v31 = vpack.c.b16 %v3968_v58, %v4064_v2 }
 0x465   : > { %4093 = vrot.lane.b32.xlu1 %v4079_v30, %s6303_s23  ;;  %v3935_v38 = vld [vmem:[#allocation2 + $0x40] sm:$0xe]  ;;  %v4335_v62 = vunpack.c.l.b16 %v7827_v20  ;;  %v4448_v30 = vrot.slane %v4440_v54, 1 }
 0x466   : > { %v4616_v6 = vpack.c.b16 %v4588_v0, %v4586_v27  ;;  %v4431_v61 = vunpack.c.l.b16 %v3935_v38  ;;  %v7844_v5 = vpop.permute.xlu2 %4267  ;;  %v4031_v27 = vrot.slane %v4029_v37, 1  ;;  %v4263_v0 = vrot.slane %v4255_v40, 1  ;;  %v3896_v16 = vld [vmem:[#allocation2 + $0x40] sm:$0xf] }
 0x467   : > { %v4592_v4 = vunpack.c.l.b16 %v4448_v30  ;;  %v4383_v55 = vshll.u32 %v4342_v53, 16  ;;  %4694 = vmatpush.bf16.msrb.mxu0 %v6139_v10  ;;  %v4080_v25 = vrot.slane %v4072_v31, 1  ;;  %v4027_v38 = vshrl.u32 %v3976_v48, 16  ;;  %v3919_v56 = vld [vmem:[#allocation2 + $0x40] sm:$0xf] }
 0x468   : > { %4045 = vrot.lane.b32.xlu2 %v4025_v52, %s6302_s21  ;;  %6068 = vmatmul.msk.bf16.gmra.mxu1 %vm1291_vm11, %v4616_v6  ;;  %v4439_v28 = vpack.c.b16 %v4335_v62, %v4431_v61  ;;  %v4159_v52 = vpack.c.b16 %v4151_v11, %v4111_v17  ;;  %v4112_v61 = vunpack.c.l.b16 %v3896_v16  ;;  %v4381_v34 = vshrl.u32 %v4342_v53, 16  ;;  %v3920_v17 = vld [vmem:[#allocation2 + $0x48] sm:$0xf] }
 0x469   : > { %4409 = vrot.lane.b32.xlu0 %v4379_v49, %s6312_s20  ;;  %v3904_v49 = vld [vmem:[#allocation2 + $0x44] sm:$0x1]  ;;  %v4032_v6 = vor.u32 %v4031_v27, %v4027_v38  ;;  %v4385_v57 = vrot.slane %v4383_v55, 1  ;;  %v4295_v11 = vunpack.c.l.b16 %v3919_v56 }
 0x46a   : > { %v7842_v24 = vpop.permute.xlu0 %4121  ;;  %v4447_v8 = vrot.slane %v4439_v28, 1  ;;  %v4206_v58 = vshll.u32 %v4159_v52, 16  ;;  %v4152_v3 = vunpack.c.l.b16 %v3904_v49  ;;  %v4204_v48 = vshrl.u32 %v4159_v52, 16  ;;  %v6138_v28 = vld [vmem:[%s8312_s12 + $0x8] sm:$0xff]  ;;  %v6137_v49 = vld [vmem:[%s8312_s12] sm:$0xff] }
 0x46b   : > { %4695 = vmatpush.bf16.msrb.mxu0 %v6138_v28  ;;  %v4303_v40 = vpack.c.b16 %v4295_v11, %v4295_v11  ;;  %v4343_v31 = vpack.c.b16 %v4335_v62, %v4295_v11  ;;  %v4120_v27 = vpack.c.b16 %v4112_v61, %v4112_v61 }
 0x46c   : > { %v4590_v46 = vunpack.c.l.b16 %v4447_v8  ;;  %v4208_v7 = vrot.slane %v4206_v58, 1  ;;  %v4160_v39 = vpack.c.b16 %v4152_v3, %v4112_v61 }
 0x46d   : > { %4227 = vrot.lane.b32.xlu1 %v4202_v44, %s6308_s26  ;;  %v3912_v44 = vld [vmem:[#allocation2 + $0x40] sm:$0xe]  ;;  %v4266_v54 = vpop.permute.xlu1 %4265 }
 0x46e   : > { %v7863_v14 = vpop.permute.xlu2 %4401  ;;  %v4618_v63 = vpack.c.b16 %v4592_v4, %v4590_v46  ;;  %v4209_v2 = vor.u32 %v4208_v7, %v4204_v48  ;;  %v4248_v50 = vunpack.c.l.b16 %v3912_v44  ;;  %v4213_v8 = vshll.u32 %v4160_v39, 16  ;;  %v6232_v48 = vld [vmem:[#allocation2 + $0x8] sm:$0xf] }
 0x46f   : > { %v4211_v46 = vshrl.u32 %v4160_v39, 16  ;;  %v4390_v4 = vshll.u32 %v4343_v31, 16  ;;  %4696 = vmatpush.bf16.msrb.mxu0 %v6137_v49 }
 0x470   : > { %4315 = vrot.lane.b32.xlu2 %v4302_v32, %s6311_s18  ;;  %v4386_v32 = vor.u32 %v4385_v57, %v4381_v34  ;;  %v4256_v53 = vpack.c.b16 %v4152_v3, %v4248_v50  ;;  %v4215_v10 = vrot.slane %v4213_v8, 1  ;;  %v6231_v57 = vld [vmem:[#allocation2] sm:$0xf] }
 0x471   : > { %4133 = vrot.lane.b32.xlu0 %v4119_v33, %s6305_s17  ;;  %v4296_v33 = vunpack.c.l.b16 %v3920_v17  ;;  %v4451_v56 = vsel %vm1291_vm11, %v6231_v57, %v7778_v21 }
 0x472   : > { %v4216_v20 = vor.u32 %v4215_v10, %v4211_v46  ;;  %v4474_v44 = vsel %vm1325_vm13, %v4451_v56, %v7857_v18 }
 0x473   : > { %v7859_v1 = vpop.permute.xlu0 %4035  ;;  %v4344_v52 = vpack.c.b16 %v4336_v59, %v4296_v33  ;;  %v4392_v59 = vrot.slane %v4390_v4, 1  ;;  %v4304_v58 = vpack.c.b16 %v4296_v33, %v4296_v33  ;;  %v4490_v17 = vsel %vm1359_vm15, %v4474_v44, %v7842_v24 }
 0x474   : > { %v4454_v11 = vsel %vm1291_vm11, %v6232_v48, %v7859_v1  ;;  %v4506_v28 = vsel %vm1393_vm1, %v4490_v17, %v7822_v13 }
 0x475   : > { %4277 = vrot.lane.b32.xlu1 %v4263_v0, %s6310_s27  ;;  %v4264_v0 = vrot.slane %v4256_v53, 1  ;;  %v4397_v55 = vshll.u32 %v4344_v52, 16  ;;  %v4124_v16 = vpop.permute.xlu1 %4123  ;;  %v4522_v50 = vsel %vm2412_vm10, %v4506_v28, %v4266_v54 }
 0x477   : > { %v4399_v38 = vrot.slane %v4397_v55, 1 }
 0x478   : > { %4095 = vrot.lane.b32.xlu2 %v4080_v25, %s6303_s23  ;;  %6069 = vmatmul.msk.bf16.gmra.mxu1 %vm1291_vm11, %v4618_v63  ;;  %v4395_v25 = vshrl.u32 %v4344_v52, 16 }
 0x479   : > { %4047 = vrot.lane.b32.xlu0 %v4032_v6, %s6302_s21  ;;  %v4388_v6 = vshrl.u32 %v4343_v31, 16 }
 0x47a   : > { %v4400_v61 = vor.u32 %v4399_v38, %v4395_v25 }
 0x47b   : > { %v4306_v37 = vpop.permute.xlu0 %4305  ;;  %v4393_v3 = vor.u32 %v4392_v59, %v4388_v6 }
 0x47c   : > { %v4538_v33 = vsel %vm2429_vm12, %v4522_v50, %v4306_v37 }
 0x47d   : > { %4411 = vrot.lane.b32.xlu1 %v4386_v32, %s6312_s20  ;;  %v4038_v63 = vpop.permute.xlu1 %4037  ;;  %v4476_v32 = vsel %vm1325_vm13, %v4454_v11, %v7803_v23  ;;  %v4554_v1 = vsel %vm2446_vm14, %v4538_v33, %v7863_v14 }
 0x47e   : > { %v4492_v18 = vsel %vm1359_vm15, %v4476_v32, %v4124_v16  ;;  %v4577_v31 = vunpack.c.l.b16 %v4554_v1 }
 0x480   : > { %4229 = vrot.lane.b32.xlu2 %v4209_v2, %s6308_s26  ;;  %v7872_v30 = vpop.permute.xlu2 %4125 }
 0x481   : > { %4317 = vrot.lane.b32.xlu0 %v4303_v40, %s6311_s18 }
 0x483   : > { %v4086_v62 = vpop.permute.xlu0 %4085 }
 0x485   : > { %4135 = vrot.lane.b32.xlu1 %v4120_v27, %s6305_s17 }
 0x488   : > { %4279 = vrot.lane.b32.xlu2 %v4264_v0, %s6310_s27  ;;  %v6233_v0 = vld [vmem:[#allocation2 + $0x10] sm:$0xf] }
 0x489   : > { %4231 = vrot.lane.b32.xlu0 %v4216_v20, %s6308_s26  ;;  %v4457_v46 = vsel %vm1291_vm11, %v6233_v0, %v4038_v63 }
 0x48a   : > { %v4040_v36 = vpop.permute.xlu2 %4039  ;;  %v4478_v14 = vsel %vm1325_vm13, %v4457_v46, %v4086_v62 }
 0x48b   : > { %v4220_v7 = vpop.permute.xlu0 %4219  ;;  %v4460_v20 = vsel %vm1291_vm11, %v7726_v22, %v4040_v36 }
 0x48c   : > { %v4508_v24 = vsel %vm1393_vm1, %v4492_v18, %v4220_v7 }
 0x48d   : > { %4319 = vrot.lane.b32.xlu1 %v4304_v58, %s6311_s18  ;;  %v4524_v13 = vsel %vm2412_vm10, %v4508_v24, %v7844_v5  ;;  %v4494_v5 = vsel %vm1359_vm15, %v4478_v14, %v7872_v30 }
 0x490   : > { %4413 = vrot.lane.b32.xlu2 %v4393_v3, %s6312_s20 }
 0x491   : > { %4415 = vrot.lane.b32.xlu0 %v4400_v61, %s6312_s20 }
 0x492   : > { %v4310_v34 = vpop.permute.xlu2 %4309 }
 0x497   : > { %v4308_v39 = vpop.permute.xlu1 %4307 }
 0x498   : > { %v4540_v8 = vsel %vm2429_vm12, %v4524_v13, %v4308_v39 }
 0x49a   : > { %v4090_v2 = vpop.permute.xlu2 %4089 }
 0x49b   : > { %v4270_v21 = vpop.permute.xlu0 %4269 }
 0x49f   : > { %v4088_v40 = vpop.permute.xlu1 %4087 }
 0x4a0   : > { %v4480_v59 = vsel %vm1325_vm13, %v4460_v20, %v4088_v40 }
 0x4a2   : > { %v4224_v52 = vpop.permute.xlu2 %4223 }
 0x4a3   : > { %v4404_v23 = vpop.permute.xlu0 %4403 }
 0x4a4   : > { %v4556_v53 = vsel %vm2446_vm14, %v4540_v8, %v4404_v23 }
 0x4a5   : > { %v4579_v54 = vunpack.c.l.b16 %v4556_v53 }
 0x4a7   : > { %v4611_v10 = vpack.c.b16 %v4579_v54, %v4577_v31  ;;  %v4222_v27 = vpop.permute.xlu1 %4221 }
 0x4a8   : > { %v4510_v16 = vsel %vm1393_vm1, %v4494_v5, %v4222_v27 }
 0x4a9   : > { %4697 = vmatmul.bf16.vlgmr.msrb.gmra.mxu0 %v4611_v10  ;;  %v4526_v25 = vsel %vm2412_vm10, %v4510_v16, %v4270_v21 }
 0x4aa   : > { %v4274_v55 = vpop.permute.xlu2 %4273  ;;  %v4542_v6 = vsel %vm2429_vm12, %v4526_v25, %v4310_v34 }
 0x4ab   : > { %v4128_v37 = vpop.permute.xlu0 %4127 }
 0x4ac   : > { %v4496_v38 = vsel %vm1359_vm15, %v4480_v59, %v4128_v37 }
 0x4ad   : > { %v4512_v62 = vsel %vm1393_vm1, %v4496_v38, %v4224_v52 }
 0x4af   : > { %v4272_v4 = vpop.permute.xlu1 %4271 }
 0x4b0   : > { %v4528_v30 = vsel %vm2412_vm10, %v4512_v62, %v4272_v4 }
 0x4b2   : > { %v4408_v3 = vpop.permute.xlu2 %4407 }
 0x4b3   : > { %v4042_v49 = vpop.permute.xlu0 %4041 }
 0x4b4   : > { %v4463_v13 = vsel %vm1291_vm11, %v7741_v43, %v4042_v49 }
 0x4b5   : > { %v4482_v23 = vsel %vm1325_vm13, %v4463_v13, %v4090_v2 }
 0x4b7   : > { %v4406_v58 = vpop.permute.xlu1 %4405 }
 0x4b8   : > { %v4558_v61 = vsel %vm2446_vm14, %v4542_v6, %v4406_v58 }
 0x4b9   : > { %v4581_v36 = vunpack.c.l.b16 %v4558_v61 }
 0x4ba   : > { %v4132_v48 = vpop.permute.xlu2 %4131 }
 0x4bb   : > { %v4312_v63 = vpop.permute.xlu0 %4311 }
 0x4bc   : > { %v4544_v57 = vsel %vm2429_vm12, %v4528_v30, %v4312_v63 }
 0x4bd   : > { %v4560_v22 = vsel %vm2446_vm14, %v4544_v57, %v4408_v3 }
 0x4be   : > { %v4583_v56 = vunpack.c.l.b16 %v4560_v22 }
 0x4bf   : > { %v4130_v7 = vpop.permute.xlu1 %4129 }
 0x4c0   : > { %v4613_v44 = vpack.c.b16 %v4583_v56, %v4581_v36  ;;  %v4498_v31 = vsel %vm1359_vm15, %v4482_v23, %v4130_v7 }
 0x4c2   : > { %4702 = vmatmul.bf16.gmra.mxu0 %v4613_v44  ;;  %v4046_v34 = vpop.permute.xlu2 %4045 }
 0x4c3   : > { %v4092_v17 = vpop.permute.xlu0 %4091  ;;  %v4469_v25 = vsel %vm1291_vm11, %v7789_v35, %v4046_v34  ;;  %v4922_v34 = vld [vmem:[#allocation2 + $0x4] sm:$0x1] }
 0x4c7   : > { %v4044_v11 = vpop.permute.xlu1 %4043 }
 0x4c8   : > { %v4466_v24 = vsel %vm1291_vm11, %v7760_v29, %v4044_v11 }
 0x4c9   : > { %v4484_v8 = vsel %vm1325_vm13, %v4466_v24, %v4092_v17 }
 0x4ca   : > { %v4316_v50 = vpop.permute.xlu2 %4315  ;;  %v4500_v54 = vsel %vm1359_vm15, %v4484_v8, %v4132_v48 }
 0x4cb   : > { %v4226_v39 = vpop.permute.xlu0 %4225 }
 0x4cc   : > { %v4514_v52 = vsel %vm1393_vm1, %v4498_v31, %v4226_v39  ;;  %v4914_v39 = vld [vmem:[#allocation2] sm:$0xf] }
 0x4cd   : > { %v4530_v29 = vsel %vm2412_vm10, %v4514_v52, %v4274_v55  ;;  %v7963_v31 = vld [vmem:[%s8313_s13] ss:$0 sm:$0xff] }
 0x4cf   : > { %v4314_v28 = vpop.permute.xlu1 %4313 }
 0x4d0   : > { %v4546_v43 = vsel %vm2429_vm12, %v4530_v29, %v4314_v28 }
 0x4d2   : > { %v4096_v40 = vpop.permute.xlu2 %4095 }
 0x4d3   : > { %v4276_v32 = vpop.permute.xlu0 %4275 }
 0x4d7   : > { %v4094_v21 = vpop.permute.xlu1 %4093 }
 0x4d8   : > { %v4486_v58 = vsel %vm1325_vm13, %v4469_v25, %v4094_v21  ;;  %v5003_v21 = vunpack.c.l.b16 %v4922_v34  ;;  %v4869_v25 = vld [vmem:[#allocation2 + $0xc] sm:$0x1] }
 0x4da   : > { %v4230_v37 = vpop.permute.xlu2 %4229 }
 0x4db   : > { %v4410_v18 = vpop.permute.xlu0 %4409 }
 0x4dc   : > { %v4562_v46 = vsel %vm2446_vm14, %v4546_v43, %v4410_v18 }
 0x4dd   : > { %v4585_v5 = vunpack.c.l.b16 %v4562_v46 }
 0x4df   : > { %v4228_v33 = vpop.permute.xlu1 %4227 }
 0x4e0   : > { %v4516_v10 = vsel %vm1393_vm1, %v4500_v54, %v4228_v33  ;;  %v4930_v33 = vld [vmem:[#allocation2] sm:$0xe] }
 0x4e1   : > { %v4532_v0 = vsel %vm2412_vm10, %v4516_v10, %v4276_v32  ;;  %v5002_v32 = vunpack.c.l.b16 %v4914_v39  ;;  %v5106_v24 = vunpack.c.l.b16 %v4930_v33  ;;  %v7968_v10 = vld [vmem:[%s8314_s14] ss:$0 sm:$0xff] }
 0x4e2   : > { %v4548_v2 = vsel %vm2429_vm12, %v4532_v0, %v4316_v50  ;;  %v4280_v55 = vpop.permute.xlu2 %4279 }
 0x4e3   : > { %v4134_v1 = vpop.permute.xlu0 %4133  ;;  %v5018_v50 = vpack.c.b16 %v5003_v21, %v5002_v32  ;;  %v5114_v13 = vpack.c.b16 %v5003_v21, %v5106_v24  ;;  %v6154_v24 = vld [vmem:[%s8315_s15 + $0x40] sm:$0xff] }
 0x4e4   : > { %v4502_v6 = vsel %vm1359_vm15, %v4486_v58, %v4134_v1  ;;  %5774 = vmatpush.bf16.msra.mxu0 %v6154_v24  ;;  %6156 = vmatpush.bf16.msra.mxu2 %v6154_v24 }
 0x4e5   : > { %v4518_v61 = vsel %vm1393_vm1, %v4502_v6, %v4230_v37  ;;  %v5029_v18 = vshll.u32 %v5018_v50, 16  ;;  %v5122_v23 = vrot.slane %v5114_v13, 1 }
 0x4e7   : > { %v4278_v53 = vpop.permute.xlu1 %4277  ;;  %v5031_v1 = vrot.slane %v5029_v18, 1  ;;  %5130 = vrot.lane.b32.xlu0 %v5122_v23, %s6303_s23 }
 0x4ea   : > { %v4414_v36 = vpop.permute.xlu2 %4413 }
 0x4eb   : > { %v4048_v27 = vpop.permute.xlu0 %4047 }
 0x4ec   : > { %v4472_v59 = vsel %vm1291_vm11, %v7824_v47, %v4048_v27  ;;  %v4534_v47 = vsel %vm2412_vm10, %v4518_v61, %v4278_v53  ;;  %v4727_v53 = vpop.f32.mrf.mxu1 }
 0x4ed   : > { %v4488_v62 = vsel %vm1325_vm13, %v4472_v59, %v4096_v40  ;;  %v5027_v40 = vshrl.u32 %v5018_v50, 16 }
 0x4ef   : > { %v4412_v14 = vpop.permute.xlu1 %4411  ;;  %v5032_v8 = vor.u32 %v5031_v1, %v5027_v40 }
 0x4f0   : > { %v4564_v4 = vsel %vm2446_vm14, %v4548_v2, %v4412_v14 }
 0x4f1   : > { %v4587_v49 = vunpack.c.l.b16 %v4564_v4  ;;  %5082 = vrot.lane.b32.xlu1 %v5032_v8, %s6302_s21 }
 0x4f3   : > { %v4318_v16 = vpop.permute.xlu0 %4317  ;;  %v4615_v20 = vpack.c.b16 %v4587_v49, %v4585_v5 }
 0x4f4   : > { %v4550_v57 = vsel %vm2429_vm12, %v4534_v47, %v4318_v16  ;;  %v4729_v0 = vpop.f32.mrf.mxu1 }
 0x4f5   : > { %4707 = vmatmul.bf16.gmra.mxu0 %v4615_v20  ;;  %v4566_v7 = vsel %vm2446_vm14, %v4550_v57, %v4414_v36 }
 0x4f6   : > { %v4589_v11 = vunpack.c.l.b16 %v4566_v7 }
 0x4f7   : > { %v4136_v38 = vpop.permute.xlu1 %4135 }
 0x4f8   : > { %v4504_v3 = vsel %vm1359_vm15, %v4488_v62, %v4136_v38  ;;  %v6234_v38 = vld [vmem:[#allocation2 + $0x8] sm:$0xf] }
 0x4fb   : > { %v4232_v30 = vpop.permute.xlu0 %4231 }
 0x4fc   : > { %v4520_v63 = vsel %vm1393_vm1, %v4504_v3, %v4232_v30 }
 0x4fd   : > { %v4536_v35 = vsel %vm2412_vm10, %v4520_v63, %v4280_v55  ;;  %v4732_v63 = vpop.f32.mrf.mxu1 }
 0x4ff   : > { %v4320_v22 = vpop.permute.xlu1 %4319 }
 0x500   : > { %v4552_v56 = vsel %vm2429_vm12, %v4536_v35, %v4320_v22  ;;  %v4872_v35 = vld [vmem:[#allocation2 + $0x10] sm:$0xf]  ;;  %v4875_v22 = vld [vmem:[#allocation2 + $0x14] sm:$0x1] }
 0x503   : > { %v4416_v44 = vpop.permute.xlu0 %4415 }
 0x504   : > { %v4568_v17 = vsel %vm2446_vm14, %v4552_v56, %v4416_v44 }
 0x505   : > { %v4591_v48 = vunpack.c.l.b16 %v4568_v17 }
 0x507   : > { %v4617_v28 = vpack.c.b16 %v4591_v48, %v4589_v11 }
 0x509   : > { %4712 = vmatmul.bf16.gmra.mxu0 %v4617_v28 }
 0x526   : > { %v4698_v54 = vpop.f32.mrf.mxu0 }
 0x527   : > { %v4728_v52 = vadd.f32 %v4727_v53, %v4698_v54 }
 0x529   : > { %v4752_v27 = vmul.f32 %v7963_v31, %v4728_v52 }
 0x52b   : > { %v4763_v29 = vadd.f32 %v7968_v10, %v4752_v27 }
 0x52d   : > { %v4771_v37 = vmax.f32 %v4763_v29, 0.0 }
 0x52e   : > { %v4700_v43 = vpop.f32.mrf.mxu0 }
 0x52f   : > { %v4779_v46 = vpack.c.bf16 %v4771_v37, %v4771_v37  ;;  %v4730_v2 = vadd.f32 %v4729_v0, %v4700_v43 }
 0x531   : > { %v4788_v14 = vshrl.u32 %v4779_v46, 16  ;;  %v4753_v4 = vmul.f32 %v7963_v31, %v4730_v2  ;;  %v4791_v49 = vshll.u32 %v4779_v46, 16  ;;  %v4734_v46 = vpop.f32.mrf.mxu1 }
 0x533   : > { %v4790_v5 = vrot.slane %v4788_v14, 7  ;;  %v4764_v16 = vadd.f32 %v7968_v10, %v4753_v4 }
 0x535   : > { %v4793_v20 = vor.u32 %v4791_v49, %v4790_v5  ;;  %v4794_v59 = vrot.slane %v4790_v5, 4  ;;  %v4772_v55 = vmax.f32 %v4764_v16, 0.0 }
 0x537   : > { %v4867_v58 = vsel %vm7036_vm9, %v4793_v20, %v6234_v38  ;;  %v4870_v62 = vsel %vm6971_vm7, %v4794_v59, %v4869_v25  ;;  %v4780_v6 = vpack.c.bf16 %v4772_v55, %v4772_v55 }
 0x538   : > { %4868 = vst [vmem:[#allocation2 + $0x8] sm:$0xf] %v4867_v58 }
 0x539   : > { %4871 = vst [vmem:[#allocation2 + $0xc] sm:$0x1] %v4870_v62  ;;  %v4796_v3 = vshrl.u32 %v4780_v6, 16  ;;  %v4799_v61 = vshll.u32 %v4780_v6, 16 }
 0x53b   : > { %v4798_v30 = vrot.slane %v4796_v3, 7 }
 0x53d   : > { %v4801_v47 = vor.u32 %v4799_v61, %v4798_v30  ;;  %v4802_v57 = vrot.slane %v4798_v30, 4 }
 0x53f   : > { %v4873_v36 = vsel %vm7036_vm9, %v4801_v47, %v4872_v35  ;;  %v4876_v56 = vsel %vm6971_vm7, %v4802_v57, %v4875_v22  ;;  %v4703_v7 = vpop.f32.mrf.mxu0  ;;  %v4938_v44 = vld [vmem:[#allocation2 + $0x8] sm:$0xf] }
 0x540   : > { %v4954_v17 = vld [vmem:[#allocation2 + $0x8] sm:$0xe]  ;;  %4874 = vst [vmem:[#allocation2 + $0x10] sm:$0xf] %v4873_v36  ;;  %v4733_v11 = vadd.f32 %v4732_v63, %v4703_v7  ;;  %v5154_v39 = vunpack.c.l.b16 %v4938_v44  ;;  %v4946_v34 = vld [vmem:[#allocation2 + $0xc] sm:$0x1] }
 0x541   : > { %v4931_v48 = vld [vmem:[#allocation2 + $0x8] sm:$0xe]  ;;  %v5290_v28 = vunpack.c.l.b16 %v4954_v17  ;;  %v4923_v32 = vld [vmem:[#allocation2 + $0xc] sm:$0x1]  ;;  %4877 = vst [vmem:[#allocation2 + $0x14] sm:$0x1] %v4876_v56  ;;  %v5194_v50 = vunpack.c.l.b16 %v4946_v34 }
 0x542   : > { %v5107_v21 = vunpack.c.l.b16 %v4931_v48  ;;  %v5005_v18 = vunpack.c.l.b16 %v4923_v32  ;;  %v7982_v33 = vld [vmem:[#allocation2 + $0x8] sm:$0xf]  ;;  %v4754_v40 = vmul.f32 %v7963_v31, %v4733_v11  ;;  %v5162_v1 = vpack.c.b16 %v5154_v39, %v5154_v39 }
 0x543   : > { %v5004_v13 = vunpack.c.l.b16 %v7982_v33  ;;  %v5298_v8 = vpack.c.b16 %v5194_v50, %v5290_v28  ;;  %v5202_v53 = vpack.c.b16 %v5194_v50, %v5154_v39  ;;  %v4878_v50 = vld [vmem:[#allocation2 + $0x18] sm:$0xf] }
 0x544   : > { %v5115_v23 = vpack.c.b16 %v5005_v18, %v5107_v21  ;;  %v4765_v54 = vadd.f32 %v7968_v10, %v4754_v40  ;;  %5170 = vrot.lane.b32.xlu2 %v5162_v1, %s6305_s17 }
 0x545   : > { %v5019_v52 = vpack.c.b16 %v5005_v18, %v5004_v13  ;;  %v5306_v27 = vrot.slane %v5298_v8, 1  ;;  %v5213_v37 = vshll.u32 %v5202_v53, 16  ;;  %v5211_v14 = vshrl.u32 %v5202_v53, 16  ;;  %v4881_v18 = vld [vmem:[#allocation2 + $0x1c] sm:$0x1] }
 0x546   : > { %v5123_v29 = vrot.slane %v5115_v23, 1  ;;  %v4773_v0 = vmax.f32 %v4765_v54, 0.0 }
 0x547   : > { %v5036_v43 = vshll.u32 %v5019_v52, 16  ;;  %5314 = vrot.lane.b32.xlu0 %v5306_v27, %s6310_s27  ;;  %v4705_v2 = vpop.f32.mrf.mxu0  ;;  %v5215_v4 = vrot.slane %v5213_v37, 1  ;;  %v4939_v5 = vld [vmem:[#allocation2 + $0x10] sm:$0xf]  ;;  %v5034_v20 = vshrl.u32 %v5019_v52, 16 }
 0x548   : > { %5132 = vrot.lane.b32.xlu1 %v5123_v29, %s6303_s23  ;;  %v4781_v49 = vpack.c.bf16 %v4773_v0, %v4773_v0  ;;  %v4735_v16 = vadd.f32 %v4734_v46, %v4705_v2  ;;  %v4962_v55 = vld [vmem:[#allocation2 + $0x10] sm:$0xf]  ;;  %v5155_v25 = vunpack.c.l.b16 %v4939_v5  ;;  %v4947_v38 = vld [vmem:[#allocation2 + $0x14] sm:$0x1] }
 0x549   : > { %v5038_v59 = vrot.slane %v5036_v43, 1  ;;  %v7993_v58 = vld [vmem:[#allocation2 + $0x10] sm:$0xf]  ;;  %v4924_v62 = vld [vmem:[#allocation2 + $0x14] sm:$0x1]  ;;  %v5216_v47 = vor.u32 %v5215_v4, %v5211_v14  ;;  %v5338_v57 = vunpack.c.l.b16 %v4962_v55  ;;  %v5195_v48 = vunpack.c.l.b16 %v4947_v38 }
 0x54a   : > { %v4804_v6 = vshrl.u32 %v4781_v49, 16  ;;  %v4755_v3 = vmul.f32 %v7963_v31, %v4735_v16  ;;  %v4955_v61 = vld [vmem:[#allocation2 + $0x10] sm:$0xe]  ;;  %v4970_v63 = vld [vmem:[#allocation2 + $0x14] sm:$0x1]  ;;  %v5006_v35 = vunpack.c.l.b16 %v7993_v58  ;;  %v4807_v36 = vshll.u32 %v4781_v49, 16 }
 0x54b   : > { %v5039_v30 = vor.u32 %v5038_v59, %v5034_v20  ;;  %v5007_v7 = vunpack.c.l.b16 %v4924_v62  ;;  %v4932_v44 = vld [vmem:[#allocation2 + $0x10] sm:$0xe]  ;;  %v5163_v17 = vpack.c.b16 %v5155_v25, %v5155_v25  ;;  %v5291_v11 = vunpack.c.l.b16 %v4955_v61  ;;  %v4884_v59 = vld [vmem:[#allocation2 + $0x20] sm:$0xf]  ;;  %v4887_v55 = vld [vmem:[#allocation2 + $0x24] sm:$0x1] }
 0x54c   : > { %v4806_v22 = vrot.slane %v4804_v6, 7  ;;  %v4766_v56 = vadd.f32 %v7968_v10, %v4755_v3  ;;  %v5378_v39 = vunpack.c.l.b16 %v4970_v63  ;;  %v5108_v24 = vunpack.c.l.b16 %v4932_v44  ;;  %v4978_v54 = vld [vmem:[#allocation2 + $0x10] sm:$0xe] }
 0x54d   : > { %5084 = vrot.lane.b32.xlu2 %v5039_v30, %s6302_s21  ;;  %v5020_v21 = vpack.c.b16 %v5007_v7, %v5006_v35  ;;  %v5299_v23 = vpack.c.b16 %v5195_v48, %v5291_v11  ;;  %v5346_v27 = vpack.c.b16 %v5338_v57, %v5338_v57  ;;  %v5203_v29 = vpack.c.b16 %v5195_v48, %v5155_v25 }
 0x54e   : > { %v4809_v34 = vor.u32 %v4807_v36, %v4806_v22  ;;  %v4810_v28 = vrot.slane %v4806_v22, 4  ;;  %v4774_v32 = vmax.f32 %v4766_v56, 0.0  ;;  %v5386_v40 = vpack.c.b16 %v5378_v39, %v5338_v57 }
 0x54f   : > { %5172 = vrot.lane.b32.xlu0 %v5163_v17, %s6305_s17  ;;  %v5043_v53 = vshll.u32 %v5020_v21, 16  ;;  %v5041_v37 = vshrl.u32 %v5020_v21, 16  ;;  %v5116_v43 = vpack.c.b16 %v5007_v7, %v5108_v24  ;;  %v5474_v4 = vunpack.c.l.b16 %v4978_v54 }
 0x550   : > { %5266 = vrot.lane.b32.xlu1 %v5216_v47, %s6308_s26  ;;  %v4879_v1 = vsel %vm7036_vm9, %v4809_v34, %v4878_v50  ;;  %v4882_v13 = vsel %vm6971_vm7, %v4810_v28, %v4881_v18  ;;  %v4782_v8 = vpack.c.bf16 %v4774_v32, %v4774_v32  ;;  %v5397_v46 = vshll.u32 %v5386_v40, 16 }
 0x551   : > { %4880 = vst [vmem:[#allocation2 + $0x18] sm:$0xf] %v4879_v1  ;;  %v5045_v0 = vrot.slane %v5043_v53, 1  ;;  %v5307_v5 = vrot.slane %v5299_v23, 1  ;;  %v5124_v25 = vrot.slane %v5116_v43, 1  ;;  %v5395_v38 = vshrl.u32 %v5386_v40, 16 }
 0x552   : > { %4883 = vst [vmem:[#allocation2 + $0x1c] sm:$0x1] %v4882_v13  ;;  %v4812_v52 = vshrl.u32 %v4782_v8, 16  ;;  %v4815_v14 = vshll.u32 %v4782_v8, 16  ;;  %v5399_v62 = vrot.slane %v5397_v46, 1  ;;  %v5220_v6 = vshll.u32 %v5203_v29, 16 }
 0x553   : > { %v5046_v49 = vor.u32 %v5045_v0, %v5041_v37  ;;  %v5482_v47 = vpack.c.b16 %v5378_v39, %v5474_v4  ;;  %v5218_v53 = vshrl.u32 %v5203_v29, 16 }
 0x554   : > { %v4814_v2 = vrot.slane %v4812_v52, 7  ;;  %v5400_v34 = vor.u32 %v5399_v62, %v5395_v38  ;;  %v5222_v1 = vrot.slane %v5220_v6, 1 }
 0x555   : > { %5354 = vrot.lane.b32.xlu2 %v5346_v27, %s6311_s18  ;;  %v5490_v32 = vrot.slane %v5482_v47, 1 }
 0x556   : > { %v4817_v16 = vor.u32 %v4815_v14, %v4814_v2  ;;  %v4818_v20 = vrot.slane %v4814_v2, 4  ;;  %v5223_v0 = vor.u32 %v5222_v1, %v5218_v53 }
 0x557   : > { %5086 = vrot.lane.b32.xlu0 %v5046_v49, %s6302_s21  ;;  %v5627_v8 = vunpack.c.l.b16 %v5490_v32 }
 0x558   : > { %5316 = vrot.lane.b32.xlu1 %v5307_v5, %s6310_s27  ;;  %v4885_v3 = vsel %vm7036_vm9, %v4817_v16, %v4884_v59  ;;  %v4888_v30 = vsel %vm6971_vm7, %v4818_v20, %v4887_v55  ;;  %v4963_v61 = vld [vmem:[#allocation2 + $0x18] sm:$0xf] }
 0x559   : > { %v4979_v63 = vld [vmem:[#allocation2 + $0x18] sm:$0xe]  ;;  %4886 = vst [vmem:[#allocation2 + $0x20] sm:$0xf] %v4885_v3  ;;  %v5339_v35 = vunpack.c.l.b16 %v4963_v61  ;;  %v4971_v22 = vld [vmem:[#allocation2 + $0x1c] sm:$0x1] }
 0x55a   : > { %v4940_v57 = vld [vmem:[#allocation2 + $0x18] sm:$0xf]  ;;  %v5475_v36 = vunpack.c.l.b16 %v4979_v63  ;;  %v4925_v56 = vld [vmem:[#allocation2 + $0x1c] sm:$0x1]  ;;  %4889 = vst [vmem:[#allocation2 + $0x24] sm:$0x1] %v4888_v30  ;;  %v5379_v7 = vunpack.c.l.b16 %v4971_v22 }
 0x55b   : > { %v4933_v44 = vld [vmem:[#allocation2 + $0x18] sm:$0xe]  ;;  %v4948_v17 = vld [vmem:[#allocation2 + $0x1c] sm:$0x1]  ;;  %v5347_v48 = vpack.c.b16 %v5339_v35, %v5339_v35  ;;  %v5156_v21 = vunpack.c.l.b16 %v4940_v57  ;;  %v5009_v39 = vunpack.c.l.b16 %v4925_v56 }
 0x55c   : > { %v8012_v11 = vld [vmem:[#allocation2 + $0x18] sm:$0xf]  ;;  %v5483_v28 = vpack.c.b16 %v5379_v7, %v5475_v36  ;;  %v5109_v50 = vunpack.c.l.b16 %v4933_v44  ;;  %v5196_v18 = vunpack.c.l.b16 %v4948_v17  ;;  %v5387_v49 = vpack.c.b16 %v5379_v7, %v5339_v35  ;;  %v4737_v7 = vpop.f32.mrf.mxu1 }
 0x55d   : > { %5134 = vrot.lane.b32.xlu2 %v5124_v25, %s6303_s23  ;;  %v5008_v24 = vunpack.c.l.b16 %v8012_v11  ;;  %v4956_v13 = vld [vmem:[#allocation2 + $0x18] sm:$0xe]  ;;  %v5164_v46 = vpack.c.b16 %v5156_v21, %v5156_v21 }
 0x55e   : > { %v5491_v40 = vrot.slane %v5483_v28, 1  ;;  %v5117_v54 = vpack.c.b16 %v5009_v39, %v5109_v50  ;;  %v5204_v52 = vpack.c.b16 %v5196_v18, %v5156_v21  ;;  %v5292_v43 = vunpack.c.l.b16 %v4956_v13 }
 0x55f   : > { %5356 = vrot.lane.b32.xlu0 %v5347_v48, %s6311_s18  ;;  %v5021_v27 = vpack.c.b16 %v5009_v39, %v5008_v24  ;;  %v5404_v25 = vshll.u32 %v5387_v49, 16  ;;  %v5402_v44 = vshrl.u32 %v5387_v49, 16 }
 0x560   : > { %5450 = vrot.lane.b32.xlu1 %v5400_v34, %s6312_s20  ;;  %v5629_v23 = vunpack.c.l.b16 %v5491_v40  ;;  %v5125_v2 = vrot.slane %v5117_v54, 1  ;;  %v5227_v14 = vshll.u32 %v5204_v52, 16  ;;  %v5300_v5 = vpack.c.b16 %v5196_v18, %v5292_v43  ;;  %v4964_v20 = vld [vmem:[#allocation2 + $0x20] sm:$0xf] }
 0x561   : > { %v5050_v4 = vshll.u32 %v5021_v27, 16  ;;  %v4949_v59 = vld [vmem:[#allocation2 + $0x24] sm:$0x1]  ;;  %v4957_v38 = vld [vmem:[#allocation2 + $0x20] sm:$0xe]  ;;  %v5225_v6 = vshrl.u32 %v5204_v52, 16  ;;  %v5340_v30 = vunpack.c.l.b16 %v4964_v20 }
 0x562   : > { %v5661_v37 = vpack.c.b16 %v5629_v23, %v5627_v8  ;;  %v5229_v29 = vrot.slane %v5227_v14, 1  ;;  %v5308_v55 = vrot.slane %v5300_v5, 1  ;;  %v8022_v62 = vld [vmem:[#allocation2 + $0x24] sm:$0x1]  ;;  %v5048_v3 = vshrl.u32 %v5021_v27, 16 }
 0x563   : > { %v5052_v16 = vrot.slane %v5050_v4, 1  ;;  %v5197_v61 = vunpack.c.l.b16 %v4949_v59  ;;  %v5293_v57 = vunpack.c.l.b16 %v4957_v38  ;;  %v5380_v35 = vunpack.c.l.b16 %v8022_v62  ;;  %v4926_v36 = vld [vmem:[#allocation2 + $0x24] sm:$0x1]  ;;  %v8028_v56 = vld [vmem:[#allocation2 + $0x20] sm:$0xf] }
 0x564   : > { %6106 = vmatmul.msk.bf16.vlgmr.msra.gmra.mxu0 %vm1291_vm11, %v5661_v37  ;;  %v5230_v63 = vor.u32 %v5229_v29, %v5225_v6  ;;  %v5406_v22 = vrot.slane %v5404_v25, 1  ;;  %v4941_v28 = vld [vmem:[#allocation2 + $0x20] sm:$0xf]  ;;  %v5011_v21 = vunpack.c.l.b16 %v4926_v36  ;;  %v5010_v39 = vunpack.c.l.b16 %v8028_v56 }
 0x565   : > { %5268 = vrot.lane.b32.xlu2 %v5223_v0, %s6308_s26  ;;  %v5053_v47 = vor.u32 %v5052_v16, %v5048_v3  ;;  %v5301_v17 = vpack.c.b16 %v5197_v61, %v5293_v57  ;;  %v5388_v48 = vpack.c.b16 %v5380_v35, %v5340_v30  ;;  %v4934_v32 = vld [vmem:[#allocation2 + $0x20] sm:$0xe]  ;;  %v5348_v24 = vpack.c.b16 %v5340_v30, %v5340_v30  ;;  %v4739_v0 = vpop.f32.mrf.mxu1 }
 0x566   : > { %v5407_v34 = vor.u32 %v5406_v22, %v5402_v44  ;;  %v5157_v1 = vunpack.c.l.b16 %v4941_v28  ;;  %v5110_v8 = vunpack.c.l.b16 %v4934_v32  ;;  %v5022_v53 = vpack.c.b16 %v5011_v21, %v5010_v39  ;;  %v4893_v44 = vld [vmem:[#allocation2 + $0x2c] sm:$0x1] }
 0x567   : > { %5136 = vrot.lane.b32.xlu0 %v5125_v2, %s6303_s23  ;;  %v5309_v40 = vrot.slane %v5301_v17, 1  ;;  %v5411_v13 = vshll.u32 %v5388_v48, 16  ;;  %v5409_v4 = vshrl.u32 %v5388_v48, 16 }
 0x568   : > { %5174 = vrot.lane.b32.xlu1 %v5164_v46, %s6305_s17  ;;  %v5118_v27 = vpack.c.b16 %v5011_v21, %v5110_v8  ;;  %v5205_v37 = vpack.c.b16 %v5197_v61, %v5157_v1  ;;  %v5165_v46 = vpack.c.b16 %v5157_v1, %v5157_v1  ;;  %v5057_v2 = vshll.u32 %v5022_v53, 16  ;;  %v4980_v61 = vld [vmem:[#allocation2 + $0x20] sm:$0xe] }
 0x569   : > { %v5413_v52 = vrot.slane %v5411_v13, 1  ;;  %v5055_v30 = vshrl.u32 %v5022_v53, 16  ;;  %v5476_v48 = vunpack.c.l.b16 %v4980_v61 }
 0x56a   : > { %v5126_v16 = vrot.slane %v5118_v27, 1  ;;  %v5234_v20 = vshll.u32 %v5205_v37, 16  ;;  %v5059_v25 = vrot.slane %v5057_v2, 1  ;;  %v5232_v17 = vshrl.u32 %v5205_v37, 16 }
 0x56b   : > { %v5414_v29 = vor.u32 %v5413_v52, %v5409_v4  ;;  %v4899_v52 = vld [vmem:[#allocation2 + $0x34] sm:$0x1] }
 0x56c   : > { %v5060_v36 = vor.u32 %v5059_v25, %v5055_v30 }
 0x56d   : > { %5318 = vrot.lane.b32.xlu2 %v5308_v55, %s6310_s27 }
 0x56f   : > { %5270 = vrot.lane.b32.xlu0 %v5230_v63, %s6308_s26  ;;  %v5236_v63 = vrot.slane %v5234_v20, 1 }
 0x570   : > { %5088 = vrot.lane.b32.xlu1 %v5053_v47, %s6302_s21 }
 0x571   : > { %v5237_v39 = vor.u32 %v5236_v63, %v5232_v17 }
 0x572   : > { %v4708_v50 = vpop.f32.mrf.mxu0 }
 0x573   : > { %v4738_v18 = vadd.f32 %v4737_v7, %v4708_v50  ;;  %v4890_v7 = vld [vmem:[#allocation2 + $0x28] sm:$0xf] }
 0x575   : > { %5452 = vrot.lane.b32.xlu2 %v5407_v34, %s6312_s20  ;;  %v4756_v23 = vmul.f32 %v7963_v31, %v4738_v18  ;;  %v4742_v34 = vpop.f32.mrf.mxu1 }
 0x577   : > { %5320 = vrot.lane.b32.xlu0 %v5309_v40, %s6310_s27  ;;  %v4767_v54 = vadd.f32 %v7968_v10, %v4756_v23  ;;  %v5484_v40 = vpack.c.b16 %v5380_v35, %v5476_v48 }
 0x578   : > { %5358 = vrot.lane.b32.xlu1 %v5348_v24, %s6311_s18 }
 0x579   : > { %v4775_v43 = vmax.f32 %v4767_v54, 0.0  ;;  %v4896_v54 = vld [vmem:[#allocation2 + $0x30] sm:$0xf]  ;;  %v5492_v37 = vrot.slane %v5484_v40, 1 }
 0x57a   : > { %v4710_v14 = vpop.f32.mrf.mxu0 }
 0x57b   : > { %v4783_v5 = vpack.c.bf16 %v4775_v43, %v4775_v43  ;;  %v4740_v49 = vadd.f32 %v4739_v0, %v4710_v14  ;;  %v5631_v17 = vunpack.c.l.b16 %v5492_v37 }
 0x57d   : > { %5176 = vrot.lane.b32.xlu2 %v5165_v46, %s6305_s17  ;;  %v4820_v59 = vshrl.u32 %v4783_v5, 16  ;;  %v4757_v55 = vmul.f32 %v7963_v31, %v4740_v49  ;;  %v4823_v6 = vshll.u32 %v4783_v5, 16 }
 0x57f   : > { %5454 = vrot.lane.b32.xlu0 %v5414_v29, %s6312_s20  ;;  %v4822_v38 = vrot.slane %v4820_v59, 7  ;;  %v4768_v3 = vadd.f32 %v7968_v10, %v4757_v55  ;;  %v4744_v29 = vpop.f32.mrf.mxu1 }
 0x580   : > { %5138 = vrot.lane.b32.xlu1 %v5126_v16, %s6303_s23 }
 0x581   : > { %v4825_v47 = vor.u32 %v4823_v6, %v4822_v38  ;;  %v4826_v57 = vrot.slane %v4822_v38, 4  ;;  %v4776_v22 = vmax.f32 %v4768_v3, 0.0 }
 0x583   : > { %v4891_v28 = vsel %vm7036_vm9, %v4825_v47, %v4890_v7  ;;  %v4894_v32 = vsel %vm6971_vm7, %v4826_v57, %v4893_v44  ;;  %v4784_v21 = vpack.c.bf16 %v4776_v22, %v4776_v22 }
 0x584   : > { %4892 = vst [vmem:[#allocation2 + $0x28] sm:$0xf] %v4891_v28 }
 0x585   : > { %5090 = vrot.lane.b32.xlu2 %v5060_v36, %s6302_s21  ;;  %4895 = vst [vmem:[#allocation2 + $0x2c] sm:$0x1] %v4894_v32  ;;  %v4828_v50 = vshrl.u32 %v4784_v21, 16  ;;  %v4831_v13 = vshll.u32 %v4784_v21, 16 }
 0x586   : > { %v4713_v18 = vpop.f32.mrf.mxu0 }
 0x587   : > { %v4743_v24 = vadd.f32 %v4742_v34, %v4713_v18  ;;  %v4830_v1 = vrot.slane %v4828_v50, 7 }
 0x588   : > { %5272 = vrot.lane.b32.xlu1 %v5237_v39, %s6308_s26 }
 0x589   : > { %v4758_v8 = vmul.f32 %v7963_v31, %v4743_v24  ;;  %v4833_v23 = vor.u32 %v4831_v13, %v4830_v1  ;;  %v4834_v53 = vrot.slane %v4830_v1, 4 }
 0x58b   : > { %v4769_v27 = vadd.f32 %v7968_v10, %v4758_v8  ;;  %v4897_v0 = vsel %vm7036_vm9, %v4833_v23, %v4896_v54  ;;  %v4900_v43 = vsel %vm6971_vm7, %v4834_v53, %v4899_v52  ;;  %v4965_v46 = vld [vmem:[#allocation2 + $0x28] sm:$0xf]  ;;  %v4902_v53 = vld [vmem:[#allocation2 + $0x38] sm:$0xf] }
 0x58c   : > { %v4942_v62 = vld [vmem:[#allocation2 + $0x28] sm:$0xf]  ;;  %4898 = vst [vmem:[#allocation2 + $0x30] sm:$0xf] %v4897_v0  ;;  %v5341_v14 = vunpack.c.l.b16 %v4965_v46  ;;  %v4950_v5 = vld [vmem:[#allocation2 + $0x2c] sm:$0x1] }
 0x58d   : > { %v4958_v35 = vld [vmem:[#allocation2 + $0x28] sm:$0xe]  ;;  %v4777_v2 = vmax.f32 %v4769_v27, 0.0  ;;  %v5158_v4 = vunpack.c.l.b16 %v4942_v62  ;;  %4901 = vst [vmem:[#allocation2 + $0x34] sm:$0x1] %v4900_v43  ;;  %v5198_v20 = vunpack.c.l.b16 %v4950_v5 }
 0x58e   : > { %v5294_v49 = vunpack.c.l.b16 %v4958_v35  ;;  %v4715_v16 = vpop.f32.mrf.mxu0  ;;  %v4973_v59 = vld [vmem:[#allocation2 + $0x2c] sm:$0x1]  ;;  %v4981_v55 = vld [vmem:[#allocation2 + $0x28] sm:$0xe]  ;;  %v5349_v6 = vpack.c.b16 %v5341_v14, %v5341_v14  ;;  %v4905_v27 = vld [vmem:[#allocation2 + $0x3c] sm:$0x1] }
 0x58f   : > { %v4785_v25 = vpack.c.bf16 %v4777_v2, %v4777_v2  ;;  %v4745_v38 = vadd.f32 %v4744_v29, %v4715_v16  ;;  %v5166_v3 = vpack.c.b16 %v5158_v4, %v5158_v4  ;;  %v4927_v30 = vld [vmem:[#allocation2 + $0x2c] sm:$0x1]  ;;  %v4935_v61 = vld [vmem:[#allocation2 + $0x28] sm:$0xe]  ;;  %v5381_v57 = vunpack.c.l.b16 %v4973_v59 }
 0x590   : > { %v8057_v63 = vld [vmem:[#allocation2 + $0x28] sm:$0xf]  ;;  %v5302_v47 = vpack.c.b16 %v5198_v20, %v5294_v49  ;;  %v5477_v22 = vunpack.c.l.b16 %v4981_v55  ;;  %v5013_v36 = vunpack.c.l.b16 %v4927_v30  ;;  %5360 = vrot.lane.b32.xlu2 %v5349_v6, %s6311_s18  ;;  %v5111_v48 = vunpack.c.l.b16 %v4935_v61 }
 0x591   : > { %v4836_v7 = vshrl.u32 %v4785_v25, 16  ;;  %v4759_v44 = vmul.f32 %v7963_v31, %v4745_v38  ;;  %5178 = vrot.lane.b32.xlu0 %v5166_v3, %s6305_s17  ;;  %v5012_v32 = vunpack.c.l.b16 %v8057_v63  ;;  %v5389_v21 = vpack.c.b16 %v5381_v57, %v5341_v14 }
 0x592   : > { %v5310_v34 = vrot.slane %v5302_v47, 1  ;;  %v5485_v28 = vpack.c.b16 %v5381_v57, %v5477_v22  ;;  %v4839_v50 = vshll.u32 %v4785_v25, 16  ;;  %v5119_v24 = vpack.c.b16 %v5013_v36, %v5111_v48 }
 0x593   : > { %v4838_v39 = vrot.slane %v4836_v7, 7  ;;  %v4770_v18 = vadd.f32 %v7968_v10, %v4759_v44  ;;  %v5023_v31 = vpack.c.b16 %v5013_v36, %v5012_v32  ;;  %v5418_v1 = vshll.u32 %v5389_v21, 16  ;;  %v6153_v10 = vld [vmem:[%s8315_s15 + $0x38] sm:$0xff]  ;;  %v4943_v59 = vld [vmem:[#allocation2 + $0x30] sm:$0xf] }
 0x594   : > { %5322 = vrot.lane.b32.xlu1 %v5310_v34, %s6310_s27  ;;  %v5493_v40 = vrot.slane %v5485_v28, 1  ;;  %v5206_v13 = vpack.c.b16 %v5198_v20, %v5158_v4  ;;  %v5416_v52 = vshrl.u32 %v5389_v21, 16  ;;  %v5127_v0 = vrot.slane %v5119_v24, 1  ;;  %v8072_v29 = vld [vmem:[#allocation2 + $0x34] sm:$0x1]  ;;  %5738 = vmatpush.bf16.msrb.mxu3 %v6153_v10 }
 0x595   : > { %v4841_v8 = vor.u32 %v4839_v50, %v4838_v39  ;;  %v4842_v23 = vrot.slane %v4838_v39, 4  ;;  %v4778_v54 = vmax.f32 %v4770_v18, 0.0  ;;  %v5064_v43 = vshll.u32 %v5023_v31, 16  ;;  %v4966_v20 = vld [vmem:[#allocation2 + $0x30] sm:$0xf] }
 0x596   : > { %v5633_v37 = vunpack.c.l.b16 %v5493_v40  ;;  %v5420_v46 = vrot.slane %v5418_v1, 1  ;;  %v5062_v14 = vshrl.u32 %v5023_v31, 16  ;;  %v5241_v49 = vshll.u32 %v5206_v13, 16  ;;  %v4974_v55 = vld [vmem:[#allocation2 + $0x34] sm:$0x1]  ;;  %v6151_v1 = vld [vmem:[%s8315_s15 + $0x28] sm:$0xff] }
 0x597   : > { %v4903_v62 = vsel %vm7036_vm9, %v4841_v8, %v4902_v53  ;;  %v4906_v35 = vsel %vm6971_vm7, %v4842_v23, %v4905_v27  ;;  %v4786_v2 = vpack.c.bf16 %v4778_v54, %v4778_v54  ;;  %v5066_v5 = vrot.slane %v5064_v43, 1  ;;  %v4951_v6 = vld [vmem:[#allocation2 + $0x34] sm:$0x1]  ;;  %v4982_v3 = vld [vmem:[#allocation2 + $0x30] sm:$0xe] }
 0x598   : > { %4904 = vst [vmem:[#allocation2 + $0x38] sm:$0xf] %v4903_v62  ;;  %v5663_v4 = vpack.c.b16 %v5633_v37, %v5631_v17  ;;  %5140 = vrot.lane.b32.xlu2 %v5127_v0, %s6303_s23  ;;  %v5421_v38 = vor.u32 %v5420_v46, %v5416_v52  ;;  %v8076_v30 = vld [vmem:[#allocation2 + $0x30] sm:$0xf]  ;;  %v5243_v57 = vrot.slane %v5241_v49, 1  ;;  %v5239_v36 = vshrl.u32 %v5206_v13, 16 }
 0x599   : > { %4907 = vst [vmem:[#allocation2 + $0x3c] sm:$0x1] %v4906_v35  ;;  %v4844_v16 = vshrl.u32 %v4786_v2, 16  ;;  %v5067_v25 = vor.u32 %v5066_v5, %v5062_v14  ;;  %v4847_v47 = vshll.u32 %v4786_v2, 16  ;;  %v4959_v22 = vld [vmem:[#allocation2 + $0x30] sm:$0xe]  ;;  %v5015_v7 = vunpack.c.l.b16 %v8072_v29 }
 0x59a   : > { %6107 = vmatmul.msk.bf16.vlgmr.msra.gmra.mxu2 %vm1291_vm11, %v5663_v4  ;;  %v5382_v44 = vunpack.c.l.b16 %v4974_v55  ;;  %v6152_v17 = vld [vmem:[%s8315_s15 + $0x30] sm:$0xff]  ;;  %v5478_v28 = vunpack.c.l.b16 %v4982_v3  ;;  %v5014_v32 = vunpack.c.l.b16 %v8076_v30  ;;  %v4908_v21 = vld [vmem:[#allocation2 + $0x40] sm:$0xf]  ;;  %v4911_v39 = vld [vmem:[#allocation2 + $0x44] sm:$0x1]  ;;  %v5342_v18 = vunpack.c.l.b16 %v4966_v20 }
 0x59b   : > { %v4846_v61 = vrot.slane %v4844_v16, 7  ;;  %5092 = vrot.lane.b32.xlu0 %v5067_v25, %s6302_s21  ;;  %v5159_v24 = vunpack.c.l.b16 %v4943_v59  ;;  %v5199_v40 = vunpack.c.l.b16 %v4951_v6  ;;  %v5295_v31 = vunpack.c.l.b16 %v4959_v22  ;;  %5739 = vmatpush.bf16.msrb.mxu3 %v6152_v17  ;;  %v4936_v53 = vld [vmem:[#allocation2 + $0x30] sm:$0xe]  ;;  %v8102_v5 = vld [vmem:[#allocation2 + $0x4c] sm:$0x1]  ;;  %v6150_v49 = vld [vmem:[%s8315_s15 + $0x20] sm:$0xff] }
 0x59c   : > { %5456 = vrot.lane.b32.xlu1 %v5421_v38, %s6312_s20  ;;  %v5244_v23 = vor.u32 %v5243_v57, %v5239_v36  ;;  %v5486_v52 = vpack.c.b16 %v5382_v44, %v5478_v28  ;;  %v5024_v0 = vpack.c.b16 %v5015_v7, %v5014_v32  ;;  %v5350_v46 = vpack.c.b16 %v5342_v18, %v5342_v18  ;;  %v4985_v55 = vld [vmem:[#allocation2 + $0x48] sm:$0xe] }
 0x59d   : > { %v4849_v48 = vor.u32 %v4847_v47, %v4846_v61  ;;  %v4850_v34 = vrot.slane %v4846_v61, 4  ;;  %v5167_v60 = vpack.c.b16 %v5159_v24, %v5159_v24  ;;  %v5112_v10 = vunpack.c.l.b16 %v4936_v53  ;;  %v6149_v47 = vld [vmem:[%s8315_s15 + $0x18] sm:$0xff] }
 0x59e   : > { %v8085_v50 = vpop.permute.xlu2 %5170  ;;  %v5071_v62 = vshll.u32 %v5024_v0, 16  ;;  %v5303_v42 = vpack.c.b16 %v5199_v40, %v5295_v31  ;;  %v5390_v35 = vpack.c.b16 %v5382_v44, %v5342_v18  ;;  %v5494_v14 = vrot.slane %v5486_v52, 1 }
 0x59f   : > { %v4909_v13 = vsel %vm7036_vm9, %v4849_v48, %v4908_v21  ;;  %v4912_v8 = vsel %vm6971_vm7, %v4850_v34, %v4911_v39  ;;  %v4983_v54 = vld [vmem:[#allocation2 + $0x38] sm:$0xe]  ;;  %5740 = vmatpush.bf16.msrb.mxu3 %v6151_v1  ;;  %v5120_v16 = vpack.c.b16 %v5015_v7, %v5112_v10  ;;  %v5207_v59 = vpack.c.b16 %v5199_v40, %v5159_v24  ;;  %v6148_v40 = vld [vmem:[%s8315_s15 + $0x10] sm:$0xff] }
 0x5a0   : > { %4910 = vst [vmem:[#allocation2 + $0x40] sm:$0xf] %v4909_v13  ;;  %v8094_v27 = vld [vmem:[#allocation2 + $0x3c] sm:$0x1]  ;;  %v5479_v37 = vunpack.c.l.b16 %v4983_v54  ;;  %5274 = vrot.lane.b32.xlu2 %v5244_v23, %s6308_s26  ;;  %v5073_v20 = vrot.slane %v5071_v62, 1  ;;  %v5311_v25 = vrot.slane %v5303_v42, 1  ;;  %v5635_v38 = vunpack.c.l.b16 %v5494_v14 }
 0x5a1   : > { %4913 = vst [vmem:[#allocation2 + $0x44] sm:$0x1] %v4912_v8  ;;  %v5383_v43 = vunpack.c.l.b16 %v8094_v27  ;;  %v5425_v3 = vshll.u32 %v5390_v35, 16  ;;  %v5069_v57 = vshrl.u32 %v5024_v0, 16  ;;  %v5385_v36 = vunpack.c.l.b16 %v8102_v5  ;;  %v4967_v21 = vld [vmem:[#allocation2 + $0x38] sm:$0xf] }
 0x5a2   : > { %v5481_v48 = vunpack.c.l.b16 %v4985_v55  ;;  %v5128_v34 = vrot.slane %v5120_v16, 1  ;;  %v5248_v32 = vshll.u32 %v5207_v59, 16  ;;  %v4929_v18 = vld [vmem:[#allocation2 + $0x3c] sm:$0x1]  ;;  %v8120_v24 = vld [vmem:[#allocation2 + $0x38] sm:$0xf]  ;;  %v5343_v1 = vunpack.c.l.b16 %v4967_v21 }
 0x5a3   : > { %v5487_v2 = vpack.c.b16 %v5383_v43, %v5479_v37  ;;  %5362 = vrot.lane.b32.xlu0 %v5350_v46, %s6311_s18  ;;  %5741 = vmatpush.bf16.msrb.mxu3 %v6150_v49  ;;  %v5074_v28 = vor.u32 %v5073_v20, %v5069_v57  ;;  %v5427_v39 = vrot.slane %v5425_v3, 1  ;;  %v5423_v31 = vshrl.u32 %v5390_v35, 16  ;;  %v4952_v54 = vld [vmem:[#allocation2 + $0x3c] sm:$0x1]  ;;  %v4960_v52 = vld [vmem:[#allocation2 + $0x38] sm:$0xe]  ;;  %v5083_v35 = vpop.permute.xlu1 %5082 }
 0x5a4   : > { %5180 = vrot.lane.b32.xlu1 %v5167_v60, %s6305_s17  ;;  %v5489_v8 = vpack.c.b16 %v5385_v36, %v5481_v48  ;;  %v5250_v53 = vrot.slane %v5248_v32, 1  ;;  %v4944_v0 = vld [vmem:[#allocation2 + $0x38] sm:$0xf]  ;;  %v5017_v60 = vunpack.c.l.b16 %v4929_v18  ;;  %v5016_v10 = vunpack.c.l.b16 %v8120_v24  ;;  %v6147_v62 = vld [vmem:[%s8315_s15 + $0x8] sm:$0xff] }
 0x5a5   : > { %v5495_v4 = vrot.slane %v5487_v2, 1  ;;  %v5428_v37 = vor.u32 %v5427_v39, %v5423_v31  ;;  %v4937_v46 = vld [vmem:[#allocation2 + $0x38] sm:$0xe]  ;;  %v5246_v42 = vshrl.u32 %v5207_v59, 16  ;;  %v8135_v2 = vpop.permute.xlu0 %5130  ;;  %v5351_v14 = vpack.c.b16 %v5343_v1, %v5343_v1  ;;  %v6146_v59 = vld [vmem:[%s8315_s15] sm:$0xff] }
 0x5a6   : > { %v5497_v16 = vrot.slane %v5489_v8, 1  ;;  %v5296_v55 = vunpack.c.l.b16 %v4960_v52 }
 0x5a7   : > { %v8107_v29 = vpop.permute.xlu2 %5084  ;;  %v5637_v6 = vunpack.c.l.b16 %v5495_v4  ;;  %v4984_v61 = vld [vmem:[#allocation2 + $0x40] sm:$0xe]  ;;  %5742 = vmatpush.bf16.msrb.mxu3 %v6149_v47  ;;  %v5200_v4 = vunpack.c.l.b16 %v4952_v54  ;;  %v5251_v20 = vor.u32 %v5250_v53, %v5246_v42 }
 0x5a8   : > { %v8112_v22 = vld [vmem:[#allocation2 + $0x44] sm:$0x1]  ;;  %5324 = vrot.lane.b32.xlu2 %v5311_v25, %s6310_s27  ;;  %v5480_v17 = vunpack.c.l.b16 %v4984_v61  ;;  %v5160_v25 = vunpack.c.l.b16 %v4944_v0  ;;  %v5641_v61 = vunpack.c.l.b16 %v5497_v16  ;;  %v4945_v27 = vld [vmem:[#allocation2 + $0x40] sm:$0xf] }
 0x5a9   : > { %v5665_v7 = vpack.c.b16 %v5637_v6, %v5635_v38  ;;  %v5384_v44 = vunpack.c.l.b16 %v8112_v22  ;;  %v5113_v38 = vunpack.c.l.b16 %v4937_v46  ;;  %v5025_v6 = vpack.c.b16 %v5017_v60, %v5016_v10  ;;  %v4968_v0 = vld [vmem:[#allocation2 + $0x40] sm:$0xf] }
 0x5aa   : > { %v5304_v57 = vpack.c.b16 %v5200_v4, %v5296_v55  ;;  %v5208_v48 = vpack.c.b16 %v5200_v4, %v5160_v25  ;;  %v5161_v46 = vunpack.c.l.b16 %v4945_v27  ;;  %v5503_v22 = vsel %vm1291_vm11, %v7982_v33, %v8107_v29 }
 0x5ab   : > { %6108 = vmatmul.msk.bf16.gmra.mxu2 %vm1291_vm11, %v5665_v7  ;;  %5142 = vrot.lane.b32.xlu0 %v5128_v34, %s6303_s23  ;;  %v5488_v13 = vpack.c.b16 %v5384_v44, %v5480_v17  ;;  %v5121_v7 = vpack.c.b16 %v5017_v60, %v5113_v38  ;;  %v5391_v17 = vpack.c.b16 %v5383_v43, %v5343_v1  ;;  %v4953_v43 = vld [vmem:[#allocation2 + $0x44] sm:$0x1]  ;;  %v5076_v1 = vshrl.u32 %v5025_v6, 16  ;;  %v4961_v60 = vld [vmem:[#allocation2 + $0x40] sm:$0xe] }
 0x5ac   : > { %5094 = vrot.lane.b32.xlu1 %v5074_v28, %s6302_s21  ;;  %5743 = vmatpush.bf16.msrb.mxu3 %v6148_v40  ;;  %v5168_v34 = vpack.c.b16 %v5160_v25, %v5160_v25  ;;  %v5078_v28 = vshll.u32 %v5025_v6, 16  ;;  %v5312_v18 = vrot.slane %v5304_v57, 1  ;;  %v5201_v10 = vunpack.c.l.b16 %v4953_v43  ;;  %v6235_v38 = vld [vmem:[#allocation2] sm:$0xf] }
 0x5ad   : > { %v5496_v49 = vrot.slane %v5488_v13, 1  ;;  %v5129_v40 = vrot.slane %v5121_v7, 1  ;;  %v5432_v31 = vshll.u32 %v5391_v17, 16  ;;  %v5255_v13 = vshll.u32 %v5208_v48, 16 }
 0x5ae   : > { %v5080_v8 = vrot.slane %v5078_v28, 1  ;;  %v5253_v42 = vshrl.u32 %v5208_v48, 16  ;;  %v5297_v55 = vunpack.c.l.b16 %v4961_v60  ;;  %v5209_v25 = vpack.c.b16 %v5201_v10, %v5161_v46 }
 0x5af   : > { %v8129_v23 = vpop.permute.xlu2 %5354  ;;  %v5639_v3 = vunpack.c.l.b16 %v5496_v49  ;;  %v5434_v54 = vrot.slane %v5432_v31, 1  ;;  %v5257_v52 = vrot.slane %v5255_v13, 1  ;;  %v5500_v6 = vsel %vm1291_vm11, %v6235_v38, %v5083_v35 }
 0x5b0   : > { %5458 = vrot.lane.b32.xlu2 %v5428_v37, %s6312_s20  ;;  %5744 = vmatpush.bf16.msrb.mxu3 %v6147_v62  ;;  %v5081_v37 = vor.u32 %v5080_v8, %v5076_v1  ;;  %v5430_v62 = vshrl.u32 %v5391_v17, 16  ;;  %v5523_v7 = vsel %vm1325_vm13, %v5500_v6, %v8135_v2  ;;  %v5262_v48 = vshll.u32 %v5209_v25, 16 }
 0x5b1   : > { %v5667_v39 = vpack.c.b16 %v5641_v61, %v5639_v3  ;;  %v5258_v16 = vor.u32 %v5257_v52, %v5253_v42  ;;  %v5305_v3 = vpack.c.b16 %v5201_v10, %v5297_v55  ;;  %v4969_v61 = vld [vmem:[#allocation2 + $0x48] sm:$0xf]  ;;  %v5260_v27 = vshrl.u32 %v5209_v25, 16 }
 0x5b2   : > { %v5435_v49 = vor.u32 %v5434_v54, %v5430_v62  ;;  %v5345_v35 = vunpack.c.l.b16 %v4969_v61  ;;  %v5264_v2 = vrot.slane %v5262_v48, 1 }
 0x5b3   : > { %5276 = vrot.lane.b32.xlu0 %v5251_v20, %s6308_s26  ;;  %v5344_v20 = vunpack.c.l.b16 %v4968_v0 }
 0x5b4   : > { %5364 = vrot.lane.b32.xlu1 %v5351_v14, %s6311_s18  ;;  %5745 = vmatpush.bf16.msrb.mxu3 %v6146_v59  ;;  %v5393_v13 = vpack.c.b16 %v5385_v36, %v5345_v35  ;;  %v5265_v29 = vor.u32 %v5264_v2, %v5260_v27  ;;  %v5353_v5 = vpack.c.b16 %v5345_v35, %v5345_v35 }
 0x5b5   : > { %v5392_v57 = vpack.c.b16 %v5384_v44, %v5344_v20  ;;  %v5352_v17 = vpack.c.b16 %v5344_v20, %v5344_v20 }
 0x5b6   : > { %v5446_v43 = vshll.u32 %v5393_v13, 16  ;;  %v5444_v60 = vshrl.u32 %v5393_v13, 16 }
 0x5b7   : > { %v8143_v47 = vpop.permute.xlu2 %5134  ;;  %v5439_v31 = vshll.u32 %v5392_v57, 16  ;;  %v5437_v36 = vshrl.u32 %v5392_v57, 16 }
 0x5b8   : > { %5182 = vrot.lane.b32.xlu2 %v5168_v34, %s6305_s17  ;;  %v5448_v10 = vrot.slane %v5446_v43, 1 }
 0x5b9   : > { %v8147_v32 = vpop.permute.xlu0 %5314  ;;  %v5441_v33 = vrot.slane %v5439_v31, 1 }
 0x5ba   : > { %v5133_v21 = vpop.permute.xlu1 %5132 }
 0x5bb   : > { %6109 = vmatmul.msk.bf16.gmra.mxu2 %vm1291_vm11, %v5667_v39  ;;  %5326 = vrot.lane.b32.xlu0 %v5312_v18, %s6310_s27  ;;  %v5539_v39 = vsel %vm1359_vm15, %v5523_v7, %v8085_v50  ;;  %v5169_v18 = vpack.c.b16 %v5161_v46, %v5161_v46  ;;  %v5525_v8 = vsel %vm1325_vm13, %v5503_v22, %v5133_v21 }
 0x5bc   : > { %5144 = vrot.lane.b32.xlu1 %v5129_v40, %s6303_s23  ;;  %v5313_v40 = vrot.slane %v5305_v3, 1  ;;  %v5442_v42 = vor.u32 %v5441_v33, %v5437_v36 }
 0x5bf   : > { %v5269_v53 = vpop.permute.xlu2 %5268 }
 0x5c0   : > { %5096 = vrot.lane.b32.xlu2 %v5081_v37, %s6302_s21  ;;  %s515_s21 = sand.u32 1, %s6290_s22  }
 0x5c1   : > { %v5173_v14 = vpop.permute.xlu0 %5172  ;;  %s5894_s23 = sshll.u32 %s515_s21, 6 }
 0x5c2   : > { %v5267_v4 = vpop.permute.xlu1 %5266  ;;  %v5541_v50 = vsel %vm1359_vm15, %v5525_v8, %v5173_v14 }
 0x5c3   : > { %5460 = vrot.lane.b32.xlu0 %v5435_v49, %s6312_s20  ;;  %v5555_v44 = vsel %vm1393_vm1, %v5539_v39, %v5267_v4  ;;  %v5557_v54 = vsel %vm1393_vm1, %v5541_v50, %v5269_v53  ;;  %v5449_v49 = vor.u32 %v5448_v10, %v5444_v60 }
 0x5c4   : > { %5278 = vrot.lane.b32.xlu1 %v5258_v16, %s6308_s26  ;;  %v5571_v1 = vsel %vm2412_vm10, %v5555_v44, %v8147_v32 }
 0x5c5   : > { %v5587_v0 = vsel %vm2429_vm12, %v5571_v1, %v8129_v23 }
 0x5c7   : > { %v5319_v59 = vpop.permute.xlu2 %5318 }
 0x5c8   : > { %5366 = vrot.lane.b32.xlu2 %v5352_v17, %s6311_s18 }
 0x5c9   : > { %v5087_v34 = vpop.permute.xlu0 %5086 }
 0x5ca   : > { %v5317_v28 = vpop.permute.xlu1 %5316  ;;  %v5506_v25 = vsel %vm1291_vm11, %v7993_v58, %v5087_v34 }
 0x5cb   : > { %5184 = vrot.lane.b32.xlu0 %v5169_v18, %s6305_s17  ;;  %v5573_v21 = vsel %vm2412_vm10, %v5557_v54, %v5317_v28  ;;  %v5527_v38 = vsel %vm1325_vm13, %v5506_v25, %v8143_v47  ;;  %s8240_s17 = scalar_lea.vmem [#allocation3], %s5894_s23 }
 0x5cc   : > { %5328 = vrot.lane.b32.xlu1 %v5313_v40, %s6310_s27  ;;  %s5825_s19 = sshll.u32 %s8240_s17, 4  ;;  %s6256_s27 = scalar_lea.hbm %s8316_s16, 128  ;;  %s5826_s19 = int_to_ptr.vmem [resolvable:$true] %s5825_s19 }
 0x5cf   : > { %v5453_v52 = vpop.permute.xlu2 %5452 }
 0x5d0   : > { %5280 = vrot.lane.b32.xlu2 %v5265_v29, %s6308_s26  ;;  %s6155_s26 = sshll.u32 %s6420_s25, 6  ;;  %s5813_s25 = scalar_lea.sflag [#allocation4], %s515_s21 }
 0x5d1   : > { %v5357_v37 = vpop.permute.xlu0 %5356 }
 0x5d2   : > { %v5451_v46 = vpop.permute.xlu1 %5450  ;;  %v5589_v32 = vsel %vm2429_vm12, %v5573_v21, %v5357_v37 }
 0x5d3   : > { %v5603_v62 = vsel %vm2446_vm14, %v5587_v0, %v5451_v46  ;;  %v5605_v53 = vsel %vm2446_vm14, %v5589_v32, %v5453_v52  ;;  %5368 = vrot.lane.b32.xlu0 %v5353_v5, %s6311_s18 }
 0x5d4   : > { %v5626_v14 = vunpack.c.l.b16 %v5603_v62  ;;  %v5628_v4 = vunpack.c.l.b16 %v5605_v53  ;;  %5462 = vrot.lane.b32.xlu1 %v5442_v42, %s6312_s20 }
 0x5d6   : > { %v5660_v23 = vpack.c.b16 %v5628_v4, %v5626_v14 }
 0x5d7   : > { %v5177_v55 = vpop.permute.xlu2 %5176 }
 0x5d8   : > { %5746 = vmatmul.bf16.vlgmr.msrb.gmra.mxu3 %v5660_v23  ;;  %5464 = vrot.lane.b32.xlu2 %v5449_v49, %s6312_s20  ;;  %s5824_s20 = scalar_lea.hbm %s8316_s16, %s6155_s26 }
 0x5d9   : > { %v5137_v16 = vpop.permute.xlu0 %5136  ;;  %s5827_s30 = sshll.u32 %s5824_s20, 4  ;;  %s5828_s30 = int_to_ptr.hbm [resolvable:$true] %s5827_s30 }
 0x5da   : > { %v5175_v20 = vpop.permute.xlu1 %5174  ;;  %s6250_s29 = sshra.s32 %s5828_s30, 4  ;;  %s6251_s29 = int_to_ptr.hbm [resolvable:$true] %s6250_s29 }
 0x5db   : > { %v5543_v6 = vsel %vm1359_vm15, %v5527_v38, %v5175_v20  ;;  %s6252_s28 = scalar_lea.hbm %s6251_s29, 64  ;;  %p6257_p0 = scmp.lt.s32.totalorder %s6251_s29, %s8316_s16 }
 0x5dc   : > { %p6253_p11 = scmp.ne.s32.totalorder %s6251_s29, %s6252_s28  ;;  %p6258_p1 = scmp.lt.s32.totalorder %s6256_s27, %s6252_s28 }
 0x5de   : > { %p6254_p12 = pnand %p6253_p11, %p6437_p5  ;;  %p6259_p2 = por %p6258_p1, %p6257_p0 }
 0x5df   : > { %v5091_v17 = vpop.permute.xlu2 %5090 }
 0x5e0   : > { %v5512_v32 = vsel %vm1291_vm11, %v8028_v56, %v5091_v17  ;;  %p6255_p13 = pneg %p6254_p12 }
 0x5e1   : > { %v5271_v3 = vpop.permute.xlu0 %5270 }
 0x5e2   : > { %v5559_v61 = vsel %vm1393_vm1, %v5543_v6, %v5271_v3  ;;  %v5089_v57 = vpop.permute.xlu1 %5088  ;;  %p6260_p3 = pnand %p6259_p2, %p6255_p13 }
 0x5e3   : > { %v5575_v7 = vsel %vm2412_vm10, %v5559_v61, %v5319_v59  ;;  %v5509_v58 = vsel %vm1291_vm11, %v8012_v11, %v5089_v57 }
 0x5e4   : > { %v5529_v34 = vsel %vm1325_vm13, %v5509_v58, %v5137_v16 }
 0x5e5   : > { %v5545_v2 = vsel %vm1359_vm15, %v5529_v34, %v5177_v55 }
 0x5e9   : > { %v5321_v35 = vpop.permute.xlu0 %5320 }
 0x5ea   : > { %v5359_v48 = vpop.permute.xlu1 %5358  ;;  %v5361_v28 = vpop.permute.xlu2 %5360 }
 0x5eb   : > { %v5591_v50 = vsel %vm2429_vm12, %v5575_v7, %v5359_v48 }
 0x5f1   : > { %v5455_v40 = vpop.permute.xlu0 %5454 }
 0x5f2   : > { %v5139_v39 = vpop.permute.xlu1 %5138  ;;  %v5141_v18 = vpop.permute.xlu2 %5140  ;;  %v5607_v27 = vsel %vm2446_vm14, %v5591_v50, %v5455_v40 }
 0x5f3   : > { %v5630_v29 = vunpack.c.l.b16 %v5607_v27  ;;  %v5531_v42 = vsel %vm1325_vm13, %v5512_v32, %v5139_v39 }
 0x5fa   : > { %v5273_v31 = vpop.permute.xlu1 %5272  ;;  %v5275_v47 = vpop.permute.xlu2 %5274 }
 0x5fb   : > { %v5561_v59 = vsel %vm1393_vm1, %v5545_v2, %v5273_v31 }
 0x5fc   : > { %v5577_v13 = vsel %vm2412_vm10, %v5561_v59, %v5321_v35 }
 0x5fd   : > { %v5593_v1 = vsel %vm2429_vm12, %v5577_v13, %v5361_v28 }
 0x602   : > { %v5325_v8 = vpop.permute.xlu2 %5324 }
 0x603   : > { %v5179_v22 = vpop.permute.xlu0 %5178 }
 0x604   : > { %v5547_v53 = vsel %vm1359_vm15, %v5531_v42, %v5179_v22 }
 0x605   : > { %v5563_v4 = vsel %vm1393_vm1, %v5547_v53, %v5275_v47 }
 0x606   : > { %v5323_v44 = vpop.permute.xlu1 %5322 }
 0x607   : > { %v5579_v56 = vsel %vm2412_vm10, %v5563_v4, %v5323_v44 }
 0x60a   : > { %v5459_v5 = vpop.permute.xlu2 %5458 }
 0x60d   : > { %v5093_v43 = vpop.permute.xlu0 %5092 }
 0x60e   : > { %v5457_v11 = vpop.permute.xlu1 %5456  ;;  %v5515_v14 = vsel %vm1291_vm11, %v8057_v63, %v5093_v43 }
 0x60f   : > { %v5609_v33 = vsel %vm2446_vm14, %v5593_v1, %v5457_v11  ;;  %v5533_v49 = vsel %vm1325_vm13, %v5515_v14, %v5141_v18 }
 0x610   : > { %v5632_v54 = vunpack.c.l.b16 %v5609_v33 }
 0x612   : > { %v5662_v52 = vpack.c.b16 %v5632_v54, %v5630_v29  ;;  %v5183_v46 = vpop.permute.xlu2 %5182  ;;  %v5776_v54 = vpop.f32.mrf.mxu0 }
 0x614   : > { %5751 = vmatmul.bf16.gmra.mxu3 %v5662_v52 }
 0x615   : > { %v5363_v36 = vpop.permute.xlu0 %5362 }
 0x616   : > { %v5181_v21 = vpop.permute.xlu1 %5180  ;;  %v5595_v25 = vsel %vm2429_vm12, %v5579_v56, %v5363_v36 }
 0x617   : > { %v5549_v16 = vsel %vm1359_vm15, %v5533_v49, %v5181_v21  ;;  %v5611_v3 = vsel %vm2446_vm14, %v5595_v25, %v5459_v5 }
 0x618   : > { %v5634_v48 = vunpack.c.l.b16 %v5611_v3 }
 0x61a   : > { %v5097_v62 = vpop.permute.xlu2 %5096  ;;  %v5778_v21 = vpop.f32.mrf.mxu0 }
 0x61b   : > { %v5521_v40 = vsel %vm1291_vm11, %v8120_v24, %v5097_v62 }
 0x61d   : > { %v5143_v37 = vpop.permute.xlu0 %5142 }
 0x61e   : > { %v5095_v0 = vpop.permute.xlu1 %5094 }
 0x61f   : > { %v5518_v28 = vsel %vm1291_vm11, %v8076_v30, %v5095_v0 }
 0x620   : > { %v5535_v39 = vsel %vm1325_vm13, %v5518_v28, %v5143_v37 }
 0x621   : > { %v5551_v34 = vsel %vm1359_vm15, %v5535_v39, %v5183_v46 }
 0x622   : > { %v5367_v38 = vpop.permute.xlu2 %5366 }
 0x625   : > { %v5277_v60 = vpop.permute.xlu0 %5276 }
 0x626   : > { %v5365_v10 = vpop.permute.xlu1 %5364  ;;  %v5565_v55 = vsel %vm1393_vm1, %v5549_v16, %v5277_v60  ;;  %v5781_v60 = vpop.f32.mrf.mxu2 }
 0x627   : > { %v5581_v6 = vsel %vm2412_vm10, %v5565_v55, %v5325_v8 }
 0x628   : > { %v5597_v63 = vsel %vm2429_vm12, %v5581_v6, %v5365_v10 }
 0x62a   : > { %v5281_v18 = vpop.permute.xlu2 %5280 }
 0x62d   : > { %v5327_v23 = vpop.permute.xlu0 %5326 }
 0x62e   : > { %v5145_v20 = vpop.permute.xlu1 %5144  ;;  %v5783_v62 = vpop.f32.mrf.mxu2 }
 0x62f   : > { %v5537_v58 = vsel %vm1325_vm13, %v5521_v40, %v5145_v20 }
 0x632   : > { %v5465_v59 = vpop.permute.xlu2 %5464 }
 0x635   : > { %v5461_v61 = vpop.permute.xlu0 %5460 }
 0x636   : > { %v5613_v57 = vsel %vm2446_vm14, %v5597_v63, %v5461_v61  ;;  %v5279_v7 = vpop.permute.xlu1 %5278 }
 0x637   : > { %v5636_v17 = vunpack.c.l.b16 %v5613_v57  ;;  %v5567_v44 = vsel %vm1393_vm1, %v5551_v34, %v5279_v7 }
 0x638   : > { %v5583_v2 = vsel %vm2412_vm10, %v5567_v44, %v5327_v23 }
 0x639   : > { %v5664_v35 = vpack.c.b16 %v5636_v17, %v5634_v48  ;;  %v5599_v50 = vsel %vm2429_vm12, %v5583_v2, %v5367_v38 }
 0x63b   : > { %5756 = vmatmul.bf16.gmra.mxu3 %v5664_v35 }
 0x63d   : > { %v5185_v31 = vpop.permute.xlu0 %5184 }
 0x63e   : > { %v5329_v47 = vpop.permute.xlu1 %5328  ;;  %v5553_v22 = vsel %vm1359_vm15, %v5537_v58, %v5185_v31 }
 0x63f   : > { %v5569_v30 = vsel %vm1393_vm1, %v5553_v22, %v5281_v18 }
 0x640   : > { %v5585_v13 = vsel %vm2412_vm10, %v5569_v30, %v5329_v47 }
 0x645   : > { %v5369_v24 = vpop.permute.xlu0 %5368 }
 0x646   : > { %v5601_v8 = vsel %vm2429_vm12, %v5585_v13, %v5369_v24  ;;  %v5463_v27 = vpop.permute.xlu1 %5462 }
 0x647   : > { %v5617_v43 = vsel %vm2446_vm14, %v5601_v8, %v5465_v59  ;;  %v5615_v1 = vsel %vm2446_vm14, %v5599_v50, %v5463_v27 }
 0x648   : > { %v5640_v11 = vunpack.c.l.b16 %v5617_v43  ;;  %v5638_v33 = vunpack.c.l.b16 %v5615_v1 }
 0x64a   : > { %v5666_v29 = vpack.c.b16 %v5640_v11, %v5638_v33 }
 0x64c   : > { %5761 = vmatmul.bf16.gmra.mxu3 %v5666_v29 }
 0x65b   : > { %v5747_v52 = vpop.f32.mrf.mxu3 }
 0x65c   : > { %v5777_v5 = vadd.f32 %v5776_v54, %v5747_v52 }
 0x65e   : > { %v5796_v36 = vadd.f32 %v5777_v5, %v7655_v26 }
 0x660   : > { %5804 = vst.msk [vmem:[%s8240_s17] sm:$0xff] %vm1291_vm11, %v5796_v36 }
 0x663   : > { %v5749_v37 = vpop.f32.mrf.mxu3 }
 0x664   : > { %v5779_v0 = vadd.f32 %v5778_v21, %v5749_v37 }
 0x666   : > { %v5797_v46 = vadd.f32 %v5779_v0, %v7666_v9  ;;  %v5786_v9 = vpop.f32.mrf.mxu2 }
 0x668   : > { %5805 = vst.msk [vmem:[%s8240_s17 + $0x8] sm:$0xff] %vm1291_vm11, %v5797_v46 }
 0x66e   : > { %v5788_v16 = vpop.f32.mrf.mxu2 }
 0x697   : > { %v5752_v10 = vpop.f32.mrf.mxu3 }
 0x698   : > { %v5782_v32 = vadd.f32 %v5781_v60, %v5752_v10 }
 0x69a   : > { %v5798_v26 = vadd.f32 %v5782_v32, %v7691_v41 }
 0x69c   : > { %5806 = vst.msk [vmem:[%s8240_s17 + $0x10] sm:$0xff] %vm1291_vm11, %v5798_v26 }
 0x69f   : > { %v5754_v42 = vpop.f32.mrf.mxu3 }
 0x6a0   : > { %v5784_v53 = vadd.f32 %v5783_v62, %v5754_v42 }
 0x6a2   : > { %v5799_v14 = vadd.f32 %v5784_v53, %v7703_v19  ;;  %v5791_v19 = vpop.f32.mrf.mxu2 }
 0x6a4   : > { %5807 = vst.msk [vmem:[%s8240_s17 + $0x18] sm:$0xff] %vm1291_vm11, %v5799_v14 }
 0x6be   : > { %v5757_v4 = vpop.f32.mrf.mxu3 }
 0x6bf   : > { %v5787_v49 = vadd.f32 %v5786_v9, %v5757_v4 }
 0x6c1   : > { %v5800_v23 = vadd.f32 %v5787_v49, %v7722_v51  ;;  %v5793_v51 = vpop.f32.mrf.mxu2 }
 0x6c3   : > { %5808 = vst.msk [vmem:[%s8240_s17 + $0x20] sm:$0xff] %vm1291_vm11, %v5800_v23 }
 0x6c6   : > { %v5759_v41 = vpop.f32.mrf.mxu3 }
 0x6c7   : > { %v5789_v20 = vadd.f32 %v5788_v16, %v5759_v41 }
 0x6c9   : > { %v5801_v55 = vadd.f32 %v5789_v20, %v7734_v45 }
 0x6cb   : > { %5809 = vst.msk [vmem:[%s8240_s17 + $0x28] sm:$0xff] %vm1291_vm11, %v5801_v55 }
 0x6cf   : > { %v5762_v56 = vpop.f32.mrf.mxu3 }
 0x6d0   : > { %v5792_v25 = vadd.f32 %v5791_v19, %v5762_v56 }
 0x6d2   : > { %v5802_v38 = vadd.f32 %v5792_v25, %v7764_v12 }
 0x6d4   : > { %5810 = vst.msk [vmem:[%s8240_s17 + $0x30] sm:$0xff] %vm1291_vm11, %v5802_v38 }
 0x6d7   : > { %v5764_v45 = vpop.f32.mrf.mxu3 }
 0x6d8   : > { %v5794_v6 = vadd.f32 %v5793_v51, %v5764_v45 }
 0x6da   : > { %v5803_v3 = vadd.f32 %v5794_v6, %v7774_v15 }
 0x6dc   : > { %5811 = vst.msk [vmem:[%s8240_s17 + $0x38] sm:$0xff] %vm1291_vm11, %v5803_v3 }
 0x6dd   : > { %6263 = shalt.err (!%p6260_p3)
}
 0x6de   : > { %s6313_s21 = smov 128   ;;  %s8352_s17 = smov 8  }
 0x6df   : > { %6158 = dma.vmem_to_hbm [thread:$0]  (%p6437_p5), %s5826_s19, 1024, %s5828_s30, %s5813_s25, %s6313_s21, %s6313_s21, %s8352_s17  }
 0x6e0 PF: > { %s8353_s1 = sld [smem:[#allocation6_spill]]  ;;  %p6164_p4 = scmp.ge.s32.totalorder %s6298_s24, 2 }
 0x6e2   : > { %p6161_p7 = pnand %p6164_p4, %p6441_p6 }
 0x6e4   : > { %p6162_p8 = pneg %p6161_p7 }
 0x6e6   : > { %s5842_s23 = sand.u32 1, %s8353_s1  }
 0x6e7   : > { %s5843_s26 = scalar_lea.sflag [#allocation4], %s5842_s23 }
 0x6e8   : > { %6281 = dma.done.wait (%p6162_p8), %s5843_s26, 1024  }
 0x6e9   : > { %6283 = vsyncadd (%p6162_p8), %s5843_s26, 4294966272  ;;  %s8355_s24 = sld [smem:[#allocation8_spill]]  ;;  %s8358_s21 = smov %s6290_s22 }
 0x6ea   : > { %s8356_s29 = sld [smem:[#allocation7_spill]] }
 0x6eb   : > { %s8357_s23 = sld [smem:[#allocation9_spill]] }
 0x6ef   : > { %p26_p9 = scmp.ge.s32.totalorder %s8355_s24, 4  }
 0x6f0   : > { %s8359_s22 = smov %s8356_s29 }
 0x6f1   :  { %28 = sbr.rel (!%p26_p9) target bundleno = 7 (0x7), region = 125 }
 0x6f6   :  { %5849 = vsyncpa [#allocation4], 1 }
 0x6f7   :  { %5851 = vsyncpa [#allocation4 + $0x1], 1 }

</bundles_post_ra>
